<compile_context>
chip_gen: v7x
topology: tpu7x:2x2x1
jax: 0.10.0
libtpu: 0.0.40
codegen_flags: <defaults>
</compile_context>

<pallas_src>
import functools

import jax
import jax.numpy as jnp
import numpy as np
from jax.experimental import pallas as pl
from jax.experimental.pallas import tpu as pltpu

BN_EPS = 1e-5


def _round_up(x, m):
    return ((x + m - 1) // m) * m


# ----------------------------------------------------------------------------
# Kernel 1: fused embedding + significance MLP over a tile of columns.
#   emb_nn (3 -> 16 -> emb) and significance_fc (emb -> 64 -> 32 -> 1) run
#   back-to-back in VMEM; both the embedding and the score are emitted.
# ----------------------------------------------------------------------------
def embsig_kernel(*refs, relus, n_emb_layers):
    x_ref = refs[0]
    emb_ref, sig_ref = refs[-2], refs[-1]
    h = x_ref[...]                                            # (Cin, T)
    for li, relu in enumerate(relus):
        w = refs[1 + 2 * li][...]                             # (Co, Ci)
        b = refs[2 + 2 * li][...]                             # (Co, 1)
        ci = w.shape[1]
        if ci <= 4:
            # tiny contraction dim: VPU broadcast-FMAs beat a K<=4 MXU matmul
            acc = b
            for c in range(ci):
                acc = acc + w[:, c:c + 1] * h[c:c + 1, :]
            h = acc
        else:
            h = jnp.dot(w, h, preferred_element_type=jnp.float32) + b
        if relu:
            h = jnp.maximum(h, 0.0)
        if li == n_emb_layers - 1:
            emb_ref[...] = h
    sig_ref[...] = h


def fused_embed_sig(x, emb_layers, sig_layers, *, max_tile=2048):
    """x: [Bx, 3, N] -> (embedding [Bx, E, N], significance score [Bx, N])."""
    Bx, Cin, N = x.shape
    L = Bx * N
    tile = min(max_tile, _round_up(L, 128))
    Lp = _round_up(L, tile)

    xt = jnp.swapaxes(x, 0, 1).reshape(Cin, L)                # weights shared -> collapse batch
    if Lp != L:
        xt = jnp.pad(xt, ((0, 0), (0, Lp - L)))

    layers = list(emb_layers) + list(sig_layers)
    relus = tuple(bool(l["relu"]) for l in layers)
    E = emb_layers[-1]["w"].shape[0]

    args = [xt]
    in_specs = [pl.BlockSpec((Cin, tile), lambda l: (0, l))]
    for lyr in layers:
        args += [lyr["w"], lyr["b"]]
        in_specs += [pl.BlockSpec(lyr["w"].shape, lambda l: (0, 0)),
                     pl.BlockSpec(lyr["b"].shape, lambda l: (0, 0))]

    emb, sig = pl.pallas_call(
        functools.partial(embsig_kernel, relus=relus, n_emb_layers=len(emb_layers)),
        out_shape=(jax.ShapeDtypeStruct((E, Lp), jnp.float32),
                   jax.ShapeDtypeStruct((1, Lp), jnp.float32)),
        grid=(Lp // tile,),
        in_specs=in_specs,
        out_specs=(pl.BlockSpec((E, tile), lambda l: (0, l)),
                   pl.BlockSpec((1, tile), lambda l: (0, l))),
        compiler_params=pltpu.CompilerParams(dimension_semantics=("parallel",)),
    )(*args)

    emb = jnp.swapaxes(emb[:, :L].reshape(E, Bx, N), 0, 1)    # [Bx, E, N]
    sig = sig[0, :L].reshape(Bx, N)                           # [Bx, N]
    return emb, sig


# ----------------------------------------------------------------------------
# Kernel 2: fused per-iteration pairwise kernel (vectorized over a row tile)
#
# For a tile of TI source rows it computes, without materializing [C+1,N,N]:
#   simF = simF_MLP([dist_f, diff_f/dist_f])           (feature path)
#   simS = simS_MLP([dist_s, diff_s/dist_s, src_rep])  (spatial path)
#   corr[i]    = argmax_j clip(simF+simS, -20, 20)        (first occurrence)
#   weights[i] = weight_fc( max_j preweight_conv([simF, simS]) )
#
# All hidden (32-ch) tensors for the TI rows are stacked into a (TI*32, N)
# slab (row = c*TI + i) and every 32x32 layer is ONE kron(W, I_TI) matmul.
# ----------------------------------------------------------------------------
def pairwise_iter_kernel(sp_ref, sc_ref, cs_ref, wbd_ref, wout_ref, cv_ref,
                         corr_ref, wts_ref, *, C, TI):
    f32 = jnp.float32
    M = TI * 32
    N = cs_ref.shape[-1]
    it = pl.program_id(1)

    # --- source row tile ------------------------------------------------
    sp = sp_ref[...]                                          # (TI, C+3)
    semb = sp[:, 0:C]                                         # (TI, C)
    sx, sy, sz = sp[:, C:C + 1], sp[:, C + 1:C + 2], sp[:, C + 2:C + 3]

    # --- per-batch slab (resident across the row-tile axis) --------------
    temb = cs_ref[0:C, :]                                     # (C, N)
    tx = cs_ref[C:C + 1, :]
    ty = cs_ref[C + 1:C + 2, :]
    tz = cs_ref[C + 2:C + 3, :]
    tn2 = cs_ref[C + 8:C + 9, :]                              # (1, N)  ||temb_j||^2
    AFr = cs_ref[C + 16:C + 16 + M, :]                        # (M, N)  wcF @ temb, row-repeated
    ASr = cs_ref[C + 16 + M:C + 16 + 2 * M, :]                # (M, N)  wcS @ tpt,  row-repeated

    # --- per-source-row first-layer columns (precomputed in wrapper) -----
    BFc = sc_ref[:, 0:1]                                      # (M, 1)  wcF @ semb_i
    BSc = sc_ref[:, 1:2]                                      # (M, 1)  wcS @ spt_i
    CSc = sc_ref[:, 2:3]                                      # (M, 1)  wsrc @ spt_i

    # --- packed column vectors / scalars ---------------------------------
    wdF = cv_ref[:, 0:1]; b1F = cv_ref[:, 1:2]; b2F = cv_ref[:, 2:3]; b3F = cv_ref[:, 3:4]
    wdS = cv_ref[:, 4:5]; b1S = cv_ref[:, 5:6]; b2S = cv_ref[:, 6:7]; b3S = cv_ref[:, 7:8]
    wp0 = cv_ref[:, 8:9]; wp1 = cv_ref[:, 9:10]; bpc = cv_ref[:, 10:11]; bfc1 = cv_ref[:, 11:12]
    b4F = cv_ref[0:1, 12:13]; b4S = cv_ref[0:1, 13:14]; bfc2 = cv_ref[0:1, 14:15]

    # --- pairwise distances ----------------------------------------------
    # feature-space distance via MXU Gram trick (kept in f32 for accuracy)
    gram = jnp.dot(semb, temb, preferred_element_type=f32)    # (TI, N)
    sn2 = jnp.sum(semb * semb, axis=1, keepdims=True)         # (TI, 1)
    distF = jnp.sqrt(jnp.maximum(sn2 + tn2 - 2.0 * gram, 0.0))
    invF = 1.0 / (distF + 1e-8)
    # spatial distance, exact (3 channels)
    distS = jnp.sqrt((sx - tx) ** 2 + (sy - ty) ** 2 + (sz - tz) ** 2)
    invS = 1.0 / (distS + 1e-8)

    def tile32(x):        # (TI, N) -> (M, N), c-major stacking: row (c*TI+i) = x[i]
        return jnp.concatenate([x] * 32, axis=0)

    distF_t, invF_t = tile32(distF), tile32(invF)
    distS_t, invS_t = tile32(distS), tile32(invS)

    # --- first layers (channel mixing of diff folded into per-i/per-j terms)
    #   simF input = [dist_f, (tgt-src)/dist_f] ; simS input = [dist_s, (src-tgt)/dist_s, src]
    hF = jnp.maximum(wdF * distF_t + invF_t * (AFr - BFc) + b1F, 0.0)        # (M, N)
    hS = jnp.maximum(wdS * distS_t + invS_t * (BSc - ASr) + CSc + b1S, 0.0)  # (M, N)

    # --- hidden layers: one block-diagonal matmul per layer ---------------
    W2F = wbd_ref[:, 0:M];         W3F = wbd_ref[:, M:2 * M]
    W2S = wbd_ref[:, 2 * M:3 * M]; W3S = wbd_ref[:, 3 * M:4 * M]
    Wfc1 = wbd_ref[:, 4 * M:5 * M]
    hF = jnp.maximum(jnp.dot(W2F, hF, preferred_element_type=f32) + b2F, 0.0)
    hF = jnp.maximum(jnp.dot(W3F, hF, preferred_element_type=f32) + b3F, 0.0)
    hS = jnp.maximum(jnp.dot(W2S, hS, preferred_element_type=f32) + b2S, 0.0)
    hS = jnp.maximum(jnp.dot(W3S, hS, preferred_element_type=f32) + b3S, 0.0)

    W4F = wout_ref[0:TI, :]
    W4S = wout_ref[TI:2 * TI, :]
    Wfc2 = wout_ref[2 * TI:3 * TI, :]
    simF = jnp.dot(W4F, hF, preferred_element_type=f32) + b4F               # (TI, N)
    simS = jnp.dot(W4S, hS, preferred_element_type=f32) + b4S               # (TI, N)

    # --- correspondence: argmax of the clipped sum (first occurrence) ----
    sim = jnp.clip(simF + simS, -20.0, 20.0)
    rmax = jnp.max(sim, axis=1, keepdims=True)
    cid = jax.lax.broadcasted_iota(jnp.int32, (TI, N), 1)
    corr = jnp.min(jnp.where(sim >= rmax, cid, N), axis=1, keepdims=True)    # (TI, 1) i32

    # --- preweight (2->32 conv, UNclipped inputs) + max_j + weight_fc -----
    pw = wp0 * tile32(simF) + wp1 * tile32(simS) + bpc                       # (M, N)
    wpre = jnp.max(pw, axis=1, keepdims=True)                                # (M, 1)
    hfc = jnp.maximum(jnp.dot(Wfc1, wpre, preferred_element_type=f32) + bfc1, 0.0)
    wts = jnp.dot(Wfc2, hfc, preferred_element_type=f32) + bfc2              # (TI, 1)

    # --- store into per-batch resident output blocks ----------------------
    off = pl.multiple_of(it * TI, TI)
    corr_ref[pl.ds(off, TI), :] = corr
    wts_ref[pl.ds(off, TI), :] = wts


def fused_iteration(src, tgt, src_emb, tgt_emb, simF, simS, prew, wfc, *, TI=8):
    """Returns (corr_idx [B,N] int32, weights_raw [B,N] float32 = weight_fc output)."""
    B, C, N = src_emb.shape
    assert C % 8 == 0, "emb_dims must be a multiple of 8"
    M = TI * 32
    Np = _round_up(N, TI)
    n_tiles = Np // TI

    def pad_pts(x):  # pad point axis of [B, c, N] -> [B, c, Np]
        return jnp.pad(x, ((0, 0), (0, 0), (0, Np - N))) if Np != N else x

    src_p, semb_p = pad_pts(src), pad_pts(src_emb)

    # ---- source row-tile pack [B, Np, C+3] -------------------------------
    srcpack = jnp.concatenate([jnp.swapaxes(semb_p, 1, 2),
                               jnp.swapaxes(src_p, 1, 2)], axis=-1)

    # ---- first-layer weight splits ---------------------------------------
    w1F, b1F = simF[0]["w"], simF[0]["b"]            # (32, C+1)
    w1S, b1S = simS[0]["w"], simS[0]["b"]            # (32, 7)
    wcF, wcS, wsS = w1F[:, 1:], w1S[:, 1:4], w1S[:, 4:7]

    # ---- per-batch column slab [B, C+16+2M, N] (hoisted invariants) ------
    AF = jnp.einsum("ck,bkn->bcn", wcF, tgt_emb)     # [B, 32, N]
    AS = jnp.einsum("ck,bkn->bcn", wcS, tgt)         # [B, 32, N]
    AF_rep = jnp.repeat(AF, TI, axis=1)              # [B, M, N] (c-major row-repeat)
    AS_rep = jnp.repeat(AS, TI, axis=1)
    tn2 = jnp.sum(tgt_emb * tgt_emb, axis=1, keepdims=True)

    def rpad(x, rows):
        return jnp.pad(x, ((0, 0), (0, rows - x.shape[1]), (0, 0)))

    colslab = jnp.concatenate([tgt_emb, rpad(tgt, 8), rpad(tn2, 8), AF_rep, AS_rep], axis=1)
    R = C + 16 + 2 * M

    # ---- per-source-row first-layer columns [B*n_tiles, M, 3] ------------
    def to_cols(Wmix, x):                            # (32,k),[B,k,Np] -> [B, n_tiles, M]
        v = jnp.einsum("ck,bkn->bcn", Wmix, x)                       # [B, 32, Np]
        v = v.reshape(B, 32, n_tiles, TI).transpose(0, 2, 1, 3)      # [B, nt, 32, TI]
        return v.reshape(B, n_tiles, M)
    srccols = jnp.stack([to_cols(wcF, semb_p), to_cols(wcS, src_p), to_cols(wsS, src_p)],
                        axis=-1).reshape(B * n_tiles, M, 3)

    # ---- packed weight slabs (block-diagonal, c-major) -------------------
    eyeT = jnp.eye(TI, dtype=jnp.float32)
    kr = lambda w: jnp.kron(w, eyeT)
    Wfc1, bfc1 = wfc[0]["w"], wfc[0]["b"]
    Wfc2, bfc2 = wfc[1]["w"], wfc[1]["b"]
    Wbd = jnp.concatenate([kr(simF[1]["w"]), kr(simF[2]["w"]),
                           kr(simS[1]["w"]), kr(simS[2]["w"]), kr(Wfc1)], axis=1)   # (M, 5M)
    Wout = jnp.concatenate([kr(simF[3]["w"]), kr(simS[3]["w"]), kr(Wfc2)], axis=0)  # (3TI, M)

    rep = lambda v: jnp.repeat(v.reshape(-1), TI).reshape(M, 1)
    fill = lambda s: jnp.full((M, 1), s, jnp.float32)
    wp, bp = prew["w"], prew["b"]
    colvec = jnp.concatenate([
        rep(w1F[:, 0]), rep(b1F), rep(simF[1]["b"]), rep(simF[2]["b"]),
        rep(w1S[:, 0]), rep(b1S), rep(simS[1]["b"]), rep(simS[2]["b"]),
        rep(wp[:, 0]), rep(wp[:, 1]), rep(bp), rep(bfc1),
        fill(simF[3]["b"][0, 0]), fill(simS[3]["b"][0, 0]), fill(bfc2[0, 0]),
    ], axis=1)                                                                      # (M, 15)

    corr, wts = pl.pallas_call(
        functools.partial(pairwise_iter_kernel, C=C, TI=TI),
        out_shape=(jax.ShapeDtypeStruct((B, Np, 1), jnp.int32),
                   jax.ShapeDtypeStruct((B, Np, 1), jnp.float32)),
        grid=(B, n_tiles),
        in_specs=[
            pl.BlockSpec((None, TI, C + 3), lambda b, it: (b, it, 0)),
            pl.BlockSpec((None, M, 3), lambda b, it: (b * n_tiles + it, 0, 0)),
            pl.BlockSpec((None, R, N), lambda b, it: (b, 0, 0)),
            pl.BlockSpec((M, 5 * M), lambda b, it: (0, 0)),
            pl.BlockSpec((3 * TI, M), lambda b, it: (0, 0)),
            pl.BlockSpec((M, 15), lambda b, it: (0, 0)),
        ],
        out_specs=(pl.BlockSpec((None, Np, 1), lambda b, it: (b, 0, 0)),
                   pl.BlockSpec((None, Np, 1), lambda b, it: (b, 0, 0))),
        compiler_params=pltpu.CompilerParams(
            dimension_semantics=("parallel", "arbitrary"),
            vmem_limit_bytes=32 * 1024 * 1024),
    )(srcpack, srccols, colslab, Wbd, Wout, colvec)

    return corr[:, :N, 0], wts[:, :N, 0]


# ----------------------------------------------------------------------------
# Parameters (deterministic synthetic weights; eval-mode BN folded into conv)
# ----------------------------------------------------------------------------
def init_conv_block(key, channels):
    """Conv{1,2}DBlock with ksize=1.  BN (eval: gamma=1, beta=0, mu=0, var=1)
    is folded into the conv weight; last layer is a plain conv with bias."""
    layers = []
    keys = jax.random.split(key, len(channels))
    bn_scale = float(1.0 / np.sqrt(1.0 + BN_EPS))
    for i in range(len(channels) - 2):
        w = jax.random.normal(keys[i], (channels[i + 1], channels[i]), jnp.float32) * 0.1
        layers.append(dict(w=w * bn_scale,
                           b=jnp.zeros((channels[i + 1], 1), jnp.float32),
                           relu=True))
    w = jax.random.normal(keys[-2], (channels[-1], channels[-2]), jnp.float32) * 0.1
    b = jax.random.normal(keys[-1], (channels[-1], 1), jnp.float32) * 0.1
    layers.append(dict(w=w, b=b, relu=False))
    return layers


def init_mfgnet_params(key, emb_dims, num_iter, K_test):
    k = jax.random.split(key, 6 + 4 * num_iter)
    return dict(
        emb_dims=emb_dims,
        num_iter=num_iter,
        K_test=K_test,
        # TODO(synk): emb_nn is an external module in the original (e.g. DGCNN);
        # here it is a simple pointwise-conv embedder [B,3,N] -> [B,emb_dims,N].
        emb_nn=init_conv_block(k[0], (3, 16, emb_dims)),
        sig_fc=init_conv_block(k[1], (emb_dims, 64, 32, 1)),
        simF=[init_conv_block(k[2 + i], (emb_dims + 1, 32, 32, 32, 1)) for i in range(num_iter)],
        simS=[init_conv_block(k[2 + num_iter + i], (7, 32, 32, 32, 1)) for i in range(num_iter)],
        wfc=[init_conv_block(k[2 + 2 * num_iter + i], (32, 32, 1)) for i in range(num_iter)],
        prew=[init_conv_block(k[2 + 3 * num_iter + i], (2, 32)) for i in range(num_iter)],
    )


# ----------------------------------------------------------------------------
# SVD head (tiny 3x3 algebra — plain JAX glue)
# ----------------------------------------------------------------------------
def svd_head(src, src_corr, weights):
    """src, src_corr: [B, 3, N]; weights: [B, N] -> (R [B,3,3], t [B,3])."""
    src_c = src - src.mean(axis=2, keepdims=True)
    corr_c = src_corr - src_corr.mean(axis=2, keepdims=True)
    H = jnp.matmul(src_c * weights[:, None, :], jnp.swapaxes(corr_c, 1, 2))   # [B,3,3]
    # TODO(synk): torch.svd of 3x3 matrices has no Pallas equivalent; use XLA SVD.
    U, _, Vh = jnp.linalg.svd(H)
    V = jnp.swapaxes(Vh, 1, 2)
    R0 = jnp.matmul(V, jnp.swapaxes(U, 1, 2))
    det = jnp.linalg.det(R0)
    refl = jnp.where(det[:, None] < 0,
                     jnp.array([1.0, 1.0, -1.0], jnp.float32),
                     jnp.ones(3, jnp.float32))
    Vf = V * refl[:, None, :]
    R = jnp.matmul(Vf, jnp.swapaxes(U, 1, 2))
    t = (jnp.matmul(-R, (weights[:, None, :] * src).sum(axis=2, keepdims=True))
         + (weights[:, None, :] * src_corr).sum(axis=2, keepdims=True))
    return R, t[..., 0]


# ----------------------------------------------------------------------------
# MFGNet forward (inference / test path)
# ----------------------------------------------------------------------------
def mfgnet_forward(params, src, tgt):
    """src, tgt: [B, 3, N] -> (R [B,3,3], t [B,3], loss=0.0)."""
    B = src.shape[0]
    K = params["K_test"]
    num_iter = params["num_iter"]

    # embedding + significance for tgt and src in ONE fused kernel
    both = jnp.concatenate([tgt, src], axis=0)                              # [2B, 3, N]
    emb_both, sig_both = fused_embed_sig(both, params["emb_nn"], params["sig_fc"])
    tgt_embedding, src_embedding = emb_both[:B], emb_both[B:]
    tgt_sig_score, src_sig_score = sig_both[:B], sig_both[B:]

    _, src_idx = jax.lax.top_k(src_sig_score, K)
    _, tgt_idx = jax.lax.top_k(tgt_sig_score, K)

    def gather_pts(x, idx):  # x: [B, C, N], idx: [B, K] -> [B, C, K]
        return jnp.take_along_axis(
            x, jnp.broadcast_to(idx[:, None, :], (B, x.shape[1], idx.shape[1])), axis=2)

    src = gather_pts(src, src_idx)
    src_embedding = gather_pts(src_embedding, src_idx)
    tgt = gather_pts(tgt, tgt_idx)
    tgt_embedding = gather_pts(tgt_embedding, tgt_idx)

    R = jnp.broadcast_to(jnp.eye(3, dtype=jnp.float32), (B, 3, 3))
    t = jnp.zeros((B, 3), jnp.float32)
    loss = 0.0

    N = K
    for i in range(num_iter):
        corr_idx, weights_raw = fused_iteration(
            src, tgt, src_embedding, tgt_embedding,
            params["simF"][i], params["simS"][i],
            params["prew"][i][0], params["wfc"][i])

        src_corr = gather_pts(tgt, corr_idx)                                 # [B, 3, N]

        weights = jax.nn.sigmoid(weights_raw)
        med = jnp.sort(weights, axis=-1)[:, (N - 1) // 2][:, None]           # torch lower-median
        weights = weights * (weights >= med).astype(jnp.float32)
        weights = weights / (weights.sum(axis=-1, keepdims=True) + 1e-8)

        rotation_ab, translation_ab = svd_head(src, src_corr, weights)

        src = jnp.matmul(rotation_ab, src) + translation_ab[..., None]
        R = jnp.matmul(rotation_ab, R)
        t = jnp.matmul(rotation_ab, t[..., None])[..., 0] + translation_ab

    return R, t, loss


# ----------------------------------------------------------------------------
# Demo
# ----------------------------------------------------------------------------
if __name__ == "__main__":
    B = 2
    N_POINTS = 48       # stands in for 768 (small demo size)
    EMB_DIMS = 32
    NUM_ITER = 2
    K_TEST = 16

    key = jax.random.PRNGKey(0)
    k_param, k_src, k_tgt = jax.random.split(key, 3)

    params = init_mfgnet_params(k_param, EMB_DIMS, NUM_ITER, K_TEST)

    src = jax.random.normal(k_src, (B, 3, N_POINTS), jnp.float32)
    tgt = jax.random.normal(k_tgt, (B, 3, N_POINTS), jnp.float32)

    fwd = jax.jit(lambda s, t: mfgnet_forward(params, s, t))
    R, t, loss = fwd(src, tgt)
    jax.block_until_ready(R)
    jax.block_until_ready(t)

    assert R.shape == (B, 3, 3) and t.shape == (B, 3)
    assert bool(jnp.all(jnp.isfinite(R))) and bool(jnp.all(jnp.isfinite(t)))
    print("KERNEL_OK")
</pallas_src>

<mosaic_0001>
module attributes {stable_mosaic.version = 11 : i64} {
  func.func @embsig_kernel(%arg0: i32, %arg1: memref<3x256xf32, #tpu.memory_space<vmem>>, %arg2: memref<16x3xf32, #tpu.memory_space<vmem>>, %arg3: memref<16x1xf32, #tpu.memory_space<vmem>>, %arg4: memref<32x16xf32, #tpu.memory_space<vmem>>, %arg5: memref<32x1xf32, #tpu.memory_space<vmem>>, %arg6: memref<64x32xf32, #tpu.memory_space<vmem>>, %arg7: memref<64x1xf32, #tpu.memory_space<vmem>>, %arg8: memref<32x64xf32, #tpu.memory_space<vmem>>, %arg9: memref<32x1xf32, #tpu.memory_space<vmem>>, %arg10: memref<1x32xf32, #tpu.memory_space<vmem>>, %arg11: memref<1x1xf32, #tpu.memory_space<vmem>>, %arg12: memref<32x256xf32, #tpu.memory_space<vmem>>, %arg13: memref<1x256xf32, #tpu.memory_space<vmem>>) attributes {dimension_semantics = [#tpu.dimension_semantics<parallel>], iteration_bounds = array<i64: 1>, scalar_prefetch = 0 : i64, scratch_operands = 0 : i64, tpu.core_type = #tpu.core_type<tc>, window_params = [{transform_indices = @transform_0, window_bounds = array<i64: 3, 256>}, {pipeline_mode = #tpu.pipeline_mode<synchronous>, transform_indices = @transform_1, window_bounds = array<i64: 16, 3>}, {pipeline_mode = #tpu.pipeline_mode<synchronous>, transform_indices = @transform_2, window_bounds = array<i64: 16, 1>}, {pipeline_mode = #tpu.pipeline_mode<synchronous>, transform_indices = @transform_3, window_bounds = array<i64: 32, 16>}, {pipeline_mode = #tpu.pipeline_mode<synchronous>, transform_indices = @transform_4, window_bounds = array<i64: 32, 1>}, {pipeline_mode = #tpu.pipeline_mode<synchronous>, transform_indices = @transform_5, window_bounds = array<i64: 64, 32>}, {pipeline_mode = #tpu.pipeline_mode<synchronous>, transform_indices = @transform_6, window_bounds = array<i64: 64, 1>}, {pipeline_mode = #tpu.pipeline_mode<synchronous>, transform_indices = @transform_7, window_bounds = array<i64: 32, 64>}, {pipeline_mode = #tpu.pipeline_mode<synchronous>, transform_indices = @transform_8, window_bounds = array<i64: 32, 1>}, {pipeline_mode = #tpu.pipeline_mode<synchronous>, transform_indices = @transform_9, window_bounds = array<i64: 1, 32>}, {pipeline_mode = #tpu.pipeline_mode<synchronous>, transform_indices = @transform_10, window_bounds = array<i64: 1, 1>}, {transform_indices = @transform_11, window_bounds = array<i64: 32, 256>}, {transform_indices = @transform_12, window_bounds = array<i64: 1, 256>}]} {
    %c0 = arith.constant 0 : index
    %c0_0 = arith.constant 0 : index
    %0 = vector.load %arg1[%c0, %c0_0] : memref<3x256xf32, #tpu.memory_space<vmem>>, vector<3x256xf32>
    %c0_1 = arith.constant 0 : index
    %c0_2 = arith.constant 0 : index
    %1 = vector.load %arg2[%c0_1, %c0_2] : memref<16x3xf32, #tpu.memory_space<vmem>>, vector<16x3xf32>
    %c0_3 = arith.constant 0 : index
    %c0_4 = arith.constant 0 : index
    %2 = vector.load %arg3[%c0_3, %c0_4] : memref<16x1xf32, #tpu.memory_space<vmem>>, vector<16x1xf32>
    %3 = vector.extract_strided_slice %1 {offsets = [0, 0], sizes = [16, 1], strides = [1, 1]} : vector<16x3xf32> to vector<16x1xf32>
    %4 = vector.extract_strided_slice %0 {offsets = [0, 0], sizes = [1, 256], strides = [1, 1]} : vector<3x256xf32> to vector<1x256xf32>
    %5 = vector.broadcast %3 : vector<16x1xf32> to vector<16x256xf32>
    %6 = vector.broadcast %4 : vector<1x256xf32> to vector<16x256xf32>
    %7 = arith.mulf %5, %6 : vector<16x256xf32>
    %8 = vector.broadcast %2 : vector<16x1xf32> to vector<16x256xf32>
    %9 = arith.addf %8, %7 : vector<16x256xf32>
    %10 = vector.extract_strided_slice %1 {offsets = [0, 1], sizes = [16, 1], strides = [1, 1]} : vector<16x3xf32> to vector<16x1xf32>
    %11 = vector.extract_strided_slice %0 {offsets = [1, 0], sizes = [1, 256], strides = [1, 1]} : vector<3x256xf32> to vector<1x256xf32>
    %12 = vector.broadcast %10 : vector<16x1xf32> to vector<16x256xf32>
    %13 = vector.broadcast %11 : vector<1x256xf32> to vector<16x256xf32>
    %14 = arith.mulf %12, %13 : vector<16x256xf32>
    %15 = arith.addf %9, %14 : vector<16x256xf32>
    %16 = vector.extract_strided_slice %1 {offsets = [0, 2], sizes = [16, 1], strides = [1, 1]} : vector<16x3xf32> to vector<16x1xf32>
    %17 = vector.extract_strided_slice %0 {offsets = [2, 0], sizes = [1, 256], strides = [1, 1]} : vector<3x256xf32> to vector<1x256xf32>
    %18 = vector.broadcast %16 : vector<16x1xf32> to vector<16x256xf32>
    %19 = vector.broadcast %17 : vector<1x256xf32> to vector<16x256xf32>
    %20 = arith.mulf %18, %19 : vector<16x256xf32>
    %21 = arith.addf %15, %20 : vector<16x256xf32>
    %cst = arith.constant 0.000000e+00 : f32
    %22 = vector.broadcast %cst : f32 to vector<16x256xf32>
    %23 = arith.maximumf %21, %22 : vector<16x256xf32>
    %c0_5 = arith.constant 0 : index
    %c0_6 = arith.constant 0 : index
    %24 = vector.load %arg4[%c0_5, %c0_6] : memref<32x16xf32, #tpu.memory_space<vmem>>, vector<32x16xf32>
    %c0_7 = arith.constant 0 : index
    %c0_8 = arith.constant 0 : index
    %25 = vector.load %arg5[%c0_7, %c0_8] : memref<32x1xf32, #tpu.memory_space<vmem>>, vector<32x1xf32>
    %cst_9 = arith.constant dense<0.000000e+00> : vector<32x256xf32>
    %26 = tpu.matmul %24, %23, %cst_9 {dimension_numbers = #tpu.dot_dimension_numbers<[1], [0], [0], [1], [0, 0, 1, 1], [], []>} : vector<32x16xf32>, vector<16x256xf32>, vector<32x256xf32> -> vector<32x256xf32>
    %27 = vector.broadcast %25 : vector<32x1xf32> to vector<32x256xf32>
    %28 = arith.addf %26, %27 : vector<32x256xf32>
    %c0_10 = arith.constant 0 : index
    %c0_11 = arith.constant 0 : index
    %29 = vector.load %arg12[%c0_10, %c0_11] : memref<32x256xf32, #tpu.memory_space<vmem>>, vector<32x256xf32>
    tpu.vector_store %arg12[%c0_10, %c0_11], %28 {strides = array<i32>} : memref<32x256xf32, #tpu.memory_space<vmem>>, vector<32x256xf32>,
    %c0_12 = arith.constant 0 : index
    %c0_13 = arith.constant 0 : index
    %30 = vector.load %arg6[%c0_12, %c0_13] : memref<64x32xf32, #tpu.memory_space<vmem>>, vector<64x32xf32>
    %c0_14 = arith.constant 0 : index
    %c0_15 = arith.constant 0 : index
    %31 = vector.load %arg7[%c0_14, %c0_15] : memref<64x1xf32, #tpu.memory_space<vmem>>, vector<64x1xf32>
    %cst_16 = arith.constant dense<0.000000e+00> : vector<64x256xf32>
    %32 = tpu.matmul %30, %28, %cst_16 {dimension_numbers = #tpu.dot_dimension_numbers<[1], [0], [0], [1], [0, 0, 1, 1], [], []>} : vector<64x32xf32>, vector<32x256xf32>, vector<64x256xf32> -> vector<64x256xf32>
    %33 = vector.broadcast %31 : vector<64x1xf32> to vector<64x256xf32>
    %34 = arith.addf %32, %33 : vector<64x256xf32>
    %cst_17 = arith.constant 0.000000e+00 : f32
    %35 = vector.broadcast %cst_17 : f32 to vector<64x256xf32>
    %36 = arith.maximumf %34, %35 : vector<64x256xf32>
    %c0_18 = arith.constant 0 : index
    %c0_19 = arith.constant 0 : index
    %37 = vector.load %arg8[%c0_18, %c0_19] : memref<32x64xf32, #tpu.memory_space<vmem>>, vector<32x64xf32>
    %c0_20 = arith.constant 0 : index
    %c0_21 = arith.constant 0 : index
    %38 = vector.load %arg9[%c0_20, %c0_21] : memref<32x1xf32, #tpu.memory_space<vmem>>, vector<32x1xf32>
    %cst_22 = arith.constant dense<0.000000e+00> : vector<32x256xf32>
    %39 = tpu.matmul %37, %36, %cst_22 {dimension_numbers = #tpu.dot_dimension_numbers<[1], [0], [0], [1], [0, 0, 1, 1], [], []>} : vector<32x64xf32>, vector<64x256xf32>, vector<32x256xf32> -> vector<32x256xf32>
    %40 = vector.broadcast %38 : vector<32x1xf32> to vector<32x256xf32>
    %41 = arith.addf %39, %40 : vector<32x256xf32>
    %cst_23 = arith.constant 0.000000e+00 : f32
    %42 = vector.broadcast %cst_23 : f32 to vector<32x256xf32>
    %43 = arith.maximumf %41, %42 : vector<32x256xf32>
    %c0_24 = arith.constant 0 : index
    %c0_25 = arith.constant 0 : index
    %44 = vector.load %arg10[%c0_24, %c0_25] : memref<1x32xf32, #tpu.memory_space<vmem>>, vector<1x32xf32>
    %c0_26 = arith.constant 0 : index
    %c0_27 = arith.constant 0 : index
    %45 = vector.load %arg11[%c0_26, %c0_27] : memref<1x1xf32, #tpu.memory_space<vmem>>, vector<1x1xf32>
    %cst_28 = arith.constant dense<0.000000e+00> : vector<1x256xf32>
    %46 = tpu.matmul %44, %43, %cst_28 {dimension_numbers = #tpu.dot_dimension_numbers<[1], [0], [0], [1], [0, 0, 1, 1], [], []>} : vector<1x32xf32>, vector<32x256xf32>, vector<1x256xf32> -> vector<1x256xf32>
    %47 = vector.broadcast %45 : vector<1x1xf32> to vector<1x256xf32>
    %48 = arith.addf %46, %47 : vector<1x256xf32>
    %c0_29 = arith.constant 0 : index
    %c0_30 = arith.constant 0 : index
    %49 = vector.load %arg13[%c0_29, %c0_30] : memref<1x256xf32, #tpu.memory_space<vmem>>, vector<1x256xf32>
    tpu.vector_store %arg13[%c0_29, %c0_30], %48 {strides = array<i32>} : memref<1x256xf32, #tpu.memory_space<vmem>>, vector<1x256xf32>,
    return
  }
  func.func @transform_0(%arg0: i32) -> (i32, i32) {
    %c0_i32 = arith.constant 0 : i32
    %c0_i32_0 = arith.constant 0 : i32
    return %c0_i32, %arg0 : i32, i32
  }
  func.func @transform_1(%arg0: i32) -> (i32, i32) {
    %c0_i32 = arith.constant 0 : i32
    %c0_i32_0 = arith.constant 0 : i32
    %c0_i32_1 = arith.constant 0 : i32
    return %c0_i32, %c0_i32_0 : i32, i32
  }
  func.func @transform_2(%arg0: i32) -> (i32, i32) {
    %c0_i32 = arith.constant 0 : i32
    %c0_i32_0 = arith.constant 0 : i32
    %c0_i32_1 = arith.constant 0 : i32
    return %c0_i32, %c0_i32_0 : i32, i32
  }
  func.func @transform_3(%arg0: i32) -> (i32, i32) {
    %c0_i32 = arith.constant 0 : i32
    %c0_i32_0 = arith.constant 0 : i32
    %c0_i32_1 = arith.constant 0 : i32
    return %c0_i32, %c0_i32_0 : i32, i32
  }
  func.func @transform_4(%arg0: i32) -> (i32, i32) {
    %c0_i32 = arith.constant 0 : i32
    %c0_i32_0 = arith.constant 0 : i32
    %c0_i32_1 = arith.constant 0 : i32
    return %c0_i32, %c0_i32_0 : i32, i32
  }
  func.func @transform_5(%arg0: i32) -> (i32, i32) {
    %c0_i32 = arith.constant 0 : i32
    %c0_i32_0 = arith.constant 0 : i32
    %c0_i32_1 = arith.constant 0 : i32
    return %c0_i32, %c0_i32_0 : i32, i32
  }
  func.func @transform_6(%arg0: i32) -> (i32, i32) {
    %c0_i32 = arith.constant 0 : i32
    %c0_i32_0 = arith.constant 0 : i32
    %c0_i32_1 = arith.constant 0 : i32
    return %c0_i32, %c0_i32_0 : i32, i32
  }
  func.func @transform_7(%arg0: i32) -> (i32, i32) {
    %c0_i32 = arith.constant 0 : i32
    %c0_i32_0 = arith.constant 0 : i32
    %c0_i32_1 = arith.constant 0 : i32
    return %c0_i32, %c0_i32_0 : i32, i32
  }
  func.func @transform_8(%arg0: i32) -> (i32, i32) {
    %c0_i32 = arith.constant 0 : i32
    %c0_i32_0 = arith.constant 0 : i32
    %c0_i32_1 = arith.constant 0 : i32
    return %c0_i32, %c0_i32_0 : i32, i32
  }
  func.func @transform_9(%arg0: i32) -> (i32, i32) {
    %c0_i32 = arith.constant 0 : i32
    %c0_i32_0 = arith.constant 0 : i32
    %c0_i32_1 = arith.constant 0 : i32
    return %c0_i32, %c0_i32_0 : i32, i32
  }
  func.func @transform_10(%arg0: i32) -> (i32, i32) {
    %c0_i32 = arith.constant 0 : i32
    %c0_i32_0 = arith.constant 0 : i32
    %c0_i32_1 = arith.constant 0 : i32
    return %c0_i32, %c0_i32_0 : i32, i32
  }
  func.func @transform_11(%arg0: i32) -> (i32, i32) {
    %c0_i32 = arith.constant 0 : i32
    %c0_i32_0 = arith.constant 0 : i32
    return %c0_i32, %arg0 : i32, i32
  }
  func.func @transform_12(%arg0: i32) -> (i32, i32) {
    %c0_i32 = arith.constant 0 : i32
    %c0_i32_0 = arith.constant 0 : i32
    return %c0_i32, %arg0 : i32, i32
  }
}

module attributes {stable_mosaic.version = 11 : i64} {
  func.func @pairwise_iter_kernel(%arg0: i32, %arg1: i32, %arg2: memref<1x8x35xf32, #tpu.memory_space<vmem>>, %arg3: memref<1x256x3xf32, #tpu.memory_space<vmem>>, %arg4: memref<1x560x16xf32, #tpu.memory_space<vmem>>, %arg5: memref<256x1280xf32, #tpu.memory_space<vmem>>, %arg6: memref<24x256xf32, #tpu.memory_space<vmem>>, %arg7: memref<256x15xf32, #tpu.memory_space<vmem>>, %arg8: memref<1x16x1xi32, #tpu.memory_space<vmem>>, %arg9: memref<1x16x1xf32, #tpu.memory_space<vmem>>) attributes {dimension_semantics = [#tpu.dimension_semantics<parallel>, #tpu.dimension_semantics<arbitrary>], iteration_bounds = array<i64: 2, 2>, scalar_prefetch = 0 : i64, scratch_operands = 0 : i64, tpu.core_type = #tpu.core_type<tc>, window_params = [{transform_indices = @transform_0, window_bounds = array<i64: 1, 8, 35>}, {transform_indices = @transform_1, window_bounds = array<i64: 1, 256, 3>}, {transform_indices = @transform_2, window_bounds = array<i64: 1, 560, 16>}, {pipeline_mode = #tpu.pipeline_mode<synchronous>, transform_indices = @transform_3, window_bounds = array<i64: 256, 1280>}, {pipeline_mode = #tpu.pipeline_mode<synchronous>, transform_indices = @transform_4, window_bounds = array<i64: 24, 256>}, {pipeline_mode = #tpu.pipeline_mode<synchronous>, transform_indices = @transform_5, window_bounds = array<i64: 256, 15>}, {transform_indices = @transform_6, window_bounds = array<i64: 1, 16, 1>}, {transform_indices = @transform_7, window_bounds = array<i64: 1, 16, 1>}]} {
    %c0 = arith.constant 0 : index
    %c0_0 = arith.constant 0 : index
    %c0_1 = arith.constant 0 : index
    %0 = vector.load %arg2[%c0, %c0_0, %c0_1] : memref<1x8x35xf32, #tpu.memory_space<vmem>>, vector<1x8x35xf32>
    %1 = vector.shape_cast %0 : vector<1x8x35xf32> to vector<8x35xf32>
    %2 = vector.extract_strided_slice %1 {offsets = [0, 0], sizes = [8, 32], strides = [1, 1]} : vector<8x35xf32> to vector<8x32xf32>
    %3 = vector.extract_strided_slice %1 {offsets = [0, 32], sizes = [8, 1], strides = [1, 1]} : vector<8x35xf32> to vector<8x1xf32>
    %4 = vector.extract_strided_slice %1 {offsets = [0, 33], sizes = [8, 1], strides = [1, 1]} : vector<8x35xf32> to vector<8x1xf32>
    %5 = vector.extract_strided_slice %1 {offsets = [0, 34], sizes = [8, 1], strides = [1, 1]} : vector<8x35xf32> to vector<8x1xf32>
    %c0_2 = arith.constant 0 : index
    %c0_3 = arith.constant 0 : index
    %c0_4 = arith.constant 0 : index
    %6 = vector.load %arg4[%c0_2, %c0_3, %c0_4] : memref<1x560x16xf32, #tpu.memory_space<vmem>>, vector<1x32x16xf32>
    %7 = vector.shape_cast %6 : vector<1x32x16xf32> to vector<32x16xf32>
    %c0_5 = arith.constant 0 : index
    %c32 = arith.constant 32 : index
    %c0_6 = arith.constant 0 : index
    %8 = vector.load %arg4[%c0_5, %c32, %c0_6] : memref<1x560x16xf32, #tpu.memory_space<vmem>>, vector<1x1x16xf32>
    %9 = vector.shape_cast %8 : vector<1x1x16xf32> to vector<1x16xf32>
    %c0_7 = arith.constant 0 : index
    %c33 = arith.constant 33 : index
    %c0_8 = arith.constant 0 : index
    %10 = vector.load %arg4[%c0_7, %c33, %c0_8] : memref<1x560x16xf32, #tpu.memory_space<vmem>>, vector<1x1x16xf32>
    %11 = vector.shape_cast %10 : vector<1x1x16xf32> to vector<1x16xf32>
    %c0_9 = arith.constant 0 : index
    %c34 = arith.constant 34 : index
    %c0_10 = arith.constant 0 : index
    %12 = vector.load %arg4[%c0_9, %c34, %c0_10] : memref<1x560x16xf32, #tpu.memory_space<vmem>>, vector<1x1x16xf32>
    %13 = vector.shape_cast %12 : vector<1x1x16xf32> to vector<1x16xf32>
    %c0_11 = arith.constant 0 : index
    %c40 = arith.constant 40 : index
    %c0_12 = arith.constant 0 : index
    %14 = vector.load %arg4[%c0_11, %c40, %c0_12] : memref<1x560x16xf32, #tpu.memory_space<vmem>>, vector<1x1x16xf32>
    %15 = vector.shape_cast %14 : vector<1x1x16xf32> to vector<1x16xf32>
    %c0_13 = arith.constant 0 : index
    %c48 = arith.constant 48 : index
    %c0_14 = arith.constant 0 : index
    %16 = vector.load %arg4[%c0_13, %c48, %c0_14] : memref<1x560x16xf32, #tpu.memory_space<vmem>>, vector<1x256x16xf32>
    %17 = vector.shape_cast %16 : vector<1x256x16xf32> to vector<256x16xf32>
    %c0_15 = arith.constant 0 : index
    %c304 = arith.constant 304 : index
    %c0_16 = arith.constant 0 : index
    %18 = vector.load %arg4[%c0_15, %c304, %c0_16] : memref<1x560x16xf32, #tpu.memory_space<vmem>>, vector<1x256x16xf32>
    %19 = vector.shape_cast %18 : vector<1x256x16xf32> to vector<256x16xf32>
    %c0_17 = arith.constant 0 : index
    %c0_18 = arith.constant 0 : index
    %c0_19 = arith.constant 0 : index
    %20 = vector.load %arg3[%c0_17, %c0_18, %c0_19] : memref<1x256x3xf32, #tpu.memory_space<vmem>>, vector<1x256x1xf32>
    %21 = vector.shape_cast %20 : vector<1x256x1xf32> to vector<256x1xf32>
    %c0_20 = arith.constant 0 : index
    %c0_21 = arith.constant 0 : index
    %c1 = arith.constant 1 : index
    %22 = vector.load %arg3[%c0_20, %c0_21, %c1] : memref<1x256x3xf32, #tpu.memory_space<vmem>>, vector<1x256x1xf32>
    %23 = vector.shape_cast %22 : vector<1x256x1xf32> to vector<256x1xf32>
    %c0_22 = arith.constant 0 : index
    %c0_23 = arith.constant 0 : index
    %c2 = arith.constant 2 : index
    %24 = vector.load %arg3[%c0_22, %c0_23, %c2] : memref<1x256x3xf32, #tpu.memory_space<vmem>>, vector<1x256x1xf32>
    %25 = vector.shape_cast %24 : vector<1x256x1xf32> to vector<256x1xf32>
    %c0_24 = arith.constant 0 : index
    %c0_25 = arith.constant 0 : index
    %26 = vector.load %arg7[%c0_24, %c0_25] : memref<256x15xf32, #tpu.memory_space<vmem>>, vector<256x1xf32>
    %c0_26 = arith.constant 0 : index
    %c1_27 = arith.constant 1 : index
    %27 = vector.load %arg7[%c0_26, %c1_27] : memref<256x15xf32, #tpu.memory_space<vmem>>, vector<256x1xf32>
    %c0_28 = arith.constant 0 : index
    %c2_29 = arith.constant 2 : index
    %28 = vector.load %arg7[%c0_28, %c2_29] : memref<256x15xf32, #tpu.memory_space<vmem>>, vector<256x1xf32>
    %c0_30 = arith.constant 0 : index
    %c3 = arith.constant 3 : index
    %29 = vector.load %arg7[%c0_30, %c3] : memref<256x15xf32, #tpu.memory_space<vmem>>, vector<256x1xf32>
    %c0_31 = arith.constant 0 : index
    %c4 = arith.constant 4 : index
    %30 = vector.load %arg7[%c0_31, %c4] : memref<256x15xf32, #tpu.memory_space<vmem>>, vector<256x1xf32>
    %c0_32 = arith.constant 0 : index
    %c5 = arith.constant 5 : index
    %31 = vector.load %arg7[%c0_32, %c5] : memref<256x15xf32, #tpu.memory_space<vmem>>, vector<256x1xf32>
    %c0_33 = arith.constant 0 : index
    %c6 = arith.constant 6 : index
    %32 = vector.load %arg7[%c0_33, %c6] : memref<256x15xf32, #tpu.memory_space<vmem>>, vector<256x1xf32>
    %c0_34 = arith.constant 0 : index
    %c7 = arith.constant 7 : index
    %33 = vector.load %arg7[%c0_34, %c7] : memref<256x15xf32, #tpu.memory_space<vmem>>, vector<256x1xf32>
    %c0_35 = arith.constant 0 : index
    %c8 = arith.constant 8 : index
    %34 = vector.load %arg7[%c0_35, %c8] : memref<256x15xf32, #tpu.memory_space<vmem>>, vector<256x1xf32>
    %c0_36 = arith.constant 0 : index
    %c9 = arith.constant 9 : index
    %35 = vector.load %arg7[%c0_36, %c9] : memref<256x15xf32, #tpu.memory_space<vmem>>, vector<256x1xf32>
    %c0_37 = arith.constant 0 : index
    %c10 = arith.constant 10 : index
    %36 = vector.load %arg7[%c0_37, %c10] : memref<256x15xf32, #tpu.memory_space<vmem>>, vector<256x1xf32>
    %c0_38 = arith.constant 0 : index
    %c11 = arith.constant 11 : index
    %37 = vector.load %arg7[%c0_38, %c11] : memref<256x15xf32, #tpu.memory_space<vmem>>, vector<256x1xf32>
    %c0_39 = arith.constant 0 : index
    %c12 = arith.constant 12 : index
    %38 = vector.load %arg7[%c0_39, %c12] : memref<256x15xf32, #tpu.memory_space<vmem>>, vector<1x1xf32>
    %c0_40 = arith.constant 0 : index
    %c13 = arith.constant 13 : index
    %39 = vector.load %arg7[%c0_40, %c13] : memref<256x15xf32, #tpu.memory_space<vmem>>, vector<1x1xf32>
    %c0_41 = arith.constant 0 : index
    %c14 = arith.constant 14 : index
    %40 = vector.load %arg7[%c0_41, %c14] : memref<256x15xf32, #tpu.memory_space<vmem>>, vector<1x1xf32>
    %cst = arith.constant dense<0.000000e+00> : vector<8x16xf32>
    %41 = tpu.matmul %2, %7, %cst {dimension_numbers = #tpu.dot_dimension_numbers<[1], [0], [0], [1], [0, 0, 1, 1], [], []>} : vector<8x32xf32>, vector<32x16xf32>, vector<8x16xf32> -> vector<8x16xf32>
    %42 = arith.mulf %2, %2 : vector<8x32xf32>
    %cst_42 = arith.constant dense<0.000000e+00> : vector<8xf32>
    %43 = vector.multi_reduction <add>, %42, %cst_42 [1] : vector<8x32xf32> to vector<8xf32>
    %44 = vector.shape_cast %43 : vector<8xf32> to vector<8x1xf32>
    %45 = vector.broadcast %44 : vector<8x1xf32> to vector<8x16xf32>
    %46 = vector.broadcast %15 : vector<1x16xf32> to vector<8x16xf32>
    %47 = arith.addf %45, %46 : vector<8x16xf32>
    %cst_43 = arith.constant 2.000000e+00 : f32
    %48 = vector.broadcast %cst_43 : f32 to vector<8x16xf32>
    %49 = arith.mulf %48, %41 : vector<8x16xf32>
    %50 = arith.subf %47, %49 : vector<8x16xf32>
    %cst_44 = arith.constant 0.000000e+00 : f32
    %51 = vector.broadcast %cst_44 : f32 to vector<8x16xf32>
    %52 = arith.maximumf %50, %51 : vector<8x16xf32>
    %53 = math.sqrt %52 : vector<8x16xf32>
    %cst_45 = arith.constant 9.99999993E-9 : f32
    %54 = vector.broadcast %cst_45 : f32 to vector<8x16xf32>
    %55 = arith.addf %53, %54 : vector<8x16xf32>
    %cst_46 = arith.constant 1.000000e+00 : f32
    %56 = vector.broadcast %cst_46 : f32 to vector<8x16xf32>
    %57 = arith.divf %56, %55 : vector<8x16xf32>
    %58 = vector.broadcast %3 : vector<8x1xf32> to vector<8x16xf32>
    %59 = vector.broadcast %9 : vector<1x16xf32> to vector<8x16xf32>
    %60 = arith.subf %58, %59 : vector<8x16xf32>
    %61 = arith.mulf %60, %60 : vector<8x16xf32>
    %62 = vector.broadcast %4 : vector<8x1xf32> to vector<8x16xf32>
    %63 = vector.broadcast %11 : vector<1x16xf32> to vector<8x16xf32>
    %64 = arith.subf %62, %63 : vector<8x16xf32>
    %65 = arith.mulf %64, %64 : vector<8x16xf32>
    %66 = arith.addf %61, %65 : vector<8x16xf32>
    %67 = vector.broadcast %5 : vector<8x1xf32> to vector<8x16xf32>
    %68 = vector.broadcast %13 : vector<1x16xf32> to vector<8x16xf32>
    %69 = arith.subf %67, %68 : vector<8x16xf32>
    %70 = arith.mulf %69, %69 : vector<8x16xf32>
    %71 = arith.addf %66, %70 : vector<8x16xf32>
    %72 = math.sqrt %71 : vector<8x16xf32>
    %cst_47 = arith.constant 9.99999993E-9 : f32
    %73 = vector.broadcast %cst_47 : f32 to vector<8x16xf32>
    %74 = arith.addf %72, %73 : vector<8x16xf32>
    %cst_48 = arith.constant 1.000000e+00 : f32
    %75 = vector.broadcast %cst_48 : f32 to vector<8x16xf32>
    %76 = arith.divf %75, %74 : vector<8x16xf32>
    %77 = tpu.concatenate %53, %53, %53, %53, %53, %53, %53, %53, %53, %53, %53, %53, %53, %53, %53, %53 in 0 : vector<8x16xf32>, vector<8x16xf32>, vector<8x16xf32>, vector<8x16xf32>, vector<8x16xf32>, vector<8x16xf32>, vector<8x16xf32>, vector<8x16xf32>, vector<8x16xf32>, vector<8x16xf32>, vector<8x16xf32>, vector<8x16xf32>, vector<8x16xf32>, vector<8x16xf32>, vector<8x16xf32>, vector<8x16xf32> -> vector<128x16xf32>
    %78 = tpu.concatenate %53, %53, %53, %53, %53, %53, %53, %53, %53, %53, %53, %53, %53, %53, %53, %53 in 0 : vector<8x16xf32>, vector<8x16xf32>, vector<8x16xf32>, vector<8x16xf32>, vector<8x16xf32>, vector<8x16xf32>, vector<8x16xf32>, vector<8x16xf32>, vector<8x16xf32>, vector<8x16xf32>, vector<8x16xf32>, vector<8x16xf32>, vector<8x16xf32>, vector<8x16xf32>, vector<8x16xf32>, vector<8x16xf32> -> vector<128x16xf32>
    %79 = tpu.concatenate %77, %78 in 0 : vector<128x16xf32>, vector<128x16xf32> -> vector<256x16xf32>
    %80 = tpu.concatenate %57, %57, %57, %57, %57, %57, %57, %57, %57, %57, %57, %57, %57, %57, %57, %57 in 0 : vector<8x16xf32>, vector<8x16xf32>, vector<8x16xf32>, vector<8x16xf32>, vector<8x16xf32>, vector<8x16xf32>, vector<8x16xf32>, vector<8x16xf32>, vector<8x16xf32>, vector<8x16xf32>, vector<8x16xf32>, vector<8x16xf32>, vector<8x16xf32>, vector<8x16xf32>, vector<8x16xf32>, vector<8x16xf32> -> vector<128x16xf32>
    %81 = tpu.concatenate %57, %57, %57, %57, %57, %57, %57, %57, %57, %57, %57, %57, %57, %57, %57, %57 in 0 : vector<8x16xf32>, vector<8x16xf32>, vector<8x16xf32>, vector<8x16xf32>, vector<8x16xf32>, vector<8x16xf32>, vector<8x16xf32>, vector<8x16xf32>, vector<8x16xf32>, vector<8x16xf32>, vector<8x16xf32>, vector<8x16xf32>, vector<8x16xf32>, vector<8x16xf32>, vector<8x16xf32>, vector<8x16xf32> -> vector<128x16xf32>
    %82 = tpu.concatenate %80, %81 in 0 : vector<128x16xf32>, vector<128x16xf32> -> vector<256x16xf32>
    %83 = tpu.concatenate %72, %72, %72, %72, %72, %72, %72, %72, %72, %72, %72, %72, %72, %72, %72, %72 in 0 : vector<8x16xf32>, vector<8x16xf32>, vector<8x16xf32>, vector<8x16xf32>, vector<8x16xf32>, vector<8x16xf32>, vector<8x16xf32>, vector<8x16xf32>, vector<8x16xf32>, vector<8x16xf32>, vector<8x16xf32>, vector<8x16xf32>, vector<8x16xf32>, vector<8x16xf32>, vector<8x16xf32>, vector<8x16xf32> -> vector<128x16xf32>
    %84 = tpu.concatenate %72, %72, %72, %72, %72, %72, %72, %72, %72, %72, %72, %72, %72, %72, %72, %72 in 0 : vector<8x16xf32>, vector<8x16xf32>, vector<8x16xf32>, vector<8x16xf32>, vector<8x16xf32>, vector<8x16xf32>, vector<8x16xf32>, vector<8x16xf32>, vector<8x16xf32>, vector<8x16xf32>, vector<8x16xf32>, vector<8x16xf32>, vector<8x16xf32>, vector<8x16xf32>, vector<8x16xf32>, vector<8x16xf32> -> vector<128x16xf32>
    %85 = tpu.concatenate %83, %84 in 0 : vector<128x16xf32>, vector<128x16xf32> -> vector<256x16xf32>
    %86 = tpu.concatenate %76, %76, %76, %76, %76, %76, %76, %76, %76, %76, %76, %76, %76, %76, %76, %76 in 0 : vector<8x16xf32>, vector<8x16xf32>, vector<8x16xf32>, vector<8x16xf32>, vector<8x16xf32>, vector<8x16xf32>, vector<8x16xf32>, vector<8x16xf32>, vector<8x16xf32>, vector<8x16xf32>, vector<8x16xf32>, vector<8x16xf32>, vector<8x16xf32>, vector<8x16xf32>, vector<8x16xf32>, vector<8x16xf32> -> vector<128x16xf32>
    %87 = tpu.concatenate %76, %76, %76, %76, %76, %76, %76, %76, %76, %76, %76, %76, %76, %76, %76, %76 in 0 : vector<8x16xf32>, vector<8x16xf32>, vector<8x16xf32>, vector<8x16xf32>, vector<8x16xf32>, vector<8x16xf32>, vector<8x16xf32>, vector<8x16xf32>, vector<8x16xf32>, vector<8x16xf32>, vector<8x16xf32>, vector<8x16xf32>, vector<8x16xf32>, vector<8x16xf32>, vector<8x16xf32>, vector<8x16xf32> -> vector<128x16xf32>
    %88 = tpu.concatenate %86, %87 in 0 : vector<128x16xf32>, vector<128x16xf32> -> vector<256x16xf32>
    %89 = vector.broadcast %26 : vector<256x1xf32> to vector<256x16xf32>
    %90 = arith.mulf %89, %79 : vector<256x16xf32>
    %91 = vector.broadcast %21 : vector<256x1xf32> to vector<256x16xf32>
    %92 = arith.subf %17, %91 : vector<256x16xf32>
    %93 = arith.mulf %82, %92 : vector<256x16xf32>
    %94 = arith.addf %90, %93 : vector<256x16xf32>
    %95 = vector.broadcast %27 : vector<256x1xf32> to vector<256x16xf32>
    %96 = arith.addf %94, %95 : vector<256x16xf32>
    %cst_49 = arith.constant 0.000000e+00 : f32
    %97 = vector.broadcast %cst_49 : f32 to vector<256x16xf32>
    %98 = arith.maximumf %96, %97 : vector<256x16xf32>
    %99 = vector.broadcast %30 : vector<256x1xf32> to vector<256x16xf32>
    %100 = arith.mulf %99, %85 : vector<256x16xf32>
    %101 = vector.broadcast %23 : vector<256x1xf32> to vector<256x16xf32>
    %102 = arith.subf %101, %19 : vector<256x16xf32>
    %103 = arith.mulf %88, %102 : vector<256x16xf32>
    %104 = arith.addf %100, %103 : vector<256x16xf32>
    %105 = vector.broadcast %25 : vector<256x1xf32> to vector<256x16xf32>
    %106 = arith.addf %104, %105 : vector<256x16xf32>
    %107 = vector.broadcast %31 : vector<256x1xf32> to vector<256x16xf32>
    %108 = arith.addf %106, %107 : vector<256x16xf32>
    %cst_50 = arith.constant 0.000000e+00 : f32
    %109 = vector.broadcast %cst_50 : f32 to vector<256x16xf32>
    %110 = arith.maximumf %108, %109 : vector<256x16xf32>
    %c0_51 = arith.constant 0 : index
    %c0_52 = arith.constant 0 : index
    %111 = vector.load %arg5[%c0_51, %c0_52] : memref<256x1280xf32, #tpu.memory_space<vmem>>, vector<256x256xf32>
    %c0_53 = arith.constant 0 : index
    %c256 = arith.constant 256 : index
    %112 = vector.load %arg5[%c0_53, %c256] : memref<256x1280xf32, #tpu.memory_space<vmem>>, vector<256x256xf32>
    %c0_54 = arith.constant 0 : index
    %c512 = arith.constant 512 : index
    %113 = vector.load %arg5[%c0_54, %c512] : memref<256x1280xf32, #tpu.memory_space<vmem>>, vector<256x256xf32>
    %c0_55 = arith.constant 0 : index
    %c768 = arith.constant 768 : index
    %114 = vector.load %arg5[%c0_55, %c768] : memref<256x1280xf32, #tpu.memory_space<vmem>>, vector<256x256xf32>
    %c0_56 = arith.constant 0 : index
    %c1024 = arith.constant 1024 : index
    %115 = vector.load %arg5[%c0_56, %c1024] : memref<256x1280xf32, #tpu.memory_space<vmem>>, vector<256x256xf32>
    %cst_57 = arith.constant dense<0.000000e+00> : vector<256x16xf32>
    %116 = tpu.matmul %111, %98, %cst_57 {dimension_numbers = #tpu.dot_dimension_numbers<[1], [0], [0], [1], [0, 0, 1, 1], [], []>} : vector<256x256xf32>, vector<256x16xf32>, vector<256x16xf32> -> vector<256x16xf32>
    %117 = vector.broadcast %28 : vector<256x1xf32> to vector<256x16xf32>
    %118 = arith.addf %116, %117 : vector<256x16xf32>
    %cst_58 = arith.constant 0.000000e+00 : f32
    %119 = vector.broadcast %cst_58 : f32 to vector<256x16xf32>
    %120 = arith.maximumf %118, %119 : vector<256x16xf32>
    %cst_59 = arith.constant dense<0.000000e+00> : vector<256x16xf32>
    %121 = tpu.matmul %112, %120, %cst_59 {dimension_numbers = #tpu.dot_dimension_numbers<[1], [0], [0], [1], [0, 0, 1, 1], [], []>} : vector<256x256xf32>, vector<256x16xf32>, vector<256x16xf32> -> vector<256x16xf32>
    %122 = vector.broadcast %29 : vector<256x1xf32> to vector<256x16xf32>
    %123 = arith.addf %121, %122 : vector<256x16xf32>
    %cst_60 = arith.constant 0.000000e+00 : f32
    %124 = vector.broadcast %cst_60 : f32 to vector<256x16xf32>
    %125 = arith.maximumf %123, %124 : vector<256x16xf32>
    %cst_61 = arith.constant dense<0.000000e+00> : vector<256x16xf32>
    %126 = tpu.matmul %113, %110, %cst_61 {dimension_numbers = #tpu.dot_dimension_numbers<[1], [0], [0], [1], [0, 0, 1, 1], [], []>} : vector<256x256xf32>, vector<256x16xf32>, vector<256x16xf32> -> vector<256x16xf32>
    %127 = vector.broadcast %32 : vector<256x1xf32> to vector<256x16xf32>
    %128 = arith.addf %126, %127 : vector<256x16xf32>
    %cst_62 = arith.constant 0.000000e+00 : f32
    %129 = vector.broadcast %cst_62 : f32 to vector<256x16xf32>
    %130 = arith.maximumf %128, %129 : vector<256x16xf32>
    %cst_63 = arith.constant dense<0.000000e+00> : vector<256x16xf32>
    %131 = tpu.matmul %114, %130, %cst_63 {dimension_numbers = #tpu.dot_dimension_numbers<[1], [0], [0], [1], [0, 0, 1, 1], [], []>} : vector<256x256xf32>, vector<256x16xf32>, vector<256x16xf32> -> vector<256x16xf32>
    %132 = vector.broadcast %33 : vector<256x1xf32> to vector<256x16xf32>
    %133 = arith.addf %131, %132 : vector<256x16xf32>
    %cst_64 = arith.constant 0.000000e+00 : f32
    %134 = vector.broadcast %cst_64 : f32 to vector<256x16xf32>
    %135 = arith.maximumf %133, %134 : vector<256x16xf32>
    %c0_65 = arith.constant 0 : index
    %c0_66 = arith.constant 0 : index
    %136 = vector.load %arg6[%c0_65, %c0_66] : memref<24x256xf32, #tpu.memory_space<vmem>>, vector<8x256xf32>
    %c8_67 = arith.constant 8 : index
    %c0_68 = arith.constant 0 : index
    %137 = vector.load %arg6[%c8_67, %c0_68] : memref<24x256xf32, #tpu.memory_space<vmem>>, vector<8x256xf32>
    %c16 = arith.constant 16 : index
    %c0_69 = arith.constant 0 : index
    %138 = vector.load %arg6[%c16, %c0_69] : memref<24x256xf32, #tpu.memory_space<vmem>>, vector<8x256xf32>
    %cst_70 = arith.constant dense<0.000000e+00> : vector<8x16xf32>
    %139 = tpu.matmul %136, %125, %cst_70 {dimension_numbers = #tpu.dot_dimension_numbers<[1], [0], [0], [1], [0, 0, 1, 1], [], []>} : vector<8x256xf32>, vector<256x16xf32>, vector<8x16xf32> -> vector<8x16xf32>
    %140 = vector.broadcast %38 : vector<1x1xf32> to vector<8x16xf32>
    %141 = arith.addf %139, %140 : vector<8x16xf32>
    %cst_71 = arith.constant dense<0.000000e+00> : vector<8x16xf32>
    %142 = tpu.matmul %137, %135, %cst_71 {dimension_numbers = #tpu.dot_dimension_numbers<[1], [0], [0], [1], [0, 0, 1, 1], [], []>} : vector<8x256xf32>, vector<256x16xf32>, vector<8x16xf32> -> vector<8x16xf32>
    %143 = vector.broadcast %39 : vector<1x1xf32> to vector<8x16xf32>
    %144 = arith.addf %142, %143 : vector<8x16xf32>
    %145 = arith.addf %141, %144 : vector<8x16xf32>
    %cst_72 = arith.constant -2.000000e+01 : f32
    %cst_73 = arith.constant 2.000000e+01 : f32
    %146 = vector.broadcast %cst_72 : f32 to vector<8x16xf32>
    %147 = arith.maximumf %146, %145 : vector<8x16xf32>
    %148 = vector.broadcast %cst_73 : f32 to vector<8x16xf32>
    %149 = arith.minimumf %148, %147 : vector<8x16xf32>
    %cst_74 = arith.constant dense<0xFF800000> : vector<8xf32>
    %150 = vector.multi_reduction <maximumf>, %149, %cst_74 [1] : vector<8x16xf32> to vector<8xf32>
    %151 = vector.shape_cast %150 : vector<8xf32> to vector<8x1xf32>
    %152 = tpu.iota {dimensions = array<i32: 1>} : vector<8x16xi32>
    %153 = vector.broadcast %151 : vector<8x1xf32> to vector<8x16xf32>
    %154 = arith.cmpf oge, %149, %153 : vector<8x16xf32>
    %c16_i32 = arith.constant 16 : i32
    %155 = vector.broadcast %c16_i32 : i32 to vector<8x16xi32>
    %156 = arith.select %154, %152, %155 : vector<8x16xi1>, vector<8x16xi32>
    %cst_75 = arith.constant dense<2147483647> : vector<8xi32>
    %157 = vector.multi_reduction <minsi>, %156, %cst_75 [1] : vector<8x16xi32> to vector<8xi32>
    %158 = vector.shape_cast %157 : vector<8xi32> to vector<8x1xi32>
    %159 = tpu.concatenate %141, %141, %141, %141, %141, %141, %141, %141, %141, %141, %141, %141, %141, %141, %141, %141 in 0 : vector<8x16xf32>, vector<8x16xf32>, vector<8x16xf32>, vector<8x16xf32>, vector<8x16xf32>, vector<8x16xf32>, vector<8x16xf32>, vector<8x16xf32>, vector<8x16xf32>, vector<8x16xf32>, vector<8x16xf32>, vector<8x16xf32>, vector<8x16xf32>, vector<8x16xf32>, vector<8x16xf32>, vector<8x16xf32> -> vector<128x16xf32>
    %160 = tpu.concatenate %141, %141, %141, %141, %141, %141, %141, %141, %141, %141, %141, %141, %141, %141, %141, %141 in 0 : vector<8x16xf32>, vector<8x16xf32>, vector<8x16xf32>, vector<8x16xf32>, vector<8x16xf32>, vector<8x16xf32>, vector<8x16xf32>, vector<8x16xf32>, vector<8x16xf32>, vector<8x16xf32>, vector<8x16xf32>, vector<8x16xf32>, vector<8x16xf32>, vector<8x16xf32>, vector<8x16xf32>, vector<8x16xf32> -> vector<128x16xf32>
    %161 = tpu.concatenate %159, %160 in 0 : vector<128x16xf32>, vector<128x16xf32> -> vector<256x16xf32>
    %162 = vector.broadcast %34 : vector<256x1xf32> to vector<256x16xf32>
    %163 = arith.mulf %162, %161 : vector<256x16xf32>
    %164 = tpu.concatenate %144, %144, %144, %144, %144, %144, %144, %144, %144, %144, %144, %144, %144, %144, %144, %144 in 0 : vector<8x16xf32>, vector<8x16xf32>, vector<8x16xf32>, vector<8x16xf32>, vector<8x16xf32>, vector<8x16xf32>, vector<8x16xf32>, vector<8x16xf32>, vector<8x16xf32>, vector<8x16xf32>, vector<8x16xf32>, vector<8x16xf32>, vector<8x16xf32>, vector<8x16xf32>, vector<8x16xf32>, vector<8x16xf32> -> vector<128x16xf32>
    %165 = tpu.concatenate %144, %144, %144, %144, %144, %144, %144, %144, %144, %144, %144, %144, %144, %144, %144, %144 in 0 : vector<8x16xf32>, vector<8x16xf32>, vector<8x16xf32>, vector<8x16xf32>, vector<8x16xf32>, vector<8x16xf32>, vector<8x16xf32>, vector<8x16xf32>, vector<8x16xf32>, vector<8x16xf32>, vector<8x16xf32>, vector<8x16xf32>, vector<8x16xf32>, vector<8x16xf32>, vector<8x16xf32>, vector<8x16xf32> -> vector<128x16xf32>
    %166 = tpu.concatenate %164, %165 in 0 : vector<128x16xf32>, vector<128x16xf32> -> vector<256x16xf32>
    %167 = vector.broadcast %35 : vector<256x1xf32> to vector<256x16xf32>
    %168 = arith.mulf %167, %166 : vector<256x16xf32>
    %169 = arith.addf %163, %168 : vector<256x16xf32>
    %170 = vector.broadcast %36 : vector<256x1xf32> to vector<256x16xf32>
    %171 = arith.addf %169, %170 : vector<256x16xf32>
    %cst_76 = arith.constant dense<0xFF800000> : vector<256xf32>
    %172 = vector.multi_reduction <maximumf>, %171, %cst_76 [1] : vector<256x16xf32> to vector<256xf32>
    %173 = vector.shape_cast %172 : vector<256xf32> to vector<256x1xf32>
    %cst_77 = arith.constant dense<0.000000e+00> : vector<256x1xf32>
    %174 = tpu.matmul %115, %173, %cst_77 {dimension_numbers = #tpu.dot_dimension_numbers<[1], [0], [0], [1], [0, 0, 1, 1], [], []>} : vector<256x256xf32>, vector<256x1xf32>, vector<256x1xf32> -> vector<256x1xf32>
    %175 = arith.addf %174, %37 : vector<256x1xf32>
    %cst_78 = arith.constant 0.000000e+00 : f32
    %176 = vector.broadcast %cst_78 : f32 to vector<256x1xf32>
    %177 = arith.maximumf %175, %176 : vector<256x1xf32>
    %cst_79 = arith.constant dense<0.000000e+00> : vector<8x1xf32>
    %178 = tpu.matmul %138, %177, %cst_79 {dimension_numbers = #tpu.dot_dimension_numbers<[1], [0], [0], [1], [0, 0, 1, 1], [], []>} : vector<8x256xf32>, vector<256x1xf32>, vector<8x1xf32> -> vector<8x1xf32>
    %179 = vector.broadcast %40 : vector<1x1xf32> to vector<8x1xf32>
    %180 = arith.addf %178, %179 : vector<8x1xf32>
    %c8_i32 = arith.constant 8 : i32
    %181 = arith.muli %arg1, %c8_i32 : i32
    %182 = tpu.assume_multiple %181, 8 : i32
    %c0_80 = arith.constant 0 : index
    %183 = arith.index_cast %182 : i32 to index
    %c0_81 = arith.constant 0 : index
    %184 = vector.load %arg8[%c0_80, %183, %c0_81] : memref<1x16x1xi32, #tpu.memory_space<vmem>>, vector<1x8x1xi32>
    %185 = vector.shape_cast %184 : vector<1x8x1xi32> to vector<8x1xi32>
    %186 = vector.shape_cast %158 : vector<8x1xi32> to vector<1x8x1xi32>
    tpu.vector_store %arg8[%c0_80, %183, %c0_81], %186 {strides = array<i32>} : memref<1x16x1xi32, #tpu.memory_space<vmem>>, vector<1x8x1xi32>,
    %c0_82 = arith.constant 0 : index
    %187 = arith.index_cast %182 : i32 to index
    %c0_83 = arith.constant 0 : index
    %188 = vector.load %arg9[%c0_82, %187, %c0_83] : memref<1x16x1xf32, #tpu.memory_space<vmem>>, vector<1x8x1xf32>
    %189 = vector.shape_cast %188 : vector<1x8x1xf32> to vector<8x1xf32>
    %190 = vector.shape_cast %180 : vector<8x1xf32> to vector<1x8x1xf32>
    tpu.vector_store %arg9[%c0_82, %187, %c0_83], %190 {strides = array<i32>} : memref<1x16x1xf32, #tpu.memory_space<vmem>>, vector<1x8x1xf32>,
    return
  }
  func.func @transform_0(%arg0: i32, %arg1: i32) -> (i32, i32, i32) {
    %c0_i32 = arith.constant 0 : i32
    %c0_i32_0 = arith.constant 0 : i32
    return %arg0, %arg1, %c0_i32 : i32, i32, i32
  }
  func.func @transform_1(%arg0: i32, %arg1: i32) -> (i32, i32, i32) {
    %c2_i32 = arith.constant 2 : i32
    %0 = arith.muli %arg0, %c2_i32 : i32
    %1 = arith.addi %0, %arg1 : i32
    %c0_i32 = arith.constant 0 : i32
    %c0_i32_0 = arith.constant 0 : i32
    %c0_i32_1 = arith.constant 0 : i32
    return %1, %c0_i32, %c0_i32_0 : i32, i32, i32
  }
  func.func @transform_2(%arg0: i32, %arg1: i32) -> (i32, i32, i32) {
    %c0_i32 = arith.constant 0 : i32
    %c0_i32_0 = arith.constant 0 : i32
    %c0_i32_1 = arith.constant 0 : i32
    return %arg0, %c0_i32, %c0_i32_0 : i32, i32, i32
  }
  func.func @transform_3(%arg0: i32, %arg1: i32) -> (i32, i32) {
    %c0_i32 = arith.constant 0 : i32
    %c0_i32_0 = arith.constant 0 : i32
    %c0_i32_1 = arith.constant 0 : i32
    return %c0_i32, %c0_i32_0 : i32, i32
  }
  func.func @transform_4(%arg0: i32, %arg1: i32) -> (i32, i32) {
    %c0_i32 = arith.constant 0 : i32
    %c0_i32_0 = arith.constant 0 : i32
    %c0_i32_1 = arith.constant 0 : i32
    return %c0_i32, %c0_i32_0 : i32, i32
  }
  func.func @transform_5(%arg0: i32, %arg1: i32) -> (i32, i32) {
    %c0_i32 = arith.constant 0 : i32
    %c0_i32_0 = arith.constant 0 : i32
    %c0_i32_1 = arith.constant 0 : i32
    return %c0_i32, %c0_i32_0 : i32, i32
  }
  func.func @transform_6(%arg0: i32, %arg1: i32) -> (i32, i32, i32) {
    %c0_i32 = arith.constant 0 : i32
    %c0_i32_0 = arith.constant 0 : i32
    %c0_i32_1 = arith.constant 0 : i32
    return %arg0, %c0_i32, %c0_i32_0 : i32, i32, i32
  }
  func.func @transform_7(%arg0: i32, %arg1: i32) -> (i32, i32, i32) {
    %c0_i32 = arith.constant 0 : i32
    %c0_i32_0 = arith.constant 0 : i32
    %c0_i32_1 = arith.constant 0 : i32
    return %arg0, %c0_i32, %c0_i32_0 : i32, i32, i32
  }
}

</mosaic_0001>

<bundles_post_ra>
// kernel: _lambda_.3
= control target key start
LH: loop header
LB: loop body
LE: loop exit
PB: predicated region body
PF: predicated region fallthrough
CT: control target
= control target key end

     0   :  { %s1363_s0 = inlined_call_operand.vmem [shape: f32[3,256], index: 0, kind: input, shape index: {}]   ;;  %s1364_s1 = inlined_call_operand.hbm [shape: f32[16,3], index: 1, kind: input, shape index: {}]   ;;  %s1365_s2 = inlined_call_operand.vmem [shape: f32[16,1], index: 2, kind: input, shape index: {}]   ;;  %s1366_s3 = inlined_call_operand.hbm [shape: f32[32,16], index: 3, kind: input, shape index: {}]   ;;  %s1367_s4 = inlined_call_operand.hbm [shape: f32[32,1], index: 4, kind: input, shape index: {}]   ;;  %s1368_s5 = inlined_call_operand.hbm [shape: f32[64,32], index: 5, kind: input, shape index: {}]   ;;  %s1369_s6 = inlined_call_operand.vmem [shape: f32[64,1], index: 6, kind: input, shape index: {}]   ;;  %s1370_s7 = inlined_call_operand.hbm [shape: f32[32,64], index: 7, kind: input, shape index: {}]   ;;  %s1371_s8 = inlined_call_operand.vmem [shape: f32[32,1], index: 8, kind: input, shape index: {}]   ;;  %s1372_s9 = inlined_call_operand.hbm [shape: f32[1,32], index: 9, kind: input, shape index: {}]   ;;  %s1373_s10 = inlined_call_operand.<no memory space> [shape: f32[1,1], index: 10, kind: input, shape index: {}]   ;;  %s1374_s11 = inlined_call_operand.vmem [shape: f32[32,256], index: 11, kind: output, shape index: {0}]   ;;  %s1375_s12 = inlined_call_operand.vmem [shape: f32[1,256], index: 12, kind: output, shape index: {1}]  }
   0x1   :  { %v18_v0 = vstv %s1373_s10 }
   0x2   :  { %19 = vst [vmem:[#allocation2] sm:$0x1] %v18_v0 }
   0x3   :  { %20 = vsyncpa [#allocation4], 0 }
   0x4   :  { %21 = vsyncpa [#allocation6], 0 }
   0x5   :  { %22 = vsyncpa [#allocation9], 0 }
   0x6   :  { %23 = vsyncpa [#allocation12], 0  ;;  %s1066_s23 = smov [#allocation5]   ;;  %s1067_s25 = smov [#allocation8]  }
   0x7   :  { %s45_s24 = sshll.u32 %s1066_s23, 4  ;;  %s69_s26 = sshll.u32 %s1067_s25, 4  ;;  %s46_s24 = int_to_ptr.vmem [resolvable:$true] %s45_s24  ;;  %s1147_s26 = int_to_ptr.vmem [resolvable:$true] %s69_s26 }
   0x8   :  { %s926_s29 = scalar_lea.hbm %s1366_s3, 512 }
   0x9   :  { %p927_p0 = scmp.ne.s32.totalorder %s1366_s3, %s926_s29  ;;  %p930_p1 = scmp.lt.u32.totalorder %s926_s29, %s1366_s3 }
   0xb   :  { %p932_p2 = pnand %p930_p1, %p927_p0 }
   0xd   :  { %935 = shalt.err (!%p932_p2)
}
   0xe   :  { %s936_s15 = scalar_lea.vmem %s46_s24, 512  ;;  %p941_p4 = scmp.lt.s32.totalorder %s46_s24, %s46_s24 }
   0xf   :  { %p937_p3 = scmp.ne.s32.totalorder %s46_s24, %s936_s15  ;;  %p942_p5 = scmp.lt.s32.totalorder %s936_s15, %s936_s15 }
  0x11   :  { %p943_p6 = por %p942_p5, %p941_p4 }
  0x13   :  { %p944_p7 = pnand %p943_p6, %p937_p3 }
  0x15   :  { %947 = shalt.err (!%p944_p7)
}
  0x16   :  { %s1068_s16 = smov 128   ;;  %s1069_s17 = smov 8  }
  0x17   :  { %51 = dma.hbm_to_vmem [thread:$0]  %s1366_s3, 512, %s46_s24, [#allocation6], %s1068_s16, %s1068_s16, %s1069_s17  }
  0x18   :  { %s948_s22 = scalar_lea.hbm %s1368_s5, 1024 }
  0x19   :  { %p949_p8 = scmp.ne.s32.totalorder %s1368_s5, %s948_s22  ;;  %p952_p9 = scmp.lt.u32.totalorder %s948_s22, %s1368_s5 }
  0x1b   :  { %p954_p10 = pnand %p952_p9, %p949_p8 }
  0x1d   :  { %957 = shalt.err (!%p954_p10)
}
  0x1e   :  { %s958_s29 = scalar_lea.vmem %s1147_s26, 1024  ;;  %p963_p12 = scmp.lt.s32.totalorder %s1147_s26, %s1147_s26 }
  0x1f   :  { %p959_p11 = scmp.ne.s32.totalorder %s1147_s26, %s958_s29  ;;  %p964_p13 = scmp.lt.s32.totalorder %s958_s29, %s958_s29 }
  0x21   :  { %p965_p0 = por %p964_p13, %p963_p12 }
  0x23   :  { %p966_p1 = pnand %p965_p0, %p959_p11 }
  0x25   :  { %969 = shalt.err (!%p966_p1)
}
  0x26   :  { %75 = dma.hbm_to_vmem [thread:$0]  %s1368_s5, 1024, %s1147_s26, [#allocation9], %s1068_s16, %s1068_s16, %s1069_s17  }
  0x27   :  { %s1070_s30 = smov [#allocation3]   ;;  %s1071_s10 = smov [#allocation7]  }
  0x28   :  { %s31_s13 = sshll.u32 %s1070_s30, 4  ;;  %s57_s14 = sshll.u32 %s1071_s10, 4  ;;  %s32_s13 = int_to_ptr.vmem [resolvable:$true] %s31_s13  ;;  %s1184_s14 = int_to_ptr.vmem [resolvable:$true] %s57_s14 }
  0x29   :  { %s970_s19 = scalar_lea.hbm %s1364_s1, 256 }
  0x2a   :  { %p971_p2 = scmp.ne.s32.totalorder %s1364_s1, %s970_s19  ;;  %p974_p3 = scmp.lt.u32.totalorder %s970_s19, %s1364_s1 }
  0x2c   :  { %p976_p4 = pnand %p974_p3, %p971_p2 }
  0x2e   :  { %979 = shalt.err (!%p976_p4)
}
  0x2f   :  { %s980_s5 = scalar_lea.vmem %s32_s13, 256  ;;  %p985_p6 = scmp.lt.s32.totalorder %s32_s13, %s32_s13 }
  0x30   :  { %p981_p5 = scmp.ne.s32.totalorder %s32_s13, %s980_s5  ;;  %p986_p7 = scmp.lt.s32.totalorder %s980_s5, %s980_s5 }
  0x32   :  { %p987_p8 = por %p986_p7, %p985_p6 }
  0x34   :  { %p988_p9 = pnand %p987_p8, %p981_p5 }
  0x36   :  { %991 = shalt.err (!%p988_p9)
}
  0x37   :  { %37 = dma.hbm_to_vmem [thread:$0]  %s1364_s1, 256, %s32_s13, [#allocation4], %s1068_s16, %s1068_s16, %s1069_s17  }
  0x38   :  { %s992_s29 = scalar_lea.hbm %s1367_s4, 512 }
  0x39   :  { %p993_p10 = scmp.ne.s32.totalorder %s1367_s4, %s992_s29  ;;  %p996_p11 = scmp.lt.u32.totalorder %s992_s29, %s1367_s4 }
  0x3b   :  { %p998_p12 = pnand %p996_p11, %p993_p10 }
  0x3d   :  { %1001 = shalt.err (!%p998_p12)
}
  0x3e   :  { %s1002_s15 = scalar_lea.vmem %s1184_s14, 512  ;;  %p1007_p0 = scmp.lt.s32.totalorder %s1184_s14, %s1184_s14 }
  0x3f   :  { %p1003_p13 = scmp.ne.s32.totalorder %s1184_s14, %s1002_s15  ;;  %p1008_p1 = scmp.lt.s32.totalorder %s1002_s15, %s1002_s15 }
  0x41   :  { %p1009_p2 = por %p1008_p1, %p1007_p0 }
  0x43   :  { %p1010_p3 = pnand %p1009_p2, %p1003_p13 }
  0x45   :  { %1013 = shalt.err (!%p1010_p3)
}
  0x46   :  { %63 = dma.hbm_to_vmem [thread:$0]  %s1367_s4, 512, %s1184_s14, [#allocation6], %s1068_s16, %s1068_s16, %s1069_s17  }
  0x47   :  { %s1072_s18 = smov [#allocation10]   ;;  %s1073_s20 = smov [#allocation11]  }
  0x48   :  { %s83_s19 = sshll.u32 %s1072_s18, 4  ;;  %s98_s21 = sshll.u32 %s1073_s20, 4  ;;  %s84_s19 = int_to_ptr.vmem [resolvable:$true] %s83_s19  ;;  %s99_s21 = int_to_ptr.vmem [resolvable:$true] %s98_s21 }
  0x49   :  { %s1014_s5 = scalar_lea.hbm %s1370_s7, 512 }
  0x4a   :  { %p1015_p4 = scmp.ne.s32.totalorder %s1370_s7, %s1014_s5  ;;  %p1018_p5 = scmp.lt.u32.totalorder %s1014_s5, %s1370_s7 }
  0x4c   :  { %p1020_p6 = pnand %p1018_p5, %p1015_p4 }
  0x4e   :  { %1023 = shalt.err (!%p1020_p6)
}
  0x4f   :  { %s1024_s4 = scalar_lea.vmem %s84_s19, 512  ;;  %p1029_p8 = scmp.lt.s32.totalorder %s84_s19, %s84_s19 }
  0x50   :  { %p1025_p7 = scmp.ne.s32.totalorder %s84_s19, %s1024_s4  ;;  %p1030_p9 = scmp.lt.s32.totalorder %s1024_s4, %s1024_s4 }
  0x52   :  { %p1031_p10 = por %p1030_p9, %p1029_p8 }
  0x54   :  { %p1032_p11 = pnand %p1031_p10, %p1025_p7 }
  0x56   :  { %1035 = shalt.err (!%p1032_p11)
}
  0x57   :  { %89 = dma.hbm_to_vmem [thread:$0]  %s1370_s7, 512, %s84_s19, [#allocation9], %s1068_s16, %s1068_s16, %s1069_s17  }
  0x58   :  { %s1036_s30 = scalar_lea.hbm %s1372_s9, 16 }
  0x59   :  { %p1037_p12 = scmp.ne.s32.totalorder %s1372_s9, %s1036_s30  ;;  %p1040_p13 = scmp.lt.u32.totalorder %s1036_s30, %s1372_s9 }
  0x5b   :  { %p1042_p0 = pnand %p1040_p13, %p1037_p12 }
  0x5d   :  { %1045 = shalt.err (!%p1042_p0)
}
  0x5e   :  { %s1046_s18 = scalar_lea.vmem %s99_s21, 16  ;;  %s1050_s20 = scalar_lea.vmem %s99_s21, 32 }
  0x5f   :  { %p1047_p1 = scmp.ne.s32.totalorder %s99_s21, %s1046_s18  ;;  %p1051_p2 = scmp.lt.s32.totalorder %s99_s21, %s99_s21 }
  0x60   :  { %p1052_p3 = scmp.lt.s32.totalorder %s1050_s20, %s1046_s18 }
  0x62   :  { %p1053_p4 = por %p1052_p3, %p1051_p2 }
  0x64   :  { %p1054_p5 = pnand %p1053_p4, %p1047_p1 }
  0x66   :  { %1057 = shalt.err (!%p1054_p5)
}
  0x67   :  { %101 = dma.hbm_to_vmem [thread:$0]  %s1372_s9, 16, %s99_s21, [#allocation12]  }
  0x68   :  { %1058 = dma.done.wait [#allocation4], 256  }
  0x69   :  { %1059 = vsyncadd [#allocation4], 4294967040 }
  0x6a   :  { %1060 = dma.done.wait [#allocation6], 1024  }
  0x6b   :  { %1061 = vsyncadd [#allocation6], 4294966272 }
  0x6c   :  { %1062 = dma.done.wait [#allocation9], 1536  }
  0x6d   :  { %1063 = vsyncadd [#allocation9], 4294965760 }
  0x6e   :  { %1064 = dma.done.wait [#allocation12], 16  }
  0x6f   :  { %1065 = vsyncadd [#allocation12], 4294967280  ;;  %v1074_v1 = vmov 0   ;;  %v125_v2 = vld [vmem:[%s1365_s2] sm:$0xff]  ;;  %v123_v3 = vld [vmem:[#allocation3] sm:$0xff]  ;;  %v1075_v6 = vmov 1   ;;  %v138_v26 = vlaneseq }
  0x70   :  { %919 = vset.pattern.permute.xlu1 %v1074_v1  ;;  %918 = vset.pattern.permute.xlu0 %v1074_v1  ;;  %v126_v4 = vld [vmem:[%s1365_s2 + $0x8] sm:$0xff]  ;;  %v124_v5 = vld [vmem:[#allocation3 + $0x8] sm:$0xff]  ;;  %v1076_v7 = vmov 2   ;;  %v1077_v8 = vmov 0.0   ;;  %v250_v9 = vld [vmem:[#allocation7] sm:$0xff]  ;;  %vm274_vm0 = vcmask 130048  }
  0x71   :  { %162 = vperm.xlu1 %919, %v125_v2   ;;  %129 = vperm.xlu0 %918, %v123_v3   ;;  %v251_v10 = vld [vmem:[#allocation7 + $0x8] sm:$0xff]  ;;  %v252_v11 = vld [vmem:[#allocation7 + $0x10] sm:$0xff]  ;;  %v253_v13 = vld [vmem:[#allocation7 + $0x18] sm:$0xff]  ;;  %v1293_v27 = vshrl.u32 %v138_v26, 7  ;;  %vm440_vm1 = vcmask 261120   ;;  %vm622_vm2 = vcmask 523264  }
  0x72   :  { %351 = vmatprep.mubr.f32.mxu0 %v1077_v8  ;;  %529 = vmatprep.mubr.f32.mxu1 %v1077_v8  ;;  %v393_v12 = vld [vmem:[%s1369_s6 + $0x8] sm:$0xff]  ;;  %v395_v14 = vld [vmem:[%s1369_s6 + $0x18] sm:$0xff]  ;;  %v392_v15 = vld [vmem:[%s1369_s6] sm:$0xff]  ;;  %vm837_vm3 = vcmp.lt.s32.totalorder %v138_v26, 256 }
  0x73   :  { %v397_v16 = vld [vmem:[%s1369_s6 + $0x28] sm:$0xff]  ;;  %v394_v17 = vld [vmem:[%s1369_s6 + $0x10] sm:$0xff]  ;;  %v399_v18 = vld [vmem:[%s1369_s6 + $0x38] sm:$0xff]  ;;  %v1296_v28 = vsub.s32 0, %v1293_v27  ;;  %v144_v29 = vsub.s32 4, %v1293_v27  ;;  %v184_v31 = vsub.s32 1, %v1293_v27 }
  0x74   :  { %v396_v19 = vld [vmem:[%s1369_s6 + $0x20] sm:$0xff]  ;;  %v599_v20 = vld [vmem:[%s1371_s8 + $0x8] sm:$0xff]  ;;  %v398_v21 = vld [vmem:[%s1369_s6 + $0x30] sm:$0xff]  ;;  %v188_v32 = vsub.s32 5, %v1293_v27  ;;  %v218_v39 = vsub.s32 2, %v1293_v27  ;;  %v222_v40 = vsub.s32 6, %v1293_v27 }
  0x75   :  { %167 = vperm.xlu1 %919, %v126_v4   ;;  %134 = vperm.xlu0 %918, %v124_v5   ;;  %v601_v22 = vld [vmem:[%s1371_s8 + $0x18] sm:$0xff]  ;;  %v598_v23 = vld [vmem:[%s1371_s8] sm:$0xff]  ;;  %v600_v24 = vld [vmem:[%s1371_s8 + $0x10] sm:$0xff] }
  0x76   :  { %v733_v25 = vld [vmem:[#allocation2] sm:$0x1]  ;;  %v122_v30 = vld [vmem:[%s1363_s0] sm:$0x77] }
  0x77   :  { %v141_v35 = vrot.slane %v122_v30, %v1296_v28  ;;  %v145_v36 = vrot.slane %v122_v30, %v144_v29  ;;  %v185_v37 = vrot.slane %v122_v30, %v184_v31  ;;  %v189_v38 = vrot.slane %v122_v30, %v188_v32 }
  0x78   :  { %v219_v47 = vrot.slane %v122_v30, %v218_v39  ;;  %v223_v48 = vrot.slane %v122_v30, %v222_v40 }
  0x79   :  { %921 = vset.pattern.permute.xlu1 %v1075_v6  ;;  %920 = vset.pattern.permute.xlu0 %v1075_v6  ;;  %v151_v41 = vrot.slane %v141_v35, %v1296_v28  ;;  %v155_v42 = vrot.slane %v145_v36, %v1296_v28  ;;  %v195_v45 = vrot.slane %v185_v37, %v184_v31 }
  0x7a   :  { %179 = vperm.xlu1 %921, %v124_v5   ;;  %175 = vperm.xlu0 %920, %v123_v3   ;;  %v199_v46 = vrot.slane %v189_v38, %v184_v31  ;;  %v229_v59 = vrot.slane %v219_v47, %v218_v39  ;;  %v233_v60 = vrot.slane %v223_v48, %v218_v39 }
  0x7e   :  { %922 = vset.pattern.permute.xlu1 %v1076_v7  ;;  %923 = vset.pattern.permute.xlu0 %v1076_v7 }
  0x7f   :  { %209 = vperm.xlu1 %922, %v123_v3   ;;  %213 = vperm.xlu0 %923, %v124_v5  }
  0x83   :  { %924 = vset.pattern.permute.xlu1 %v1074_v1  ;;  %925 = vset.pattern.permute.xlu0 %v1074_v1 }
  0x84   :  { %256 = vperm.xlu1 %924, %v250_v9   ;;  %266 = vperm.xlu0 %925, %v252_v11  }
  0x88   :  { %261 = vperm.xlu1 %924, %v251_v10   ;;  %407 = vperm.xlu0 %925, %v393_v12  }
  0x8c   :  { %271 = vperm.xlu1 %924, %v253_v13   ;;  %417 = vperm.xlu0 %925, %v395_v14  }
  0x90   :  { %402 = vperm.xlu1 %924, %v392_v15   ;;  %427 = vperm.xlu0 %925, %v397_v16  }
  0x94   :  { %412 = vperm.xlu1 %924, %v394_v17   ;;  %437 = vperm.xlu0 %925, %v399_v18  }
  0x98   :  { %422 = vperm.xlu1 %924, %v396_v19   ;;  %609 = vperm.xlu0 %925, %v599_v20  }
  0x9c   :  { %432 = vperm.xlu1 %924, %v398_v21   ;;  %619 = vperm.xlu0 %925, %v601_v22   ;;  %v246_v22 = vld [vmem:[#allocation5] sm:$0xff] }
  0xa0   :  { %604 = vperm.xlu1 %924, %v598_v23   ;;  %v247_v23 = vld [vmem:[#allocation5 + $0x8] sm:$0xff] }
  0xa4   :  { %614 = vperm.xlu1 %924, %v600_v24   ;;  %v248_v24 = vld [vmem:[#allocation5 + $0x10] sm:$0xff] }
  0xa8   :  { %736 = vperm.xlu1 %924, %v733_v25   ;;  %v249_v25 = vld [vmem:[#allocation5 + $0x18] sm:$0xff] }
  0xf0   :  { %v163_v33 = vpop.permute.xlu1 %162  ;;  %v130_v34 = vpop.permute.xlu0 %129 }
  0xf1   :  { %v156_v49 = vmul.f32 %v151_v41, %v130_v34  ;;  %v157_v50 = vmul.f32 %v155_v42, %v130_v34 }
  0xf3   :  { %v170_v61 = vadd.f32 %v163_v33, %v156_v49  ;;  %v171_v62 = vadd.f32 %v163_v33, %v157_v50 }
  0xf4   :  { %v168_v43 = vpop.permute.xlu1 %167  ;;  %v135_v44 = vpop.permute.xlu0 %134 }
  0xf5   :  { %v158_v51 = vmul.f32 %v151_v41, %v135_v44  ;;  %v159_v52 = vmul.f32 %v155_v42, %v135_v44 }
  0xf7   :  { %v172_v63 = vadd.f32 %v168_v43, %v158_v51  ;;  %v173_v0 = vadd.f32 %v168_v43, %v159_v52 }
  0xf9   :  { %v180_v53 = vpop.permute.xlu1 %179  ;;  %v176_v54 = vpop.permute.xlu0 %175 }
  0xfa   :  { %v202_v55 = vmul.f32 %v195_v45, %v180_v53  ;;  %v203_v56 = vmul.f32 %v199_v46, %v180_v53  ;;  %v200_v57 = vmul.f32 %v195_v45, %v176_v54  ;;  %v201_v58 = vmul.f32 %v199_v46, %v176_v54  ;;  %v384_v53 = vld [vmem:[#allocation8] sm:$0xff]  ;;  %v385_v54 = vld [vmem:[#allocation8 + $0x8] sm:$0xff] }
  0xfc   :  { %v206_v1 = vadd.f32 %v202_v55, %v172_v63  ;;  %v207_v2 = vadd.f32 %v203_v56, %v173_v0  ;;  %v204_v3 = vadd.f32 %v200_v57, %v170_v61  ;;  %v205_v4 = vadd.f32 %v201_v58, %v171_v62  ;;  %v386_v55 = vld [vmem:[#allocation8 + $0x10] sm:$0xff]  ;;  %v387_v56 = vld [vmem:[#allocation8 + $0x18] sm:$0xff]  ;;  %v388_v57 = vld [vmem:[#allocation8 + $0x20] sm:$0xff] }
  0xfd   :  { %v389_v58 = vld [vmem:[#allocation8 + $0x28] sm:$0xff] }
  0xfe   :  { %v210_v5 = vpop.permute.xlu1 %209  ;;  %v214_v6 = vpop.permute.xlu0 %213 }
  0xff   :  { %v234_v7 = vmul.f32 %v229_v59, %v210_v5  ;;  %v235_v9 = vmul.f32 %v233_v60, %v210_v5  ;;  %v236_v10 = vmul.f32 %v229_v59, %v214_v6  ;;  %v237_v11 = vmul.f32 %v233_v60, %v214_v6  ;;  %v390_v59 = vld [vmem:[#allocation8 + $0x30] sm:$0xff]  ;;  %v391_v60 = vld [vmem:[#allocation8 + $0x38] sm:$0xff] }
 0x101   :  { %v238_v12 = vadd.f32 %v234_v7, %v204_v3  ;;  %v240_v13 = vadd.f32 %v236_v10, %v206_v1  ;;  %v239_v14 = vadd.f32 %v235_v9, %v205_v4  ;;  %v241_v15 = vadd.f32 %v237_v11, %v207_v2 }
 0x103   :  { %v243_v16 = vmax.f32 %v239_v14, 0.0  ;;  %v245_v17 = vmax.f32 %v241_v15, 0.0  ;;  %v242_v18 = vmax.f32 %v238_v12, 0.0  ;;  %v244_v19 = vmax.f32 %v240_v13, 0.0  ;;  %v257_v29 = vpop.permute.xlu1 %256  ;;  %v267_v40 = vpop.permute.xlu0 %266 }
 0x105   :  { %v869_v20 = vpack.c.bf16 %v245_v17, %v243_v16  ;;  %v871_v21 = vpack.c.bf16 %v244_v19, %v242_v18 }
 0x107   :  { %870 = vmatprep.subr.bf16.mxu0 %v869_v20  ;;  %v262_v34 = vpop.permute.xlu1 %261  ;;  %v408_v1 = vpop.permute.xlu0 %407 }
 0x108   :  { %872 = vmatpush1.bf16.msra.mxu0 %v871_v21 }
 0x10b   :  { %852 = vmatmul.mubr.msk.f32.vlgmr.msra.gmra.mrb[0].mxu0 %vm274_vm0, %v246_v22  ;;  %v272_v46 = vpop.permute.xlu1 %271  ;;  %v418_v18 = vpop.permute.xlu0 %417 }
 0x10c   :  { %357 = vmatprep.mubr.f32.mxu0 %v1077_v8 }
 0x10f   :  { %853 = vmatmul.mubr.msk.f32.gmra.mrb[2].mxu0 %vm274_vm0, %v247_v23  ;;  %v403_v63 = vpop.permute.xlu1 %402 }
 0x110   :  { %363 = vmatprep.mubr.f32.mxu0 %v1077_v8 }
 0x113   :  { %854 = vmatmul.mubr.msk.f32.gmra.mrb[4].mxu0 %vm274_vm0, %v248_v24  ;;  %v413_v15 = vpop.permute.xlu1 %412 }
 0x114   :  { %369 = vmatprep.mubr.f32.mxu0 %v1077_v8 }
 0x117   :  { %855 = vmatmul.mubr.msk.f32.gmra.mrb[6].mxu0 %vm274_vm0, %v249_v25 }
 0x118   :  { %699 = vmatprep.mubr.f32.mxu0 %v1077_v8 }
 0x1de   :  { %v353_v30 = vpop.f32.mrb[0].mxu0 }
 0x1df   :  { %v354_v31 = vadd.f32 %v353_v30, %v257_v29  ;;  %v355_v32 = vpop.f32.mrb[1].mxu0 }
 0x1e0   :  { %v356_v33 = vadd.f32 %v355_v32, %v257_v29 }
 0x1e1   :  { %376 = vst [vmem:[%s1374_s11] sm:$0xff] %v354_v31 }
 0x1e2   :  { %377 = vst [vmem:[%s1374_s11 + $0x8] sm:$0xff] %v356_v33  ;;  %v359_v35 = vpop.f32.mrb[2].mxu0 }
 0x1e3   :  { %v360_v36 = vadd.f32 %v359_v35, %v262_v34  ;;  %v361_v37 = vpop.f32.mrb[3].mxu0 }
 0x1e4   :  { %v362_v38 = vadd.f32 %v361_v37, %v262_v34  ;;  %v423_v34 = vpop.permute.xlu1 %422  ;;  %v428_v37 = vpop.permute.xlu0 %427 }
 0x1e5   :  { %378 = vst [vmem:[%s1374_s11 + $0x10] sm:$0xff] %v360_v36  ;;  %v875_v39 = vpack.c.bf16 %v360_v36, %v354_v31 }
 0x1e6   :  { %379 = vst [vmem:[%s1374_s11 + $0x18] sm:$0xff] %v362_v38  ;;  %v365_v41 = vpop.f32.mrb[4].mxu0  ;;  %v873_v42 = vpack.c.bf16 %v362_v38, %v356_v33 }
 0x1e7   :  { %v366_v43 = vadd.f32 %v365_v41, %v267_v40  ;;  %v367_v44 = vpop.f32.mrb[5].mxu0 }
 0x1e8   :  { %v368_v45 = vadd.f32 %v367_v44, %v267_v40  ;;  %874 = vmatprep.subr.bf16.mxu1 %v873_v42 }
 0x1e9   :  { %380 = vst [vmem:[%s1374_s11 + $0x20] sm:$0xff] %v366_v43  ;;  %876 = vmatpush1.bf16.msra.mxu1 %v875_v39 }
 0x1ea   :  { %381 = vst [vmem:[%s1374_s11 + $0x28] sm:$0xff] %v368_v45  ;;  %v371_v47 = vpop.f32.mrb[6].mxu0 }
 0x1eb   :  { %v372_v48 = vadd.f32 %v371_v47, %v272_v46  ;;  %v373_v49 = vpop.f32.mrb[7].mxu0 }
 0x1ec   :  { %v374_v50 = vadd.f32 %v373_v49, %v272_v46 }
 0x1ed   :  { %382 = vst [vmem:[%s1374_s11 + $0x30] sm:$0xff] %v372_v48  ;;  %v879_v51 = vpack.c.bf16 %v372_v48, %v366_v43 }
 0x1ee   :  { %383 = vst [vmem:[%s1374_s11 + $0x38] sm:$0xff] %v374_v50  ;;  %v877_v52 = vpack.c.bf16 %v374_v50, %v368_v45  ;;  %v433_v50 = vpop.permute.xlu1 %432 }
 0x1f0   :  { %878 = vmatprep.subr.bf16.mxu1 %v877_v52 }
 0x1f1   :  { %880 = vmatpush1.bf16.msra.mxu1 %v879_v51 }
 0x1f4   :  { %856 = vmatmul.mubr.msk.f32.vlgmr.msra.gmra.mrb[0].mxu1 %vm440_vm1, %v384_v53  ;;  %v438_v53 = vpop.permute.xlu0 %437 }
 0x1f5   :  { %535 = vmatprep.mubr.f32.mxu1 %v1077_v8 }
 0x1f8   :  { %857 = vmatmul.mubr.msk.f32.gmra.mrb[2].mxu1 %vm440_vm1, %v385_v54 }
 0x1f9   :  { %541 = vmatprep.mubr.f32.mxu1 %v1077_v8 }
 0x1fc   :  { %858 = vmatmul.mubr.msk.f32.gmra.mrb[4].mxu1 %vm440_vm1, %v386_v55 }
 0x1fd   :  { %547 = vmatprep.mubr.f32.mxu1 %v1077_v8 }
 0x200   :  { %859 = vmatmul.mubr.msk.f32.gmra.mrb[6].mxu1 %vm440_vm1, %v387_v56 }
 0x201   :  { %553 = vmatprep.mubr.f32.mxu1 %v1077_v8 }
 0x204   :  { %860 = vmatmul.mubr.msk.f32.gmra.mrb[8].mxu1 %vm440_vm1, %v388_v57 }
 0x205   :  { %559 = vmatprep.mubr.f32.mxu1 %v1077_v8 }
 0x208   :  { %861 = vmatmul.mubr.msk.f32.gmra.mrb[10].mxu1 %vm440_vm1, %v389_v58 }
 0x209   :  { %565 = vmatprep.mubr.f32.mxu1 %v1077_v8 }
 0x20c   :  { %862 = vmatmul.mubr.msk.f32.gmra.mrb[12].mxu1 %vm440_vm1, %v390_v59 }
 0x20d   :  { %571 = vmatprep.mubr.f32.mxu1 %v1077_v8 }
 0x210   :  { %863 = vmatmul.mubr.msk.f32.gmra.mrb[14].mxu1 %vm440_vm1, %v391_v60 }
 0x2c7   :  { %v531_v61 = vpop.f32.mrb[0].mxu1 }
 0x2c8   :  { %v533_v62 = vpop.f32.mrb[1].mxu1  ;;  %v532_v0 = vadd.f32 %v531_v61, %v403_v63 }
 0x2c9   :  { %v534_v2 = vadd.f32 %v533_v62, %v403_v63 }
 0x2ca   :  { %v578_v7 = vmax.f32 %v532_v0, 0.0 }
 0x2cb   :  { %v537_v3 = vpop.f32.mrb[2].mxu1  ;;  %v579_v10 = vmax.f32 %v534_v2, 0.0  ;;  %v595_v2 = vld [vmem:[#allocation10 + $0x8] sm:$0xff] }
 0x2cc   :  { %v538_v4 = vadd.f32 %v537_v3, %v408_v1  ;;  %v539_v5 = vpop.f32.mrb[3].mxu1  ;;  %v596_v3 = vld [vmem:[#allocation10 + $0x10] sm:$0xff] }
 0x2cd   :  { %v540_v6 = vadd.f32 %v539_v5, %v408_v1  ;;  %v594_v1 = vld [vmem:[#allocation10] sm:$0xff] }
 0x2ce   :  { %v580_v9 = vmax.f32 %v538_v4, 0.0  ;;  %v597_v4 = vld [vmem:[#allocation10 + $0x18] sm:$0xff] }
 0x2cf   :  { %v581_v11 = vmax.f32 %v540_v6, 0.0  ;;  %v543_v12 = vpop.f32.mrb[4].mxu1 }
 0x2d0   :  { %v883_v13 = vpack.c.bf16 %v580_v9, %v578_v7  ;;  %v545_v14 = vpop.f32.mrb[5].mxu1  ;;  %v544_v17 = vadd.f32 %v543_v12, %v413_v15  ;;  %v605_v7 = vpop.permute.xlu1 %604 }
 0x2d1   :  { %v881_v16 = vpack.c.bf16 %v581_v11, %v579_v10  ;;  %v546_v19 = vadd.f32 %v545_v14, %v413_v15  ;;  %v610_v10 = vpop.permute.xlu0 %609 }
 0x2d2   :  { %v582_v24 = vmax.f32 %v544_v17, 0.0 }
 0x2d3   :  { %v549_v20 = vpop.f32.mrb[6].mxu1  ;;  %882 = vmatprep.subr.bf16.mxu0 %v881_v16  ;;  %v583_v29 = vmax.f32 %v546_v19, 0.0 }
 0x2d4   :  { %v550_v21 = vadd.f32 %v549_v20, %v418_v18  ;;  %v551_v22 = vpop.f32.mrb[7].mxu1  ;;  %884 = vmatpush1.bf16.msra.mxu0 %v883_v13 }
 0x2d5   :  { %v552_v23 = vadd.f32 %v551_v22, %v418_v18 }
 0x2d6   :  { %v584_v25 = vmax.f32 %v550_v21, 0.0 }
 0x2d7   :  { %v585_v30 = vmax.f32 %v552_v23, 0.0  ;;  %v555_v31 = vpop.f32.mrb[8].mxu1  ;;  %v615_v23 = vpop.permute.xlu1 %614 }
 0x2d8   :  { %v887_v32 = vpack.c.bf16 %v584_v25, %v582_v24  ;;  %v557_v33 = vpop.f32.mrb[9].mxu1  ;;  %v556_v36 = vadd.f32 %v555_v31, %v423_v34  ;;  %v620_v25 = vpop.permute.xlu0 %619 }
 0x2d9   :  { %v885_v35 = vpack.c.bf16 %v585_v30, %v583_v29  ;;  %v558_v38 = vadd.f32 %v557_v33, %v423_v34 }
 0x2da   :  { %v586_v43 = vmax.f32 %v556_v36, 0.0 }
 0x2db   :  { %v561_v39 = vpop.f32.mrb[10].mxu1  ;;  %886 = vmatprep.subr.bf16.mxu0 %v885_v35  ;;  %v587_v45 = vmax.f32 %v558_v38, 0.0 }
 0x2dc   :  { %v562_v40 = vadd.f32 %v561_v39, %v428_v37  ;;  %v563_v41 = vpop.f32.mrb[11].mxu1  ;;  %888 = vmatpush1.bf16.msra.mxu0 %v887_v32 }
 0x2dd   :  { %v564_v42 = vadd.f32 %v563_v41, %v428_v37  ;;  %v1078_v41 = vmov 1966171168  }
 0x2de   :  { %v588_v44 = vmax.f32 %v562_v40, 0.0  ;;  %v732_v40 = vld [vmem:[#allocation11] sm:$0x1] }
 0x2df   :  { %v589_v46 = vmax.f32 %v564_v42, 0.0  ;;  %v567_v47 = vpop.f32.mrb[12].mxu1  ;;  %v821_v42 = vunpack.c.l.s4 %v1078_v41 }
 0x2e0   :  { %v891_v48 = vpack.c.bf16 %v588_v44, %v586_v43  ;;  %v569_v49 = vpop.f32.mrb[13].mxu1  ;;  %v568_v52 = vadd.f32 %v567_v47, %v433_v50  ;;  %v737_v43 = vpop.permute.xlu1 %736 }
 0x2e1   :  { %v889_v51 = vpack.c.bf16 %v589_v46, %v587_v45  ;;  %v570_v54 = vadd.f32 %v569_v49, %v433_v50  ;;  %v822_v44 = vunpack.c.0.s8 %v821_v42  ;;  %v742_v45 = vrot.slane %v737_v43, %v1296_v28 }
 0x2e2   :  { %v590_v59 = vmax.f32 %v568_v52, 0.0 }
 0x2e3   :  { %v573_v55 = vpop.f32.mrb[14].mxu1  ;;  %890 = vmatprep.subr.bf16.mxu0 %v889_v51  ;;  %v591_v61 = vmax.f32 %v570_v54, 0.0  ;;  %v825_v50 = vsub.s32 %v822_v44, %v1293_v27 }
 0x2e4   :  { %v574_v56 = vadd.f32 %v573_v55, %v438_v53  ;;  %v575_v57 = vpop.f32.mrb[15].mxu1  ;;  %892 = vmatpush1.bf16.msra.mxu0 %v891_v48 }
 0x2e5   :  { %v576_v58 = vadd.f32 %v575_v57, %v438_v53 }
 0x2e6   :  { %v592_v60 = vmax.f32 %v574_v56, 0.0 }
 0x2e7   :  { %v593_v62 = vmax.f32 %v576_v58, 0.0 }
 0x2e8   :  { %v895_v63 = vpack.c.bf16 %v592_v60, %v590_v59 }
 0x2e9   :  { %v893_v0 = vpack.c.bf16 %v593_v62, %v591_v61 }
 0x2eb   :  { %894 = vmatprep.subr.bf16.mxu0 %v893_v0 }
 0x2ec   :  { %896 = vmatpush1.bf16.msra.mxu0 %v895_v63 }
 0x2ef   :  { %864 = vmatmul.mubr.msk.f32.vlgmr.msra.gmra.mrb[8].mxu0 %vm622_vm2, %v594_v1 }
 0x2f0   :  { %705 = vmatprep.mubr.f32.mxu0 %v1077_v8 }
 0x2f3   :  { %865 = vmatmul.mubr.msk.f32.gmra.mrb[10].mxu0 %vm622_vm2, %v595_v2 }
 0x2f4   :  { %711 = vmatprep.mubr.f32.mxu0 %v1077_v8 }
 0x2f7   :  { %866 = vmatmul.mubr.msk.f32.gmra.mrb[12].mxu0 %vm622_vm2, %v596_v3 }
 0x2f8   :  { %717 = vmatprep.mubr.f32.mxu0 %v1077_v8 }
 0x2fb   :  { %867 = vmatmul.mubr.msk.f32.gmra.mrb[14].mxu0 %vm622_vm2, %v597_v4 }
 0x2fc   :  { %810 = vmatprep.mubr.f32.mxu0 %v1077_v8 }
 0x3c2   :  { %v701_v5 = vpop.f32.mrb[8].mxu0 }
 0x3c3   :  { %v703_v6 = vpop.f32.mrb[9].mxu0  ;;  %v702_v9 = vadd.f32 %v701_v5, %v605_v7 }
 0x3c4   :  { %v704_v11 = vadd.f32 %v703_v6, %v605_v7 }
 0x3c5   :  { %v724_v16 = vmax.f32 %v702_v9, 0.0 }
 0x3c6   :  { %v707_v12 = vpop.f32.mrb[10].mxu0  ;;  %v725_v18 = vmax.f32 %v704_v11, 0.0 }
 0x3c7   :  { %v708_v13 = vadd.f32 %v707_v12, %v610_v10  ;;  %v709_v14 = vpop.f32.mrb[11].mxu0 }
 0x3c8   :  { %v710_v15 = vadd.f32 %v709_v14, %v610_v10 }
 0x3c9   :  { %v726_v17 = vmax.f32 %v708_v13, 0.0 }
 0x3ca   :  { %v727_v19 = vmax.f32 %v710_v15, 0.0  ;;  %v713_v20 = vpop.f32.mrb[12].mxu0 }
 0x3cb   :  { %v899_v21 = vpack.c.bf16 %v726_v17, %v724_v16  ;;  %v715_v22 = vpop.f32.mrb[13].mxu0  ;;  %v714_v8 = vadd.f32 %v713_v20, %v615_v23 }
 0x3cc   :  { %v897_v24 = vpack.c.bf16 %v727_v19, %v725_v18  ;;  %v716_v29 = vadd.f32 %v715_v22, %v615_v23 }
 0x3cd   :  { %v728_v34 = vmax.f32 %v714_v8, 0.0 }
 0x3ce   :  { %v719_v30 = vpop.f32.mrb[14].mxu0  ;;  %898 = vmatprep.subr.bf16.mxu0 %v897_v24  ;;  %v729_v36 = vmax.f32 %v716_v29, 0.0 }
 0x3cf   :  { %v720_v31 = vadd.f32 %v719_v30, %v620_v25  ;;  %v721_v32 = vpop.f32.mrb[15].mxu0  ;;  %900 = vmatpush1.bf16.msra.mxu0 %v899_v21 }
 0x3d0   :  { %v722_v33 = vadd.f32 %v721_v32, %v620_v25 }
 0x3d1   :  { %v730_v35 = vmax.f32 %v720_v31, 0.0 }
 0x3d2   :  { %v731_v37 = vmax.f32 %v722_v33, 0.0 }
 0x3d3   :  { %v903_v38 = vpack.c.bf16 %v730_v35, %v728_v34 }
 0x3d4   :  { %v901_v39 = vpack.c.bf16 %v731_v37, %v729_v36 }
 0x3d6   :  { %902 = vmatprep.subr.bf16.mxu0 %v901_v39 }
 0x3d7   :  { %904 = vmatpush1.bf16.msra.mxu0 %v903_v38 }
 0x3da   :  { %868 = vmatmul.mubr.msk.f32.vlgmr.msra.gmra.mrb[16].mxu0 %vm440_vm1, %v732_v40 }
 0x4ad   :  { %v812_v46 = vpop.f32.mrb[16].mxu0 }
 0x4ae   :  { %v813_v47 = vadd.f32 %v812_v46, %v742_v45  ;;  %v814_v48 = vpop.f32.mrb[17].mxu0 }
 0x4af   :  { %v815_v49 = vadd.f32 %v814_v48, %v742_v45 }
 0x4b1   :  { %v819_v51 = vcombine.low %v813_v47, %v815_v49 }
 0x4b3   :  { %v826_v52 = vrot.slane %v819_v51, %v825_v50 }
 0x4b5   :  { %v833_v53 = vrot.slane %v826_v52, %v825_v50 }
 0x4b7   :  { %839 = vst.msk [vmem:[%s1375_s12] sm:$0x3] %vm837_vm3, %v833_v53 }
 0x4b8   :  { %848 = vsyncpa [#allocation4], 1 }
 0x4b9   :  { %849 = vsyncpa [#allocation6], 1 }
 0x4ba   :  { %850 = vsyncpa [#allocation9], 1 }
 0x4bb   :  { %851 = vsyncpa [#allocation12], 1 }

// kernel: squeeze.65
= control target key start
LH: loop header
LB: loop body
LE: loop exit
PB: predicated region body
PF: predicated region fallthrough
CT: control target
= control target key end

     0   :  { %vm25_vm0 = vcmask 785408   ;;  %vm7_vm1 = vcmask 392192   ;;  %s45_s8 = smov 32   ;;  %s46_s9 = smov 112   ;;  %vm29_vm2 = vcmask 261120   ;;  %vm32_vm3 = vcmask 392448   ;;  %s66_s0 = inlined_call_operand.vmem [shape: f32[192], index: 0, kind: input, shape index: {}]   ;;  %s67_s1 = inlined_call_operand.vmem [shape: f32[4,48], index: 1, kind: output, shape index: {}]  }
   0x1   :  { %v4_v0 = vld [vmem:[%s66_s0] sm:$0x3]  ;;  %s44_s0 = smov 80  }
   0x2   :  { %5 = vst [vmem:[#allocation1] sm:$0x3] %v4_v0 }
   0x9   :  { %v22_v1 = vld [vmem:[#allocation1] sm:$0x1]   ;;  %v24_v2 = vld [vmem:[#allocation1 + $0x1] sm:$0x1]  }
   0xa   :  { %v16_v3 = vld [vmem:[#allocation1] sm:$0x1]   ;;  %v26_v4 = vsel %vm25_vm0, %v24_v2, %v22_v1  ;;  %v10_v6 = vld [vmem:[#allocation1 + $0x1] sm:$0x1]  }
   0xb   :  { %17 = vrot.lane.b32.xlu1 %v16_v3, %s44_s0  ;;  %v6_v5 = vld [vmem:[#allocation1] sm:$0x1]   ;;  %27 = vrot.lane.b32.xlu0 %v26_v4, %s45_s8 }
   0xc   :  { %8 = vst.msk [vmem:[#allocation0] sm:$0x1] %vm7_vm1, %v6_v5  }
   0xf   :  { %11 = vrot.lane.b32.xlu0 %v10_v6, %s46_s9 }
  0x7d   :  { %v18_v7 = vpop.permute.xlu1 %17   ;;  %v28_v8 = vpop.permute.xlu0 %27  }
  0x7e   :  { %21 = vst.msk [vmem:[#allocation0 + $0x1] sm:$0x1] %vm7_vm1, %v18_v7  }
  0x7f   :  { %31 = vst.msk [vmem:[#allocation0 + $0x2] sm:$0x1] %vm29_vm2, %v28_v8  }
  0x80   :  { %34 = vst.msk [vmem:[#allocation0 + $0x2] sm:$0x1] %vm32_vm3, %v28_v8  }
  0x81   :  { %v12_v9 = vpop.permute.xlu0 %11  }
  0x82   :  { %15 = vst.msk [vmem:[#allocation0 + $0x3] sm:$0x1] %vm7_vm1, %v12_v9  }
  0x89   :  { %v38_v10 = vld [vmem:[#allocation0] sm:$0xf] }
  0x8a   :  { %40 = vst [vmem:[%s67_s1] sm:$0xf] %v38_v10 }

// kernel: _lambda_.4
= control target key start
LH: loop header
LB: loop body
LE: loop exit
PB: predicated region body
PF: predicated region fallthrough
CT: control target
= control target key end

     0   :  { %s6293_s24 = smov 0   ;;  %s6295_s25 = smov 0   ;;  %s10324_s0 = inlined_call_operand.vmem [shape: f32[2,16,35], index: 0, kind: input, shape index: {}]   ;;  %s10325_s1 = inlined_call_operand.vmem [shape: f32[4,256,3], index: 1, kind: input, shape index: {}]   ;;  %s10326_s2 = inlined_call_operand.vmem [shape: f32[2,560,16], index: 2, kind: input, shape index: {}]   ;;  %s10327_s3 = inlined_call_operand.vmem [shape: f32[256,1280], index: 3, kind: input, shape index: {}]   ;;  %s10328_s4 = inlined_call_operand.vmem [shape: f32[24,256], index: 4, kind: input, shape index: {}]   ;;  %s10329_s5 = inlined_call_operand.vmem [shape: f32[256,15], index: 5, kind: input, shape index: {}]   ;;  %s10330_s6 = inlined_call_operand.vmem [shape: s32[2,16,1], index: 6, kind: output, shape index: {0}]   ;;  %s10331_s7 = inlined_call_operand.vmem [shape: f32[2,16,1], index: 7, kind: output, shape index: {1}]  }
   0x1   :  { %s6297_s26 = smov 0   ;;  %s6299_s27 = smov 0  }
   0x2   :  { %s6301_s28 = smov 0  }
   0x3 LB: > { %s27_s29 = sadd.s32 1, %s6222_s26  ;;  %s30_s30 = sadd.s32 1, %s6226_s27  ;;  %s6230_s28 = sphi %s6301_s28, %s18_s28   ;;  %s6226_s27 = sphi %s6299_s27, %s10681_s27   ;;  %s6222_s26 = sphi %s6297_s26, %s10680_s26   ;;  %s6218_s25 = sphi %s6295_s25, %s10679_s25   ;;  %s6214_s24 = sphi %s6293_s24, %s10678_s24  }
   0x4   : > { %p28_p0 = scmp.ge.s32.totalorder %s27_s29, 2  ;;  %p5248_p1 = scmp.ge.s32.totalorder %s6230_s28, 1 }
   0x5   : > { %p285_p2 = scmp.lt.s32.totalorder %s6230_s28, 5 }
   0x6   : > { %s10683_s29 = smov (%p28_p0, %s27_s29), 0  ;;  %s10685_s30 = smov (!%p28_p0, %s30_s30), %s6226_s27 }
   0x7   : > { %p286_p3 = pnand %p5248_p1, %p285_p2  ;;  %p32_p4 = scmp.ge.s32.totalorder %s10685_s30, 2 }
   0x9   : > { %s10687_s30 = smov (%p32_p4, %s10685_s30), 0  ;;  %289 = sbr.rel (%p286_p3) target bundleno = 2595 (0xa23), region = 44 }
  0x10   : > { %s5251_s8 = sshll.u32 %s6218_s25, 1  ;;  %p337_p5 = scmp.lt.s32.totalorder %s6218_s25, 1  ;;  %v10336_v0 = vmov 0   ;;  %v10334_v1 = vmov 0.0|0.0   ;;  %vm6234_vm0 = vmmov 0   ;;  %v6235_v2 = vmov 0.0  }
  0x11   : > { %5833 = vset.pattern.permute.xlu1 %v10336_v0  ;;  %5392 = vmatprep.subr.bf16.mxu0 %v10334_v1  ;;  %s346_s9 = sadd.s32 %s6214_s24, %s5251_s8  ;;  %p339_p7 = scmp.lt.s32.totalorder %s6214_s24, 1  ;;  %v6357_v9 = vld [vmem:[%s10329_s5] sm:$0xff]  ;;  %v6372_v12 = vld [vmem:[%s10329_s5 + $0x8] sm:$0xff]  ;;  %vm507_vm1 = vcmask 261120   ;;  %v6387_v17 = vld [vmem:[%s10329_s5 + $0x10] sm:$0xff]  ;;  %v10342_v20 = vmov 1  }
  0x12   : > { %p347_p6 = scmp.lt.s32.totalorder %s346_s9, 3  ;;  %5389 = vmatprep.mubr.msk.f32.mxu0 %vm6234_vm0, %v6235_v2  ;;  %5832 = vset.pattern.permute.xlu0 %v10336_v0  ;;  %s10689_s25 = smov (!%p337_p5, %s6218_s25), 1  ;;  %10402 = vst [vmem:[#allocation3_spill] sm:$0xff] %v6372_v12  ;;  %v6393_v18 = vld [vmem:[%s10329_s5 + $0x18] sm:$0xff]  ;;  %v6402_v21 = vld [vmem:[%s10329_s5 + $0x28] sm:$0xff]  ;;  %v6412_v23 = vld [vmem:[%s10329_s5 + $0x30] sm:$0xff] }
  0x13   : > { %5398 = vmatprep.subr.bf16.mxu1 %v10334_v1  ;;  %s5766_s10 = smul.u32 560, %s10689_s25  ;;  %s5249_s12 = sshll.u32 %s10689_s25, 1  ;;  %10404 = vst [vmem:[#allocation5_spill] sm:$0xff] %v6412_v23  ;;  %v6421_v25 = vld [vmem:[%s10329_s5 + $0x40] sm:$0xff]  ;;  %v6432_v27 = vld [vmem:[%s10329_s5 + $0x50] sm:$0xff]  ;;  %v6473_v34 = vld [vmem:[%s10329_s5 + $0x38] sm:$0xff] }
  0x14   : > { %s10691_s9 = smov (!%p347_p6, %s346_s9), 3  ;;  %v6427_v26 = vld [vmem:[%s10329_s5 + $0x20] sm:$0xff]  ;;  %10406 = vst [vmem:[#allocation7_spill] sm:$0xff] %v6432_v27  ;;  %v6447_v29 = vld [vmem:[%s10329_s5 + $0x70] sm:$0xff]  ;;  %v6512_v41 = vld [vmem:[%s10329_s5 + $0x48] sm:$0xff]  ;;  %s6246_s8 = smov 116  }
  0x15   : > { %s5268_s11 = sshll.u32 %s10691_s9, 8  ;;  %s6343_s18 = scalar_lea.vmem %s10326_s2, %s5766_s10  ;;  %10405 = vst [vmem:[#allocation6_spill] sm:$0xff] %v6427_v26  ;;  %v6439_v28 = vld [vmem:[%s10329_s5 + $0x60] sm:$0xff]  ;;  %v6467_v33 = vld [vmem:[%s10329_s5 + $0x90] sm:$0xff]  ;;  %v6541_v46 = vld [vmem:[%s10329_s5 + $0x58] sm:$0xff]  ;;  %vm4041_vm6 = vcmask 130048  }
  0x16   : > { %s6338_s15 = scalar_lea.vmem %s10325_s1, %s5268_s11  ;;  %v370_v4 = vld [vmem:[%s6343_s18] sm:$0xff]  ;;  %v371_v5 = vld [vmem:[%s6343_s18 + $0x8] sm:$0xff]  ;;  %v372_v7 = vld [vmem:[%s6343_s18 + $0x10] sm:$0xff]  ;;  %10407 = vst [vmem:[#allocation8_spill] sm:$0xff] %v6439_v28  ;;  %s6251_s9 = smov 117   ;;  %vm5105_vm9 = vcmask 7168  }
  0x17   : > { %v6346_v3 = vld [vmem:[%s6338_s15 + $0x8] sm:$0xff]  ;;  %s340_s19 = scalar_select %p339_p7, %s6214_s24, 1  ;;  %v5393_v6 = vpack.c.bf16 %v371_v5, %v370_v4  ;;  %v373_v8 = vld [vmem:[%s6343_s18 + $0x18] sm:$0xff]  ;;  %v6380_v15 = vld [vmem:[%s6338_s15 + $0x10] sm:$0xff]  ;;  %10410 = vst [vmem:[#allocation11_spill] sm:$0xff] %v6467_v33 }
  0x18   : > { %10401 = vst [vmem:[#allocation2_spill] sm:$0xff] %v6346_v3  ;;  %844 = vperm.xlu1 %5833, %v6346_v3   ;;  %v5396_v10 = vpack.c.bf16 %v373_v8, %v372_v7  ;;  %10403 = vst [vmem:[#allocation4_spill] sm:$0xff] %v6380_v15  ;;  %v445_v16 = vld [vmem:[%s6338_s15 + $0x18] sm:$0xff]  ;;  %v442_v19 = vld [vmem:[%s6338_s15] sm:$0xff]  ;;  %v6237_v7 = vmov 33   ;;  %s5269_s17 = sshll.u32 %s10689_s25, 4 }
  0x19   : > { %s342_s22 = sadd.s32 %s5249_s12, %s340_s19  ;;  %5394 = vmatpush3.bf16.msra.mxu0 %v5393_v6  ;;  %v6407_v22 = vld [vmem:[%s6338_s15 + $0x20] sm:$0xff]  ;;  %v447_v24 = vld [vmem:[%s6338_s15 + $0x28] sm:$0xff]  ;;  %v6450_v30 = vld [vmem:[%s6338_s15 + $0x30] sm:$0xff]  ;;  %s6252_s12 = smov 114  }
  0x1a   : > { %s5250_s23 = sshll.u32 %s342_s22, 3  ;;  %5395 = vmatprep.subr.bf16.mxu0 %v10334_v1  ;;  %10408 = vst [vmem:[#allocation9_spill] sm:$0xff] %v6450_v30  ;;  %v6457_v31 = vld [vmem:[%s10329_s5 + $0x80] sm:$0xff]  ;;  %v6461_v32 = vld [vmem:[%s6338_s15 + $0x38] sm:$0xff]  ;;  %v6486_v36 = vld [vmem:[%s10329_s5 + $0xb0] sm:$0xff]  ;;  %s363_s21 = scalar_lea.vmem %s10330_s6, %s5269_s17 }
  0x1b   : > { %s6363_s10 = scalar_lea.vmem %s10324_s0, %s5250_s23  ;;  %10409 = vst [vmem:[#allocation10_spill] sm:$0xff] %v6457_v31  ;;  %v6479_v35 = vld [vmem:[%s10329_s5 + $0xa0] sm:$0xff]  ;;  %10412 = vst [vmem:[#allocation13_spill] sm:$0xff] %v6486_v36  ;;  %v6500_v39 = vld [vmem:[%s6338_s15 + $0x48] sm:$0xff] }
  0x1c   : > { %647 = vperm.xlu1 %5833, %v6357_v9   ;;  %v6367_v11 = vld [vmem:[%s6363_s10] sm:$0xff]  ;;  %10411 = vst [vmem:[#allocation12_spill] sm:$0xff] %v6479_v35  ;;  %10414 = vst [vmem:[#allocation15_spill] sm:$0xff] %v6500_v39  ;;  %v6505_v40 = vld [vmem:[%s10329_s5 + $0xd0] sm:$0xff] }
  0x1d   : > { %v581_v13 = vmul.f32 %v6367_v11, %v6367_v11  ;;  %5397 = vmatpush3.bf16.msra.mxu0 %v5396_v10  ;;  %v450_v37 = vld [vmem:[%s6338_s15 + $0x40] sm:$0xff]  ;;  %v6524_v43 = vld [vmem:[%s10329_s5 + $0xf0] sm:$0xff]  ;;  %v453_v45 = vld [vmem:[%s6338_s15 + $0x58] sm:$0xff] }
  0x1e   : > { %5446 = vmatprep.subr.bf16.mxu0 %v10334_v1  ;;  %v6495_v38 = vld [vmem:[%s10329_s5 + $0xc0] sm:$0xff]  ;;  %10416 = vst [vmem:[#allocation17_spill] sm:$0xff] %v6524_v43  ;;  %v6530_v44 = vld [vmem:[%s6338_s15 + $0x50] sm:$0xff]  ;;  %v6557_v48 = vld [vmem:[%s10329_s5 + $0x68] sm:$0xff] }
  0x1f   : > { %v582_v14 = vsel %vm507_vm1, %v581_v13, 0.0  ;;  %10413 = vst [vmem:[#allocation14_spill] sm:$0xff] %v6495_v38  ;;  %v6517_v42 = vld [vmem:[%s10329_s5 + $0xe0] sm:$0xff]  ;;  %10417 = vst [vmem:[#allocation18_spill] sm:$0xff] %v6530_v44  ;;  %v6560_v49 = vld [vmem:[%s6338_s15 + $0x68] sm:$0xff]  ;;  %v10332_v13 = vmov 2  }
  0x20   : > { %652 = vperm.xlu1 %5833, %v6372_v12   ;;  %583 = vadd.xlane.f32.xlu0 %v582_v14  ;;  %10415 = vst [vmem:[#allocation16_spill] sm:$0xff] %v6517_v42  ;;  %v6549_v47 = vld [vmem:[%s6338_s15 + $0x60] sm:$0xff]  ;;  %10419 = vst [vmem:[#allocation20_spill] sm:$0xff] %v6560_v49  ;;  %v6567_v50 = vld [vmem:[%s10329_s5 + $0x78] sm:$0xff] }
  0x21   : > { %5390 = vmatmul.mubr.msk.f32.vlgmr.msra.gmra.mrb[0].mxu0 %vm507_vm1, %v6367_v11  ;;  %10418 = vst [vmem:[#allocation19_spill] sm:$0xff] %v6549_v47  ;;  %v6574_v51 = vld [vmem:[%s10329_s5 + $0x88] sm:$0xff]  ;;  %v6581_v52 = vld [vmem:[%s10329_s5 + $0x98] sm:$0xff]  ;;  %v456_v54 = vld [vmem:[%s6338_s15 + $0x70] sm:$0xff] }
  0x22   : > { %10420 = vst [vmem:[#allocation21_spill] sm:$0xff] %v6574_v51  ;;  %v6588_v53 = vld [vmem:[%s10329_s5 + $0xa8] sm:$0xff]  ;;  %v6598_v56 = vld [vmem:[%s10329_s5 + $0xb8] sm:$0xff]  ;;  %v6634_v4 = vld [vmem:[%s6338_s15 + $0x80] sm:$0xff] }
  0x23   : > { %10421 = vst [vmem:[#allocation22_spill] sm:$0xff] %v6598_v56  ;;  %v6601_v57 = vld [vmem:[%s6338_s15 + $0x78] sm:$0xff]  ;;  %v6610_v59 = vld [vmem:[%s10329_s5 + $0xc8] sm:$0xff]  ;;  %10423 = vst [vmem:[#allocation24_spill] sm:$0xff] %v6634_v4 }
  0x24   : > { %849 = vperm.xlu1 %5833, %v6380_v15   ;;  %10422 = vst [vmem:[#allocation23_spill] sm:$0xff] %v6601_v57  ;;  %v6619_v61 = vld [vmem:[%s10329_s5 + $0xd8] sm:$0xff]  ;;  %v6628_v63 = vld [vmem:[%s10329_s5 + $0xe8] sm:$0xff] }
  0x25   : > { %v459_v6 = vld [vmem:[%s6338_s15 + $0x88] sm:$0xff] }
  0x28   : > { %854 = vperm.xlu1 %5833, %v445_v16  }
  0x2c   : > { %657 = vperm.xlu1 %5833, %v6387_v17  }
  0x30   : > { %662 = vperm.xlu1 %5833, %v6393_v18  }
  0x34   : > { %5834 = vset.pattern.permute.xlu1 %v10342_v20 }
  0x35   : > { %1094 = vperm.xlu1 %5834, %v6357_v9  }
  0x36   : > { %839 = vperm.xlu0 %5832, %v442_v19   ;;  %v6660_v19 = vld [vmem:[%s6338_s15 + $0x90] sm:$0xff] }
  0x37   : > { %10424 = vst [vmem:[#allocation25_spill] sm:$0xff] %v6660_v19 }
  0x39   : > { %1098 = vperm.xlu1 %5834, %v6372_v12  }
  0x3a   : > { %672 = vperm.xlu0 %5832, %v6402_v21  }
  0x3d   : > { %5835 = vset.pattern.permute.xlu1 %v10336_v0 }
  0x3e   : > { %859 = vperm.xlu1 %5835, %v6407_v22   ;;  %677 = vperm.xlu0 %5832, %v6412_v23  }
  0x42   : > { %864 = vperm.xlu1 %5835, %v447_v24   ;;  %687 = vperm.xlu0 %5832, %v6421_v25  }
  0x46   : > { %667 = vperm.xlu1 %5835, %v6427_v26   ;;  %697 = vperm.xlu0 %5832, %v6432_v27  }
  0x4a   : > { %5836 = vset.pattern.permute.xlu1 %v10342_v20  ;;  %707 = vperm.xlu0 %5832, %v6439_v28  }
  0x4b   : > { %1102 = vperm.xlu1 %5836, %v6387_v17  }
  0x4e   : > { %717 = vperm.xlu0 %5832, %v6447_v29  }
  0x4f   : > { %5837 = vset.pattern.permute.xlu1 %v10336_v0 }
  0x50   : > { %869 = vperm.xlu1 %5837, %v6450_v30  }
  0x52   : > { %727 = vperm.xlu0 %5832, %v6457_v31  }
  0x54   : > { %874 = vperm.xlu1 %5837, %v6461_v32  }
  0x56   : > { %737 = vperm.xlu0 %5832, %v6467_v33  }
  0x58   : > { %682 = vperm.xlu1 %5837, %v6473_v34  }
  0x5a   : > { %747 = vperm.xlu0 %5832, %v6479_v35  }
  0x5c   : > { %5838 = vset.pattern.permute.xlu1 %v10342_v20 }
  0x5d   : > { %1110 = vperm.xlu1 %5838, %v6427_v26   ;;  %v5260_v26 = vld [vmem:[%s6343_s18 + $0x28] ss:$0 sm:$0xff] }
  0x5e   : > { %757 = vperm.xlu0 %5832, %v6486_v36  }
  0x61   : > { %5839 = vset.pattern.permute.xlu1 %v10336_v0 }
  0x62   : > { %879 = vperm.xlu1 %5839, %v450_v37   ;;  %767 = vperm.xlu0 %5832, %v6495_v38  }
  0x66   : > { %884 = vperm.xlu1 %5839, %v6500_v39   ;;  %777 = vperm.xlu0 %5832, %v6505_v40  }
  0x6a   : > { %692 = vperm.xlu1 %5839, %v6512_v41   ;;  %787 = vperm.xlu0 %5832, %v6517_v42  }
  0x6e   : > { %5840 = vset.pattern.permute.xlu1 %v10342_v20  ;;  %797 = vperm.xlu0 %5832, %v6524_v43  }
  0x6f   : > { %1118 = vperm.xlu1 %5840, %v6412_v23  }
  0x72   : > { %5862 = vset.pattern.permute.xlu0 %v10342_v20 }
  0x73   : > { %5841 = vset.pattern.permute.xlu1 %v10336_v0  ;;  %1106 = vperm.xlu0 %5862, %v6393_v18  }
  0x74   : > { %889 = vperm.xlu1 %5841, %v6530_v44  }
  0x77   : > { %1114 = vperm.xlu0 %5862, %v6402_v21  }
  0x78   : > { %894 = vperm.xlu1 %5841, %v453_v45   ;;  %v6670_v45 = vld [vmem:[%s6338_s15 + $0x98] sm:$0xff] }
  0x79   : > { %10425 = vst [vmem:[#allocation26_spill] sm:$0xff] %v6670_v45 }
  0x7b   : > { %1122 = vperm.xlu0 %5862, %v6473_v34  }
  0x7c   : > { %702 = vperm.xlu1 %5841, %v6541_v46  }
  0x7f   : > { %1130 = vperm.xlu0 %5862, %v6512_v41  }
  0x80   : > { %5842 = vset.pattern.permute.xlu1 %v10342_v20 }
  0x81   : > { %1126 = vperm.xlu1 %5842, %v6421_v25  }
  0x83   : > { %1138 = vperm.xlu0 %5862, %v6541_v46  }
  0x85   : > { %5843 = vset.pattern.permute.xlu1 %v10336_v0 }
  0x86   : > { %899 = vperm.xlu1 %5843, %v6549_v47   ;;  %v10431_v47 = vmov 1  }
  0x87   : > { %1146 = vperm.xlu0 %5862, %v6557_v48  }
  0x8a   : > { %904 = vperm.xlu1 %5843, %v6560_v49  }
  0x8b   : > { %1154 = vperm.xlu0 %5862, %v6567_v50  }
  0x8e   : > { %712 = vperm.xlu1 %5843, %v6557_v48  }
  0x8f   : > { %1162 = vperm.xlu0 %5862, %v6574_v51  }
  0x92   : > { %5844 = vset.pattern.permute.xlu1 %v10342_v20 }
  0x93   : > { %1134 = vperm.xlu1 %5844, %v6432_v27   ;;  %1170 = vperm.xlu0 %5862, %v6581_v52   ;;  %v6724_v27 = vld [vmem:[%s6338_s15 + $0xb0] sm:$0xff] }
  0x94   : > { %10432 = vst [vmem:[#allocation31_spill] sm:$0xff] %v6724_v27 }
  0x97   : > { %5845 = vset.pattern.permute.xlu1 %v10336_v0  ;;  %v6592_v55 = vpop.permute.xlu1 %844  ;;  %1178 = vperm.xlu0 %5862, %v6588_v53  }
  0x98   : > { %909 = vperm.xlu1 %5845, %v456_v54  }
  0x9b   : > { %v6603_v58 = vpop.permute.xlu1 %647  ;;  %1186 = vperm.xlu0 %5862, %v6598_v56  }
  0x9c   : > { %914 = vperm.xlu1 %5845, %v6601_v57  }
  0x9f   : > { %v6612_v60 = vpop.permute.xlu1 %652  ;;  %1194 = vperm.xlu0 %5862, %v6610_v59  }
  0xa0   : > { %722 = vperm.xlu1 %5845, %v6567_v50  }
  0xa3   : > { %v6621_v62 = vpop.permute.xlu1 %849  ;;  %1202 = vperm.xlu0 %5862, %v6619_v61  }
  0xa4   : > { %5846 = vset.pattern.permute.xlu1 %v10342_v20 }
  0xa5   : > { %1142 = vperm.xlu1 %5846, %v6439_v28  }
  0xa7   : > { %v6631_v2 = vpop.permute.xlu1 %854  ;;  %1210 = vperm.xlu0 %5862, %v6628_v63  }
  0xa9   : > { %5847 = vset.pattern.permute.xlu1 %v10336_v0 }
  0xaa   : > { %919 = vperm.xlu1 %5847, %v6634_v4   ;;  %v10426_v4 = vmov 0  }
  0xab   : > { %v6639_v5 = vpop.permute.xlu1 %657  ;;  %5866 = vset.pattern.permute.xlu0 %v6237_v7 }
  0xac   : > { %614 = vperm.xlu0 %5866, %v6367_v11  }
  0xad   : > { %v6645_v10 = vpop.xlane.xlu0 %583 }
  0xae   : > { %924 = vperm.xlu1 %5847, %v459_v6  }
  0xaf   : > { %v6643_v8 = vpop.permute.xlu1 %662 }
  0xb0   : > { %5867 = vset.pattern.permute.xlu0 %v10332_v13 }
  0xb1   : > { %2342 = vperm.xlu0 %5867, %v6357_v9  }
  0xb2   : > { %732 = vperm.xlu1 %5847, %v6574_v51  }
  0xb4   : > { %v6650_v14 = vpop.permute.xlu1 %1094 }
  0xb5   : > { %v6652_v16 = vpop.permute.xlu0 %839  ;;  %2354 = vperm.xlu0 %5867, %v6393_v18  }
  0xb6   : > { %5848 = vset.pattern.permute.xlu1 %v10342_v20 }
  0xb7   : > { %1150 = vperm.xlu1 %5848, %v6447_v29  }
  0xb8   : > { %v6657_v11 = vpop.permute.xlu1 %1098 }
  0xb9   : > { %v6662_v24 = vpop.permute.xlu0 %672  ;;  %2362 = vperm.xlu0 %5867, %v6402_v21  }
  0xbb   : > { %5849 = vset.pattern.permute.xlu1 %v10336_v0 }
  0xbc   : > { %929 = vperm.xlu1 %5849, %v6660_v19  }
  0xbd   : > { %v6667_v37 = vpop.permute.xlu1 %859  ;;  %v6672_v54 = vpop.permute.xlu0 %677  ;;  %2370 = vperm.xlu0 %5867, %v6473_v34  }
  0xc0   : > { %934 = vperm.xlu1 %5849, %v6670_v45   ;;  %v462_v45 = vld [vmem:[%s6338_s15 + $0xa0] sm:$0xff] }
  0xc1   : > { %v6676_v6 = vpop.permute.xlu1 %864  ;;  %v6678_v7 = vpop.permute.xlu0 %687  ;;  %2378 = vperm.xlu0 %5867, %v6512_v41  }
  0xc4   : > { %742 = vperm.xlu1 %5849, %v6581_v52  }
  0xc5   : > { %v6682_v13 = vpop.permute.xlu1 %667  ;;  %v6684_v1 = vpop.permute.xlu0 %697  ;;  %2386 = vperm.xlu0 %5867, %v6541_v46  }
  0xc8   : > { %5850 = vset.pattern.permute.xlu1 %v10342_v20  ;;  %v6702_v20 = vld [vmem:[%s6338_s15 + $0xa8] sm:$0xff] }
  0xc9   : > { %1158 = vperm.xlu1 %5850, %v6457_v31   ;;  %v6689_v34 = vpop.permute.xlu0 %707  ;;  %2394 = vperm.xlu0 %5867, %v6557_v48   ;;  %10427 = vst [vmem:[#allocation27_spill] sm:$0xff] %v6702_v20 }
  0xca   : > { %v6692_v0 = vpop.permute.xlu1 %1102 }
  0xcd   : > { %5851 = vset.pattern.permute.xlu1 %v10426_v4  ;;  %v6696_v49 = vpop.permute.xlu0 %717  ;;  %2402 = vperm.xlu0 %5867, %v6567_v50  }
  0xce   : > { %939 = vperm.xlu1 %5851, %v462_v45  }
  0xcf   : > { %v6699_v44 = vpop.permute.xlu1 %869 }
  0xd1   : > { %v6704_v31 = vpop.permute.xlu0 %727  ;;  %2410 = vperm.xlu0 %5867, %v6574_v51  }
  0xd2   : > { %10428 = vst [vmem:[#allocation28_spill] sm:$0xff] %v6704_v31  ;;  %944 = vperm.xlu1 %5851, %v6702_v20  }
  0xd3   : > { %v6708_v48 = vpop.permute.xlu1 %874 }
  0xd5   : > { %v6710_v19 = vpop.permute.xlu0 %737  ;;  %2418 = vperm.xlu0 %5867, %v6581_v52  }
  0xd6   : > { %10429 = vst [vmem:[#allocation29_spill] sm:$0xff] %v6710_v19  ;;  %752 = vperm.xlu1 %5851, %v6588_v53  }
  0xd7   : > { %v6714_v45 = vpop.permute.xlu1 %682 }
  0xd9   : > { %v6716_v57 = vpop.permute.xlu0 %747  ;;  %2426 = vperm.xlu0 %5867, %v6588_v53  }
  0xda   : > { %10430 = vst [vmem:[#allocation30_spill] sm:$0xff] %v6716_v57  ;;  %5852 = vset.pattern.permute.xlu1 %v10431_v47  ;;  %v465_v57 = vld [vmem:[%s6338_s15 + $0xb8] sm:$0xff] }
  0xdb   : > { %1166 = vperm.xlu1 %5852, %v6467_v33  }
  0xdc   : > { %v6721_v20 = vpop.permute.xlu1 %1110 }
  0xdd   : > { %v6726_v39 = vpop.permute.xlu0 %757  ;;  %2434 = vperm.xlu0 %5867, %v6598_v56  }
  0xde   : > { %10433 = vst [vmem:[#allocation32_spill] sm:$0xff] %v6726_v39 }
  0xdf   : > { %5853 = vset.pattern.permute.xlu1 %v10426_v4 }
  0xe0   : > { %949 = vperm.xlu1 %5853, %v6724_v27  }
  0xe1   : > { %v6731_v52 = vpop.permute.xlu1 %879  ;;  %v6734_v19 = vpop.permute.xlu0 %767  ;;  %2442 = vperm.xlu0 %5867, %v6610_v59  }
  0xe2   : > { %10434 = vst [vmem:[#allocation33_spill] sm:$0xff] %v6734_v19  ;;  %v6749_v19 = vld [vmem:[%s10329_s5 + $0xf8] sm:$0xff] }
  0xe4   : > { %954 = vperm.xlu1 %5853, %v465_v57  }
  0xe5   : > { %v6737_v30 = vpop.permute.xlu1 %884  ;;  %v6739_v15 = vpop.permute.xlu0 %777  ;;  %2450 = vperm.xlu0 %5867, %v6619_v61  }
  0xe6   : > { %10435 = vst [vmem:[#allocation34_spill] sm:$0xff] %v6739_v15  ;;  %v6759_v15 = vld [vmem:[%s6338_s15 + $0xc0] sm:$0xff] }
  0xe7   : > { %10437 = vst [vmem:[#allocation36_spill] sm:$0xff] %v6759_v15 }
  0xe8   : > { %762 = vperm.xlu1 %5853, %v6598_v56   ;;  %v6771_v56 = vld [vmem:[%s6338_s15 + $0xc8] sm:$0xff] }
  0xe9   : > { %v6743_v39 = vpop.permute.xlu1 %692  ;;  %2458 = vperm.xlu0 %5867, %v6628_v63   ;;  %v6751_v27 = vpop.permute.xlu0 %787  ;;  %10439 = vst [vmem:[#allocation38_spill] sm:$0xff] %v6771_v56 }
  0xea   : > { %10436 = vst [vmem:[#allocation35_spill] sm:$0xff] %v6751_v27  ;;  %v589_v27 = vadd.f32 %v5260_v26, %v6645_v10 }
  0xec   : > { %5854 = vset.pattern.permute.xlu1 %v10431_v47 }
  0xed   : > { %1174 = vperm.xlu1 %5854, %v6479_v35   ;;  %2466 = vperm.xlu0 %5867, %v6749_v19   ;;  %v6763_v12 = vpop.permute.xlu0 %797 }
  0xee   : > { %v6756_v57 = vpop.permute.xlu1 %1118  ;;  %10438 = vst [vmem:[#allocation37_spill] sm:$0xff] %v6763_v12 }
  0xf1   : > { %5855 = vset.pattern.permute.xlu1 %v10426_v4  ;;  %1674 = vperm.xlu0 %5867, %v6346_v3  }
  0xf2   : > { %959 = vperm.xlu1 %5855, %v6759_v15   ;;  %v6777_v3 = vpop.permute.xlu0 %1106 }
  0xf3   : > { %v6768_v31 = vpop.permute.xlu1 %889 }
  0xf4   : > { %v577_v43 = vpop.f32.mrb[0].mxu0 }
  0xf5   : > { %v590_v35 = vmul.f32 2.0, %v577_v43  ;;  %1686 = vperm.xlu0 %5867, %v6407_v22   ;;  %v5391_v42 = vpop.f32.mrb[1].mxu0  ;;  %v10366_v22 = vmov 5  }
  0xf6   : > { %964 = vperm.xlu1 %5855, %v6771_v56   ;;  %v6783_v43 = vpop.permute.xlu0 %1114 }
  0xf7   : > { %v591_v51 = vsub.f32 %v589_v27, %v590_v35  ;;  %v6775_v12 = vpop.permute.xlu1 %894 }
  0xf9   : > { %v592_v15 = vmax.f32 %v591_v51, 0.0  ;;  %1698 = vperm.xlu0 %5867, %v6461_v32   ;;  %v468_v32 = vld [vmem:[%s6338_s15 + $0xd0] sm:$0xff] }
  0xfa   : > { %772 = vperm.xlu1 %5855, %v6610_v59   ;;  %v6794_v35 = vpop.permute.xlu0 %1122  ;;  %v6799_v59 = vld [vmem:[%s6338_s15 + $0xd8] sm:$0xff] }
  0xfb   : > { %6024 = vrsqrt.f32 %v592_v15  ;;  %v6781_v26 = vpop.permute.xlu1 %702  ;;  %vm595_vm2 = vcmp.eq.f32.partialorder %v592_v15, inf  ;;  %10440 = vst [vmem:[#allocation39_spill] sm:$0xff] %v6799_v59  ;;  %vm597_vm3 = vcmp.eq.f32.partialorder %v592_v15, 0.0 }
  0xfd   : > { %5886 = vset.pattern.permute.xlu0 %v10366_v22 }
  0xfe   : > { %5856 = vset.pattern.permute.xlu1 %v10431_v47  ;;  %1830 = vperm.xlu0 %5886, %v6357_v9   ;;  %v598_v9 = vand.u32 2147483648, %v592_v15  ;;  %v6805_v56 = vpop.permute.xlu0 %1130 }
  0xff   : > { %1182 = vperm.xlu1 %5856, %v6486_v36   ;;  %v378_v36 = vld [vmem:[%s6343_s18 + $0x30] sm:$0xff] }
 0x100   : > { %v6789_v27 = vpop.permute.xlu1 %1126 }
 0x102   : > { %1842 = vperm.xlu0 %5886, %v6393_v18  }
 0x103   : > { %5857 = vset.pattern.permute.xlu1 %v10426_v4 }
 0x104   : > { %969 = vperm.xlu1 %5857, %v468_v32  }
 0x105   : > { %v6025_v42 = vpop.eup %6024  ;;  %v6796_v51 = vpop.permute.xlu1 %899 }
 0x106   : > { %v594_v10 = vmul.f32 %v6025_v42, %v592_v15  ;;  %1854 = vperm.xlu0 %5886, %v6412_v23  }
 0x108   : > { %v596_v22 = vsel %vm595_vm2, %v592_v15, %v594_v10  ;;  %974 = vperm.xlu1 %5857, %v6799_v59   ;;  %v6815_v15 = vpop.permute.xlu0 %1138 }
 0x109   : > { %v6803_v18 = vpop.permute.xlu1 %904  ;;  %v6808_v32 = vsel %vm597_vm3, %v598_v9, %v596_v22  ;;  %10442 = vst [vmem:[#allocation41_spill] sm:$0xff] %v6815_v15  ;;  %v379_v9 = vld [vmem:[%s6343_s18 + $0x38] sm:$0xff]  ;;  %v381_v15 = vld [vmem:[%s6343_s18 + $0x48] sm:$0xff] }
 0x10a   : > { %1866 = vperm.xlu0 %5886, %v6512_v41   ;;  %v600_v10 = vadd.f32 1e-08, %v6808_v32  ;;  %v998_v59 = vsub.f32 %v379_v9, %v6592_v55  ;;  %v382_v55 = vld [vmem:[%s6343_s18 + $0x50] sm:$0xff]  ;;  %v806_v9 = vmul.f32 %v6612_v60, %v6808_v32 }
 0x10b   : > { %v1001_v60 = vsub.f32 %v382_v55, %v6667_v37  ;;  %v810_v37 = vmul.f32 %v6662_v24, %v6808_v32  ;;  %v809_v24 = vmul.f32 %v6682_v13, %v6808_v32 }
 0x10c   : > { %782 = vperm.xlu1 %5857, %v6619_v61   ;;  %6026 = vrcp.f32 %v600_v10  ;;  %v6823_v61 = vld [vmem:[%s6338_s15 + $0xe0] sm:$0xff]  ;;  %v6826_v22 = vpop.permute.xlu0 %1146 }
 0x10d   : > { %v6811_v42 = vpop.permute.xlu1 %712  ;;  %10444 = vst [vmem:[#allocation43_spill] sm:$0xff] %v6823_v61  ;;  %10445 = vst [vmem:[#allocation44_spill] sm:$0xff] %v6826_v22 }
 0x10e   : > { %10441 = vst [vmem:[#allocation40_spill] sm:$0xff] %v6811_v42  ;;  %1878 = vperm.xlu0 %5886, %v6439_v28   ;;  %v1000_v42 = vsub.f32 %v381_v15, %v6631_v2  ;;  %v807_v15 = vmul.f32 %v6639_v5, %v6808_v32 }
 0x110   : > { %5858 = vset.pattern.permute.xlu1 %v10431_v47  ;;  %v6837_v28 = vpop.permute.xlu0 %1154 }
 0x111   : > { %1190 = vperm.xlu1 %5858, %v6495_v38   ;;  %v471_v38 = vld [vmem:[%s6338_s15 + $0xe8] sm:$0xff]  ;;  %10446 = vst [vmem:[#allocation45_spill] sm:$0xff] %v6837_v28 }
 0x112   : > { %v6819_v41 = vpop.permute.xlu1 %1134  ;;  %1890 = vperm.xlu0 %5886, %v6567_v50   ;;  %v380_v50 = vld [vmem:[%s6343_s18 + $0x40] sm:$0xff] }
 0x113   : > { %10443 = vst [vmem:[#allocation42_spill] sm:$0xff] %v6819_v41  ;;  %v999_v41 = vsub.f32 %v380_v50, %v6621_v62  ;;  %v384_v50 = vld [vmem:[%s6343_s18 + $0x60] sm:$0xff] }
 0x114   : > { %v6852_v28 = vpop.permute.xlu0 %1162 }
 0x115   : > { %5859 = vset.pattern.permute.xlu1 %v10426_v4  ;;  %10447 = vst [vmem:[#allocation46_spill] sm:$0xff] %v6852_v28  ;;  %v385_v28 = vld [vmem:[%s6343_s18 + $0x68] sm:$0xff] }
 0x116   : > { %979 = vperm.xlu1 %5859, %v6823_v61   ;;  %1902 = vperm.xlu0 %5886, %v6467_v33   ;;  %v6839_v23 = vpop.eup %6026  ;;  %v997_v61 = vsub.f32 %v378_v36, %v6652_v16 }
 0x117   : > { %v6831_v10 = vpop.permute.xlu1 %909  ;;  %v1030_v33 = vmul.f32 %v6839_v23, %v998_v59  ;;  %v1032_v62 = vmul.f32 %v6839_v23, %v1000_v42  ;;  %v10376_v59 = vmov 4   ;;  %v805_v42 = vmul.f32 %v6603_v58, %v6808_v32 }
 0x118   : > { %v1029_v36 = vmul.f32 %v6839_v23, %v997_v61  ;;  %v6873_v61 = vpop.permute.xlu0 %1170  ;;  %v1033_v5 = vmul.f32 %v6839_v23, %v1001_v60 }
 0x119   : > { %v1062_v16 = vadd.f32 %v1030_v33, %v806_v9  ;;  %v808_v33 = vmul.f32 %v6643_v8, %v6808_v32  ;;  %10448 = vst [vmem:[#allocation47_spill] sm:$0xff] %v6873_v61  ;;  %v386_v9 = vld [vmem:[%s6343_s18 + $0x70] sm:$0xff]  ;;  %v1004_v61 = vsub.f32 %v385_v28, %v6708_v48 }
 0x11a   : > { %984 = vperm.xlu1 %5859, %v471_v38   ;;  %1914 = vperm.xlu0 %5886, %v6588_v53   ;;  %v383_v38 = vld [vmem:[%s6343_s18 + $0x58] sm:$0xff]  ;;  %v1031_v53 = vmul.f32 %v6839_v23, %v999_v41  ;;  %v1061_v58 = vadd.f32 %v1029_v36, %v805_v42  ;;  %v389_v36 = vld [vmem:[%s6343_s18 + $0x88] sm:$0xff]  ;;  %v1065_v48 = vadd.f32 %v1033_v5, %v809_v24 }
 0x11b   : > { %v6845_v22 = vpop.permute.xlu1 %914  ;;  %v1002_v41 = vsub.f32 %v383_v38, %v6676_v6  ;;  %v1222_v38 = vadd.f32 %v6657_v11, %v1062_v16  ;;  %v1064_v8 = vadd.f32 %v1032_v62, %v808_v33  ;;  %v811_v11 = vmul.f32 %v6672_v54, %v6808_v32  ;;  %v6896_v62 = vld [vmem:[%s6338_s15 + $0xf0] sm:$0xff] }
 0x11c   : > { %v1063_v55 = vadd.f32 %v1031_v53, %v807_v15  ;;  %v1005_v53 = vsub.f32 %v386_v9, %v6731_v52  ;;  %v387_v15 = vld [vmem:[%s6343_s18 + $0x78] sm:$0xff]  ;;  %v1036_v13 = vmul.f32 %v6839_v23, %v1004_v61  ;;  %v1221_v54 = vadd.f32 %v6650_v14, %v1061_v58 }
 0x11d   : > { %v1034_v6 = vmul.f32 %v6839_v23, %v1002_v41  ;;  %v1224_v52 = vadd.f32 %v6777_v3, %v1064_v8  ;;  %v1008_v42 = vsub.f32 %v389_v36, %v6775_v12  ;;  %v813_v3 = vmul.f32 %v6678_v7, %v6808_v32 }
 0x11e   : > { %792 = vperm.xlu1 %5859, %v6628_v63   ;;  %5917 = vset.pattern.permute.xlu0 %v10376_v59  ;;  %v1003_v59 = vsub.f32 %v384_v50, %v6699_v44  ;;  %v6898_v44 = vpop.permute.xlu0 %1178  ;;  %v1223_v16 = vadd.f32 %v6692_v0, %v1063_v55  ;;  %v1006_v50 = vsub.f32 %v387_v15, %v6737_v30  ;;  %v1253_v14 = vmax.f32 %v1221_v54, 0.0 }
 0x11f   : > { %v6859_v2 = vpop.permute.xlu1 %722  ;;  %1294 = vperm.xlu0 %5917, %v6387_v17   ;;  %v1066_v41 = vadd.f32 %v1034_v6, %v810_v37  ;;  %v812_v0 = vmul.f32 %v6714_v45, %v6808_v32  ;;  %v1037_v33 = vmul.f32 %v6839_v23, %v1005_v53  ;;  %v1225_v9 = vadd.f32 %v6721_v20, %v1065_v48 }
 0x120   : > { %v1035_v28 = vmul.f32 %v6839_v23, %v1003_v59  ;;  %v388_v59 = vld [vmem:[%s6343_s18 + $0x80] sm:$0xff]  ;;  %v1038_v30 = vmul.f32 %v6839_v23, %v1006_v50  ;;  %v1255_v37 = vmax.f32 %v1223_v16, 0.0  ;;  %v1256_v5 = vmax.f32 %v1224_v52, 0.0 }
 0x121   : > { %v1226_v55 = vadd.f32 %v6783_v43, %v1066_v41  ;;  %v1068_v45 = vadd.f32 %v1036_v13, %v812_v0  ;;  %v1007_v58 = vsub.f32 %v388_v59, %v6768_v31  ;;  %v815_v20 = vmul.f32 %v6684_v1, %v6808_v32  ;;  %v392_v13 = vld [vmem:[%s6343_s18 + $0xa0] sm:$0xff]  ;;  %v393_v59 = vld [vmem:[%s6343_s18 + $0xa8] sm:$0xff] }
 0x122   : > { %5860 = vset.pattern.permute.xlu1 %v10431_v47  ;;  %v1067_v12 = vadd.f32 %v1035_v28, %v811_v11  ;;  %v6922_v7 = vpop.permute.xlu0 %1186  ;;  %v1040_v43 = vmul.f32 %v6839_v23, %v1008_v42  ;;  %v1257_v31 = vmax.f32 %v1225_v9, 0.0  ;;  %v1069_v15 = vadd.f32 %v1037_v33, %v813_v3  ;;  %v390_v11 = vld [vmem:[%s6343_s18 + $0x90] sm:$0xff]  ;;  %v10453_v9 = vld [vmem:[#allocation42_spill] sm:$0xff] }
 0x123   : > { %1198 = vperm.xlu1 %5860, %v6505_v40   ;;  %1306 = vperm.xlu0 %5917, %v6402_v21   ;;  %v1254_v21 = vmax.f32 %v1222_v38, 0.0  ;;  %v814_v38 = vmul.f32 %v6743_v39, %v6808_v32  ;;  %v1039_v24 = vmul.f32 %v6839_v23, %v1007_v58  ;;  %v10449_v36 = vmov 0.0|0.0  }
 0x124   : > { %v6887_v60 = vpop.permute.xlu1 %1142  ;;  %v1227_v53 = vadd.f32 %v6756_v57, %v1067_v12  ;;  %v1258_v28 = vmax.f32 %v1226_v55, 0.0  ;;  %v1228_v39 = vadd.f32 %v6794_v35, %v1068_v45  ;;  %v5402_v48 = vpack.c.bf16 %v1256_v5, %v1255_v37  ;;  %v10452_v12 = vld [vmem:[#allocation40_spill] sm:$0xff] }
 0x125   : > { %v5399_v6 = vpack.c.bf16 %v1254_v21, %v1253_v14  ;;  %v1070_v1 = vadd.f32 %v1038_v30, %v814_v38  ;;  %v816_v16 = vmul.f32 %v6781_v26, %v6808_v32  ;;  %v1009_v57 = vsub.f32 %v390_v11, %v6796_v51  ;;  %v10451_v30 = vld [vmem:[#allocation16_spill] sm:$0xff] }
 0x126   : > { %v6946_v41 = vpop.permute.xlu0 %1194  ;;  %v1229_v35 = vadd.f32 %v6789_v27, %v1069_v15  ;;  %v1071_v54 = vadd.f32 %v1039_v24, %v815_v20  ;;  %v1011_v42 = vsub.f32 %v392_v13, %v6831_v10  ;;  %v1259_v26 = vmax.f32 %v1227_v53, 0.0  ;;  %v10450_v27 = vld [vmem:[#allocation21_spill] sm:$0xff]  ;;  %v10455_v20 = vld [vmem:[#allocation12_spill] sm:$0xff] }
 0x127   : > { %5861 = vset.pattern.permute.xlu1 %v10426_v4  ;;  %1318 = vperm.xlu0 %5917, %v6421_v25   ;;  %v473_v4 = vld [vmem:[%s6338_s15 + $0xf8] sm:$0xff]  ;;  %v1072_v50 = vadd.f32 %v1040_v43, %v816_v16  ;;  %v1260_v0 = vmax.f32 %v1228_v39, 0.0  ;;  %v1230_v3 = vadd.f32 %v6805_v56, %v1070_v1  ;;  %v5405_v51 = vpack.c.bf16 %v1258_v28, %v1257_v31  ;;  %v10456_v31 = vld [vmem:[#allocation17_spill] sm:$0xff]  ;;  %v394_v39 = vld [vmem:[%s6343_s18 + $0xb0] sm:$0xff] }
 0x128   : > { %989 = vperm.xlu1 %5861, %v6896_v62   ;;  %5400 = vmatpush1.bf16.msra.mxu1 %v5399_v6  ;;  %v819_v33 = vmul.f32 %v6696_v49, %v6808_v32  ;;  %v1041_v10 = vmul.f32 %v6839_v23, %v1009_v57  ;;  %v1261_v56 = vmax.f32 %v1229_v35, 0.0  ;;  %v1231_v37 = vadd.f32 %v10453_v9, %v1071_v54  ;;  %v10454_v49 = vld [vmem:[#allocation41_spill] sm:$0xff]  ;;  %v10457_v16 = vld [vmem:[#allocation22_spill] sm:$0xff]  ;;  %v10458_v57 = vld [vmem:[#allocation44_spill] sm:$0xff] }
 0x129   : > { %v6916_v61 = vpop.permute.xlu1 %919  ;;  %5401 = vmatprep.subr.bf16.mxu1 %v10449_v36  ;;  %v1232_v5 = vadd.f32 %v10454_v49, %v1072_v50  ;;  %v1262_v45 = vmax.f32 %v1230_v3, 0.0  ;;  %v1043_v6 = vmul.f32 %v6839_v23, %v1011_v42  ;;  %v5408_v58 = vpack.c.bf16 %v1260_v0, %v1259_v26  ;;  %v2022_v9 = vld [vmem:[%s10327_s3 + $0x8] sm:$0xff] }
 0x12a   : > { %v6971_v38 = vpop.permute.xlu0 %1202  ;;  %v1263_v15 = vmax.f32 %v1231_v37, 0.0  ;;  %v1013_v42 = vsub.f32 %v394_v39, %v6916_v61  ;;  %v10461_v61 = vld [vmem:[#allocation28_spill] sm:$0xff]  ;;  %2533 = vmatprep.mubr.f32.mxu1 %v2022_v9  ;;  %v10463_v49 = vld [vmem:[#allocation46_spill] sm:$0xff]  ;;  %v398_v9 = vld [vmem:[%s6343_s18 + $0xd0] sm:$0xff] }
 0x12b   : > { %1330 = vperm.xlu0 %5917, %v6541_v46   ;;  %v391_v46 = vld [vmem:[%s6343_s18 + $0x98] sm:$0xff]  ;;  %v1264_v11 = vmax.f32 %v1232_v5, 0.0  ;;  %v5411_v1 = vpack.c.bf16 %v1262_v45, %v1261_v56  ;;  %v1075_v13 = vadd.f32 %v1043_v6, %v819_v33  ;;  %v10460_v33 = vmov 2  }
 0x12c   : > { %994 = vperm.xlu1 %5861, %v473_v4   ;;  %v1010_v21 = vsub.f32 %v391_v46, %v6803_v18  ;;  %5403 = vmatpush1.bf16.msra.mxu1 %v5402_v48  ;;  %v817_v18 = vmul.f32 %v6689_v34, %v6808_v32  ;;  %v1012_v4 = vsub.f32 %v393_v59, %v6845_v22  ;;  %v395_v46 = vld [vmem:[%s6343_s18 + $0xb8] sm:$0xff] }
 0x12d   : > { %v6931_v8 = vpop.permute.xlu1 %924  ;;  %5404 = vmatprep.subr.bf16.mxu1 %v10449_v36  ;;  %v818_v34 = vmul.f32 %v10452_v12, %v6808_v32  ;;  %v820_v22 = vmul.f32 %v6859_v2, %v6808_v32  ;;  %v5414_v3 = vpack.c.bf16 %v1264_v11, %v1263_v15  ;;  %v10466_v11 = vld [vmem:[#allocation4_spill] sm:$0xff] }
 0x12e   : > { %v1042_v14 = vmul.f32 %v6839_v23, %v1010_v21  ;;  %v1044_v24 = vmul.f32 %v6839_v23, %v1012_v4  ;;  %v1073_v53 = vadd.f32 %v1041_v10, %v817_v18  ;;  %v1014_v35 = vsub.f32 %v395_v46, %v6931_v8  ;;  %v6986_v50 = vpop.permute.xlu0 %1210  ;;  %v10462_v10 = vld [vmem:[#allocation3_spill] sm:$0xff]  ;;  %v396_v46 = vld [vmem:[%s6343_s18 + $0xc0] sm:$0xff] }
 0x12f   : > { %1342 = vperm.xlu0 %5917, %v6447_v29  }
 0x130   : > { %802 = vperm.xlu1 %5861, %v6749_v19   ;;  %5406 = vmatpush1.bf16.msra.mxu1 %v5405_v51  ;;  %v1074_v43 = vadd.f32 %v1042_v14, %v818_v34  ;;  %v1076_v28 = vadd.f32 %v1044_v24, %v820_v22  ;;  %v1233_v2 = vadd.f32 %v6887_v60, %v1073_v53  ;;  %v10459_v60 = vld [vmem:[#allocation45_spill] sm:$0xff] }
 0x131   : > { %v733_v52 = vpop.permute.xlu1 %732  ;;  %5407 = vmatprep.subr.bf16.mxu1 %v10449_v36  ;;  %v1046_v18 = vmul.f32 %v6839_v23, %v1014_v35  ;;  %v10469_v35 = vld [vmem:[#allocation29_spill] sm:$0xff] }
 0x132   : > { %v1234_v21 = vadd.f32 %v10458_v57, %v1074_v43  ;;  %v1236_v59 = vadd.f32 %v10459_v60, %v1076_v28  ;;  %v1265_v26 = vmax.f32 %v1233_v2, 0.0  ;;  %v822_v0 = vmul.f32 %v733_v52, %v6808_v32  ;;  %v7000_v34 = vpop.permute.xlu0 %614  ;;  %v10467_v28 = vld [vmem:[#allocation5_spill] sm:$0xff] }
 0x133   : > { %1354 = vperm.xlu0 %5917, %v10450_v27   ;;  %v821_v27 = vmul.f32 %v10461_v61, %v6808_v32  ;;  %v1045_v52 = vmul.f32 %v6839_v23, %v1013_v42  ;;  %v10468_v57 = vld [vmem:[#allocation9_spill] sm:$0xff] }
 0x134   : > { %5863 = vset.pattern.permute.xlu1 %v10431_v47  ;;  %5409 = vmatpush1.bf16.msra.mxu1 %v5408_v58  ;;  %v1266_v8 = vmax.f32 %v1234_v21, 0.0  ;;  %v1268_v14 = vmax.f32 %v1236_v59, 0.0  ;;  %v1078_v4 = vadd.f32 %v1046_v18, %v822_v0  ;;  %v10465_v58 = vld [vmem:[#allocation6_spill] sm:$0xff]  ;;  %v10471_v0 = vld [vmem:[#allocation7_spill] sm:$0xff]  ;;  %v10474_v18 = vld [vmem:[#allocation8_spill] sm:$0xff] }
 0x135   : > { %1206 = vperm.xlu1 %5863, %v10451_v30   ;;  %5410 = vmatprep.subr.bf16.mxu1 %v10449_v36 }
 0x136   : > { %v1151_v55 = vpop.permute.xlu1 %1150  ;;  %v5417_v56 = vpack.c.bf16 %v1266_v8, %v1265_v26  ;;  %v1238_v5 = vadd.f32 %v10463_v49, %v1078_v4  ;;  %v7010_v22 = vpop.permute.xlu0 %2342  ;;  %v10473_v8 = vld [vmem:[#allocation19_spill] sm:$0xff]  ;;  %v399_v4 = vld [vmem:[%s6343_s18 + $0xd8] sm:$0xff] }
 0x137   : > { %1366 = vperm.xlu0 %5917, %v10455_v20   ;;  %v1235_v54 = vadd.f32 %v1151_v55, %v1075_v13  ;;  %v1077_v55 = vadd.f32 %v1045_v52, %v821_v27  ;;  %v10475_v52 = vld [vmem:[#allocation23_spill] sm:$0xff] }
 0x138   : > { %5412 = vmatpush1.bf16.msra.mxu1 %v5411_v1  ;;  %v1270_v43 = vmax.f32 %v1238_v5, 0.0  ;;  %v10476_v5 = vld [vmem:[#allocation25_spill] sm:$0xff] }
 0x139   : > { %1214 = vperm.xlu1 %5863, %v10456_v31   ;;  %5413 = vmatprep.subr.bf16.mxu1 %v10449_v36 }
 0x13a   : > { %v7019_v39 = vpop.permute.xlu0 %2354 }
 0x13b   : > { %v6980_v48 = vpop.permute.xlu1 %929  ;;  %1378 = vperm.xlu0 %5917, %v10457_v16  }
 0x13c   : > { %5415 = vmatpush1.bf16.msra.mxu1 %v5414_v3  ;;  %v1015_v1 = vsub.f32 %v396_v46, %v6980_v48  ;;  %v10470_v48 = vld [vmem:[#allocation15_spill] sm:$0xff]  ;;  %v10480_v46 = vld [vmem:[#allocation30_spill] sm:$0xff] }
 0x13d   : > { %1218 = vperm.xlu1 %5863, %v6749_v19   ;;  %v1267_v19 = vmax.f32 %v1235_v54, 0.0  ;;  %5416 = vmatprep.subr.bf16.mxu1 %v10449_v36  ;;  %v823_v54 = vmul.f32 %v10469_v35, %v6808_v32  ;;  %v10472_v3 = vld [vmem:[#allocation47_spill] sm:$0xff]  ;;  %v10483_v35 = vld [vmem:[#allocation13_spill] sm:$0xff] }
 0x13e   : > { %v1047_v42 = vmul.f32 %v6839_v23, %v1015_v1  ;;  %v7030_v26 = vpop.permute.xlu0 %2362 }
 0x13f   : > { %v935_v51 = vpop.permute.xlu1 %934  ;;  %1390 = vperm.xlu0 %5917, %v6505_v40   ;;  %v5420_v37 = vpack.c.bf16 %v1268_v14, %v1267_v19 }
 0x140   : > { %5418 = vmatpush1.bf16.msra.mxu1 %v5417_v56 }
 0x141   : > { %5864 = vset.pattern.permute.xlu1 %v10460_v33  ;;  %5419 = vmatprep.subr.bf16.mxu1 %v10449_v36 }
 0x142   : > { %2346 = vperm.xlu1 %5864, %v10462_v10   ;;  %v7037_v27 = vpop.permute.xlu0 %2370 }
 0x143   : > { %v743_v12 = vpop.permute.xlu1 %742  ;;  %1402 = vperm.xlu0 %5917, %v6628_v63   ;;  %v10464_v63 = vld [vmem:[#allocation2_spill] sm:$0xff] }
 0x144   : > { %5421 = vmatpush1.bf16.msra.mxu1 %v5420_v37  ;;  %v824_v13 = vmul.f32 %v743_v12, %v6808_v32 }
 0x145   : > { %5422 = vmatprep.subr.bf16.mxu1 %v10449_v36 }
 0x146   : > { %2350 = vperm.xlu1 %5864, %v6387_v17   ;;  %v397_v17 = vld [vmem:[%s6343_s18 + $0xc8] sm:$0xff]  ;;  %v7043_v49 = vpop.permute.xlu0 %2378 }
 0x147   : > { %5927 = vset.pattern.permute.xlu0 %v10431_v47  ;;  %v1016_v2 = vsub.f32 %v397_v17, %v935_v51 }
 0x148   : > { %v1159_v45 = vpop.permute.xlu1 %1158  ;;  %1450 = vperm.xlu0 %5927, %v10464_v63  }
 0x149   : > { %v1237_v6 = vadd.f32 %v1159_v45, %v1077_v55  ;;  %v1048_v21 = vmul.f32 %v6839_v23, %v1016_v2  ;;  %v10477_v55 = vld [vmem:[#allocation10_spill] sm:$0xff] }
 0x14a   : > { %2358 = vperm.xlu1 %5864, %v10465_v58  }
 0x14b   : > { %v1269_v24 = vmax.f32 %v1237_v6, 0.0  ;;  %v1080_v60 = vadd.f32 %v1048_v21, %v824_v13  ;;  %v10482_v21 = vld [vmem:[#allocation39_spill] sm:$0xff] }
 0x14c   : > { %1454 = vperm.xlu0 %5927, %v10466_v11   ;;  %v7053_v11 = vpop.permute.xlu0 %2386 }
 0x14d   : > { %v940_v53 = vpop.permute.xlu1 %939  ;;  %v5423_v15 = vpack.c.bf16 %v1270_v43, %v1269_v24  ;;  %v1240_v51 = vadd.f32 %v10472_v3, %v1080_v60  ;;  %v10479_v43 = vld [vmem:[#allocation11_spill] sm:$0xff]  ;;  %v401_v60 = vld [vmem:[%s6343_s18 + $0xe8] sm:$0xff] }
 0x14e   : > { %2366 = vperm.xlu1 %5864, %v10467_v28   ;;  %v1017_v45 = vsub.f32 %v398_v9, %v940_v53  ;;  %v825_v28 = vmul.f32 %v10480_v46, %v6808_v32  ;;  %v10481_v53 = vld [vmem:[#allocation36_spill] sm:$0xff] }
 0x14f   : > { %5424 = vmatpush1.bf16.msra.mxu1 %v5423_v15  ;;  %v1272_v10 = vmax.f32 %v1240_v51, 0.0 }
 0x150   : > { %5425 = vmatprep.subr.bf16.mxu1 %v10449_v36  ;;  %1470 = vperm.xlu0 %5927, %v10468_v57   ;;  %v1049_v24 = vmul.f32 %v6839_v23, %v1017_v45  ;;  %v7060_v57 = vpop.permute.xlu0 %2394 }
 0x151   : > { %v945_v16 = vpop.permute.xlu1 %944 }
 0x152   : > { %2374 = vperm.xlu1 %5864, %v6421_v25   ;;  %v1079_v25 = vadd.f32 %v1047_v42, %v823_v54  ;;  %v1018_v37 = vsub.f32 %v399_v4, %v945_v16  ;;  %v1081_v1 = vadd.f32 %v1049_v24, %v825_v28  ;;  %v10487_v4 = vld [vmem:[#allocation32_spill] sm:$0xff]  ;;  %v402_v24 = vld [vmem:[%s6343_s18 + $0xf0] sm:$0xff] }
 0x154   : > { %1482 = vperm.xlu0 %5927, %v10470_v48   ;;  %v1050_v58 = vmul.f32 %v6839_v23, %v1018_v37  ;;  %v7068_v3 = vpop.permute.xlu0 %2402  ;;  %v10488_v37 = vld [vmem:[#allocation24_spill] sm:$0xff] }
 0x155   : > { %v753_v59 = vpop.permute.xlu1 %752 }
 0x156   : > { %2382 = vperm.xlu1 %5864, %v10471_v0   ;;  %v826_v6 = vmul.f32 %v753_v59, %v6808_v32  ;;  %v400_v0 = vld [vmem:[%s6343_s18 + $0xe0] sm:$0xff] }
 0x158   : > { %1494 = vperm.xlu0 %5927, %v10473_v8   ;;  %v1082_v17 = vadd.f32 %v1050_v58, %v826_v6  ;;  %v403_v6 = vld [vmem:[%s6343_s18 + $0xf8] sm:$0xff]  ;;  %v10490_v58 = vld [vmem:[#allocation26_spill] sm:$0xff] }
 0x15a   : > { %2390 = vperm.xlu1 %5864, %v10474_v18   ;;  %v1167_v19 = vpop.permute.xlu1 %1166  ;;  %v1242_v2 = vadd.f32 %v6898_v44, %v1082_v17  ;;  %v10485_v18 = vld [vmem:[#allocation18_spill] sm:$0xff] }
 0x15b   : > { %v1239_v61 = vadd.f32 %v1167_v19, %v1079_v25 }
 0x15c   : > { %1506 = vperm.xlu0 %5927, %v10475_v52   ;;  %v1274_v42 = vmax.f32 %v1242_v2, 0.0  ;;  %v10486_v52 = vld [vmem:[#allocation20_spill] sm:$0xff]  ;;  %v6242_v2 = vmov 34  }
 0x15d   : > { %v1271_v14 = vmax.f32 %v1239_v61, 0.0 }
 0x15e   : > { %2398 = vperm.xlu1 %5864, %v6447_v29   ;;  %v10478_v29 = vld [vmem:[#allocation27_spill] sm:$0xff] }
 0x15f   : > { %v950_v56 = vpop.permute.xlu1 %949  ;;  %v5426_v12 = vpack.c.bf16 %v1272_v10, %v1271_v14  ;;  %v7077_v14 = vpop.permute.xlu0 %2410 }
 0x160   : > { %1518 = vperm.xlu0 %5927, %v10476_v5   ;;  %v1019_v51 = vsub.f32 %v400_v0, %v950_v56  ;;  %v827_v56 = vmul.f32 %v10487_v4, %v6808_v32 }
 0x161   : > { %5427 = vmatpush1.bf16.msra.mxu1 %v5426_v12 }
 0x162   : > { %2406 = vperm.xlu1 %5864, %v10477_v55   ;;  %5428 = vmatprep.subr.bf16.mxu1 %v10449_v36  ;;  %v1051_v19 = vmul.f32 %v6839_v23, %v1019_v51 }
 0x163   : > { %v955_v63 = vpop.permute.xlu1 %954  ;;  %v7086_v55 = vpop.permute.xlu0 %2418 }
 0x164   : > { %1530 = vperm.xlu0 %5927, %v10478_v29   ;;  %v1020_v44 = vsub.f32 %v401_v60, %v955_v63  ;;  %v1083_v12 = vadd.f32 %v1051_v19, %v827_v56  ;;  %10489 = vst [vmem:[#allocation21_spill] sm:$0xff] %v7086_v55  ;;  %v6241_v63 = vmov 32   ;;  %v404_v56 = vld [vmem:[%s6343_s18 + $0x100] sm:$0xff] }
 0x166   : > { %2414 = vperm.xlu1 %5864, %v10479_v43   ;;  %v6032_v43 = vld [vmem:[%s6363_s10] sm:$0xff] }
 0x167   : > { %v763_v15 = vpop.permute.xlu1 %762 }
 0x168   : > { %1542 = vperm.xlu0 %5927, %v10481_v53   ;;  %v828_v25 = vmul.f32 %v763_v15, %v6808_v32  ;;  %v10492_v15 = vld [vmem:[#allocation31_spill] sm:$0xff] }
 0x16a   : > { %2422 = vperm.xlu1 %5864, %v10455_v20   ;;  %v10484_v20 = vld [vmem:[#allocation14_spill] sm:$0xff] }
 0x16c   : > { %v1175_v13 = vpop.permute.xlu1 %1174  ;;  %1554 = vperm.xlu0 %5927, %v10482_v21  }
 0x16d   : > { %v1241_v16 = vadd.f32 %v1175_v13, %v1081_v1  ;;  %v10493_v13 = vld [vmem:[#allocation38_spill] sm:$0xff] }
 0x16e   : > { %2430 = vperm.xlu1 %5864, %v10483_v35  }
 0x16f   : > { %v1273_v54 = vmax.f32 %v1241_v16, 0.0 }
 0x170   : > { %1566 = vperm.xlu0 %5927, %v6896_v62   ;;  %v1052_v62 = vmul.f32 %v6839_v23, %v1020_v44 }
 0x171   : > { %v960_v59 = vpop.permute.xlu1 %959  ;;  %v5429_v48 = vpack.c.bf16 %v1274_v42, %v1273_v54  ;;  %v10495_v42 = vld [vmem:[#allocation33_spill] sm:$0xff] }
 0x172   : > { %2438 = vperm.xlu1 %5864, %v10484_v20   ;;  %v1084_v61 = vadd.f32 %v1052_v62, %v828_v25  ;;  %v1021_v46 = vsub.f32 %v402_v24, %v960_v59  ;;  %v829_v60 = vmul.f32 %v10495_v42, %v6808_v32  ;;  %v6033_v59 = vld [vmem:[%s6338_s15] sm:$0xff]  ;;  %v10497_v25 = vmov 4   ;;  %v407_v42 = vld [vmem:[%s6343_s18 + $0x118] sm:$0xff] }
 0x173   : > { %5430 = vmatpush1.bf16.msra.mxu1 %v5429_v48  ;;  %v10496_v48 = vld [vmem:[#allocation43_spill] sm:$0xff]  ;;  %v10499_v62 = vmov 5  }
 0x174   : > { %5431 = vmatprep.subr.bf16.mxu1 %v10449_v36  ;;  %5929 = vset.pattern.permute.xlu0 %v10460_v33  ;;  %v1053_v16 = vmul.f32 %v6839_v23, %v1021_v46  ;;  %v6040_v46 = vld [vmem:[%s10329_s5 + $0xf0] sm:$0xff] }
 0x175   : > { %v965_v8 = vpop.permute.xlu1 %964  ;;  %1710 = vperm.xlu0 %5929, %v10485_v18   ;;  %v6034_v18 = vld [vmem:[%s10329_s5] sm:$0xff] }
 0x176   : > { %2446 = vperm.xlu1 %5864, %v6505_v40   ;;  %v1244_v40 = vadd.f32 %v6922_v7, %v1084_v61  ;;  %v1022_v17 = vsub.f32 %v403_v6, %v965_v8  ;;  %v1085_v20 = vadd.f32 %v1053_v16, %v829_v60 }
 0x178   : > { %v1054_v1 = vmul.f32 %v6839_v23, %v1022_v17  ;;  %v10502_v17 = vld [vmem:[#allocation34_spill] sm:$0xff] }
 0x179   : > { %v773_v10 = vpop.permute.xlu1 %772  ;;  %1722 = vperm.xlu0 %5929, %v10486_v52  }
 0x17a   : > { %2454 = vperm.xlu1 %5864, %v10451_v30   ;;  %v1276_v30 = vmax.f32 %v1244_v40, 0.0  ;;  %v830_v28 = vmul.f32 %v773_v10, %v6808_v32  ;;  %v405_v10 = vld [vmem:[%s6343_s18 + $0x108] sm:$0xff] }
 0x17b   : > { %v7123_v40 = vld [vmem:[%s10329_s5 + $0x8] sm:$0xff] }
 0x17c   : > { %v1086_v21 = vadd.f32 %v1054_v1, %v830_v28  ;;  %v7154_v28 = vld [vmem:[%s10329_s5 + $0x18] sm:$0xff] }
 0x17d   : > { %1734 = vperm.xlu0 %5929, %v10488_v37   ;;  %v6037_v37 = vld [vmem:[%s10329_s5 + $0xd8] sm:$0xff] }
 0x17e   : > { %2462 = vperm.xlu1 %5864, %v10456_v31   ;;  %v1183_v9 = vpop.permute.xlu1 %1182  ;;  %v7092_v31 = vpop.permute.xlu0 %2426  ;;  %v1246_v0 = vadd.f32 %v6946_v41, %v1086_v21  ;;  %v6035_v41 = vld [vmem:[%s10329_s5 + $0xc0] sm:$0xff] }
 0x17f   : > { %v1243_v5 = vadd.f32 %v1183_v9, %v1083_v12  ;;  %10491 = vst [vmem:[#allocation16_spill] sm:$0xff] %v7092_v31  ;;  %v7524_v31 = vld [vmem:[%s6338_s15 + $0x70] sm:$0xff] }
 0x180   : > { %v1278_v61 = vmax.f32 %v1246_v0, 0.0  ;;  %v406_v0 = vld [vmem:[%s6343_s18 + $0x110] sm:$0xff] }
 0x181   : > { %v1275_v45 = vmax.f32 %v1243_v5, 0.0  ;;  %1746 = vperm.xlu0 %5929, %v10490_v58   ;;  %v6039_v58 = vld [vmem:[%s10329_s5 + $0xe8] sm:$0xff] }
 0x182   : > { %5865 = vset.pattern.permute.xlu1 %v6241_v63  ;;  %v7100_v54 = vpop.permute.xlu0 %2434  ;;  %v7136_v63 = vld [vmem:[%s6338_s15 + $0x18] sm:$0xff] }
 0x183   : > { %v970_v29 = vpop.permute.xlu1 %969  ;;  %604 = vperm.xlu1 %5865, %v6032_v43   ;;  %v5432_v7 = vpack.c.bf16 %v1276_v30, %v1275_v45  ;;  %10494 = vst [vmem:[#allocation40_spill] sm:$0xff] %v7100_v54  ;;  %v2074_v54 = vld [vmem:[%s10327_s3 + $0x828] sm:$0xff] }
 0x184   : > { %v1023_v5 = vsub.f32 %v404_v56, %v970_v29 }
 0x185   : > { %5433 = vmatpush1.bf16.msra.mxu1 %v5432_v7  ;;  %1758 = vperm.xlu0 %5929, %v10492_v15   ;;  %v831_v15 = vmul.f32 %v10502_v17, %v6808_v32 }
 0x186   : > { %5434 = vmatprep.subr.bf16.mxu1 %v10449_v36  ;;  %v7109_v8 = vpop.permute.xlu0 %2442 }
 0x187   : > { %v975_v53 = vpop.permute.xlu1 %974  ;;  %5868 = vset.pattern.permute.xlu1 %v6242_v2  ;;  %10498 = vst [vmem:[#allocation42_spill] sm:$0xff] %v7109_v8  ;;  %v6057_v8 = vld [vmem:[%s6338_s15 + $0x48] sm:$0xff] }
 0x188   : > { %625 = vperm.xlu1 %5868, %v6032_v43   ;;  %v1024_v12 = vsub.f32 %v405_v10, %v975_v53  ;;  %v1055_v43 = vmul.f32 %v6839_v23, %v1023_v5 }
 0x189   : > { %1770 = vperm.xlu0 %5929, %v10493_v13  }
 0x18a   : > { %v7126_v9 = vpop.permute.xlu0 %2450  ;;  %v1056_v6 = vmul.f32 %v6839_v23, %v1024_v12  ;;  %v1087_v2 = vadd.f32 %v1055_v43, %v831_v15  ;;  %v10505_v15 = vld [vmem:[#allocation37_spill] sm:$0xff] }
 0x18b   : > { %v783_v35 = vpop.permute.xlu1 %782  ;;  %10500 = vst [vmem:[#allocation41_spill] sm:$0xff] %v7126_v9  ;;  %v2058_v9 = vld [vmem:[%s10327_s3 + $0x5a8] sm:$0xff] }
 0x18c   : > { %5869 = vset.pattern.permute.xlu1 %v10431_v47  ;;  %v832_v45 = vmul.f32 %v783_v35, %v6808_v32 }
 0x18d   : > { %1446 = vperm.xlu1 %5869, %v6033_v59   ;;  %1782 = vperm.xlu0 %5929, %v10496_v48  }
 0x18e   : > { %v1088_v7 = vadd.f32 %v1056_v6, %v832_v45  ;;  %v7143_v24 = vpop.permute.xlu0 %2458  ;;  %v409_v45 = vld [vmem:[%s6343_s18 + $0x128] sm:$0xff] }
 0x18f   : > { %10501 = vst [vmem:[#allocation12_spill] sm:$0xff] %v7143_v24  ;;  %v7415_v24 = vld [vmem:[%s10329_s5 + $0x50] sm:$0xff] }
 0x190   : > { %v1191_v44 = vpop.permute.xlu1 %1190  ;;  %v1248_v53 = vadd.f32 %v6971_v38, %v1088_v7 }
 0x191   : > { %v1245_v51 = vadd.f32 %v1191_v44, %v1085_v20  ;;  %5870 = vset.pattern.permute.xlu1 %v10497_v25  ;;  %5933 = vset.pattern.permute.xlu0 %v10499_v62  ;;  %v6042_v44 = vld [vmem:[%s6338_s15 + $0x20] sm:$0xff] }
 0x192   : > { %1286 = vperm.xlu1 %5870, %v6034_v18   ;;  %1926 = vperm.xlu0 %5933, %v6035_v41   ;;  %v7158_v16 = vpop.permute.xlu0 %2466  ;;  %v1280_v35 = vmax.f32 %v1248_v53, 0.0  ;;  %v7172_v41 = vld [vmem:[%s6338_s15 + $0x28] sm:$0xff] }
 0x193   : > { %v1277_v19 = vmax.f32 %v1245_v51, 0.0  ;;  %10503 = vst [vmem:[#allocation17_spill] sm:$0xff] %v7158_v16 }
 0x195   : > { %v980_v52 = vpop.permute.xlu1 %979  ;;  %v5435_v4 = vpack.c.bf16 %v1278_v61, %v1277_v19  ;;  %v408_v61 = vld [vmem:[%s6343_s18 + $0x120] sm:$0xff] }
 0x196   : > { %1290 = vperm.xlu1 %5870, %v7123_v40   ;;  %1938 = vperm.xlu0 %5933, %v6037_v37   ;;  %v7164_v38 = vpop.permute.xlu0 %1674  ;;  %v1025_v51 = vsub.f32 %v406_v0, %v980_v52  ;;  %v10504_v37 = vld [vmem:[#allocation35_spill] sm:$0xff] }
 0x197   : > { %5436 = vmatpush1.bf16.msra.mxu1 %v5435_v4  ;;  %v833_v5 = vmul.f32 %v10504_v37, %v6808_v32  ;;  %v2026_v37 = vld [vmem:[%s10327_s3 + $0xa8] sm:$0xff] }
 0x198   : > { %5437 = vmatprep.subr.bf16.mxu1 %v10449_v36  ;;  %v1057_v10 = vmul.f32 %v6839_v23, %v1025_v51 }
 0x199   : > { %v985_v30 = vpop.permute.xlu1 %984 }
 0x19a   : > { %5871 = vset.pattern.permute.xlu1 %v10431_v47  ;;  %1946 = vperm.xlu0 %5933, %v6039_v58   ;;  %v1026_v20 = vsub.f32 %v407_v42, %v985_v30  ;;  %v7176_v12 = vpop.permute.xlu0 %1686  ;;  %v1089_v6 = vadd.f32 %v1057_v10, %v833_v5 }
 0x19b   : > { %1458 = vperm.xlu1 %5871, %v7136_v63  }
 0x19c   : > { %v1058_v19 = vmul.f32 %v6839_v23, %v1026_v20  ;;  %v6045_v20 = vld [vmem:[%s6338_s15 + $0x10] sm:$0xff] }
 0x19d   : > { %v793_v29 = vpop.permute.xlu1 %792 }
 0x19e   : > { %1950 = vperm.xlu0 %5933, %v6040_v46   ;;  %v835_v46 = vmul.f32 %v10505_v15, %v6808_v32 }
 0x19f   : > { %5872 = vset.pattern.permute.xlu1 %v10497_v25 }
 0x1a0   : > { %1298 = vperm.xlu1 %5872, %v7154_v28  }
 0x1a2   : > { %v1199_v1 = vpop.permute.xlu1 %1198 }
 0x1a3   : > { %v1247_v13 = vadd.f32 %v1199_v1, %v1087_v2 }
 0x1a4   : > { %5873 = vset.pattern.permute.xlu1 %v10460_v33 }
 0x1a5   : > { %v1279_v21 = vmax.f32 %v1247_v13, 0.0  ;;  %1670 = vperm.xlu1 %5873, %v6033_v59   ;;  %v834_v59 = vmul.f32 %v793_v29, %v6808_v32  ;;  %v7185_v29 = vpop.permute.xlu0 %1698 }
 0x1a7   : > { %v990_v60 = vpop.permute.xlu1 %989  ;;  %v5438_v48 = vpack.c.bf16 %v1280_v35, %v1279_v21  ;;  %v1090_v4 = vadd.f32 %v1058_v19, %v834_v59  ;;  %v2021_v19 = vld [vmem:[%s10327_s3] sm:$0xff] }
 0x1a8   : > { %v1027_v52 = vsub.f32 %v408_v61, %v990_v60  ;;  %v2024_v61 = vld [vmem:[%s10327_s3 + $0x58] sm:$0xff] }
 0x1a9   : > { %5874 = vset.pattern.permute.xlu1 %v10431_v47  ;;  %5439 = vmatpush1.bf16.msra.mxu1 %v5438_v48  ;;  %v1250_v30 = vadd.f32 %v6986_v50, %v1090_v4  ;;  %v7198_v42 = vpop.permute.xlu0 %1830  ;;  %v6046_v4 = vld [vmem:[%s6338_s15 + $0x38] sm:$0xff] }
 0x1aa   : > { %1462 = vperm.xlu1 %5874, %v6042_v44   ;;  %5440 = vmatprep.subr.bf16.mxu1 %v10449_v36  ;;  %v1059_v43 = vmul.f32 %v6839_v23, %v1027_v52  ;;  %v6047_v52 = vld [vmem:[%s10329_s5 + $0x10] sm:$0xff] }
 0x1ab   : > { %v995_v18 = vpop.permute.xlu1 %994  ;;  %v1282_v50 = vmax.f32 %v1250_v30, 0.0  ;;  %v2028_v30 = vld [vmem:[%s10327_s3 + $0xf8] sm:$0xff] }
 0x1ac   : > { %v1028_v7 = vsub.f32 %v409_v45, %v995_v18  ;;  %v1091_v21 = vadd.f32 %v1059_v43, %v835_v46  ;;  %v2025_v45 = vld [vmem:[%s10327_s3 + $0xa0] sm:$0xff]  ;;  %v2027_v43 = vld [vmem:[%s10327_s3 + $0xf0] sm:$0xff] }
 0x1ad   : > { %v7203_v59 = vpop.permute.xlu0 %1842 }
 0x1ae   : > { %1466 = vperm.xlu1 %5874, %v7172_v41   ;;  %v1060_v13 = vmul.f32 %v6839_v23, %v1028_v7  ;;  %v6048_v7 = vld [vmem:[%s10329_s5 + $0x30] sm:$0xff] }
 0x1af   : > { %v803_v56 = vpop.permute.xlu1 %802 }
 0x1b0   : > { %v836_v53 = vmul.f32 %v803_v56, %v6808_v32  ;;  %v2023_v56 = vld [vmem:[%s10327_s3 + $0x50] sm:$0xff] }
 0x1b2   : > { %5875 = vset.pattern.permute.xlu1 %v10499_v62  ;;  %v1092_v60 = vadd.f32 %v1060_v13, %v836_v53  ;;  %v2029_v53 = vld [vmem:[%s10327_s3 + $0x140] sm:$0xff]  ;;  %v2031_v13 = vld [vmem:[%s10327_s3 + $0x190] sm:$0xff] }
 0x1b3   : > { %1834 = vperm.xlu1 %5875, %v7123_v40   ;;  %v7194_v40 = vld [vmem:[%s10329_s5 + $0x20] sm:$0xff] }
 0x1b4   : > { %v1207_v58 = vpop.permute.xlu1 %1206 }
 0x1b5   : > { %v1249_v17 = vadd.f32 %v1207_v58, %v1089_v6 }
 0x1b7   : > { %v1281_v2 = vmax.f32 %v1249_v17, 0.0  ;;  %5876 = vset.pattern.permute.xlu1 %v10497_v25  ;;  %v2030_v17 = vld [vmem:[%s10327_s3 + $0x148] sm:$0xff] }
 0x1b8   : > { %v1215_v1 = vpop.permute.xlu1 %1214  ;;  %1302 = vperm.xlu1 %5876, %v7194_v40  }
 0x1b9   : > { %v5441_v35 = vpack.c.bf16 %v1282_v50, %v1281_v2  ;;  %v1251_v32 = vadd.f32 %v1215_v1, %v1091_v21  ;;  %v7263_v2 = vld [vmem:[%s10329_s5 + $0x38] sm:$0xff]  ;;  %v2034_v21 = vld [vmem:[%s10327_s3 + $0x1e8] sm:$0xff] }
 0x1ba   : > { %v2032_v50 = vld [vmem:[%s10327_s3 + $0x198] sm:$0xff] }
 0x1bb   : > { %5442 = vmatpush1.bf16.msra.mxu1 %v5441_v35  ;;  %v1283_v44 = vmax.f32 %v1251_v32, 0.0 }
 0x1bc   : > { %v1219_v48 = vpop.permute.xlu1 %1218  ;;  %5877 = vset.pattern.permute.xlu1 %v10460_v33  ;;  %5443 = vmatprep.subr.bf16.mxu1 %v10449_v36 }
 0x1bd   : > { %v1252_v0 = vadd.f32 %v1219_v48, %v1092_v60  ;;  %1678 = vperm.xlu1 %5877, %v6045_v20   ;;  %v2033_v60 = vld [vmem:[%s10327_s3 + $0x1e0] sm:$0xff]  ;;  %v2036_v48 = vld [vmem:[%s10327_s3 + $0x238] sm:$0xff] }
 0x1be   : > { %v7293_v20 = vld [vmem:[%s6338_s15 + $0x40] sm:$0xff] }
 0x1bf   : > { %v1284_v51 = vmax.f32 %v1252_v0, 0.0 }
 0x1c1   : > { %v7205_v23 = vpop.permute.xlu1 %2346  ;;  %1682 = vperm.xlu1 %5877, %v7136_v63   ;;  %v5444_v18 = vpack.c.bf16 %v1284_v51, %v1283_v44  ;;  %v7219_v63 = vpop.permute.xlu0 %1854  ;;  %v2035_v44 = vld [vmem:[%s10327_s3 + $0x230] sm:$0xff]  ;;  %v2038_v51 = vld [vmem:[%s10327_s3 + $0x288] sm:$0xff] }
 0x1c3   : > { %5445 = vmatpush1.bf16.msra.mxu1 %v5444_v18 }
 0x1c4   : > { %5734 = vmatprep.subr.bf16.mxu1 %v10449_v36 }
 0x1c5   : > { %v7215_v10 = vpop.permute.xlu1 %2350  ;;  %5878 = vset.pattern.permute.xlu1 %v10431_v47  ;;  %v7239_v6 = vpop.permute.xlu0 %1866 }
 0x1c6   : > { %1474 = vperm.xlu1 %5878, %v6046_v4   ;;  %2534 = vmatmul.mubr.f32.vlgmr.msra.gmra.mrb[0].mxu1 %v2021_v19  ;;  %v2037_v19 = vld [vmem:[%s10327_s3 + $0x280] sm:$0xff] }
 0x1c7   : > { %2538 = vmatprep.mubr.f32.mxu1 %v2024_v61  ;;  %v2040_v61 = vld [vmem:[%s10327_s3 + $0x2d8] sm:$0xff] }
 0x1c9   : > { %v7227_v5 = vpop.permute.xlu1 %2358  ;;  %v7255_v46 = vpop.permute.xlu0 %1878 }
 0x1ca   : > { %5879 = vset.pattern.permute.xlu1 %v10499_v62  ;;  %2539 = vmatmul.mubr.f32.gmra.mrb[2].mxu1 %v2023_v56 }
 0x1cb   : > { %1838 = vperm.xlu1 %5879, %v6047_v52   ;;  %2543 = vmatprep.mubr.f32.mxu1 %v2026_v37  ;;  %v7321_v37 = vld [vmem:[%s10329_s5 + $0x28] sm:$0xff] }
 0x1cc   : > { %v2042_v52 = vld [vmem:[%s10327_s3 + $0x328] sm:$0xff] }
 0x1cd   : > { %v7241_v58 = vpop.permute.xlu1 %2366  ;;  %v7278_v35 = vpop.permute.xlu0 %1890 }
 0x1ce   : > { %2544 = vmatmul.mubr.f32.gmra.mrb[4].mxu1 %v2025_v45  ;;  %10506 = vst [vmem:[#allocation22_spill] sm:$0xff] %v7278_v35 }
 0x1cf   : > { %5880 = vset.pattern.permute.xlu1 %v10497_v25  ;;  %2548 = vmatprep.mubr.f32.mxu1 %v2028_v30 }
 0x1d0   : > { %1310 = vperm.xlu1 %5880, %v6048_v7   ;;  %v7341_v7 = vld [vmem:[%s10329_s5 + $0x48] sm:$0xff] }
 0x1d1   : > { %v7253_v15 = vpop.permute.xlu1 %2374 }
 0x1d2   : > { %2549 = vmatmul.mubr.f32.gmra.mrb[6].mxu1 %v2027_v43  ;;  %v2041_v43 = vld [vmem:[%s10327_s3 + $0x320] sm:$0xff] }
 0x1d3   : > { %2553 = vmatprep.mubr.f32.mxu1 %v2030_v17  ;;  %v2044_v17 = vld [vmem:[%s10327_s3 + $0x378] sm:$0xff] }
 0x1d4   : > { %1314 = vperm.xlu1 %5880, %v7263_v2  }
 0x1d5   : > { %v7269_v1 = vpop.permute.xlu1 %2382 }
 0x1d6   : > { %2554 = vmatmul.mubr.f32.gmra.mrb[8].mxu1 %v2029_v53 }
 0x1d7   : > { %2558 = vmatprep.mubr.f32.mxu1 %v2032_v50  ;;  %v2043_v50 = vld [vmem:[%s10327_s3 + $0x370] sm:$0xff] }
 0x1d8   : > { %5881 = vset.pattern.permute.xlu1 %v10460_v33 }
 0x1d9   : > { %v7280_v32 = vpop.permute.xlu1 %2390  ;;  %1690 = vperm.xlu1 %5881, %v7172_v41   ;;  %v7296_v41 = vpop.permute.xlu0 %1902 }
 0x1da   : > { %2559 = vmatmul.mubr.f32.gmra.mrb[10].mxu1 %v2031_v13  ;;  %10507 = vst [vmem:[#allocation44_spill] sm:$0xff] %v7296_v41  ;;  %v2046_v13 = vld [vmem:[%s10327_s3 + $0x3c8] sm:$0xff] }
 0x1db   : > { %2563 = vmatprep.mubr.f32.mxu1 %v2034_v21 }
 0x1dd   : > { %v7289_v0 = vpop.permute.xlu1 %2398  ;;  %5882 = vset.pattern.permute.xlu1 %v10431_v47  ;;  %v7314_v4 = vpop.permute.xlu0 %1914 }
 0x1de   : > { %1478 = vperm.xlu1 %5882, %v7293_v20   ;;  %2564 = vmatmul.mubr.f32.gmra.mrb[12].mxu1 %v2033_v60  ;;  %10508 = vst [vmem:[#allocation45_spill] sm:$0xff] %v7314_v4  ;;  %v2054_v4 = vld [vmem:[%s10327_s3 + $0x508] sm:$0xff] }
 0x1df   : > { %2568 = vmatprep.mubr.f32.mxu1 %v2036_v48  ;;  %v6053_v48 = vld [vmem:[%s6338_s15 + $0x30] sm:$0xff] }
 0x1e1   : > { %v7304_v18 = vpop.permute.xlu1 %2406  ;;  %v7332_v30 = vpop.permute.xlu0 %1294 }
 0x1e2   : > { %5883 = vset.pattern.permute.xlu1 %v10499_v62  ;;  %2569 = vmatmul.mubr.f32.gmra.mrb[14].mxu1 %v2035_v44  ;;  %v2045_v44 = vld [vmem:[%s10327_s3 + $0x3c0] sm:$0xff] }
 0x1e3   : > { %1846 = vperm.xlu1 %5883, %v7194_v40   ;;  %2573 = vmatprep.mubr.f32.mxu1 %v2038_v51  ;;  %v2039_v40 = vld [vmem:[%s10327_s3 + $0x2d0] sm:$0xff]  ;;  %v2048_v51 = vld [vmem:[%s10327_s3 + $0x418] sm:$0xff] }
 0x1e5   : > { %v7316_v56 = vpop.permute.xlu1 %2414  ;;  %v7356_v21 = vpop.permute.xlu0 %1306 }
 0x1e6   : > { %10509 = vst [vmem:[#allocation28_spill] sm:$0xff] %v7316_v56  ;;  %2574 = vmatmul.mubr.f32.gmra.mrb[16].mxu1 %v2037_v19 }
 0x1e7   : > { %1850 = vperm.xlu1 %5883, %v7321_v37   ;;  %2578 = vmatprep.mubr.f32.mxu1 %v2040_v61  ;;  %v6054_v61 = vld [vmem:[%s6338_s15 + $0x50] sm:$0xff] }
 0x1e9   : > { %v7330_v45 = vpop.permute.xlu1 %2422 }
 0x1ea   : > { %10510 = vst [vmem:[#allocation3_spill] sm:$0xff] %v7330_v45  ;;  %2579 = vmatmul.mubr.f32.gmra.mrb[18].mxu1 %v2039_v40  ;;  %v7371_v40 = vpop.permute.xlu0 %1318 }
 0x1eb   : > { %5884 = vset.pattern.permute.xlu1 %v10497_v25  ;;  %2583 = vmatprep.mubr.f32.mxu1 %v2042_v52  ;;  %v2047_v52 = vld [vmem:[%s10327_s3 + $0x410] sm:$0xff] }
 0x1ec   : > { %1322 = vperm.xlu1 %5884, %v7341_v7  }
 0x1ed   : > { %v7347_v53 = vpop.permute.xlu1 %2430 }
 0x1ee   : > { %10511 = vst [vmem:[#allocation46_spill] sm:$0xff] %v7347_v53  ;;  %2584 = vmatmul.mubr.f32.gmra.mrb[20].mxu1 %v2041_v43  ;;  %v2050_v43 = vld [vmem:[%s10327_s3 + $0x468] sm:$0xff] }
 0x1ef   : > { %2588 = vmatprep.mubr.f32.mxu1 %v2044_v17 }
 0x1f0   : > { %5885 = vset.pattern.permute.xlu1 %v10460_v33 }
 0x1f1   : > { %v7358_v60 = vpop.permute.xlu1 %2438  ;;  %1694 = vperm.xlu1 %5885, %v6053_v48   ;;  %v2052_v48 = vld [vmem:[%s10327_s3 + $0x4b8] sm:$0xff] }
 0x1f2   : > { %10512 = vst [vmem:[#allocation2_spill] sm:$0xff] %v7358_v60  ;;  %2589 = vmatmul.mubr.f32.gmra.mrb[22].mxu1 %v2043_v50  ;;  %v7382_v50 = vld [vmem:[%s6338_s15 + $0x58] sm:$0xff] }
 0x1f3   : > { %2593 = vmatprep.mubr.f32.mxu1 %v2046_v13  ;;  %v2049_v13 = vld [vmem:[%s10327_s3 + $0x460] sm:$0xff] }
 0x1f5   : > { %v7367_v19 = vpop.permute.xlu1 %2446  ;;  %5887 = vset.pattern.permute.xlu1 %v10431_v47 }
 0x1f6   : > { %10513 = vst [vmem:[#allocation6_spill] sm:$0xff] %v7367_v19  ;;  %1486 = vperm.xlu1 %5887, %v6054_v61   ;;  %2594 = vmatmul.mubr.f32.gmra.mrb[24].mxu1 %v2045_v44  ;;  %v7391_v44 = vpop.permute.xlu0 %1330  ;;  %v5262_v61 = vld [vmem:[%s6343_s18 + $0x21] ss:$0 sm:$0xff] }
 0x1f7   : > { %2598 = vmatprep.mubr.f32.mxu1 %v2048_v51  ;;  %v621_v16 = vsub.f32 %v7000_v34, %v5262_v61  ;;  %v2056_v34 = vld [vmem:[%s10327_s3 + $0x558] sm:$0xff]  ;;  %v5263_v61 = vld [vmem:[%s6343_s18 + $0x22] ss:$0 sm:$0xff] }
 0x1f9   : > { %v7379_v17 = vpop.permute.xlu1 %2454 }
 0x1fa   : > { %10514 = vst [vmem:[#allocation4_spill] sm:$0xff] %v7379_v17  ;;  %1490 = vperm.xlu1 %5887, %v7382_v50   ;;  %2599 = vmatmul.mubr.f32.gmra.mrb[26].mxu1 %v2047_v52  ;;  %v2051_v52 = vld [vmem:[%s10327_s3 + $0x4b0] sm:$0xff] }
 0x1fb   : > { %2603 = vmatprep.mubr.f32.mxu1 %v2050_v43  ;;  %v5261_v43 = vld [vmem:[%s6343_s18 + $0x20] ss:$0 sm:$0xff] }
 0x1fd   : > { %v7393_v51 = vpop.permute.xlu1 %2462 }
 0x1fe   : > { %10515 = vst [vmem:[#allocation5_spill] sm:$0xff] %v7393_v51  ;;  %5888 = vset.pattern.permute.xlu1 %v10499_v62  ;;  %2604 = vmatmul.mubr.f32.gmra.mrb[28].mxu1 %v2049_v13  ;;  %v7406_v51 = vpop.permute.xlu0 %1342 }
 0x1ff   : > { %1858 = vperm.xlu1 %5888, %v7263_v2   ;;  %2608 = vmatprep.mubr.f32.mxu1 %v2052_v48  ;;  %v2053_v48 = vld [vmem:[%s10327_s3 + $0x500] sm:$0xff] }
 0x202   : > { %v605_v41 = vpop.permute.xlu1 %604  ;;  %2609 = vmatmul.mubr.f32.gmra.mrb[30].mxu1 %v2051_v52  ;;  %v7429_v19 = vpop.permute.xlu0 %1354 }
 0x203   : > { %v611_v13 = vsub.f32 %v605_v41, %v5261_v43  ;;  %5889 = vset.pattern.permute.xlu1 %v10497_v25  ;;  %2613 = vmatprep.mubr.f32.mxu1 %v2054_v4  ;;  %v622_v41 = vmul.f32 %v621_v16, %v621_v16  ;;  %v2055_v43 = vld [vmem:[%s10327_s3 + $0x550] sm:$0xff]  ;;  %10516 = vst [vmem:[#allocation9_spill] sm:$0xff] %v7429_v19  ;;  %v411_v19 = vld [vmem:[%s6343_s18 + $0x138] sm:$0xff] }
 0x204   : > { %1326 = vperm.xlu1 %5889, %v7415_v24  }
 0x205   : > { %v612_v52 = vmul.f32 %v611_v13, %v611_v13 }
 0x206   : > { %2614 = vmatmul.mubr.f32.gmra.mrb[32].mxu1 %v2053_v48  ;;  %v2057_v48 = vld [vmem:[%s10327_s3 + $0x5a0] sm:$0xff] }
 0x207   : > { %v626_v4 = vpop.permute.xlu1 %625  ;;  %2618 = vmatprep.mubr.f32.mxu1 %v2056_v34  ;;  %v623_v16 = vadd.f32 %v622_v41, %v612_v52  ;;  %v6058_v52 = vld [vmem:[%s6338_s15 + $0x68] sm:$0xff] }
 0x208   : > { %v632_v17 = vsub.f32 %v626_v4, %v5263_v61  ;;  %5890 = vset.pattern.permute.xlu1 %v10460_v33  ;;  %v2060_v4 = vld [vmem:[%s10327_s3 + $0x5f8] sm:$0xff] }
 0x209   : > { %1702 = vperm.xlu1 %5890, %v7293_v20   ;;  %v7441_v20 = vpop.permute.xlu0 %1366 }
 0x20a   : > { %v633_v13 = vmul.f32 %v632_v17, %v632_v17  ;;  %2619 = vmatmul.mubr.f32.gmra.mrb[34].mxu1 %v2055_v43  ;;  %10517 = vst [vmem:[#allocation29_spill] sm:$0xff] %v7441_v20  ;;  %v2062_v17 = vld [vmem:[%s10327_s3 + $0x648] sm:$0xff]  ;;  %v2064_v43 = vld [vmem:[%s10327_s3 + $0x698] sm:$0xff] }
 0x20b   : > { %2623 = vmatprep.mubr.f32.mxu1 %v2058_v9  ;;  %v2059_v9 = vld [vmem:[%s10327_s3 + $0x5f0] sm:$0xff] }
 0x20c   : > { %v634_v34 = vadd.f32 %v633_v13, %v623_v16  ;;  %v7435_v61 = vpop.permute.xlu1 %1446 }
 0x20d   : > { %1706 = vperm.xlu1 %5890, %v6057_v8   ;;  %v2061_v8 = vld [vmem:[%s10327_s3 + $0x640] sm:$0xff]  ;;  %v7459_v16 = vpop.permute.xlu0 %1378 }
 0x20e   : > { %6028 = vrsqrt.f32 %v634_v34  ;;  %2624 = vmatmul.mubr.f32.gmra.mrb[36].mxu1 %v2057_v48  ;;  %10518 = vst [vmem:[#allocation15_spill] sm:$0xff] %v7459_v16  ;;  %v6059_v48 = vld [vmem:[%s10329_s5 + $0x40] sm:$0xff]  ;;  %vm637_vm4 = vcmp.eq.f32.partialorder %v634_v34, inf  ;;  %v640_v16 = vand.u32 2147483648, %v634_v34  ;;  %vm639_vm5 = vcmp.eq.f32.partialorder %v634_v34, 0.0 }
 0x20f   : > { %2628 = vmatprep.mubr.f32.mxu1 %v2060_v4  ;;  %v2063_v4 = vld [vmem:[%s10327_s3 + $0x690] sm:$0xff] }
 0x211   : > { %5891 = vset.pattern.permute.xlu1 %v10431_v47  ;;  %v7450_v41 = vpop.permute.xlu1 %1286 }
 0x212   : > { %1498 = vperm.xlu1 %5891, %v6058_v52   ;;  %2629 = vmatmul.mubr.f32.gmra.mrb[38].mxu1 %v2059_v9 }
 0x213   : > { %2633 = vmatprep.mubr.f32.mxu1 %v2062_v17  ;;  %v2066_v17 = vld [vmem:[%s10327_s3 + $0x6e8] sm:$0xff] }
 0x215   : > { %v1291_v13 = vpop.permute.xlu1 %1290 }
 0x216   : > { %5892 = vset.pattern.permute.xlu1 %v10499_v62  ;;  %2634 = vmatmul.mubr.f32.gmra.mrb[40].mxu1 %v2061_v8  ;;  %v7473_v8 = vpop.permute.xlu0 %1390 }
 0x217   : > { %1862 = vperm.xlu1 %5892, %v6059_v48   ;;  %2638 = vmatprep.mubr.f32.mxu1 %v2064_v43  ;;  %10519 = vst [vmem:[#allocation7_spill] sm:$0xff] %v7473_v8  ;;  %v2065_v43 = vld [vmem:[%s10327_s3 + $0x6e0] sm:$0xff]  ;;  %v2072_v8 = vld [vmem:[%s10327_s3 + $0x7d8] sm:$0xff] }
 0x218   : > { %v6029_v9 = vpop.eup %6028 }
 0x219   : > { %v636_v52 = vmul.f32 %v6029_v9, %v634_v34  ;;  %v6060_v9 = vld [vmem:[%s10329_s5 + $0x60] sm:$0xff] }
 0x21a   : > { %v7471_v20 = vpop.permute.xlu1 %1458  ;;  %2639 = vmatmul.mubr.f32.gmra.mrb[42].mxu1 %v2063_v4  ;;  %v2068_v4 = vld [vmem:[%s10327_s3 + $0x738] sm:$0xff] }
 0x21b   : > { %v638_v60 = vsel %vm637_vm4, %v634_v34, %v636_v52  ;;  %5893 = vset.pattern.permute.xlu1 %v10497_v25  ;;  %2643 = vmatprep.mubr.f32.mxu1 %v2066_v17  ;;  %v2070_v52 = vld [vmem:[%s10327_s3 + $0x788] sm:$0xff] }
 0x21c   : > { %v7479_v48 = vsel %vm639_vm5, %v640_v16, %v638_v60  ;;  %1334 = vperm.xlu1 %5893, %v6060_v9   ;;  %v2067_v60 = vld [vmem:[%s10327_s3 + $0x730] sm:$0xff]  ;;  %v7496_v16 = vld [vmem:[%s10329_s5 + $0x68] sm:$0xff]  ;;  %v2069_v9 = vld [vmem:[%s10327_s3 + $0x780] sm:$0xff] }
 0x21d   : > { %v642_v34 = vadd.f32 1e-08, %v7479_v48  ;;  %v1413_v55 = vmul.f32 %v7450_v41, %v7479_v48 }
 0x21e   : > { %2644 = vmatmul.mubr.f32.gmra.mrb[44].mxu1 %v2065_v43  ;;  %v7502_v43 = vpop.permute.xlu0 %1402 }
 0x21f   : > { %v7488_v17 = vpop.permute.xlu1 %1298  ;;  %2648 = vmatprep.mubr.f32.mxu1 %v2068_v4  ;;  %10520 = vst [vmem:[#allocation47_spill] sm:$0xff] %v7502_v43  ;;  %6030 = vrcp.f32 %v642_v34  ;;  %v2071_v34 = vld [vmem:[%s10327_s3 + $0x7d0] sm:$0xff] }
 0x220   : > { %1338 = vperm.xlu1 %5893, %v7496_v16  }
 0x222   : > { %2649 = vmatmul.mubr.f32.gmra.mrb[46].mxu1 %v2067_v60  ;;  %v1451_v43 = vpop.permute.xlu0 %1450 }
 0x223   : > { %2653 = vmatprep.mubr.f32.mxu1 %v2070_v52  ;;  %v1574_v60 = vsub.f32 %v1451_v43, %v411_v19  ;;  %v410_v52 = vld [vmem:[%s6343_s18 + $0x130] sm:$0xff]  ;;  %v1414_v43 = vmul.f32 %v1291_v13, %v7479_v48 }
 0x224   : > { %5894 = vset.pattern.permute.xlu1 %v10460_v33  ;;  %v1671_v4 = vpop.permute.xlu1 %1670  ;;  %v2075_v13 = vld [vmem:[%s10327_s3 + $0x870] sm:$0xff] }
 0x225   : > { %1714 = vperm.xlu1 %5894, %v7382_v50  }
 0x226   : > { %2654 = vmatmul.mubr.f32.gmra.mrb[48].mxu1 %v2069_v9  ;;  %v2073_v9 = vld [vmem:[%s10327_s3 + $0x820] sm:$0xff] }
 0x227   : > { %2658 = vmatprep.mubr.f32.mxu1 %v2072_v8  ;;  %v1573_v8 = vsub.f32 %v7435_v61, %v410_v52  ;;  %v2076_v61 = vld [vmem:[%s10327_s3 + $0x878] sm:$0xff]  ;;  %v2078_v52 = vld [vmem:[%s10327_s3 + $0x8c8] sm:$0xff] }
 0x229   : > { %5895 = vset.pattern.permute.xlu1 %v10431_v47  ;;  %v7521_v53 = vpop.permute.xlu1 %1462  ;;  %v7527_v50 = vpop.eup %6030 }
 0x22a   : > { %1502 = vperm.xlu1 %5895, %v7524_v31   ;;  %2659 = vmatmul.mubr.f32.gmra.mrb[50].mxu1 %v2071_v34  ;;  %v1606_v19 = vmul.f32 %v7527_v50, %v1574_v60  ;;  %v1605_v45 = vmul.f32 %v7527_v50, %v1573_v8 }
 0x22b   : > { %2663 = vmatprep.mubr.f32.mxu1 %v2074_v54 }
 0x22c   : > { %v1638_v54 = vadd.f32 %v1606_v19, %v1414_v43  ;;  %v1637_v34 = vadd.f32 %v1605_v45, %v1413_v55  ;;  %v7556_v55 = vld [vmem:[%s10329_s5 + $0x58] sm:$0xff] }
 0x22d   : > { %v7538_v56 = vpop.permute.xlu1 %1466 }
 0x22e   : > { %5896 = vset.pattern.permute.xlu1 %v10499_v62  ;;  %2664 = vmatmul.mubr.f32.gmra.mrb[52].mxu1 %v2073_v9  ;;  %v1797_v60 = vadd.f32 %v1671_v4, %v1637_v34  ;;  %v1798_v41 = vadd.f32 %v7164_v38, %v1638_v54  ;;  %v7576_v54 = vld [vmem:[%s10329_s5 + $0x78] sm:$0xff]  ;;  %v2082_v34 = vld [vmem:[%s10327_s3 + $0x968] sm:$0xff] }
 0x22f   : > { %1870 = vperm.xlu1 %5896, %v7415_v24   ;;  %2668 = vmatprep.mubr.f32.mxu1 %v2076_v61  ;;  %v2077_v24 = vld [vmem:[%s10327_s3 + $0x8c0] sm:$0xff]  ;;  %v2079_v61 = vld [vmem:[%s10327_s3 + $0x910] sm:$0xff] }
 0x230   : > { %v1957_v19 = vadd.f32 %v7198_v42, %v1797_v60  ;;  %v2080_v42 = vld [vmem:[%s10327_s3 + $0x918] sm:$0xff]  ;;  %v412_v60 = vld [vmem:[%s6343_s18 + $0x140] sm:$0xff] }
 0x232   : > { %v1835_v8 = vpop.permute.xlu1 %1834  ;;  %2669 = vmatmul.mubr.f32.gmra.mrb[54].mxu1 %v2075_v13  ;;  %v1989_v38 = vmax.f32 %v1957_v19, 0.0  ;;  %v413_v13 = vld [vmem:[%s6343_s18 + $0x148] sm:$0xff]  ;;  %v2084_v19 = vld [vmem:[%s10327_s3 + $0x9b8] sm:$0xff] }
 0x233   : > { %v1958_v43 = vadd.f32 %v1835_v8, %v1798_v41  ;;  %1874 = vperm.xlu1 %5896, %v7556_v55   ;;  %2673 = vmatprep.mubr.f32.mxu1 %v2078_v52  ;;  %v2081_v52 = vld [vmem:[%s10327_s3 + $0x960] sm:$0xff]  ;;  %v1576_v8 = vsub.f32 %v7471_v20, %v413_v13  ;;  %v2083_v20 = vld [vmem:[%s10327_s3 + $0x9b0] sm:$0xff] }
 0x235   : > { %v1990_v45 = vmax.f32 %v1958_v43, 0.0  ;;  %v1455_v43 = vpop.permute.xlu0 %1454 }
 0x236   : > { %2674 = vmatmul.mubr.f32.gmra.mrb[56].mxu1 %v2077_v24  ;;  %v6065_v24 = vld [vmem:[%s6338_s15 + $0x60] sm:$0xff] }
 0x237   : > { %v7565_v4 = vpack.c.bf16 %v1990_v45, %v1989_v38  ;;  %v7567_v9 = vpop.permute.xlu1 %1302  ;;  %5897 = vset.pattern.permute.xlu1 %v10497_v25  ;;  %2678 = vmatprep.mubr.f32.mxu1 %v2080_v42  ;;  %v1575_v38 = vsub.f32 %v1455_v43, %v412_v60  ;;  %v1608_v45 = vmul.f32 %v7527_v50, %v1576_v8  ;;  %v6067_v43 = vld [vmem:[%s6338_s15 + $0x88] sm:$0xff] }
 0x238   : > { %1346 = vperm.xlu1 %5897, %v7576_v54   ;;  %v1415_v60 = vmul.f32 %v7332_v30, %v7479_v48 }
 0x239   : > { %10521 = vst [vmem:[#allocation19_spill] sm:$0xff] %v7565_v4  ;;  %5750 = vmatpush1.bf16.msra.mxu1 %v7565_v4 }
 0x23a   : > { %5735 = vmatprep.subr.bf16.mxu1 %v10449_v36  ;;  %2679 = vmatmul.mubr.f32.gmra.mrb[58].mxu1 %v2079_v61  ;;  %v1416_v61 = vmul.f32 %v7488_v17, %v7479_v48 }
 0x23b   : > { %2683 = vmatprep.mubr.f32.mxu1 %v2082_v34  ;;  %v1607_v34 = vmul.f32 %v7527_v50, %v1575_v38 }
 0x23c   : > { %v1679_v41 = vpop.permute.xlu1 %1678  ;;  %5898 = vset.pattern.permute.xlu1 %v10460_v33  ;;  %v1640_v13 = vadd.f32 %v1608_v45, %v1416_v61 }
 0x23d   : > { %1718 = vperm.xlu1 %5898, %v6065_v24   ;;  %v6066_v24 = vld [vmem:[%s6338_s15 + $0x80] sm:$0xff] }
 0x23e   : > { %2684 = vmatmul.mubr.f32.gmra.mrb[60].mxu1 %v2081_v52 }
 0x23f   : > { %2688 = vmatprep.mubr.f32.mxu1 %v2084_v19  ;;  %v1639_v19 = vadd.f32 %v1607_v34, %v1415_v60  ;;  %v1417_v60 = vmul.f32 %v7567_v9, %v7479_v48  ;;  %v7645_v9 = vld [vmem:[%s10329_s5 + $0x70] sm:$0xff] }
 0x240   : > { %v1683_v42 = vpop.permute.xlu1 %1682 }
 0x241   : > { %5899 = vset.pattern.permute.xlu1 %v10431_v47  ;;  %v1800_v52 = vadd.f32 %v1683_v42, %v1640_v13  ;;  %v1799_v4 = vadd.f32 %v1679_v41, %v1639_v19  ;;  %v415_v41 = vld [vmem:[%s6343_s18 + $0x158] sm:$0xff] }
 0x242   : > { %1510 = vperm.xlu1 %5899, %v6066_v24   ;;  %2689 = vmatmul.mubr.f32.gmra.mrb[62].mxu1 %v2083_v20  ;;  %v6069_v13 = vld [vmem:[%s6338_s15 + $0x78] sm:$0xff]  ;;  %v1578_v24 = vsub.f32 %v7538_v56, %v415_v41 }
 0x243   : > { %v1960_v17 = vadd.f32 %v7203_v59, %v1800_v52  ;;  %v7618_v59 = vld [vmem:[%s10329_s5 + $0x80] sm:$0xff] }
 0x245   : > { %v7606_v8 = vpop.permute.xlu1 %1474  ;;  %v1992_v45 = vmax.f32 %v1960_v17, 0.0  ;;  %v1610_v17 = vmul.f32 %v7527_v50, %v1578_v24 }
 0x246   : > { %1514 = vperm.xlu1 %5899, %v6067_v43  }
 0x24a   : > { %v1839_v35 = vpop.permute.xlu1 %1838  ;;  %5900 = vset.pattern.permute.xlu1 %v10499_v62 }
 0x24b   : > { %v1959_v38 = vadd.f32 %v1839_v35, %v1799_v4  ;;  %1882 = vperm.xlu1 %5900, %v7496_v16   ;;  %v414_v4 = vld [vmem:[%s6343_s18 + $0x150] sm:$0xff] }
 0x24c   : > { %v1577_v34 = vsub.f32 %v7521_v53, %v414_v4  ;;  %v1418_v53 = vmul.f32 %v7356_v21, %v7479_v48 }
 0x24d   : > { %v1991_v30 = vmax.f32 %v1959_v38, 0.0  ;;  %v6070_v38 = vld [vmem:[%s6338_s15 + $0x98] sm:$0xff] }
 0x24e   : > { %v1609_v52 = vmul.f32 %v7527_v50, %v1577_v34 }
 0x24f   : > { %v7612_v42 = vpack.c.bf16 %v1992_v45, %v1991_v30  ;;  %v1311_v20 = vpop.permute.xlu1 %1310  ;;  %5901 = vset.pattern.permute.xlu1 %v10497_v25  ;;  %v1642_v30 = vadd.f32 %v1610_v17, %v1418_v53  ;;  %v416_v17 = vld [vmem:[%s6343_s18 + $0x160] sm:$0xff] }
 0x250   : > { %1350 = vperm.xlu1 %5901, %v7618_v59  }
 0x251   : > { %10522 = vst [vmem:[#allocation8_spill] sm:$0xff] %v7612_v42  ;;  %5751 = vmatpush1.bf16.msra.mxu1 %v7612_v42 }
 0x252   : > { %5736 = vmatprep.subr.bf16.mxu1 %v10449_v36 }
 0x253   : > { %v1315_v35 = vpop.permute.xlu1 %1314 }
 0x254   : > { %5902 = vset.pattern.permute.xlu1 %v10460_v33 }
 0x255   : > { %1726 = vperm.xlu1 %5902, %v7524_v31   ;;  %v1641_v31 = vadd.f32 %v1609_v52, %v1417_v60 }
 0x257   : > { %v1801_v56 = vadd.f32 %v7176_v12, %v1641_v31  ;;  %v6072_v12 = vld [vmem:[%s10329_s5 + $0x90] sm:$0xff]  ;;  %v1471_v31 = vpop.permute.xlu0 %1470 }
 0x258   : > { %v1691_v61 = vpop.permute.xlu1 %1690 }
 0x259   : > { %1730 = vperm.xlu1 %5902, %v6069_v13   ;;  %v1802_v4 = vadd.f32 %v1691_v61, %v1642_v30  ;;  %v7657_v61 = vld [vmem:[%s10329_s5 + $0x98] sm:$0xff] }
 0x25d   : > { %v7633_v19 = vpop.permute.xlu1 %1478  ;;  %5903 = vset.pattern.permute.xlu1 %v10431_v47 }
 0x25e   : > { %1522 = vperm.xlu1 %5903, %v6070_v38   ;;  %v417_v38 = vld [vmem:[%s6343_s18 + $0x168] sm:$0xff] }
 0x25f   : > { %v1580_v30 = vsub.f32 %v7606_v8, %v417_v38 }
 0x262   : > { %v1847_v45 = vpop.permute.xlu1 %1846  ;;  %5904 = vset.pattern.permute.xlu1 %v10499_v62 }
 0x263   : > { %1886 = vperm.xlu1 %5904, %v7645_v9   ;;  %v1961_v41 = vadd.f32 %v1847_v45, %v1801_v56  ;;  %v1579_v45 = vsub.f32 %v1471_v31, %v416_v17  ;;  %v1419_v56 = vmul.f32 %v1311_v20, %v7479_v48  ;;  %v1483_v17 = vpop.permute.xlu0 %1482 }
 0x265   : > { %v1993_v21 = vmax.f32 %v1961_v41, 0.0  ;;  %v1420_v41 = vmul.f32 %v1315_v35, %v7479_v48 }
 0x266   : > { %v1851_v34 = vpop.permute.xlu1 %1850 }
 0x267   : > { %v1962_v13 = vadd.f32 %v1851_v34, %v1802_v4  ;;  %5905 = vset.pattern.permute.xlu1 %v10497_v25  ;;  %v1611_v4 = vmul.f32 %v7527_v50, %v1579_v45  ;;  %v7686_v45 = vld [vmem:[%s10329_s5 + $0x88] sm:$0xff] }
 0x268   : > { %1358 = vperm.xlu1 %5905, %v6072_v12  }
 0x269   : > { %v1994_v24 = vmax.f32 %v1962_v13, 0.0  ;;  %v1612_v13 = vmul.f32 %v7527_v50, %v1580_v30 }
 0x26b   : > { %v7652_v60 = vpack.c.bf16 %v1994_v24, %v1993_v21  ;;  %v1323_v52 = vpop.permute.xlu1 %1322  ;;  %v1643_v21 = vadd.f32 %v1611_v4, %v1419_v56  ;;  %v7674_v24 = vld [vmem:[%s6338_s15 + $0xa0] sm:$0xff]  ;;  %v7693_v56 = vpop.permute.xlu0 %1494  ;;  %v419_v4 = vld [vmem:[%s6343_s18 + $0x178] sm:$0xff] }
 0x26c   : > { %1362 = vperm.xlu1 %5905, %v7657_v61  }
 0x26d   : > { %10523 = vst [vmem:[#allocation23_spill] sm:$0xff] %v7652_v60  ;;  %5752 = vmatpush1.bf16.msra.mxu1 %v7652_v60 }
 0x26e   : > { %5737 = vmatprep.subr.bf16.mxu1 %v10449_v36 }
 0x270   : > { %v1695_v53 = vpop.permute.xlu1 %1694  ;;  %5906 = vset.pattern.permute.xlu1 %v10460_v33 }
 0x271   : > { %1738 = vperm.xlu1 %5906, %v6067_v43   ;;  %v1644_v43 = vadd.f32 %v1612_v13, %v1420_v41  ;;  %v1803_v12 = vadd.f32 %v1695_v53, %v1643_v21  ;;  %v418_v41 = vld [vmem:[%s6343_s18 + $0x170] sm:$0xff]  ;;  %v1582_v21 = vsub.f32 %v1483_v17, %v419_v4 }
 0x272   : > { %v6078_v17 = vld [vmem:[%s6338_s15 + $0xb0] sm:$0xff] }
 0x273   : > { %v1963_v20 = vadd.f32 %v7219_v63, %v1803_v12  ;;  %v1804_v35 = vadd.f32 %v7185_v29, %v1644_v43  ;;  %v7699_v29 = vld [vmem:[%s10329_s5 + $0xa8] sm:$0xff]  ;;  %v7707_v43 = vpop.permute.xlu0 %1506  ;;  %v6077_v12 = vld [vmem:[%s6338_s15 + $0x90] sm:$0xff] }
 0x275   : > { %v7669_v34 = vpop.permute.xlu1 %1486  ;;  %5907 = vset.pattern.permute.xlu1 %v10431_v47  ;;  %v1995_v53 = vmax.f32 %v1963_v20, 0.0  ;;  %v1581_v20 = vsub.f32 %v7633_v19, %v418_v41 }
 0x276   : > { %1526 = vperm.xlu1 %5907, %v7674_v24  }
 0x277   : > { %v7716_v4 = vpop.permute.xlu0 %1518 }
 0x279   : > { %v7677_v8 = vpop.permute.xlu1 %1490 }
 0x27a   : > { %5908 = vset.pattern.permute.xlu1 %v10499_v62 }
 0x27b   : > { %1894 = vperm.xlu1 %5908, %v7618_v59  }
 0x27e   : > { %v1859_v31 = vpop.permute.xlu1 %1858 }
 0x27f   : > { %v1964_v38 = vadd.f32 %v1859_v31, %v1804_v35  ;;  %1898 = vperm.xlu1 %5908, %v7686_v45   ;;  %v1422_v35 = vmul.f32 %v1323_v52, %v7479_v48  ;;  %v7723_v52 = vld [vmem:[%s6338_s15 + $0xb8] sm:$0xff] }
 0x281   : > { %v1996_v30 = vmax.f32 %v1964_v38, 0.0  ;;  %v1614_v38 = vmul.f32 %v7527_v50, %v1582_v21 }
 0x283   : > { %v7689_v59 = vpack.c.bf16 %v1996_v30, %v1995_v53  ;;  %v7691_v63 = vpop.permute.xlu1 %1326  ;;  %5909 = vset.pattern.permute.xlu1 %v10497_v25  ;;  %v1613_v53 = vmul.f32 %v7527_v50, %v1581_v20  ;;  %v1646_v30 = vadd.f32 %v1614_v38, %v1422_v35  ;;  %v7727_v20 = vpop.permute.xlu0 %1530 }
 0x284   : > { %1370 = vperm.xlu1 %5909, %v7699_v29  }
 0x285   : > { %10524 = vst [vmem:[#allocation25_spill] sm:$0xff] %v7689_v59  ;;  %5753 = vmatpush1.bf16.msra.mxu1 %v7689_v59  ;;  %v1421_v59 = vmul.f32 %v7371_v40, %v7479_v48 }
 0x286   : > { %5738 = vmatprep.subr.bf16.mxu1 %v10449_v36 }
 0x287   : > { %v1645_v19 = vadd.f32 %v1613_v53, %v1421_v59 }
 0x288   : > { %v1703_v13 = vpop.permute.xlu1 %1702  ;;  %5910 = vset.pattern.permute.xlu1 %v10460_v33 }
 0x289   : > { %1742 = vperm.xlu1 %5910, %v6077_v12   ;;  %v1805_v41 = vadd.f32 %v1703_v13, %v1645_v19  ;;  %v7736_v13 = vpop.permute.xlu0 %1542 }
 0x28a   : > { %10526 = vst [vmem:[#allocation27_spill] sm:$0xff] %v7736_v13 }
 0x28c   : > { %v1707_v31 = vpop.permute.xlu1 %1706 }
 0x28d   : > { %5911 = vset.pattern.permute.xlu1 %v10431_v47  ;;  %v1806_v12 = vadd.f32 %v1707_v31, %v1646_v30 }
 0x28e   : > { %1534 = vperm.xlu1 %5911, %v6078_v17  }
 0x28f   : > { %v1966_v21 = vadd.f32 %v7239_v6, %v1806_v12  ;;  %v7742_v6 = vld [vmem:[%s10329_s5 + $0xb0] sm:$0xff] }
 0x291   : > { %v7720_v60 = vpop.permute.xlu1 %1498  ;;  %v1998_v40 = vmax.f32 %v1966_v21, 0.0  ;;  %v2086_v21 = vld [vmem:[%s10327_s3 + $0x18] sm:$0xff] }
 0x292   : > { %1538 = vperm.xlu1 %5911, %v7723_v52   ;;  %2918 = vmatprep.mubr.f32.mxu0 %v2086_v21  ;;  %v421_v21 = vld [vmem:[%s6343_s18 + $0x188] sm:$0xff] }
 0x296   : > { %v1863_v35 = vpop.permute.xlu1 %1862  ;;  %5912 = vset.pattern.permute.xlu1 %v10499_v62 }
 0x297   : > { %v1965_v38 = vadd.f32 %v1863_v35, %v1805_v41  ;;  %1906 = vperm.xlu1 %5912, %v7657_v61  }
 0x299   : > { %v1997_v31 = vmax.f32 %v1965_v38, 0.0  ;;  %v2535_v30 = vpop.f32.mrb[0].mxu1 }
 0x29a   : > { %v2536_v59 = vadd.f32 %v2535_v30, %v7010_v22  ;;  %v2537_v53 = vpop.f32.mrb[1].mxu1 }
 0x29b   : > { %v7732_v17 = vpack.c.bf16 %v1998_v40, %v1997_v31  ;;  %v7734_v42 = vpop.permute.xlu1 %1334  ;;  %5913 = vset.pattern.permute.xlu1 %v10497_v25  ;;  %v7754_v31 = vpop.permute.xlu0 %1554  ;;  %v420_v53 = vld [vmem:[%s6343_s18 + $0x180] sm:$0xff] }
 0x29c   : > { %1374 = vperm.xlu1 %5913, %v7742_v6   ;;  %v2694_v22 = vmax.f32 %v2536_v59, 0.0  ;;  %10527 = vst [vmem:[#allocation11_spill] sm:$0xff] %v7754_v31  ;;  %v10382_v59 = vmov 6  }
 0x29d   : > { %10525 = vst [vmem:[#allocation10_spill] sm:$0xff] %v7732_v17  ;;  %v2540_v12 = vpop.f32.mrb[2].mxu1  ;;  %5754 = vmatpush1.bf16.msra.mxu1 %v7732_v17  ;;  %5938 = vset.pattern.permute.xlu0 %v10382_v59 }
 0x29e   : > { %v2541_v19 = vadd.f32 %v2540_v12, %v7205_v23  ;;  %v2542_v41 = vpop.f32.mrb[3].mxu1  ;;  %5739 = vmatprep.subr.bf16.mxu1 %v10449_v36  ;;  %v7762_v12 = vld [vmem:[%s10329_s5] sm:$0xff] }
 0x29f   : > { %v7751_v35 = vpop.permute.xlu1 %1338  ;;  %3112 = vperm.xlu0 %5938, %v7762_v12   ;;  %v7772_v31 = vpop.permute.xlu0 %1566 }
 0x2a0   : > { %v2695_v38 = vmax.f32 %v2541_v19, 0.0  ;;  %5914 = vset.pattern.permute.xlu1 %v10460_v33 }
 0x2a1   : > { %v2545_v40 = vpop.f32.mrb[4].mxu1  ;;  %1750 = vperm.xlu1 %5914, %v7674_v24   ;;  %v1583_v24 = vsub.f32 %v7669_v34, %v420_v53 }
 0x2a2   : > { %v5447_v30 = vpack.c.bf16 %v2695_v38, %v2694_v22  ;;  %v2547_v23 = vpop.f32.mrb[5].mxu1  ;;  %v2546_v19 = vadd.f32 %v2545_v40, %v7215_v10  ;;  %v6082_v38 = vld [vmem:[%s6338_s15 + $0xa8] sm:$0xff]  ;;  %v1584_v10 = vsub.f32 %v7677_v8, %v421_v21  ;;  %v1423_v40 = vmul.f32 %v7691_v63, %v7479_v48 }
 0x2a3   : > { %3124 = vperm.xlu0 %5938, %v7154_v28   ;;  %v1615_v53 = vmul.f32 %v7527_v50, %v1583_v24 }
 0x2a4   : > { %v1715_v41 = vpop.permute.xlu1 %1714  ;;  %5448 = vmatpush1.bf16.msra.mxu0 %v5447_v30  ;;  %v2696_v30 = vmax.f32 %v2546_v19, 0.0  ;;  %v1616_v28 = vmul.f32 %v7527_v50, %v1584_v10  ;;  %v1711_v19 = vpop.permute.xlu0 %1710 }
 0x2a5   : > { %v2550_v22 = vpop.f32.mrb[6].mxu1  ;;  %5449 = vmatprep.subr.bf16.mxu0 %v10449_v36  ;;  %1754 = vperm.xlu1 %5914, %v6082_v38   ;;  %v1647_v8 = vadd.f32 %v1615_v53, %v1423_v40 }
 0x2a6   : > { %v2551_v23 = vadd.f32 %v2550_v22, %v7019_v39  ;;  %v2552_v59 = vpop.f32.mrb[7].mxu1 }
 0x2a7   : > { %v6083_v59 = vld [vmem:[%s6338_s15 + $0xc8] sm:$0xff]  ;;  %3132 = vperm.xlu0 %5938, %v7321_v37   ;;  %v1807_v37 = vadd.f32 %v1711_v19, %v1647_v8 }
 0x2a8   : > { %v2697_v13 = vmax.f32 %v2551_v23, 0.0 }
 0x2a9   : > { %v7777_v17 = vpop.permute.xlu1 %1502  ;;  %v2555_v34 = vpop.f32.mrb[8].mxu1  ;;  %5915 = vset.pattern.permute.xlu1 %v10431_v47 }
 0x2aa   : > { %v5450_v38 = vpack.c.bf16 %v2697_v13, %v2696_v30  ;;  %v2557_v39 = vpop.f32.mrb[9].mxu1  ;;  %1546 = vperm.xlu1 %5915, %v6083_v59   ;;  %v2556_v63 = vadd.f32 %v2555_v34, %v7227_v5  ;;  %v1424_v13 = vmul.f32 %v7391_v44, %v7479_v48  ;;  %v7794_v30 = vld [vmem:[%s10329_s5 + $0xa0] sm:$0xff] }
 0x2ab   : > { %3140 = vperm.xlu0 %5938, %v7263_v2  }
 0x2ac   : > { %5451 = vmatpush1.bf16.msra.mxu0 %v5450_v38  ;;  %v1648_v10 = vadd.f32 %v1616_v28, %v1424_v13  ;;  %v2698_v40 = vmax.f32 %v2556_v63, 0.0  ;;  %v7803_v28 = vld [vmem:[%s10329_s5 + $0xc0] sm:$0xff] }
 0x2ad   : > { %v2560_v21 = vpop.f32.mrb[10].mxu1  ;;  %5452 = vmatprep.subr.bf16.mxu0 %v10449_v36 }
 0x2ae   : > { %v2561_v22 = vadd.f32 %v2560_v21, %v7030_v26  ;;  %v2562_v24 = vpop.f32.mrb[11].mxu1  ;;  %5916 = vset.pattern.permute.xlu1 %v10499_v62  ;;  %v1871_v23 = vpop.permute.xlu1 %1870  ;;  %v1808_v34 = vadd.f32 %v1715_v41, %v1648_v10 }
 0x2af   : > { %1910 = vperm.xlu1 %5916, %v7794_v30   ;;  %v1967_v53 = vadd.f32 %v1871_v23, %v1807_v37  ;;  %3148 = vperm.xlu0 %5938, %v7341_v7   ;;  %v7816_v24 = vld [vmem:[%s10329_s5 + $0xc8] sm:$0xff] }
 0x2b0   : > { %v2699_v5 = vmax.f32 %v2561_v22, 0.0 }
 0x2b1   : > { %v2565_v44 = vpop.f32.mrb[12].mxu1  ;;  %v1999_v8 = vmax.f32 %v1967_v53, 0.0 }
 0x2b2   : > { %v5453_v26 = vpack.c.bf16 %v2699_v5, %v2698_v40  ;;  %v2567_v38 = vpop.f32.mrb[13].mxu1  ;;  %v1875_v39 = vpop.permute.xlu1 %1874  ;;  %v2566_v2 = vadd.f32 %v2565_v44, %v7241_v58  ;;  %v423_v40 = vld [vmem:[%s6343_s18 + $0x198] sm:$0xff] }
 0x2b3   : > { %v1968_v59 = vadd.f32 %v1875_v39, %v1808_v34  ;;  %5918 = vset.pattern.permute.xlu1 %v10497_v25  ;;  %3156 = vperm.xlu0 %5938, %v7556_v55   ;;  %v422_v55 = vld [vmem:[%s6343_s18 + $0x190] sm:$0xff] }
 0x2b4   : > { %5454 = vmatpush1.bf16.msra.mxu0 %v5453_v26  ;;  %1382 = vperm.xlu1 %5918, %v7803_v28   ;;  %v2700_v19 = vmax.f32 %v2566_v2, 0.0  ;;  %v1585_v34 = vsub.f32 %v7693_v56, %v422_v55  ;;  %v1426_v56 = vmul.f32 %v7751_v35, %v7479_v48 }
 0x2b5   : > { %v2570_v41 = vpop.f32.mrb[14].mxu1  ;;  %5455 = vmatprep.subr.bf16.mxu0 %v10449_v36  ;;  %v2000_v63 = vmax.f32 %v1968_v59, 0.0 }
 0x2b6   : > { %v2571_v7 = vadd.f32 %v2570_v41, %v7037_v27  ;;  %v2572_v58 = vpop.f32.mrb[15].mxu1  ;;  %v1617_v59 = vmul.f32 %v7527_v50, %v1585_v34 }
 0x2b7   : > { %v7809_v21 = vpack.c.bf16 %v2000_v63, %v1999_v8  ;;  %v7811_v22 = vpop.permute.xlu1 %1346  ;;  %3164 = vperm.xlu0 %5938, %v7496_v16   ;;  %v1425_v16 = vmul.f32 %v7734_v42, %v7479_v48 }
 0x2b8   : > { %v2701_v13 = vmax.f32 %v2571_v7, 0.0  ;;  %1386 = vperm.xlu1 %5918, %v7816_v24  }
 0x2b9   : > { %v2575_v23 = vpop.f32.mrb[16].mxu1  ;;  %5755 = vmatpush1.bf16.msra.mxu1 %v7809_v21 }
 0x2ba   : > { %v5456_v37 = vpack.c.bf16 %v2701_v13, %v2700_v19  ;;  %v2577_v27 = vpop.f32.mrb[17].mxu1  ;;  %5740 = vmatprep.subr.bf16.mxu1 %v10449_v36  ;;  %v2576_v10 = vadd.f32 %v2575_v23, %v7253_v15  ;;  %v1586_v15 = vsub.f32 %v7720_v60, %v423_v40  ;;  %v1649_v60 = vadd.f32 %v1617_v59, %v1425_v16  ;;  %v1723_v23 = vpop.permute.xlu0 %1722  ;;  %v7874_v59 = vld [vmem:[%s10329_s5 + $0xd8] sm:$0xff] }
 0x2bb   : > { %3172 = vperm.xlu0 %5938, %v7576_v54   ;;  %v7841_v54 = vld [vmem:[%s6338_s15 + $0xd0] sm:$0xff] }
 0x2bc   : > { %5457 = vmatpush1.bf16.msra.mxu0 %v5456_v37  ;;  %5919 = vset.pattern.permute.xlu1 %v10460_v33  ;;  %v1719_v5 = vpop.permute.xlu1 %1718  ;;  %v2702_v38 = vmax.f32 %v2576_v10, 0.0  ;;  %v1618_v42 = vmul.f32 %v7527_v50, %v1586_v15 }
 0x2bd   : > { %v2580_v44 = vpop.f32.mrb[18].mxu1  ;;  %5458 = vmatprep.subr.bf16.mxu0 %v10449_v36  ;;  %1762 = vperm.xlu1 %5919, %v7723_v52   ;;  %v1809_v7 = vadd.f32 %v1719_v5, %v1649_v60  ;;  %v424_v60 = vld [vmem:[%s6343_s18 + $0x1a0] sm:$0xff] }
 0x2be   : > { %v2581_v26 = vadd.f32 %v2580_v44, %v7043_v49  ;;  %v2582_v53 = vpop.f32.mrb[19].mxu1  ;;  %v1650_v35 = vadd.f32 %v1618_v42, %v1426_v56 }
 0x2bf   : > { %3180 = vperm.xlu0 %5938, %v7686_v45   ;;  %v1969_v10 = vadd.f32 %v7255_v46, %v1809_v7  ;;  %v6090_v7 = vld [vmem:[%s6338_s15 + $0xc0] sm:$0xff] }
 0x2c0   : > { %v2703_v39 = vmax.f32 %v2581_v26, 0.0  ;;  %v1810_v55 = vadd.f32 %v1723_v23, %v1650_v35  ;;  %v7860_v26 = vld [vmem:[%s10329_s5 + $0xb8] sm:$0xff]  ;;  %v1428_v23 = vmul.f32 %v7811_v22, %v7479_v48 }
 0x2c1   : > { %v2585_v2 = vpop.f32.mrb[20].mxu1  ;;  %5920 = vset.pattern.permute.xlu1 %v10431_v47  ;;  %v7838_v49 = vpop.permute.xlu1 %1510  ;;  %v2001_v46 = vmax.f32 %v1969_v10, 0.0 }
 0x2c2   : > { %v5459_v41 = vpack.c.bf16 %v2703_v39, %v2702_v38  ;;  %v2587_v52 = vpop.f32.mrb[21].mxu1  ;;  %1550 = vperm.xlu1 %5920, %v7841_v54   ;;  %v2586_v8 = vadd.f32 %v2585_v2, %v7269_v1 }
 0x2c3   : > { %3188 = vperm.xlu0 %5938, %v7657_v61   ;;  %v425_v52 = vld [vmem:[%s6343_s18 + $0x1a8] sm:$0xff] }
 0x2c4   : > { %5460 = vmatpush1.bf16.msra.mxu0 %v5459_v41  ;;  %v2704_v37 = vmax.f32 %v2586_v8, 0.0  ;;  %v1588_v35 = vsub.f32 %v7707_v43, %v425_v52 }
 0x2c5   : > { %v2590_v63 = vpop.f32.mrb[22].mxu1  ;;  %5461 = vmatprep.subr.bf16.mxu0 %v10449_v36  ;;  %v7848_v58 = vpop.permute.xlu1 %1514 }
 0x2c6   : > { %v2591_v19 = vadd.f32 %v2590_v63, %v7053_v11  ;;  %v2592_v13 = vpop.f32.mrb[23].mxu1  ;;  %5921 = vset.pattern.permute.xlu1 %v10499_v62  ;;  %v1620_v10 = vmul.f32 %v7527_v50, %v1588_v35  ;;  %v10529_v35 = vld [vmem:[#allocation28_spill] sm:$0xff] }
 0x2c7   : > { %1918 = vperm.xlu1 %5921, %v7742_v6   ;;  %3196 = vperm.xlu0 %5938, %v7699_v29  }
 0x2c8   : > { %v2705_v27 = vmax.f32 %v2591_v19, 0.0 }
 0x2c9   : > { %v2595_v1 = vpop.f32.mrb[24].mxu1 }
 0x2ca   : > { %v5462_v40 = vpack.c.bf16 %v2705_v27, %v2704_v37  ;;  %v2597_v5 = vpop.f32.mrb[25].mxu1  ;;  %v1883_v44 = vpop.permute.xlu1 %1882  ;;  %v2596_v11 = vadd.f32 %v2595_v1, %v7280_v32 }
 0x2cb   : > { %v1970_v34 = vadd.f32 %v1883_v44, %v1810_v55  ;;  %1922 = vperm.xlu1 %5921, %v7860_v26   ;;  %3204 = vperm.xlu0 %5938, %v7860_v26   ;;  %v1652_v5 = vadd.f32 %v1620_v10, %v1428_v23  ;;  %v10530_v23 = vld [vmem:[#allocation21_spill] sm:$0xff] }
 0x2cc   : > { %5463 = vmatpush1.bf16.msra.mxu0 %v5462_v40  ;;  %v2706_v32 = vmax.f32 %v2596_v11, 0.0 }
 0x2cd   : > { %v2600_v6 = vpop.f32.mrb[26].mxu1  ;;  %5464 = vmatprep.subr.bf16.mxu0 %v10449_v36  ;;  %v2002_v53 = vmax.f32 %v1970_v34, 0.0  ;;  %v1427_v34 = vmul.f32 %v7406_v51, %v7479_v48 }
 0x2ce   : > { %v2601_v15 = vadd.f32 %v2600_v6, %v7060_v57  ;;  %v2602_v16 = vpop.f32.mrb[27].mxu1 }
 0x2cf   : > { %v7866_v38 = vpack.c.bf16 %v2002_v53, %v2001_v46  ;;  %5922 = vset.pattern.permute.xlu1 %v10497_v25  ;;  %v7869_v2 = vpop.permute.xlu1 %1350  ;;  %3212 = vperm.xlu0 %5938, %v7816_v24   ;;  %v7910_v16 = vld [vmem:[%s6338_s15 + $0xe8] sm:$0xff] }
 0x2d0   : > { %v2707_v39 = vmax.f32 %v2601_v15, 0.0  ;;  %1394 = vperm.xlu1 %5922, %v7874_v59  }
 0x2d1   : > { %v2605_v57 = vpop.f32.mrb[28].mxu1  ;;  %5756 = vmatpush1.bf16.msra.mxu1 %v7866_v38 }
 0x2d2   : > { %v5465_v56 = vpack.c.bf16 %v2707_v39, %v2706_v32  ;;  %v2607_v41 = vpop.f32.mrb[29].mxu1  ;;  %5741 = vmatprep.subr.bf16.mxu1 %v10449_v36  ;;  %v2606_v42 = vadd.f32 %v2605_v57, %v7289_v0  ;;  %v1587_v0 = vsub.f32 %v7777_v17, %v424_v60  ;;  %v7898_v17 = vld [vmem:[%s10329_s5 + $0xe8] sm:$0xff] }
 0x2d3   : > { %3220 = vperm.xlu0 %5938, %v7874_v59   ;;  %v10528_v41 = vld [vmem:[#allocation22_spill] sm:$0xff] }
 0x2d4   : > { %5466 = vmatpush1.bf16.msra.mxu0 %v5465_v56  ;;  %5923 = vset.pattern.permute.xlu1 %v10460_v33  ;;  %v1727_v8 = vpop.permute.xlu1 %1726  ;;  %v2708_v37 = vmax.f32 %v2606_v42, 0.0  ;;  %v1619_v22 = vmul.f32 %v7527_v50, %v1587_v0 }
 0x2d5   : > { %v2610_v63 = vpop.f32.mrb[30].mxu1  ;;  %5467 = vmatprep.subr.bf16.mxu0 %v10449_v36  ;;  %1766 = vperm.xlu1 %5923, %v6090_v7  }
 0x2d6   : > { %v2611_v19 = vadd.f32 %v2610_v63, %v7068_v3  ;;  %v2612_v13 = vpop.f32.mrb[31].mxu1  ;;  %v6091_v3 = vld [vmem:[%s6338_s15 + $0xe0] sm:$0xff]  ;;  %v1651_v32 = vadd.f32 %v1619_v22, %v1427_v34  ;;  %v6244_v63 = vmov 3  }
 0x2d7   : > { %3228 = vperm.xlu0 %5938, %v7898_v17  }
 0x2d8   : > { %v2709_v27 = vmax.f32 %v2611_v19, 0.0  ;;  %v1731_v1 = vpop.permute.xlu1 %1730  ;;  %v1811_v56 = vadd.f32 %v1727_v8, %v1651_v32  ;;  %v426_v32 = vld [vmem:[%s6343_s18 + $0x1b0] sm:$0xff] }
 0x2d9   : > { %v2615_v55 = vpop.f32.mrb[32].mxu1  ;;  %5924 = vset.pattern.permute.xlu1 %v10431_v47  ;;  %v1812_v6 = vadd.f32 %v1731_v1, %v1652_v5  ;;  %v10531_v5 = vld [vmem:[#allocation3_spill] sm:$0xff] }
 0x2da   : > { %v5468_v43 = vpack.c.bf16 %v2709_v27, %v2708_v37  ;;  %v2617_v40 = vpop.f32.mrb[33].mxu1  ;;  %1558 = vperm.xlu1 %5924, %v6091_v3   ;;  %v2616_v44 = vadd.f32 %v2615_v55, %v7304_v18  ;;  %v7916_v18 = vld [vmem:[%s10329_s5 + $0xf8] sm:$0xff] }
 0x2db   : > { %3236 = vperm.xlu0 %5938, %v7916_v18   ;;  %v1972_v52 = vadd.f32 %v10528_v41, %v1812_v6  ;;  %v7935_v40 = vld [vmem:[%s10329_s5 + $0xe0] sm:$0xff]  ;;  %v10532_v6 = vld [vmem:[#allocation16_spill] sm:$0xff] }
 0x2dc   : > { %5469 = vmatpush1.bf16.msra.mxu0 %v5468_v43  ;;  %v2710_v39 = vmax.f32 %v2616_v44, 0.0 }
 0x2dd   : > { %v2620_v11 = vpop.f32.mrb[34].mxu1  ;;  %5470 = vmatprep.subr.bf16.mxu0 %v10449_v36  ;;  %v7906_v46 = vpop.permute.xlu1 %1522  ;;  %v2004_v8 = vmax.f32 %v1972_v52, 0.0  ;;  %v1589_v52 = vsub.f32 %v7838_v49, %v426_v32 }
 0x2de   : > { %v2621_v53 = vadd.f32 %v2620_v11, %v7077_v14  ;;  %v2622_v15 = vpop.f32.mrb[35].mxu1  ;;  %1562 = vperm.xlu1 %5924, %v7910_v16  }
 0x2df   : > { %5941 = vset.pattern.permute.xlu0 %v6244_v63 }
 0x2e0   : > { %v2711_v51 = vmax.f32 %v2621_v53, 0.0  ;;  %2795 = vperm.xlu0 %5941, %v7686_v45  }
 0x2e1   : > { %v2625_v57 = vpop.f32.mrb[36].mxu1 }
 0x2e2   : > { %v5471_v14 = vpack.c.bf16 %v2711_v51, %v2710_v39  ;;  %v2627_v42 = vpop.f32.mrb[37].mxu1  ;;  %5925 = vset.pattern.permute.xlu1 %v10499_v62  ;;  %v1887_v60 = vpop.permute.xlu1 %1886  ;;  %v2626_v7 = vadd.f32 %v2625_v57, %v10529_v35  ;;  %v427_v57 = vld [vmem:[%s6343_s18 + $0x1b8] sm:$0xff]  ;;  %v1429_v35 = vmul.f32 %v7869_v2, %v7479_v48 }
 0x2e3   : > { %v1971_v19 = vadd.f32 %v1887_v60, %v1811_v56  ;;  %1930 = vperm.xlu1 %5925, %v7816_v24   ;;  %v6096_v42 = vld [vmem:[%s6338_s15 + $0xd8] sm:$0xff] }
 0x2e4   : > { %5472 = vmatpush1.bf16.msra.mxu0 %v5471_v14  ;;  %v2712_v1 = vmax.f32 %v2626_v7, 0.0  ;;  %2727 = vperm.xlu0 %5941, %v7762_v12   ;;  %v10533_v7 = vld [vmem:[#allocation46_spill] sm:$0xff] }
 0x2e5   : > { %v2630_v13 = vpop.f32.mrb[38].mxu1  ;;  %5473 = vmatprep.subr.bf16.mxu0 %v10449_v36  ;;  %v2003_v0 = vmax.f32 %v1971_v19, 0.0 }
 0x2e6   : > { %v2631_v37 = vadd.f32 %v2630_v13, %v10530_v23  ;;  %v2632_v27 = vpop.f32.mrb[39].mxu1  ;;  %v1621_v13 = vmul.f32 %v7527_v50, %v1589_v52  ;;  %v10537_v52 = vld [vmem:[#allocation42_spill] sm:$0xff] }
 0x2e7   : > { %v7927_v55 = vpack.c.bf16 %v2004_v8, %v2003_v0  ;;  %5926 = vset.pattern.permute.xlu1 %v10497_v25  ;;  %v7930_v43 = vpop.permute.xlu1 %1358  ;;  %v10534_v0 = vld [vmem:[#allocation40_spill] sm:$0xff] }
 0x2e8   : > { %v2713_v10 = vmax.f32 %v2631_v37, 0.0  ;;  %1398 = vperm.xlu1 %5926, %v7935_v40   ;;  %2803 = vperm.xlu0 %5941, %v7657_v61   ;;  %v1590_v61 = vsub.f32 %v7848_v58, %v427_v57  ;;  %v7971_v58 = vld [vmem:[%s6338_s15 + $0xf8] sm:$0xff]  ;;  %v1653_v27 = vadd.f32 %v1621_v13, %v1429_v35 }
 0x2e9   : > { %v2635_v45 = vpop.f32.mrb[40].mxu1  ;;  %5757 = vmatpush1.bf16.msra.mxu1 %v7927_v55 }
 0x2ea   : > { %v5474_v3 = vpack.c.bf16 %v2713_v10, %v2712_v1  ;;  %v2637_v22 = vpop.f32.mrb[41].mxu1  ;;  %5742 = vmatprep.subr.bf16.mxu1 %v10449_v36  ;;  %v2636_v44 = vadd.f32 %v2635_v45, %v10531_v5  ;;  %v1622_v2 = vmul.f32 %v7527_v50, %v1590_v61  ;;  %v1735_v45 = vpop.permute.xlu0 %1734 }
 0x2eb   : > { %v7942_v11 = vpop.permute.xlu1 %1362 }
 0x2ec   : > { %5475 = vmatpush1.bf16.msra.mxu0 %v5474_v3  ;;  %5928 = vset.pattern.permute.xlu1 %v10460_v33  ;;  %v2714_v39 = vmax.f32 %v2636_v44, 0.0 }
 0x2ed   : > { %v2640_v34 = vpop.f32.mrb[42].mxu1  ;;  %5476 = vmatprep.subr.bf16.mxu0 %v10449_v36  ;;  %1774 = vperm.xlu1 %5928, %v7841_v54   ;;  %v7956_v54 = vld [vmem:[%s10329_s5 + $0x10] sm:$0xff] }
 0x2ee   : > { %v2641_v53 = vadd.f32 %v2640_v34, %v10532_v6  ;;  %v2642_v15 = vpop.f32.mrb[43].mxu1  ;;  %2735 = vperm.xlu0 %5941, %v7956_v54   ;;  %v1813_v6 = vadd.f32 %v1735_v45, %v1653_v27  ;;  %v10539_v45 = vld [vmem:[#allocation41_spill] sm:$0xff] }
 0x2ef   : > { %v10536_v15 = vld [vmem:[#allocation2_spill] sm:$0xff] }
 0x2f0   : > { %v2715_v51 = vmax.f32 %v2641_v53, 0.0  ;;  %v1739_v56 = vpop.permute.xlu1 %1738 }
 0x2f1   : > { %v2645_v41 = vpop.f32.mrb[44].mxu1  ;;  %1778 = vperm.xlu1 %5928, %v6096_v42  }
 0x2f2   : > { %v5477_v14 = vpack.c.bf16 %v2715_v51, %v2714_v39  ;;  %v2647_v60 = vpop.f32.mrb[45].mxu1  ;;  %v2646_v19 = vadd.f32 %v2645_v41, %v10533_v7  ;;  %2811 = vperm.xlu0 %5941, %v7699_v29   ;;  %v7980_v29 = vld [vmem:[%s10329_s5 + $0x20] sm:$0xff]  ;;  %v7988_v39 = vld [vmem:[%s10329_s5 + $0xd0] sm:$0xff] }
 0x2f4   : > { %5478 = vmatpush1.bf16.msra.mxu0 %v5477_v14  ;;  %v2716_v1 = vmax.f32 %v2646_v19, 0.0  ;;  %v7998_v19 = vld [vmem:[%s10329_s5 + $0xf0] sm:$0xff] }
 0x2f5   : > { %v2650_v49 = vpop.f32.mrb[46].mxu1  ;;  %5479 = vmatprep.subr.bf16.mxu0 %v10449_v36  ;;  %5930 = vset.pattern.permute.xlu1 %v10431_v47  ;;  %v7966_v8 = vpop.permute.xlu1 %1526  ;;  %v10535_v47 = vld [vmem:[#allocation9_spill] sm:$0xff] }
 0x2f6   : > { %v2651_v23 = vadd.f32 %v2650_v49, %v10534_v0  ;;  %v2652_v37 = vpop.f32.mrb[47].mxu1  ;;  %1570 = vperm.xlu1 %5930, %v7971_v58   ;;  %v1430_v22 = vmul.f32 %v10535_v47, %v7479_v48  ;;  %2743 = vperm.xlu0 %5941, %v7980_v29  }
 0x2f8   : > { %v2717_v10 = vmax.f32 %v2651_v23, 0.0  ;;  %v1654_v53 = vadd.f32 %v1622_v2, %v1430_v22  ;;  %v10538_v2 = vld [vmem:[#allocation6_spill] sm:$0xff] }
 0x2f9   : > { %v2655_v3 = vpop.f32.mrb[48].mxu1  ;;  %v429_v22 = vld [vmem:[%s6343_s18 + $0x1c8] sm:$0xff] }
 0x2fa   : > { %v5480_v5 = vpack.c.bf16 %v2717_v10, %v2716_v1  ;;  %v2657_v44 = vpop.f32.mrb[49].mxu1  ;;  %5931 = vset.pattern.permute.xlu1 %v10499_v62  ;;  %v1895_v34 = vpop.permute.xlu1 %1894  ;;  %v2656_v32 = vadd.f32 %v2655_v3, %v10536_v15  ;;  %v1814_v57 = vadd.f32 %v1739_v56, %v1654_v53  ;;  %2819 = vperm.xlu0 %5941, %v7860_v26   ;;  %v8004_v26 = vld [vmem:[%s10329_s5 + $0x30] sm:$0xff]  ;;  %v428_v10 = vld [vmem:[%s6343_s18 + $0x1c0] sm:$0xff] }
 0x2fb   : > { %1934 = vperm.xlu1 %5931, %v7988_v39   ;;  %v1973_v41 = vadd.f32 %v1895_v34, %v1813_v6  ;;  %v1591_v6 = vsub.f32 %v7716_v4, %v428_v10  ;;  %v10542_v10 = vld [vmem:[#allocation5_spill] sm:$0xff] }
 0x2fc   : > { %5481 = vmatpush1.bf16.msra.mxu0 %v5480_v5  ;;  %v2718_v61 = vmax.f32 %v2656_v32, 0.0 }
 0x2fd   : > { %v2660_v51 = vpop.f32.mrb[50].mxu1  ;;  %5482 = vmatprep.subr.bf16.mxu0 %v10449_v36  ;;  %v2005_v56 = vmax.f32 %v1973_v41, 0.0  ;;  %v10540_v41 = vld [vmem:[#allocation4_spill] sm:$0xff]  ;;  %v1623_v4 = vmul.f32 %v7527_v50, %v1591_v6 }
 0x2fe   : > { %v2661_v14 = vadd.f32 %v2660_v51, %v10537_v52  ;;  %v2662_v42 = vpop.f32.mrb[51].mxu1  ;;  %v1899_v60 = vpop.permute.xlu1 %1898  ;;  %2751 = vperm.xlu0 %5941, %v8004_v26   ;;  %v1592_v51 = vsub.f32 %v7906_v46, %v429_v22 }
 0x2ff   : > { %v1974_v7 = vadd.f32 %v1899_v60, %v1814_v57  ;;  %5932 = vset.pattern.permute.xlu1 %v10497_v25  ;;  %v1431_v57 = vmul.f32 %v7930_v43, %v7479_v48  ;;  %v10541_v60 = vld [vmem:[#allocation12_spill] sm:$0xff] }
 0x300   : > { %v2719_v35 = vmax.f32 %v2661_v14, 0.0  ;;  %1406 = vperm.xlu1 %5932, %v7998_v19  }
 0x301   : > { %v2006_v13 = vmax.f32 %v1974_v7, 0.0  ;;  %v2665_v0 = vpop.f32.mrb[52].mxu1 }
 0x302   : > { %v5483_v49 = vpack.c.bf16 %v2719_v35, %v2718_v61  ;;  %v2667_v25 = vpop.f32.mrb[53].mxu1  ;;  %v2666_v27 = vadd.f32 %v2665_v0, %v10538_v2  ;;  %2827 = vperm.xlu0 %5941, %v7816_v24   ;;  %v8026_v24 = vld [vmem:[%s10329_s5 + $0x40] sm:$0xff]  ;;  %v1624_v61 = vmul.f32 %v7527_v50, %v1592_v51  ;;  %v1655_v35 = vadd.f32 %v1623_v4, %v1431_v57 }
 0x303   : > { %v8007_v23 = vpack.c.bf16 %v2006_v13, %v2005_v56  ;;  %v8009_v37 = vpop.permute.xlu1 %1370  ;;  %v1747_v25 = vpop.permute.xlu0 %1746 }
 0x304   : > { %5484 = vmatpush1.bf16.msra.mxu0 %v5483_v49  ;;  %1410 = vperm.xlu1 %5932, %v7916_v18   ;;  %v2720_v5 = vmax.f32 %v2666_v27, 0.0 }
 0x305   : > { %5485 = vmatprep.subr.bf16.mxu0 %v10449_v36  ;;  %v2670_v1 = vpop.f32.mrb[54].mxu1  ;;  %5758 = vmatpush1.bf16.msra.mxu1 %v8007_v23 }
 0x306   : > { %v2671_v3 = vadd.f32 %v2670_v1, %v10539_v45  ;;  %v2672_v47 = vpop.f32.mrb[55].mxu1  ;;  %5743 = vmatprep.subr.bf16.mxu1 %v10449_v36  ;;  %2759 = vperm.xlu0 %5941, %v8026_v24   ;;  %v8050_v1 = vld [vmem:[%s10329_s5 + $0x50] sm:$0xff] }
 0x307   : > { %v10543_v47 = vld [vmem:[#allocation44_spill] sm:$0xff] }
 0x308   : > { %v2721_v44 = vmax.f32 %v2671_v3, 0.0  ;;  %5934 = vset.pattern.permute.xlu1 %v10460_v33  ;;  %v1743_v34 = vpop.permute.xlu1 %1742 }
 0x309   : > { %1786 = vperm.xlu1 %5934, %v7910_v16   ;;  %v2675_v53 = vpop.f32.mrb[56].mxu1  ;;  %v1432_v16 = vmul.f32 %v7942_v11, %v7479_v48  ;;  %v1815_v49 = vadd.f32 %v1743_v34, %v1655_v35 }
 0x30a   : > { %v5486_v15 = vpack.c.bf16 %v2721_v44, %v2720_v5  ;;  %v2677_v32 = vpop.f32.mrb[57].mxu1  ;;  %v2676_v52 = vadd.f32 %v2675_v53, %v10540_v41  ;;  %2835 = vperm.xlu0 %5941, %v7874_v59   ;;  %v6105_v59 = vld [vmem:[%s6338_s15 + $0xf0] sm:$0xff]  ;;  %s6250_s15 = smov 115  }
 0x30b   : > { %v1656_v56 = vadd.f32 %v1624_v61, %v1432_v16  ;;  %v1975_v22 = vadd.f32 %v10543_v47, %v1815_v49  ;;  %v431_v16 = vld [vmem:[%s6343_s18 + $0x1d8] sm:$0xff]  ;;  %v2087_v61 = vld [vmem:[%s10327_s3 + $0x60] sm:$0xff] }
 0x30c   : > { %5487 = vmatpush1.bf16.msra.mxu0 %v5486_v15  ;;  %v2722_v7 = vmax.f32 %v2676_v52, 0.0  ;;  %v8063_v52 = vld [vmem:[%s10329_s5 + $0x60] sm:$0xff]  ;;  %v1594_v35 = vsub.f32 %v7727_v20, %v431_v16  ;;  %v1434_v20 = vmul.f32 %v8009_v37, %v7479_v48  ;;  %v10547_v49 = vld [vmem:[#allocation8_spill] sm:$0xff]  ;;  %v10384_v37 = vmov 7  }
 0x30d   : > { %5935 = vset.pattern.permute.xlu1 %v10499_v62  ;;  %v8037_v14 = vpop.permute.xlu1 %1534  ;;  %v2680_v42 = vpop.f32.mrb[58].mxu1  ;;  %5488 = vmatprep.subr.bf16.mxu0 %v10449_v36  ;;  %v1816_v3 = vadd.f32 %v1747_v25, %v1656_v56  ;;  %v2007_v51 = vmax.f32 %v1975_v22, 0.0  ;;  %v2186_v25 = vld [vmem:[%s10327_s3 + $0x5c8] sm:$0xff]  ;;  %v2098_v16 = vld [vmem:[%s10327_s3 + $0x1f8] sm:$0xff] }
 0x30e   : > { %v2681_v46 = vadd.f32 %v2680_v42, %v10541_v60  ;;  %1942 = vperm.xlu1 %5935, %v7935_v40   ;;  %v2682_v43 = vpop.f32.mrb[59].mxu1  ;;  %2767 = vperm.xlu0 %5941, %v8050_v1   ;;  %v2088_v42 = vld [vmem:[%s10327_s3 + $0x68] sm:$0xff]  ;;  %v10545_v60 = vmov 6  }
 0x30f   : > { %v10546_v43 = vld [vmem:[#allocation19_spill] sm:$0xff]  ;;  %3393 = vmatprep.mubr.f32.mxu1 %v2186_v25 }
 0x310   : > { %v2723_v11 = vmax.f32 %v2681_v46, 0.0  ;;  %v10553_v25 = vld [vmem:[#allocation15_spill] sm:$0xff] }
 0x311   : > { %v8044_v13 = vpop.permute.xlu1 %1538  ;;  %v2685_v0 = vpop.f32.mrb[60].mxu1 }
 0x312   : > { %v5489_v2 = vpack.c.bf16 %v2723_v11, %v2722_v7  ;;  %5936 = vset.pattern.permute.xlu1 %v10460_v33  ;;  %v2687_v27 = vpop.f32.mrb[61].mxu1  ;;  %v2686_v45 = vadd.f32 %v2685_v0, %v10542_v10  ;;  %v10544_v33 = vld [vmem:[#allocation17_spill] sm:$0xff]  ;;  %2843 = vperm.xlu0 %5941, %v7898_v17   ;;  %v8093_v7 = vld [vmem:[%s10329_s5 + $0x8] sm:$0xff]  ;;  %v2089_v0 = vld [vmem:[%s10327_s3 + $0xb0] sm:$0xff] }
 0x313   : > { %1790 = vperm.xlu1 %5936, %v6105_v59   ;;  %v10548_v59 = vld [vmem:[#allocation23_spill] sm:$0xff]  ;;  %v2091_v10 = vld [vmem:[%s10327_s3 + $0x100] sm:$0xff] }
 0x314   : > { %5490 = vmatpush1.bf16.msra.mxu0 %v5489_v2  ;;  %v2724_v15 = vmax.f32 %v2686_v45, 0.0  ;;  %v10549_v45 = vld [vmem:[#allocation29_spill] sm:$0xff] }
 0x315   : > { %v2690_v5 = vpop.f32.mrb[62].mxu1  ;;  %5491 = vmatprep.subr.bf16.mxu0 %v10449_v36 }
 0x316   : > { %v2691_v44 = vadd.f32 %v2690_v5, %v10544_v33  ;;  %v1907_v34 = vpop.permute.xlu1 %1906  ;;  %v2692_v6 = vpop.f32.mrb[63].mxu1  ;;  %2775 = vperm.xlu0 %5941, %v8063_v52   ;;  %v10550_v33 = vld [vmem:[#allocation25_spill] sm:$0xff] }
 0x317   : > { %v1976_v53 = vadd.f32 %v1907_v34, %v1816_v3  ;;  %1794 = vperm.xlu1 %5936, %v7971_v58   ;;  %v2085_v58 = vld [vmem:[%s10327_s3 + $0x10] sm:$0xff]  ;;  %v1433_v3 = vmul.f32 %v10549_v45, %v7479_v48  ;;  %v10551_v6 = vld [vmem:[#allocation45_spill] sm:$0xff] }
 0x318   : > { %v2725_v32 = vmax.f32 %v2691_v44, 0.0  ;;  %v2093_v44 = vld [vmem:[%s10327_s3 + $0x150] sm:$0xff] }
 0x319   : > { %v2008_v57 = vmax.f32 %v1976_v53, 0.0 }
 0x31a   : > { %v5492_v41 = vpack.c.bf16 %v2725_v32, %v2724_v15  ;;  %2851 = vperm.xlu0 %5941, %v7916_v18   ;;  %v2096_v15 = vld [vmem:[%s10327_s3 + $0x1a8] sm:$0xff] }
 0x31b   : > { %v8066_v4 = vpack.c.bf16 %v2008_v57, %v2007_v51  ;;  %5937 = vset.pattern.permute.xlu1 %v10499_v62  ;;  %v8069_v17 = vpop.permute.xlu1 %1374  ;;  %v430_v62 = vld [vmem:[%s6343_s18 + $0x1d0] sm:$0xff]  ;;  %v10552_v51 = vld [vmem:[#allocation10_spill] sm:$0xff]  ;;  %v2095_v57 = vld [vmem:[%s10327_s3 + $0x1a0] sm:$0xff] }
 0x31c   : > { %1954 = vperm.xlu1 %5937, %v7916_v18   ;;  %5493 = vmatpush1.bf16.msra.mxu0 %v5492_v41  ;;  %v2090_v18 = vld [vmem:[%s10327_s3 + $0xb8] sm:$0xff]  ;;  %v1593_v11 = vsub.f32 %v7966_v8, %v430_v62  ;;  %v2092_v8 = vld [vmem:[%s10327_s3 + $0x108] sm:$0xff]  ;;  %v2097_v62 = vld [vmem:[%s10327_s3 + $0x1f0] sm:$0xff] }
 0x31d   : > { %5759 = vmatpush1.bf16.msra.mxu1 %v8066_v4  ;;  %5494 = vmatprep.subr.bf16.mxu0 %v10449_v36 }
 0x31e   : > { %5744 = vmatprep.subr.bf16.mxu1 %v10449_v36  ;;  %2783 = vperm.xlu0 %5941, %v7645_v9   ;;  %v1626_v9 = vmul.f32 %v7527_v50, %v1594_v35  ;;  %v1625_v2 = vmul.f32 %v7527_v50, %v1593_v11  ;;  %v1435_v11 = vmul.f32 %v8069_v17, %v7479_v48 }
 0x31f   : > { %2919 = vmatmul.mubr.f32.vlgmr.msra.gmra.mrb[2].mxu0 %v2085_v58 }
 0x320   : > { %5939 = vset.pattern.permute.xlu1 %v10545_v60  ;;  %v1751_v46 = vpop.permute.xlu1 %1750  ;;  %5496 = vmatpush1.bf16.msra.mxu0 %v10546_v43  ;;  %v1658_v27 = vadd.f32 %v1626_v9, %v1434_v20  ;;  %v1657_v5 = vadd.f32 %v1625_v2, %v1433_v3  ;;  %v2100_v60 = vld [vmem:[%s10327_s3 + $0x248] sm:$0xff]  ;;  %v432_v43 = vld [vmem:[%s6343_s18 + $0x1e0] sm:$0xff]  ;;  %v1436_v9 = vmul.f32 %v10553_v25, %v7479_v48 }
 0x321   : > { %3116 = vperm.xlu1 %5939, %v8093_v7   ;;  %2923 = vmatprep.mubr.f32.mxu0 %v2088_v42  ;;  %v1595_v35 = vsub.f32 %v8037_v14, %v432_v43  ;;  %v2103_v14 = vld [vmem:[%s10327_s3 + $0x2e0] sm:$0xff]  ;;  %v2124_v25 = vld [vmem:[%s10327_s3 + $0x608] sm:$0xff] }
 0x322   : > { %5497 = vmatprep.subr.bf16.mxu0 %v10449_v36  ;;  %5971 = vset.pattern.permute.xlu0 %v10384_v37  ;;  %v1817_v34 = vadd.f32 %v1751_v46, %v1657_v5  ;;  %v2102_v46 = vld [vmem:[%s10327_s3 + $0x298] sm:$0xff]  ;;  %v2115_v43 = vld [vmem:[%s10327_s3 + $0x4c0] sm:$0xff] }
 0x323   : > { %2924 = vmatmul.mubr.f32.gmra.mrb[4].mxu0 %v2087_v61  ;;  %3497 = vperm.xlu0 %5971, %v7762_v12   ;;  %v2094_v12 = vld [vmem:[%s10327_s3 + $0x158] sm:$0xff]  ;;  %v1627_v20 = vmul.f32 %v7527_v50, %v1595_v35  ;;  %v2117_v35 = vld [vmem:[%s10327_s3 + $0x510] sm:$0xff] }
 0x324   : > { %v1755_v56 = vpop.permute.xlu1 %1754  ;;  %5499 = vmatpush1.bf16.msra.mxu0 %v10547_v49  ;;  %2928 = vmatprep.mubr.f32.mxu0 %v2090_v18  ;;  %v6108_v18 = vld [vmem:[%s10329_s5 + $0x70] sm:$0xff]  ;;  %v1759_v49 = vpop.permute.xlu0 %1758 }
 0x325   : > { %3120 = vperm.xlu1 %5939, %v7956_v54   ;;  %5500 = vmatprep.subr.bf16.mxu0 %v10449_v36  ;;  %v1818_v47 = vadd.f32 %v1755_v56, %v1658_v27  ;;  %v8209_v56 = vld [vmem:[%s10329_s5 + $0x80] sm:$0xff]  ;;  %v1659_v17 = vadd.f32 %v1627_v20, %v1435_v11 }
 0x326   : > { %v2119_v11 = vld [vmem:[%s10327_s3 + $0x560] sm:$0xff] }
 0x327   : > { %2929 = vmatmul.mubr.f32.gmra.mrb[6].mxu0 %v2089_v0  ;;  %3505 = vperm.xlu0 %5971, %v7956_v54   ;;  %v1978_v53 = vadd.f32 %v10551_v6, %v1818_v47  ;;  %v2105_v0 = vld [vmem:[%s10327_s3 + $0x330] sm:$0xff]  ;;  %v1819_v27 = vadd.f32 %v1759_v49, %v1659_v17  ;;  %v2110_v47 = vld [vmem:[%s10327_s3 + $0x3d8] sm:$0xff]  ;;  %v2112_v6 = vld [vmem:[%s10327_s3 + $0x428] sm:$0xff] }
 0x328   : > { %5502 = vmatpush1.bf16.msra.mxu0 %v10548_v59  ;;  %2933 = vmatprep.mubr.f32.mxu0 %v2092_v8  ;;  %v8228_v8 = vld [vmem:[%s10329_s5 + $0x90] sm:$0xff] }
 0x329   : > { %3128 = vperm.xlu1 %5939, %v7980_v29   ;;  %v8127_v22 = vpop.permute.xlu1 %1546  ;;  %5503 = vmatprep.subr.bf16.mxu0 %v10449_v36  ;;  %v2010_v41 = vmax.f32 %v1978_v53, 0.0  ;;  %v2121_v17 = vld [vmem:[%s10327_s3 + $0x5b0] sm:$0xff] }
 0x32b   : > { %2934 = vmatmul.mubr.f32.gmra.mrb[8].mxu0 %v2091_v10  ;;  %3513 = vperm.xlu0 %5971, %v7980_v29   ;;  %v2107_v10 = vld [vmem:[%s10327_s3 + $0x380] sm:$0xff] }
 0x32c   : > { %5505 = vmatpush1.bf16.msra.mxu0 %v10550_v33  ;;  %2938 = vmatprep.mubr.f32.mxu0 %v2094_v12  ;;  %v2109_v33 = vld [vmem:[%s10327_s3 + $0x3d0] sm:$0xff] }
 0x32d   : > { %3136 = vperm.xlu1 %5939, %v8004_v26   ;;  %5506 = vmatprep.subr.bf16.mxu0 %v10449_v36 }
 0x32e   : > { %v1911_v32 = vpop.permute.xlu1 %1910 }
 0x32f   : > { %v1977_v54 = vadd.f32 %v1911_v32, %v1817_v34  ;;  %2939 = vmatmul.mubr.f32.gmra.mrb[10].mxu0 %v2093_v44  ;;  %3521 = vperm.xlu0 %5971, %v8004_v26   ;;  %v2099_v26 = vld [vmem:[%s10327_s3 + $0x240] sm:$0xff] }
 0x330   : > { %5508 = vmatpush1.bf16.msra.mxu0 %v10552_v51  ;;  %2943 = vmatprep.mubr.f32.mxu0 %v2096_v15  ;;  %v2111_v32 = vld [vmem:[%s10327_s3 + $0x420] sm:$0xff]  ;;  %v434_v51 = vld [vmem:[%s6343_s18 + $0x1f0] sm:$0xff] }
 0x331   : > { %v2009_v58 = vmax.f32 %v1977_v54, 0.0  ;;  %3144 = vperm.xlu1 %5939, %v8026_v24   ;;  %5509 = vmatprep.subr.bf16.mxu0 %v10449_v36  ;;  %v2114_v54 = vld [vmem:[%s10327_s3 + $0x478] sm:$0xff] }
 0x333   : > { %v8154_v42 = vpack.c.bf16 %v2010_v41, %v2009_v58  ;;  %v8156_v29 = vpop.permute.xlu1 %1382  ;;  %2944 = vmatmul.mubr.f32.gmra.mrb[12].mxu0 %v2095_v57  ;;  %3529 = vperm.xlu0 %5971, %v8026_v24   ;;  %v433_v24 = vld [vmem:[%s6343_s18 + $0x1e8] sm:$0xff]  ;;  %v435_v57 = vld [vmem:[%s6343_s18 + $0x1f8] sm:$0xff]  ;;  %v1771_v41 = vpop.permute.xlu0 %1770 }
 0x334   : > { %5511 = vmatpush1.bf16.msra.mxu0 %v7809_v21  ;;  %2948 = vmatprep.mubr.f32.mxu0 %v2098_v16  ;;  %v10554_v16 = vld [vmem:[#allocation27_spill] sm:$0xff] }
 0x335   : > { %3152 = vperm.xlu1 %5939, %v8050_v1   ;;  %5760 = vmatpush1.bf16.msra.mxu1 %v8154_v42 }
 0x336   : > { %5512 = vmatprep.subr.bf16.mxu0 %v10449_v36  ;;  %5745 = vmatprep.subr.bf16.mxu1 %v10449_v36 }
 0x337   : > { %v8170_v21 = vpop.permute.xlu1 %1386  ;;  %2949 = vmatmul.mubr.f32.gmra.mrb[14].mxu0 %v2097_v62  ;;  %3537 = vperm.xlu0 %5971, %v8050_v1   ;;  %v2104_v1 = vld [vmem:[%s10327_s3 + $0x2e8] sm:$0xff] }
 0x338   : > { %5514 = vmatpush1.bf16.msra.mxu0 %v7866_v38  ;;  %2953 = vmatprep.mubr.f32.mxu0 %v2100_v60  ;;  %v2101_v38 = vld [vmem:[%s10327_s3 + $0x290] sm:$0xff]  ;;  %v2116_v62 = vld [vmem:[%s10327_s3 + $0x4c8] sm:$0xff]  ;;  %v1598_v60 = vsub.f32 %v8127_v22, %v435_v57  ;;  %v2118_v22 = vld [vmem:[%s10327_s3 + $0x518] sm:$0xff] }
 0x339   : > { %3160 = vperm.xlu1 %5939, %v8063_v52   ;;  %5515 = vmatprep.subr.bf16.mxu0 %v10449_v36 }
 0x33b   : > { %2954 = vmatmul.mubr.f32.gmra.mrb[16].mxu0 %v2099_v26  ;;  %3545 = vperm.xlu0 %5971, %v8063_v52   ;;  %v1437_v26 = vmul.f32 %v8156_v29, %v7479_v48  ;;  %v1630_v29 = vmul.f32 %v7527_v50, %v1598_v60 }
 0x33c   : > { %v1763_v61 = vpop.permute.xlu1 %1762  ;;  %5517 = vmatpush1.bf16.msra.mxu0 %v7927_v55  ;;  %2958 = vmatprep.mubr.f32.mxu0 %v2102_v46  ;;  %v1596_v55 = vsub.f32 %v8044_v13, %v433_v24  ;;  %v8280_v46 = vpop.permute.xlu0 %1782 }
 0x33d   : > { %3168 = vperm.xlu1 %5939, %v6108_v18   ;;  %5518 = vmatprep.subr.bf16.mxu0 %v10449_v36 }
 0x33e   : > { %v1628_v52 = vmul.f32 %v7527_v50, %v1596_v55 }
 0x33f   : > { %2959 = vmatmul.mubr.f32.gmra.mrb[18].mxu0 %v2101_v38  ;;  %3553 = vperm.xlu0 %5971, %v6108_v18  }
 0x340   : > { %5520 = vmatpush1.bf16.msra.mxu0 %v8007_v23  ;;  %2963 = vmatprep.mubr.f32.mxu0 %v2104_v1  ;;  %v2106_v23 = vld [vmem:[%s10327_s3 + $0x338] sm:$0xff]  ;;  %v1660_v59 = vadd.f32 %v1628_v52, %v1436_v9  ;;  %v1927_v55 = vpop.permute.xlu0 %1926 }
 0x341   : > { %3176 = vperm.xlu1 %5939, %v8209_v56   ;;  %v8212_v13 = vpop.permute.xlu1 %1550  ;;  %5521 = vmatprep.subr.bf16.mxu0 %v10449_v36 }
 0x342   : > { %v1820_v45 = vadd.f32 %v1763_v61, %v1660_v59  ;;  %v437_v59 = vld [vmem:[%s6343_s18 + $0x208] sm:$0xff] }
 0x343   : > { %2964 = vmatmul.mubr.f32.gmra.mrb[20].mxu0 %v2103_v14 }
 0x344   : > { %5523 = vmatpush1.bf16.msra.mxu0 %v8066_v4  ;;  %2968 = vmatprep.mubr.f32.mxu0 %v2106_v23  ;;  %v2108_v4 = vld [vmem:[%s10327_s3 + $0x388] sm:$0xff] }
 0x345   : > { %3184 = vperm.xlu1 %5939, %v8228_v8   ;;  %5524 = vmatprep.subr.bf16.mxu0 %v10449_v36 }
 0x346   : > { %v1919_v2 = vpop.permute.xlu1 %1918 }
 0x347   : > { %2969 = vmatmul.mubr.f32.gmra.mrb[22].mxu0 %v2105_v0  ;;  %v1979_v3 = vadd.f32 %v1919_v2, %v1819_v27  ;;  %v2123_v2 = vld [vmem:[%s10327_s3 + $0x600] sm:$0xff]  ;;  %v2126_v27 = vld [vmem:[%s10327_s3 + $0x658] sm:$0xff] }
 0x348   : > { %5526 = vmatpush1.bf16.msra.mxu0 %v8154_v42  ;;  %2973 = vmatprep.mubr.f32.mxu0 %v2108_v4  ;;  %v1597_v42 = vsub.f32 %v10554_v16, %v434_v51  ;;  %v10556_v51 = vld [vmem:[#allocation7_spill] sm:$0xff]  ;;  %v1939_v16 = vpop.permute.xlu0 %1938 }
 0x349   : > { %3192 = vperm.xlu1 %5939, %v7794_v30   ;;  %5527 = vmatprep.subr.bf16.mxu0 %v10449_v36  ;;  %v2011_v44 = vmax.f32 %v1979_v3, 0.0  ;;  %v8250_v30 = vld [vmem:[%s10329_s5 + $0xb0] sm:$0xff]  ;;  %v1439_v57 = vmul.f32 %v10556_v51, %v7479_v48 }
 0x34a   : > { %v1923_v12 = vpop.permute.xlu1 %1922  ;;  %v1629_v24 = vmul.f32 %v7527_v50, %v1597_v42  ;;  %v2125_v3 = vld [vmem:[%s10327_s3 + $0x650] sm:$0xff] }
 0x34b   : > { %v1980_v5 = vadd.f32 %v1923_v12, %v1820_v45  ;;  %2974 = vmatmul.mubr.f32.gmra.mrb[24].mxu0 %v2107_v10  ;;  %v436_v10 = vld [vmem:[%s6343_s18 + $0x200] sm:$0xff] }
 0x34c   : > { %2978 = vmatprep.mubr.f32.mxu0 %v2110_v47  ;;  %v1661_v38 = vadd.f32 %v1629_v24, %v1437_v26  ;;  %v10555_v47 = vld [vmem:[#allocation11_spill] sm:$0xff] }
 0x34d   : > { %v2012_v34 = vmax.f32 %v1980_v5, 0.0  ;;  %3200 = vperm.xlu1 %5939, %v8250_v30   ;;  %v1600_v12 = vsub.f32 %v10555_v47, %v437_v59  ;;  %v2128_v5 = vld [vmem:[%s10327_s3 + $0x6a8] sm:$0xff]  ;;  %v440_v47 = vld [vmem:[%s6343_s18 + $0x220] sm:$0xff] }
 0x34f   : > { %v5528_v53 = vpack.c.bf16 %v2012_v34, %v2011_v44  ;;  %v8256_v15 = vpop.permute.xlu1 %1394  ;;  %2979 = vmatmul.mubr.f32.gmra.mrb[26].mxu0 %v2109_v33  ;;  %v1599_v33 = vsub.f32 %v8212_v13, %v436_v10  ;;  %v2130_v13 = vld [vmem:[%s10327_s3 + $0x6f8] sm:$0xff] }
 0x350   : > { %2983 = vmatprep.mubr.f32.mxu0 %v2112_v6  ;;  %v1440_v44 = vmul.f32 %v8256_v15, %v7479_v48  ;;  %v2127_v6 = vld [vmem:[%s10327_s3 + $0x6a0] sm:$0xff] }
 0x351   : > { %3208 = vperm.xlu1 %5939, %v7803_v28   ;;  %5529 = vmatpush1.bf16.msra.mxu0 %v5528_v53  ;;  %v2113_v28 = vld [vmem:[%s10327_s3 + $0x470] sm:$0xff] }
 0x352   : > { %5761 = vmatpush1.bf16.msra.mxu1 %v5528_v53  ;;  %5530 = vmatprep.subr.bf16.mxu0 %v10449_v36  ;;  %v1632_v53 = vmul.f32 %v7527_v50, %v1600_v12 }
 0x353   : > { %2984 = vmatmul.mubr.f32.gmra.mrb[28].mxu0 %v2111_v32  ;;  %5746 = vmatprep.subr.bf16.mxu1 %v10449_v36  ;;  %v1631_v32 = vmul.f32 %v7527_v50, %v1599_v33  ;;  %v2141_v33 = vld [vmem:[%s10327_s3 + $0x8d0] sm:$0xff] }
 0x354   : > { %v1767_v58 = vpop.permute.xlu1 %1766  ;;  %2988 = vmatprep.mubr.f32.mxu0 %v2114_v54  ;;  %v1664_v15 = vadd.f32 %v1632_v53, %v1440_v44  ;;  %v2129_v54 = vld [vmem:[%s10327_s3 + $0x6f0] sm:$0xff] }
 0x355   : > { %3216 = vperm.xlu1 %5939, %v7988_v39   ;;  %v1438_v39 = vmul.f32 %v8170_v21, %v7479_v48  ;;  %v1821_v1 = vadd.f32 %v1767_v58, %v1661_v38  ;;  %v2120_v21 = vld [vmem:[%s10327_s3 + $0x568] sm:$0xff]  ;;  %v1663_v42 = vadd.f32 %v1631_v32, %v1439_v57 }
 0x357   : > { %2989 = vmatmul.mubr.f32.gmra.mrb[30].mxu0 %v2113_v28  ;;  %v1662_v18 = vadd.f32 %v1630_v29, %v1438_v39  ;;  %v1981_v20 = vadd.f32 %v1927_v55, %v1821_v1  ;;  %v2132_v28 = vld [vmem:[%s10327_s3 + $0x748] sm:$0xff]  ;;  %v439_v39 = vld [vmem:[%s6343_s18 + $0x218] sm:$0xff] }
 0x358   : > { %2993 = vmatprep.mubr.f32.mxu0 %v2116_v62  ;;  %v2131_v62 = vld [vmem:[%s10327_s3 + $0x740] sm:$0xff] }
 0x359   : > { %3224 = vperm.xlu1 %5939, %v7935_v40   ;;  %v8289_v61 = vpop.permute.xlu1 %1558  ;;  %v1822_v14 = vadd.f32 %v1771_v41, %v1662_v18  ;;  %v2013_v49 = vmax.f32 %v1981_v20, 0.0  ;;  %v438_v18 = vld [vmem:[%s6343_s18 + $0x210] sm:$0xff]  ;;  %v2138_v20 = vld [vmem:[%s10327_s3 + $0x838] sm:$0xff] }
 0x35b   : > { %2994 = vmatmul.mubr.f32.gmra.mrb[32].mxu0 %v2115_v43 }
 0x35c   : > { %2998 = vmatprep.mubr.f32.mxu0 %v2118_v22  ;;  %v2133_v22 = vld [vmem:[%s10327_s3 + $0x790] sm:$0xff] }
 0x35d   : > { %3232 = vperm.xlu1 %5939, %v7998_v19   ;;  %v8299_v40 = vpop.permute.xlu1 %1562  ;;  %v2122_v19 = vld [vmem:[%s10327_s3 + $0x5b8] sm:$0xff] }
 0x35e   : > { %v1602_v1 = vsub.f32 %v8299_v40, %v439_v39  ;;  %v6113_v40 = vld [vmem:[%s10329_s5 + $0x98] sm:$0xff] }
 0x35f   : > { %2999 = vmatmul.mubr.f32.gmra.mrb[34].mxu0 %v2117_v35  ;;  %v2136_v35 = vld [vmem:[%s10327_s3 + $0x7e8] sm:$0xff] }
 0x360   : > { %3003 = vmatprep.mubr.f32.mxu0 %v2120_v21 }
 0x361   : > { %5940 = vset.pattern.permute.xlu1 %v6244_v63 }
 0x362   : > { %2791 = vperm.xlu1 %5940, %v8209_v56   ;;  %v1931_v23 = vpop.permute.xlu1 %1930 }
 0x363   : > { %v1982_v52 = vadd.f32 %v1931_v23, %v1822_v14  ;;  %3004 = vmatmul.mubr.f32.gmra.mrb[36].mxu0 %v2119_v11  ;;  %v2135_v11 = vld [vmem:[%s10327_s3 + $0x7e0] sm:$0xff]  ;;  %v1947_v14 = vpop.permute.xlu0 %1946 }
 0x364   : > { %3008 = vmatprep.mubr.f32.mxu0 %v2122_v19  ;;  %v1601_v19 = vsub.f32 %v8289_v61, %v438_v18  ;;  %v2137_v61 = vld [vmem:[%s10327_s3 + $0x830] sm:$0xff] }
 0x365   : > { %v2014_v0 = vmax.f32 %v1982_v52, 0.0 }
 0x366   : > { %5942 = vset.pattern.permute.xlu1 %v10384_v37 }
 0x367   : > { %v5531_v9 = vpack.c.bf16 %v2014_v0, %v2013_v49  ;;  %3561 = vperm.xlu1 %5942, %v8209_v56   ;;  %v8320_v4 = vpop.permute.xlu1 %1398  ;;  %3009 = vmatmul.mubr.f32.gmra.mrb[38].mxu0 %v2121_v17  ;;  %v6112_v56 = vld [vmem:[%s10329_s5 + $0x88] sm:$0xff]  ;;  %v10557_v17 = vld [vmem:[#allocation47_spill] sm:$0xff] }
 0x368   : > { %3013 = vmatprep.mubr.f32.mxu0 %v2124_v25  ;;  %v1441_v52 = vmul.f32 %v8320_v4, %v7479_v48  ;;  %v1442_v49 = vmul.f32 %v10557_v17, %v7479_v48  ;;  %v2140_v0 = vld [vmem:[%s10327_s3 + $0x888] sm:$0xff]  ;;  %v1633_v25 = vmul.f32 %v7527_v50, %v1601_v19 }
 0x369   : > { %5532 = vmatpush1.bf16.msra.mxu0 %v5531_v9  ;;  %5762 = vmatpush1.bf16.msra.mxu1 %v5531_v9  ;;  %v1951_v9 = vpop.permute.xlu0 %1950 }
 0x36a   : > { %5533 = vmatprep.subr.bf16.mxu0 %v10449_v36  ;;  %5747 = vmatprep.subr.bf16.mxu1 %v10449_v36  ;;  %v1665_v4 = vadd.f32 %v1633_v25, %v1441_v52  ;;  %v2152_v52 = vld [vmem:[%s10327_s3 + $0x78] sm:$0xff]  ;;  %v2154_v25 = vld [vmem:[%s10327_s3 + $0xc8] sm:$0xff] }
 0x36b   : > { %3565 = vperm.xlu1 %5942, %v6112_v56   ;;  %3014 = vmatmul.mubr.f32.gmra.mrb[40].mxu0 %v2123_v2  ;;  %v2139_v56 = vld [vmem:[%s10327_s3 + $0x880] sm:$0xff] }
 0x36c   : > { %v1775_v45 = vpop.permute.xlu1 %1774  ;;  %3018 = vmatprep.mubr.f32.mxu0 %v2126_v27  ;;  %v8414_v27 = vld [vmem:[%s10329_s5 + $0x18] sm:$0xff] }
 0x36d   : > { %v1823_v60 = vadd.f32 %v1775_v45, %v1663_v42  ;;  %v2142_v45 = vld [vmem:[%s10327_s3 + $0x8d8] sm:$0xff] }
 0x36e   : > { %v2146_v42 = vld [vmem:[%s10327_s3 + $0x978] sm:$0xff] }
 0x36f   : > { %5943 = vset.pattern.permute.xlu1 %v6244_v63  ;;  %3019 = vmatmul.mubr.f32.gmra.mrb[42].mxu0 %v2125_v3  ;;  %v8423_v3 = vpop.permute.xlu0 %3112 }
 0x370   : > { %2731 = vperm.xlu1 %5943, %v8093_v7   ;;  %v1779_v34 = vpop.permute.xlu1 %1778  ;;  %3023 = vmatprep.mubr.f32.mxu0 %v2128_v5  ;;  %v1825_v5 = vadd.f32 %v8280_v46, %v1665_v4 }
 0x371   : > { %v1824_v41 = vadd.f32 %v1779_v34, %v1664_v15  ;;  %v2144_v34 = vld [vmem:[%s10327_s3 + $0x928] sm:$0xff] }
 0x373   : > { %3024 = vmatmul.mubr.f32.gmra.mrb[44].mxu0 %v2127_v6  ;;  %v1984_v26 = vadd.f32 %v1939_v16, %v1824_v41  ;;  %v1603_v6 = vsub.f32 %v7772_v31, %v440_v47  ;;  %v8441_v51 = vpop.permute.xlu0 %3124  ;;  %v2192_v47 = vld [vmem:[%s10327_s3 + $0x6b8] sm:$0xff] }
 0x374   : > { %5944 = vset.pattern.permute.xlu1 %v10384_v37  ;;  %3028 = vmatprep.mubr.f32.mxu0 %v2130_v13  ;;  %v441_v13 = vld [vmem:[%s6343_s18 + $0x228] sm:$0xff] }
 0x375   : > { %3501 = vperm.xlu1 %5944, %v8093_v7   ;;  %v8362_v58 = vpop.permute.xlu1 %1570  ;;  %v2134_v7 = vld [vmem:[%s10327_s3 + $0x798] sm:$0xff]  ;;  %v2016_v29 = vmax.f32 %v1984_v26, 0.0  ;;  %v1635_v57 = vmul.f32 %v7527_v50, %v1603_v6  ;;  %v2148_v26 = vld [vmem:[%s10327_s3 + $0x9c8] sm:$0xff] }
 0x376   : > { %v1604_v31 = vsub.f32 %v8362_v58, %v441_v13  ;;  %v2145_v58 = vld [vmem:[%s10327_s3 + $0x970] sm:$0xff]  ;;  %v2193_v13 = vld [vmem:[%s10327_s3 + $0x700] sm:$0xff] }
 0x377   : > { %3029 = vmatmul.mubr.f32.gmra.mrb[46].mxu0 %v2129_v54  ;;  %v2143_v54 = vld [vmem:[%s10327_s3 + $0x920] sm:$0xff] }
 0x378   : > { %3033 = vmatprep.mubr.f32.mxu0 %v2132_v28  ;;  %v6115_v28 = vld [vmem:[%s10329_s5 + $0xa0] sm:$0xff] }
 0x379   : > { %5945 = vset.pattern.permute.xlu1 %v6244_v63 }
 0x37a   : > { %2799 = vperm.xlu1 %5945, %v8228_v8   ;;  %v1935_v43 = vpop.permute.xlu1 %1934 }
 0x37b   : > { %v1983_v24 = vadd.f32 %v1935_v43, %v1823_v60  ;;  %3034 = vmatmul.mubr.f32.gmra.mrb[48].mxu0 %v2131_v62 }
 0x37c   : > { %3038 = vmatprep.mubr.f32.mxu0 %v2134_v7  ;;  %v1636_v7 = vmul.f32 %v7527_v50, %v1604_v31  ;;  %v2195_v31 = vld [vmem:[%s10327_s3 + $0x750] sm:$0xff] }
 0x37d   : > { %v2015_v38 = vmax.f32 %v1983_v24, 0.0  ;;  %v8463_v24 = vpop.permute.xlu0 %3132 }
 0x37e   : > { %5946 = vset.pattern.permute.xlu1 %v10384_v37 }
 0x37f   : > { %v5534_v21 = vpack.c.bf16 %v2016_v29, %v2015_v38  ;;  %3569 = vperm.xlu1 %5946, %v8228_v8   ;;  %v1407_v55 = vpop.permute.xlu1 %1406  ;;  %3039 = vmatmul.mubr.f32.gmra.mrb[50].mxu0 %v2133_v22  ;;  %v1634_v8 = vmul.f32 %v7527_v50, %v1602_v1  ;;  %v2147_v22 = vld [vmem:[%s10327_s3 + $0x9c0] sm:$0xff]  ;;  %v2150_v50 = vld [vmem:[%s10327_s3 + $0x28] sm:$0xff] }
 0x380   : > { %3043 = vmatprep.mubr.f32.mxu0 %v2136_v35  ;;  %v1443_v32 = vmul.f32 %v1407_v55, %v7479_v48  ;;  %v6116_v35 = vld [vmem:[%s10329_s5 + $0xa8] sm:$0xff] }
 0x381   : > { %5535 = vmatpush1.bf16.msra.mxu0 %v5534_v21  ;;  %5763 = vmatpush1.bf16.msra.mxu1 %v5534_v21  ;;  %v1666_v2 = vadd.f32 %v1634_v8, %v1442_v49  ;;  %v8474_v21 = vpop.permute.xlu0 %3140  ;;  %v2149_v8 = vld [vmem:[%s10327_s3 + $0x20] sm:$0xff]  ;;  %v2151_v49 = vld [vmem:[%s10327_s3 + $0x70] sm:$0xff] }
 0x382   : > { %5536 = vmatprep.subr.bf16.mxu0 %v10449_v36  ;;  %5748 = vmatprep.subr.bf16.mxu1 %v10449_v36  ;;  %v1667_v60 = vadd.f32 %v1635_v57, %v1443_v32  ;;  %v2160_v32 = vld [vmem:[%s10327_s3 + $0x1b8] sm:$0xff]  ;;  %v2159_v57 = vld [vmem:[%s10327_s3 + $0x1b0] sm:$0xff] }
 0x383   : > { %3573 = vperm.xlu1 %5946, %v6113_v40   ;;  %v1411_v23 = vpop.permute.xlu1 %1410  ;;  %3044 = vmatmul.mubr.f32.gmra.mrb[52].mxu0 %v2135_v11 }
 0x384   : > { %3048 = vmatprep.mubr.f32.mxu0 %v2138_v20  ;;  %v1444_v62 = vmul.f32 %v1411_v23, %v7479_v48  ;;  %v8480_v20 = vld [vmem:[%s10329_s5 + $0x28] sm:$0xff]  ;;  %v2185_v23 = vld [vmem:[%s10327_s3 + $0x5c0] sm:$0xff] }
 0x385   : > { %v8488_v40 = vpop.permute.xlu0 %3148 }
 0x386   : > { %v1668_v39 = vadd.f32 %v1636_v7, %v1444_v62  ;;  %10558 = vst [vmem:[#allocation30_spill] sm:$0xff] %v8488_v40  ;;  %v2161_v62 = vld [vmem:[%s10327_s3 + $0x200] sm:$0xff]  ;;  %v2200_v7 = vld [vmem:[%s10327_s3 + $0x7f8] sm:$0xff] }
 0x387   : > { %5947 = vset.pattern.permute.xlu1 %v6244_v63  ;;  %3049 = vmatmul.mubr.f32.gmra.mrb[54].mxu0 %v2137_v61  ;;  %v2188_v61 = vld [vmem:[%s10327_s3 + $0x618] sm:$0xff] }
 0x388   : > { %2739 = vperm.xlu1 %5947, %v8414_v27   ;;  %v1787_v59 = vpop.permute.xlu1 %1786  ;;  %3053 = vmatprep.mubr.f32.mxu0 %v2140_v0  ;;  %v2187_v0 = vld [vmem:[%s10327_s3 + $0x610] sm:$0xff] }
 0x389   : > { %v1826_v10 = vadd.f32 %v1787_v59, %v1666_v2  ;;  %v8518_v4 = vpop.permute.xlu0 %3156  ;;  %v2153_v59 = vld [vmem:[%s10327_s3 + $0xc0] sm:$0xff] }
 0x38a   : > { %10559 = vst [vmem:[#allocation36_spill] sm:$0xff] %v8518_v4 }
 0x38b   : > { %3054 = vmatmul.mubr.f32.gmra.mrb[56].mxu0 %v2139_v56  ;;  %v1986_v12 = vadd.f32 %v1947_v14, %v1826_v10  ;;  %v2189_v56 = vld [vmem:[%s10327_s3 + $0x660] sm:$0xff]  ;;  %v2156_v10 = vld [vmem:[%s10327_s3 + $0x118] sm:$0xff] }
 0x38c   : > { %5948 = vset.pattern.permute.xlu1 %v10384_v37  ;;  %3058 = vmatprep.mubr.f32.mxu0 %v2142_v45 }
 0x38d   : > { %3509 = vperm.xlu1 %5948, %v8414_v27   ;;  %v1943_v44 = vpop.permute.xlu1 %1942  ;;  %v2018_v46 = vmax.f32 %v1986_v12, 0.0  ;;  %v2155_v12 = vld [vmem:[%s10327_s3 + $0x110] sm:$0xff] }
 0x38e   : > { %v1985_v53 = vadd.f32 %v1943_v44, %v1825_v5  ;;  %v8540_v5 = vpop.permute.xlu0 %3164  ;;  %v2158_v44 = vld [vmem:[%s10327_s3 + $0x168] sm:$0xff] }
 0x38f   : > { %3059 = vmatmul.mubr.f32.gmra.mrb[58].mxu0 %v2141_v33  ;;  %10560 = vst [vmem:[#allocation39_spill] sm:$0xff] %v8540_v5  ;;  %v2191_v33 = vld [vmem:[%s10327_s3 + $0x6b0] sm:$0xff] }
 0x390   : > { %v2017_v15 = vmax.f32 %v1985_v53, 0.0  ;;  %3063 = vmatprep.mubr.f32.mxu0 %v2144_v34  ;;  %v2194_v34 = vld [vmem:[%s10327_s3 + $0x708] sm:$0xff]  ;;  %v6118_v53 = vld [vmem:[%s10329_s5 + $0xb8] sm:$0xff] }
 0x391   : > { %5949 = vset.pattern.permute.xlu1 %v6244_v63 }
 0x392   : > { %v5537_v41 = vpack.c.bf16 %v2018_v46, %v2017_v15  ;;  %2807 = vperm.xlu1 %5949, %v6115_v28   ;;  %v1791_v16 = vpop.permute.xlu1 %1790  ;;  %v2196_v46 = vld [vmem:[%s10327_s3 + $0x758] sm:$0xff] }
 0x393   : > { %3064 = vmatmul.mubr.f32.gmra.mrb[60].mxu0 %v2143_v54  ;;  %v1827_v43 = vadd.f32 %v1791_v16, %v1667_v60  ;;  %v8571_v54 = vpop.permute.xlu0 %3172  ;;  %v2198_v16 = vld [vmem:[%s10327_s3 + $0x7a8] sm:$0xff] }
 0x394   : > { %5538 = vmatpush1.bf16.msra.mxu0 %v5537_v41  ;;  %5764 = vmatpush1.bf16.msra.mxu1 %v5537_v41  ;;  %10562 = vst [vmem:[#allocation14_spill] sm:$0xff] %v8571_v54  ;;  %v2162_v41 = vld [vmem:[%s10327_s3 + $0x208] sm:$0xff] }
 0x395   : > { %3068 = vmatprep.mubr.f32.mxu0 %v2146_v42  ;;  %5539 = vmatprep.subr.bf16.mxu0 %v10449_v36  ;;  %v1987_v29 = vadd.f32 %v1951_v9, %v1827_v43  ;;  %v2190_v9 = vld [vmem:[%s10327_s3 + $0x668] sm:$0xff] }
 0x396   : > { %5950 = vset.pattern.permute.xlu1 %v10384_v37  ;;  %v1795_v48 = vpop.permute.xlu1 %1794  ;;  %5749 = vmatprep.subr.bf16.mxu1 %v10449_v36 }
 0x397   : > { %3577 = vperm.xlu1 %5950, %v6115_v28   ;;  %3069 = vmatmul.mubr.f32.gmra.mrb[62].mxu0 %v2145_v58  ;;  %v1828_v38 = vadd.f32 %v1795_v48, %v1668_v39  ;;  %v2019_v55 = vmax.f32 %v1987_v29, 0.0  ;;  %v8586_v28 = vld [vmem:[%s10329_s5 + $0x38] sm:$0xff]  ;;  %v8597_v60 = vpop.permute.xlu0 %3180  ;;  %v2197_v58 = vld [vmem:[%s10327_s3 + $0x7a0] sm:$0xff]  ;;  %v2163_v48 = vld [vmem:[%s10327_s3 + $0x250] sm:$0xff] }
 0x398   : > { %3073 = vmatprep.mubr.f32.mxu0 %v2148_v26  ;;  %10564 = vst [vmem:[#allocation20_spill] sm:$0xff] %v8597_v60  ;;  %v2164_v26 = vld [vmem:[%s10327_s3 + $0x258] sm:$0xff]  ;;  %v2199_v39 = vld [vmem:[%s10327_s3 + $0x7f0] sm:$0xff] }
 0x39b   : > { %3581 = vperm.xlu1 %5950, %v6116_v35   ;;  %v1955_v18 = vpop.permute.xlu1 %1954  ;;  %3074 = vmatmul.mubr.f32.gmra.mrb[64].mxu0 %v2147_v22  ;;  %v2166_v22 = vld [vmem:[%s10327_s3 + $0x2a8] sm:$0xff]  ;;  %v6120_v35 = vld [vmem:[%s10329_s5 + $0xc0] sm:$0xff] }
 0x39c   : > { %v1988_v1 = vadd.f32 %v1955_v18, %v1828_v38  ;;  %3303 = vmatprep.mubr.f32.mxu0 %v2150_v50  ;;  %v2202_v50 = vld [vmem:[%s10327_s3 + $0x848] sm:$0xff]  ;;  %v8626_v38 = vpop.permute.xlu0 %3188  ;;  %v2165_v18 = vld [vmem:[%s10327_s3 + $0x2a0] sm:$0xff] }
 0x39e   : > { %v2020_v11 = vmax.f32 %v1988_v1, 0.0  ;;  %v2201_v1 = vld [vmem:[%s10327_s3 + $0x840] sm:$0xff] }
 0x39f   : > { %5951 = vset.pattern.permute.xlu1 %v6244_v63 }
 0x3a0   : > { %v5540_v14 = vpack.c.bf16 %v2020_v11, %v2019_v55  ;;  %2747 = vperm.xlu1 %5951, %v8480_v20   ;;  %v8483_v19 = vpop.permute.xlu1 %3116  ;;  %v2168_v55 = vld [vmem:[%s10327_s3 + $0x2f8] sm:$0xff] }
 0x3a2   : > { %5541 = vmatpush1.bf16.msra.mxu0 %v5540_v14  ;;  %5765 = vmatpush1.bf16.msra.mxu1 %v5540_v14  ;;  %v2204_v14 = vld [vmem:[%s10327_s3 + $0x898] sm:$0xff] }
 0x3a3   : > { %5542 = vmatprep.subr.bf16.mxu0 %v10449_v36 }
 0x3a4   : > { %5952 = vset.pattern.permute.xlu1 %v10384_v37  ;;  %v8501_v17 = vpop.permute.xlu1 %3120 }
 0x3a5   : > { %3517 = vperm.xlu1 %5952, %v8480_v20   ;;  %3304 = vmatmul.mubr.f32.vlgmr.msra.gmra.mrb[66].mxu0 %v2149_v8  ;;  %v2167_v8 = vld [vmem:[%s10327_s3 + $0x2f0] sm:$0xff] }
 0x3a6   : > { %3394 = vmatmul.mubr.f32.vlgmr.msra.gmra.mrb[64].mxu1 %v2185_v23  ;;  %3308 = vmatprep.mubr.f32.mxu0 %v2152_v52  ;;  %v8650_v23 = vpop.permute.xlu0 %3196  ;;  %v2203_v52 = vld [vmem:[%s10327_s3 + $0x890] sm:$0xff] }
 0x3a7   : > { %3398 = vmatprep.mubr.f32.mxu1 %v2188_v61  ;;  %v2170_v61 = vld [vmem:[%s10327_s3 + $0x348] sm:$0xff] }
 0x3a8   : > { %v8516_v2 = vpop.permute.xlu1 %3128 }
 0x3a9   : > { %5953 = vset.pattern.permute.xlu1 %v6244_v63  ;;  %3309 = vmatmul.mubr.f32.gmra.mrb[68].mxu0 %v2151_v49  ;;  %v2206_v49 = vld [vmem:[%s10327_s3 + $0x8e8] sm:$0xff] }
 0x3aa   : > { %3399 = vmatmul.mubr.f32.gmra.mrb[66].mxu1 %v2187_v0  ;;  %2815 = vperm.xlu1 %5953, %v8250_v30  }
 0x3ab   : > { %3313 = vmatprep.mubr.f32.mxu0 %v2154_v25  ;;  %3403 = vmatprep.mubr.f32.mxu1 %v2190_v9  ;;  %v2169_v25 = vld [vmem:[%s10327_s3 + $0x340] sm:$0xff]  ;;  %v6121_v9 = vld [vmem:[%s10329_s5 + $0xc8] sm:$0xff] }
 0x3ac   : > { %v8531_v45 = vpop.permute.xlu1 %3136 }
 0x3ad   : > { %3314 = vmatmul.mubr.f32.gmra.mrb[70].mxu0 %v2153_v59  ;;  %v2205_v59 = vld [vmem:[%s10327_s3 + $0x8e0] sm:$0xff] }
 0x3ae   : > { %3404 = vmatmul.mubr.f32.gmra.mrb[68].mxu1 %v2189_v56  ;;  %5954 = vset.pattern.permute.xlu1 %v10384_v37  ;;  %v2172_v56 = vld [vmem:[%s10327_s3 + $0x398] sm:$0xff] }
 0x3af   : > { %3585 = vperm.xlu1 %5954, %v8250_v30   ;;  %3318 = vmatprep.mubr.f32.mxu0 %v2156_v10  ;;  %v2157_v30 = vld [vmem:[%s10327_s3 + $0x160] sm:$0xff]  ;;  %v2208_v10 = vld [vmem:[%s10327_s3 + $0x938] sm:$0xff] }
 0x3b0   : > { %3408 = vmatprep.mubr.f32.mxu1 %v2192_v47  ;;  %v8552_v6 = vpop.permute.xlu1 %3144 }
 0x3b1   : > { %3319 = vmatmul.mubr.f32.gmra.mrb[72].mxu0 %v2155_v12  ;;  %v8680_v12 = vpop.permute.xlu0 %3204 }
 0x3b2   : > { %3409 = vmatmul.mubr.f32.gmra.mrb[70].mxu1 %v2191_v33  ;;  %3323 = vmatprep.mubr.f32.mxu0 %v2158_v44  ;;  %v2171_v33 = vld [vmem:[%s10327_s3 + $0x390] sm:$0xff] }
 0x3b3   : > { %3589 = vperm.xlu1 %5954, %v6118_v53   ;;  %3413 = vmatprep.mubr.f32.mxu1 %v2194_v34  ;;  %v2207_v44 = vld [vmem:[%s10327_s3 + $0x930] sm:$0xff]  ;;  %v2174_v34 = vld [vmem:[%s10327_s3 + $0x3e8] sm:$0xff] }
 0x3b4   : > { %v8569_v15 = vpop.permute.xlu1 %3152  ;;  %v2210_v53 = vld [vmem:[%s10327_s3 + $0x988] sm:$0xff] }
 0x3b5   : > { %10561 = vst [vmem:[#allocation13_spill] sm:$0xff] %v8569_v15  ;;  %3324 = vmatmul.mubr.f32.gmra.mrb[74].mxu0 %v2157_v30  ;;  %v8695_v30 = vld [vmem:[%s10329_s5 + $0x48] sm:$0xff] }
 0x3b6   : > { %3414 = vmatmul.mubr.f32.gmra.mrb[72].mxu1 %v2193_v13  ;;  %3328 = vmatprep.mubr.f32.mxu0 %v2160_v32  ;;  %v2173_v32 = vld [vmem:[%s10327_s3 + $0x3e0] sm:$0xff] }
 0x3b7   : > { %5955 = vset.pattern.permute.xlu1 %v6244_v63  ;;  %3418 = vmatprep.mubr.f32.mxu1 %v2196_v46  ;;  %v8706_v46 = vpop.permute.xlu0 %3212 }
 0x3b8   : > { %2755 = vperm.xlu1 %5955, %v8586_v28   ;;  %v8592_v42 = vpop.permute.xlu1 %3160 }
 0x3b9   : > { %10563 = vst [vmem:[#allocation18_spill] sm:$0xff] %v8592_v42  ;;  %3329 = vmatmul.mubr.f32.gmra.mrb[76].mxu0 %v2159_v57  ;;  %v2209_v57 = vld [vmem:[%s10327_s3 + $0x980] sm:$0xff] }
 0x3ba   : > { %3419 = vmatmul.mubr.f32.gmra.mrb[74].mxu1 %v2195_v31  ;;  %3333 = vmatprep.mubr.f32.mxu0 %v2162_v41  ;;  %v2176_v31 = vld [vmem:[%s10327_s3 + $0x438] sm:$0xff] }
 0x3bb   : > { %3423 = vmatprep.mubr.f32.mxu1 %v2198_v16  ;;  %v2212_v41 = vld [vmem:[%s10327_s3 + $0x9d8] sm:$0xff] }
 0x3bc   : > { %5956 = vset.pattern.permute.xlu1 %v10384_v37  ;;  %v8609_v43 = vpop.permute.xlu1 %3168 }
 0x3bd   : > { %10565 = vst [vmem:[#allocation32_spill] sm:$0xff] %v8609_v43  ;;  %3525 = vperm.xlu1 %5956, %v8586_v28   ;;  %3334 = vmatmul.mubr.f32.gmra.mrb[78].mxu0 %v2161_v62  ;;  %v2175_v62 = vld [vmem:[%s10327_s3 + $0x430] sm:$0xff] }
 0x3be   : > { %3424 = vmatmul.mubr.f32.gmra.mrb[76].mxu1 %v2197_v58  ;;  %3338 = vmatprep.mubr.f32.mxu0 %v2164_v26  ;;  %v2211_v58 = vld [vmem:[%s10327_s3 + $0x9d0] sm:$0xff]  ;;  %v2178_v26 = vld [vmem:[%s10327_s3 + $0x488] sm:$0xff] }
 0x3bf   : > { %3428 = vmatprep.mubr.f32.mxu1 %v2200_v7 }
 0x3c0   : > { %v8624_v29 = vpop.permute.xlu1 %3176 }
 0x3c1   : > { %10566 = vst [vmem:[#allocation24_spill] sm:$0xff] %v8624_v29  ;;  %5957 = vset.pattern.permute.xlu1 %v6244_v63  ;;  %3339 = vmatmul.mubr.f32.gmra.mrb[80].mxu0 %v2163_v48  ;;  %v8732_v48 = vpop.permute.xlu0 %3220 }
 0x3c2   : > { %3429 = vmatmul.mubr.f32.gmra.mrb[78].mxu1 %v2199_v39  ;;  %2823 = vperm.xlu1 %5957, %v6120_v35   ;;  %10568 = vst [vmem:[#allocation31_spill] sm:$0xff] %v8732_v48  ;;  %v6123_v39 = vld [vmem:[%s10329_s5 + $0xd0] sm:$0xff] }
 0x3c3   : > { %3343 = vmatprep.mubr.f32.mxu0 %v2166_v22  ;;  %3433 = vmatprep.mubr.f32.mxu1 %v2202_v50  ;;  %v2177_v22 = vld [vmem:[%s10327_s3 + $0x480] sm:$0xff]  ;;  %v2180_v50 = vld [vmem:[%s10327_s3 + $0x4d8] sm:$0xff] }
 0x3c4   : > { %v8641_v11 = vpop.permute.xlu1 %3184 }
 0x3c5   : > { %3344 = vmatmul.mubr.f32.gmra.mrb[82].mxu0 %v2165_v18  ;;  %v2179_v18 = vld [vmem:[%s10327_s3 + $0x4d0] sm:$0xff] }
 0x3c6   : > { %3434 = vmatmul.mubr.f32.gmra.mrb[80].mxu1 %v2201_v1  ;;  %5958 = vset.pattern.permute.xlu1 %v10384_v37  ;;  %v8750_v1 = vpop.permute.xlu0 %3228 }
 0x3c7   : > { %3593 = vperm.xlu1 %5958, %v6120_v35   ;;  %3348 = vmatprep.mubr.f32.mxu0 %v2168_v55  ;;  %10570 = vst [vmem:[#allocation33_spill] sm:$0xff] %v8750_v1  ;;  %v2182_v55 = vld [vmem:[%s10327_s3 + $0x528] sm:$0xff] }
 0x3c8   : > { %3438 = vmatprep.mubr.f32.mxu1 %v2204_v14  ;;  %v8661_v0 = vpop.permute.xlu1 %3192 }
 0x3c9   : > { %3349 = vmatmul.mubr.f32.gmra.mrb[84].mxu0 %v2167_v8  ;;  %v2181_v8 = vld [vmem:[%s10327_s3 + $0x520] sm:$0xff] }
 0x3ca   : > { %3439 = vmatmul.mubr.f32.gmra.mrb[82].mxu1 %v2203_v52  ;;  %3353 = vmatprep.mubr.f32.mxu0 %v2170_v61  ;;  %v6124_v52 = vld [vmem:[%s10329_s5 + $0xd8] sm:$0xff] }
 0x3cb   : > { %3597 = vperm.xlu1 %5958, %v6121_v9   ;;  %3443 = vmatprep.mubr.f32.mxu1 %v2206_v49  ;;  %v2184_v61 = vld [vmem:[%s10327_s3 + $0x578] sm:$0xff]  ;;  %v8766_v49 = vpop.permute.xlu0 %3236 }
 0x3cc   : > { %v8678_v47 = vpop.permute.xlu1 %3200  ;;  %10571 = vst [vmem:[#allocation43_spill] sm:$0xff] %v8766_v49 }
 0x3cd   : > { %3354 = vmatmul.mubr.f32.gmra.mrb[86].mxu0 %v2169_v25  ;;  %v2183_v25 = vld [vmem:[%s10327_s3 + $0x570] sm:$0xff] }
 0x3ce   : > { %3444 = vmatmul.mubr.f32.gmra.mrb[84].mxu1 %v2205_v59  ;;  %3358 = vmatprep.mubr.f32.mxu0 %v2172_v56  ;;  %v8777_v59 = vld [vmem:[%s10329_s5 + $0x58] sm:$0xff] }
 0x3cf   : > { %5959 = vset.pattern.permute.xlu1 %v6244_v63  ;;  %3448 = vmatprep.mubr.f32.mxu1 %v2208_v10  ;;  %10573 = vst [vmem:[#allocation35_spill] sm:$0xff] %v8777_v59  ;;  %v8782_v10 = vpop.permute.xlu0 %2795 }
 0x3d0   : > { %2763 = vperm.xlu1 %5959, %v8695_v30   ;;  %v8701_v13 = vpop.permute.xlu1 %3208 }
 0x3d1   : > { %3359 = vmatmul.mubr.f32.gmra.mrb[88].mxu0 %v2171_v33 }
 0x3d2   : > { %3449 = vmatmul.mubr.f32.gmra.mrb[86].mxu1 %v2207_v44  ;;  %3363 = vmatprep.mubr.f32.mxu0 %v2174_v34  ;;  %v6126_v34 = vld [vmem:[%s10329_s5 + $0xe0] sm:$0xff] }
 0x3d3   : > { %3453 = vmatprep.mubr.f32.mxu1 %v2210_v53  ;;  %v2728_v44 = vpop.permute.xlu0 %2727 }
 0x3d4   : > { %5960 = vset.pattern.permute.xlu1 %v10384_v37  ;;  %v8718_v16 = vpop.permute.xlu1 %3216 }
 0x3d5   : > { %3533 = vperm.xlu1 %5960, %v8695_v30   ;;  %3364 = vmatmul.mubr.f32.gmra.mrb[90].mxu0 %v2173_v32 }
 0x3d6   : > { %3454 = vmatmul.mubr.f32.gmra.mrb[88].mxu1 %v2209_v57  ;;  %3368 = vmatprep.mubr.f32.mxu0 %v2176_v31 }
 0x3d7   : > { %3458 = vmatprep.mubr.f32.mxu1 %v2212_v41 }
 0x3d8   : > { %v8730_v7 = vpop.permute.xlu1 %3224 }
 0x3d9   : > { %10567 = vst [vmem:[#allocation26_spill] sm:$0xff] %v8730_v7  ;;  %5961 = vset.pattern.permute.xlu1 %v6244_v63  ;;  %3369 = vmatmul.mubr.f32.gmra.mrb[92].mxu0 %v2175_v62 }
 0x3da   : > { %3459 = vmatmul.mubr.f32.gmra.mrb[90].mxu1 %v2211_v58  ;;  %2831 = vperm.xlu1 %5961, %v6123_v39  }
 0x3db   : > { %3373 = vmatprep.mubr.f32.mxu0 %v2178_v26 }
 0x3dc   : > { %v8744_v35 = vpop.permute.xlu1 %3232 }
 0x3dd   : > { %10569 = vst [vmem:[#allocation38_spill] sm:$0xff] %v8744_v35  ;;  %3374 = vmatmul.mubr.f32.gmra.mrb[94].mxu0 %v2177_v22 }
 0x3de   : > { %5962 = vset.pattern.permute.xlu1 %v10384_v37  ;;  %3378 = vmatprep.mubr.f32.mxu0 %v2180_v50 }
 0x3df   : > { %3601 = vperm.xlu1 %5962, %v6123_v39  }
 0x3e1   : > { %3379 = vmatmul.mubr.f32.gmra.mrb[96].mxu0 %v2179_v18  ;;  %v8755_v14 = vpop.permute.xlu1 %2791 }
 0x3e2   : > { %3383 = vmatprep.mubr.f32.mxu0 %v2182_v55  ;;  %v6127_v55 = vld [vmem:[%s10329_s5 + $0xe8] sm:$0xff] }
 0x3e3   : > { %3605 = vperm.xlu1 %5962, %v6124_v52   ;;  %v8800_v52 = vpop.permute.xlu0 %2803 }
 0x3e5   : > { %3384 = vmatmul.mubr.f32.gmra.mrb[98].mxu0 %v2181_v8 }
 0x3e6   : > { %3388 = vmatprep.mubr.f32.mxu0 %v2184_v61  ;;  %v8771_v9 = vpop.permute.xlu1 %3561 }
 0x3e7   : > { %10572 = vst [vmem:[#allocation34_spill] sm:$0xff] %v8771_v9  ;;  %5963 = vset.pattern.permute.xlu1 %v6244_v63 }
 0x3e8   : > { %2771 = vperm.xlu1 %5963, %v8777_v59  }
 0x3e9   : > { %3389 = vmatmul.mubr.f32.gmra.mrb[100].mxu0 %v2183_v25 }
 0x3ea   : > { %v8780_v56 = vpop.permute.xlu1 %3565 }
 0x3eb   : > { %10574 = vst [vmem:[#allocation37_spill] sm:$0xff] %v8780_v56 }
 0x3ec   : > { %5964 = vset.pattern.permute.xlu1 %v10384_v37 }
 0x3ed   : > { %3541 = vperm.xlu1 %5964, %v8777_v59  }
 0x3ef   : > { %v2732_v33 = vpop.permute.xlu1 %2731 }
 0x3f1   : > { %5965 = vset.pattern.permute.xlu1 %v6244_v63 }
 0x3f2   : > { %2839 = vperm.xlu1 %5965, %v6126_v34   ;;  %v2920_v53 = vpop.f32.mrb[2].mxu0 }
 0x3f3   : > { %v2922_v32 = vpop.f32.mrb[3].mxu0  ;;  %v2921_v57 = vadd.f32 %v2920_v53, %v2728_v44  ;;  %v8808_v44 = vld [vmem:[%s10329_s5 + $0x68] sm:$0xff] }
 0x3f4   : > { %v8790_v31 = vpop.permute.xlu1 %3501  ;;  %10577 = vst [vmem:[#allocation21_spill] sm:$0xff] %v8808_v44  ;;  %v2736_v32 = vpop.permute.xlu0 %2735 }
 0x3f5   : > { %10575 = vst [vmem:[#allocation22_spill] sm:$0xff] %v8790_v31  ;;  %v3079_v62 = vmax.f32 %v2921_v57, 0.0 }
 0x3f6   : > { %5966 = vset.pattern.permute.xlu1 %v10384_v37  ;;  %v2925_v41 = vpop.f32.mrb[4].mxu0 }
 0x3f7   : > { %3609 = vperm.xlu1 %5966, %v6126_v34   ;;  %v2926_v58 = vadd.f32 %v2925_v41, %v2732_v33  ;;  %v2927_v26 = vpop.f32.mrb[5].mxu0 }
 0x3f9   : > { %v3080_v39 = vmax.f32 %v2926_v58, 0.0  ;;  %v8793_v22 = vpop.permute.xlu1 %2799 }
 0x3fa   : > { %v2930_v50 = vpop.f32.mrb[6].mxu0 }
 0x3fb   : > { %v8795_v18 = vpack.c.bf16 %v3080_v39, %v3079_v62  ;;  %3613 = vperm.xlu1 %5966, %v6127_v55   ;;  %v2932_v8 = vpop.f32.mrb[7].mxu0  ;;  %v2931_v41 = vadd.f32 %v2930_v50, %v2736_v32  ;;  %v10580_v50 = vmov 7  }
 0x3fd   : > { %v3081_v55 = vmax.f32 %v2931_v41, 0.0 }
 0x3fe   : > { %v8802_v61 = vpop.permute.xlu1 %3569  ;;  %v2935_v25 = vpop.f32.mrb[8].mxu0 }
 0x3ff   : > { %10576 = vst [vmem:[#allocation28_spill] sm:$0xff] %v8802_v61  ;;  %5967 = vset.pattern.permute.xlu1 %v6244_v63  ;;  %v2937_v33 = vpop.f32.mrb[9].mxu0 }
 0x400   : > { %2779 = vperm.xlu1 %5967, %v8808_v44   ;;  %v6129_v33 = vld [vmem:[%s10329_s5 + $0xf0] sm:$0xff] }
 0x402   : > { %v8811_v34 = vpop.permute.xlu1 %3573  ;;  %v2940_v53 = vpop.f32.mrb[10].mxu0 }
 0x403   : > { %10578 = vst [vmem:[#allocation3_spill] sm:$0xff] %v8811_v34  ;;  %v2942_v57 = vpop.f32.mrb[11].mxu0 }
 0x404   : > { %5968 = vset.pattern.permute.xlu1 %v10384_v37 }
 0x405   : > { %3549 = vperm.xlu1 %5968, %v8808_v44  }
 0x406   : > { %v2945_v62 = vpop.f32.mrb[12].mxu0 }
 0x407   : > { %v2740_v58 = vpop.permute.xlu1 %2739  ;;  %v2947_v26 = vpop.f32.mrb[13].mxu0 }
 0x408   : > { %v2936_v39 = vadd.f32 %v2935_v25, %v2740_v58  ;;  %v6130_v26 = vld [vmem:[%s10329_s5 + $0xf8] sm:$0xff] }
 0x409   : > { %5969 = vset.pattern.permute.xlu1 %v6244_v63 }
 0x40a   : > { %v3082_v8 = vmax.f32 %v2936_v39, 0.0  ;;  %2847 = vperm.xlu1 %5969, %v6129_v33   ;;  %v2950_v34 = vpop.f32.mrb[14].mxu0 }
 0x40b   : > { %v2952_v57 = vpop.f32.mrb[15].mxu0 }
 0x40c   : > { %v8819_v61 = vpack.c.bf16 %v3082_v8, %v3081_v55  ;;  %v8821_v37 = vpop.permute.xlu1 %3509  ;;  %v8831_v57 = vpop.permute.xlu0 %2811 }
 0x40d   : > { %10579 = vst [vmem:[#allocation16_spill] sm:$0xff] %v8821_v37 }
 0x40e   : > { %5970 = vset.pattern.permute.xlu1 %v10580_v50  ;;  %v2955_v32 = vpop.f32.mrb[16].mxu0 }
 0x40f   : > { %3617 = vperm.xlu1 %5970, %v6129_v33   ;;  %v2957_v25 = vpop.f32.mrb[17].mxu0 }
 0x410   : > { %v8841_v25 = vld [vmem:[%s10329_s5 + $0x78] sm:$0xff] }
 0x411   : > { %v8824_v58 = vpop.permute.xlu1 %2807  ;;  %10582 = vst [vmem:[#allocation40_spill] sm:$0xff] %v8841_v25 }
 0x412   : > { %v8826_v41 = vpop.f32.mrb[18].mxu0 }
 0x413   : > { %3621 = vperm.xlu1 %5970, %v6130_v26   ;;  %v2962_v39 = vpop.f32.mrb[19].mxu0 }
 0x414   : > { %v2744_v39 = vpop.permute.xlu0 %2743 }
 0x416   : > { %v8833_v55 = vpop.permute.xlu1 %3577  ;;  %v8835_v8 = vpop.f32.mrb[20].mxu0 }
 0x417   : > { %10581 = vst [vmem:[#allocation46_spill] sm:$0xff] %v8833_v55  ;;  %5972 = vset.pattern.permute.xlu1 %v6244_v63  ;;  %v2967_v33 = vpop.f32.mrb[21].mxu0  ;;  %v2941_v55 = vadd.f32 %v2940_v53, %v2744_v39 }
 0x418   : > { %2787 = vperm.xlu1 %5972, %v8841_v25   ;;  %v8862_v39 = vpop.permute.xlu0 %2819 }
 0x419   : > { %v3083_v60 = vmax.f32 %v2941_v55, 0.0 }
 0x41a   : > { %v8844_v56 = vpop.permute.xlu1 %3581  ;;  %v8846_v26 = vpop.f32.mrb[22].mxu0 }
 0x41b   : > { %10583 = vst [vmem:[#allocation9_spill] sm:$0xff] %v8844_v56  ;;  %v2972_v9 = vpop.f32.mrb[23].mxu0 }
 0x41c   : > { %5973 = vset.pattern.permute.xlu1 %v10580_v50 }
 0x41d   : > { %3557 = vperm.xlu1 %5973, %v8841_v25  }
 0x41e   : > { %v8850_v63 = vpop.f32.mrb[24].mxu0 }
 0x41f   : > { %v2748_v33 = vpop.permute.xlu1 %2747  ;;  %v2977_v37 = vpop.f32.mrb[25].mxu0 }
 0x420   : > { %v2946_v31 = vadd.f32 %v2945_v62, %v2748_v33 }
 0x422   : > { %v3084_v29 = vmax.f32 %v2946_v31, 0.0  ;;  %v8852_v44 = vpop.f32.mrb[26].mxu0 }
 0x423   : > { %v2982_v54 = vpop.f32.mrb[27].mxu0 }
 0x424   : > { %v8854_v56 = vpack.c.bf16 %v3084_v29, %v3083_v60  ;;  %v8856_v43 = vpop.permute.xlu1 %3517  ;;  %v2752_v60 = vpop.permute.xlu0 %2751 }
 0x425   : > { %10584 = vst [vmem:[#allocation2_spill] sm:$0xff] %v8856_v43  ;;  %v2951_v43 = vadd.f32 %v2950_v34, %v2752_v60 }
 0x426   : > { %v8858_v9 = vpop.f32.mrb[28].mxu0 }
 0x427   : > { %v2987_v50 = vpop.f32.mrb[29].mxu0 }
 0x429   : > { %v2816_v49 = vpop.permute.xlu1 %2815 }
 0x42a   : > { %v8860_v25 = vpop.f32.mrb[30].mxu0 }
 0x42b   : > { %v2992_v53 = vpop.f32.mrb[31].mxu0 }
 0x42e   : > { %v8864_v37 = vpop.permute.xlu1 %3585  ;;  %v8866_v62 = vpop.f32.mrb[32].mxu0 }
 0x42f   : > { %10585 = vst [vmem:[#allocation42_spill] sm:$0xff] %v8864_v37  ;;  %v2997_v31 = vpop.f32.mrb[33].mxu0  ;;  %v3085_v37 = vmax.f32 %v2951_v43, 0.0 }
 0x432   : > { %v8868_v55 = vpop.permute.xlu1 %3589  ;;  %v3000_v54 = vpop.f32.mrb[34].mxu0 }
 0x433   : > { %10586 = vst [vmem:[#allocation6_spill] sm:$0xff] %v8868_v55  ;;  %v3001_v29 = vadd.f32 %v3000_v54, %v8755_v14  ;;  %v3002_v33 = vpop.f32.mrb[35].mxu0 }
 0x435   : > { %v3095_v5 = vmax.f32 %v3001_v29, 0.0 }
 0x436   : > { %v3005_v50 = vpop.f32.mrb[36].mxu0 }
 0x437   : > { %v3006_v35 = vadd.f32 %v3005_v50, %v8782_v10  ;;  %v2756_v53 = vpop.permute.xlu1 %2755  ;;  %v3007_v42 = vpop.f32.mrb[37].mxu0 }
 0x438   : > { %v2956_v1 = vadd.f32 %v2955_v32, %v2756_v53 }
 0x439   : > { %v3096_v4 = vmax.f32 %v3006_v35, 0.0 }
 0x43a   : > { %v3086_v59 = vmax.f32 %v2956_v1, 0.0  ;;  %v3010_v7 = vpop.f32.mrb[38].mxu0 }
 0x43b   : > { %v5590_v31 = vpack.c.bf16 %v3096_v4, %v3095_v5  ;;  %v3011_v55 = vadd.f32 %v3010_v7, %v8793_v22  ;;  %v3012_v15 = vpop.f32.mrb[39].mxu0  ;;  %v2828_v7 = vpop.permute.xlu0 %2827 }
 0x43c   : > { %v5604_v48 = vpack.c.bf16 %v3086_v59, %v3085_v37  ;;  %v8873_v40 = vpop.permute.xlu1 %3525  ;;  %v506_v15 = vld [vmem:[%s10329_s5] sm:$0x1] }
 0x43d   : > { %5591 = vmatprep.subr.bf16.mxu1 %v5590_v31  ;;  %v3097_v34 = vmax.f32 %v3011_v55, 0.0  ;;  %3888 = vrot.lane.b32.xlu1 %v506_v15, %s6246_s8 }
 0x43e   : > { %v3015_v14 = vpop.f32.mrb[40].mxu0  ;;  %5593 = vmatpush3.bf16.msra.mxu1 %v8795_v18 }
 0x43f   : > { %v3016_v10 = vadd.f32 %v3015_v14, %v8800_v52  ;;  %v3017_v42 = vpop.f32.mrb[41].mxu0  ;;  %v2760_v29 = vpop.permute.xlu0 %2759  ;;  %v6248_v14 = vmov 9  }
 0x441   : > { %v3098_v32 = vmax.f32 %v3016_v10, 0.0  ;;  %v2824_v35 = vpop.permute.xlu1 %2823 }
 0x442   : > { %v3020_v43 = vpop.f32.mrb[42].mxu0 }
 0x443   : > { %v5594_v1 = vpack.c.bf16 %v3098_v32, %v3097_v34  ;;  %v3021_v4 = vadd.f32 %v3020_v43, %v8824_v58  ;;  %v3022_v5 = vpop.f32.mrb[43].mxu0  ;;  %v6247_v58 = vmov 8  }
 0x444   : > { %5974 = vset.pattern.permute.xlu1 %v6247_v58  ;;  %5975 = vset.pattern.permute.xlu0 %v6247_v58 }
 0x445   : > { %5595 = vmatprep.subr.bf16.mxu1 %v5594_v1  ;;  %v3099_v18 = vmax.f32 %v3021_v4, 0.0 }
 0x446   : > { %v3025_v59 = vpop.f32.mrb[44].mxu0  ;;  %5597 = vmatpush3.bf16.msra.mxu1 %v8819_v61  ;;  %v8882_v22 = vpop.permute.xlu1 %3593  ;;  %v6132_v61 = vld [vmem:[%s10329_s5] sm:$0xff] }
 0x447   : > { %v3026_v52 = vadd.f32 %v3025_v59, %v8831_v57  ;;  %v3027_v37 = vpop.f32.mrb[45].mxu0  ;;  %4065 = vperm.xlu1 %5974, %v6132_v61   ;;  %v2961_v57 = vadd.f32 %v8826_v41, %v2760_v29 }
 0x449   : > { %v3100_v55 = vmax.f32 %v3026_v52, 0.0 }
 0x44a   : > { %v8887_v54 = vpop.permute.xlu1 %3597  ;;  %v3030_v60 = vpop.f32.mrb[46].mxu0 }
 0x44b   : > { %v5598_v33 = vpack.c.bf16 %v3100_v55, %v3099_v18  ;;  %v3031_v50 = vadd.f32 %v3030_v60, %v2816_v49  ;;  %v3032_v53 = vpop.f32.mrb[47].mxu0  ;;  %5976 = vset.pattern.permute.xlu1 %v6248_v14  ;;  %v3087_v49 = vmax.f32 %v2961_v57, 0.0  ;;  %v2836_v57 = vpop.permute.xlu0 %2835 }
 0x44c   : > { %4225 = vperm.xlu1 %5976, %v6132_v61  }
 0x44d   : > { %5599 = vmatprep.subr.bf16.mxu1 %v5598_v33  ;;  %v3101_v34 = vmax.f32 %v3031_v50, 0.0 }
 0x44e   : > { %v3035_v31 = vpop.f32.mrb[48].mxu0  ;;  %5601 = vmatpush3.bf16.msra.mxu1 %v8854_v56  ;;  %v8900_v56 = vld [vmem:[%s10329_s5 + $0x8] sm:$0xff] }
 0x44f   : > { %v3036_v10 = vadd.f32 %v3035_v31, %v8862_v39  ;;  %v2764_v42 = vpop.permute.xlu1 %2763  ;;  %v3037_v32 = vpop.f32.mrb[49].mxu0 }
 0x450   : > { %v2966_v43 = vadd.f32 %v8835_v8, %v2764_v42  ;;  %4229 = vperm.xlu1 %5976, %v8900_v56   ;;  %v2214_v42 = vld [vmem:[%s10327_s3 + $0x38] sm:$0xff] }
 0x451   : > { %v3102_v1 = vmax.f32 %v3036_v10, 0.0  ;;  %3688 = vmatprep.mubr.f32.mxu0 %v2214_v42 }
 0x452   : > { %v3088_v4 = vmax.f32 %v2966_v43, 0.0  ;;  %v3040_v5 = vpop.f32.mrb[50].mxu0  ;;  %v6249_v43 = vmov 10  }
 0x453   : > { %v5602_v15 = vpack.c.bf16 %v3102_v1, %v3101_v34  ;;  %v3041_v41 = vadd.f32 %v3040_v5, %v2824_v35  ;;  %v3042_v59 = vpop.f32.mrb[51].mxu0 }
 0x454   : > { %v5608_v39 = vpack.c.bf16 %v3088_v4, %v3087_v49  ;;  %v8903_v18 = vpop.permute.xlu1 %3533  ;;  %5977 = vset.pattern.permute.xlu1 %v6247_v58 }
 0x455   : > { %5603 = vmatprep.subr.bf16.mxu1 %v5602_v15  ;;  %v3103_v8 = vmax.f32 %v3041_v41, 0.0  ;;  %4077 = vperm.xlu1 %5977, %v8414_v27  }
 0x456   : > { %v3045_v52 = vpop.f32.mrb[52].mxu0  ;;  %5605 = vmatpush3.bf16.msra.mxu1 %v5604_v48 }
 0x457   : > { %v3046_v37 = vadd.f32 %v3045_v52, %v2828_v7  ;;  %v3047_v55 = vpop.f32.mrb[53].mxu0  ;;  %v8922_v52 = vld [vmem:[%s10329_s5 + $0x20] sm:$0xff] }
 0x459   : > { %v3104_v35 = vmax.f32 %v3046_v37, 0.0  ;;  %v2832_v60 = vpop.permute.xlu1 %2831  ;;  %5979 = vset.pattern.permute.xlu1 %v6248_v14 }
 0x45a   : > { %v3050_v29 = vpop.f32.mrb[54].mxu0  ;;  %4237 = vperm.xlu1 %5979, %v8414_v27   ;;  %v2768_v27 = vpop.permute.xlu0 %2767 }
 0x45b   : > { %v5606_v33 = vpack.c.bf16 %v3104_v35, %v3103_v8  ;;  %v3051_v50 = vadd.f32 %v3050_v29, %v2832_v60  ;;  %v3052_v53 = vpop.f32.mrb[55].mxu0  ;;  %v2971_v15 = vadd.f32 %v8846_v26, %v2768_v27 }
 0x45d   : > { %5607 = vmatprep.subr.bf16.mxu1 %v5606_v33  ;;  %v3105_v31 = vmax.f32 %v3051_v50, 0.0  ;;  %v3089_v8 = vmax.f32 %v2971_v15, 0.0  ;;  %v8951_v15 = vld [vmem:[%s10329_s5 + $0x30] sm:$0xff] }
 0x45e   : > { %5609 = vmatpush3.bf16.msra.mxu1 %v5608_v39  ;;  %v8909_v48 = vpop.permute.xlu1 %3601  ;;  %v3055_v7 = vpop.f32.mrb[56].mxu0  ;;  %5980 = vset.pattern.permute.xlu1 %v6249_v43 }
 0x45f   : > { %v3056_v34 = vadd.f32 %v3055_v7, %v2836_v57  ;;  %v3057_v10 = vpop.f32.mrb[57].mxu0  ;;  %4417 = vperm.xlu1 %5980, %v6132_v61   ;;  %v2844_v33 = vpop.permute.xlu0 %2843 }
 0x461   : > { %v3106_v32 = vmax.f32 %v3056_v34, 0.0  ;;  %v8939_v34 = vld [vmem:[%s10329_s5 + $0x10] sm:$0xff] }
 0x462   : > { %v8915_v1 = vpop.permute.xlu1 %3605  ;;  %v3060_v49 = vpop.f32.mrb[58].mxu0 }
 0x463   : > { %v5610_v4 = vpack.c.bf16 %v3106_v32, %v3105_v31  ;;  %v3062_v5 = vpop.f32.mrb[59].mxu0  ;;  %5981 = vset.pattern.permute.xlu1 %v6247_v58 }
 0x464   : > { %4081 = vperm.xlu1 %5981, %v8922_v52  }
 0x465   : > { %5611 = vmatprep.subr.bf16.mxu1 %v5610_v4 }
 0x466   : > { %v3065_v41 = vpop.f32.mrb[60].mxu0 }
 0x467   : > { %v2772_v59 = vpop.permute.xlu1 %2771  ;;  %v3067_v39 = vpop.f32.mrb[61].mxu0  ;;  %v3066_v53 = vadd.f32 %v3065_v41, %v2844_v33 }
 0x468   : > { %v2976_v61 = vadd.f32 %v8850_v63, %v2772_v59  ;;  %4085 = vperm.xlu1 %5981, %v8480_v20   ;;  %v2776_v41 = vpop.permute.xlu0 %2775 }
 0x469   : > { %v3108_v7 = vmax.f32 %v3066_v53, 0.0 }
 0x46a   : > { %v3090_v37 = vmax.f32 %v2976_v61, 0.0  ;;  %v8926_v55 = vpop.f32.mrb[62].mxu0 }
 0x46b   : > { %v3072_v35 = vpop.f32.mrb[63].mxu0 }
 0x46c   : > { %v5612_v26 = vpack.c.bf16 %v3090_v37, %v3089_v8  ;;  %v8929_v60 = vpop.permute.xlu1 %3541  ;;  %5982 = vset.pattern.permute.xlu1 %v6248_v14  ;;  %v2981_v35 = vadd.f32 %v8852_v44, %v2776_v41 }
 0x46d   : > { %4245 = vperm.xlu1 %5982, %v8480_v20  }
 0x46e   : > { %5613 = vmatpush3.bf16.msra.mxu1 %v5612_v26  ;;  %v8931_v29 = vpop.f32.mrb[64].mxu0 }
 0x46f   : > { %v3077_v50 = vpop.f32.mrb[65].mxu0 }
 0x471   : > { %v2840_v63 = vpop.permute.xlu1 %2839  ;;  %5983 = vset.pattern.permute.xlu1 %v6249_v43 }
 0x472   : > { %v3061_v57 = vadd.f32 %v3060_v49, %v2840_v63  ;;  %4425 = vperm.xlu1 %5983, %v8939_v34  }
 0x474   : > { %v3107_v31 = vmax.f32 %v3061_v57, 0.0 }
 0x476   : > { %v8942_v10 = vpop.permute.xlu1 %3609  ;;  %v5614_v42 = vpack.c.bf16 %v3108_v7, %v3107_v31  ;;  %5984 = vset.pattern.permute.xlu1 %v6247_v58 }
 0x477   : > { %4089 = vperm.xlu1 %5984, %v8951_v15  }
 0x478   : > { %v3305_v32 = vpop.f32.mrb[66].mxu0  ;;  %5615 = vmatprep.subr.bf16.mxu1 %v5614_v42 }
 0x479   : > { %v3307_v27 = vpop.f32.mrb[67].mxu0  ;;  %v3395_v20 = vpop.f32.mrb[64].mxu1  ;;  %v3306_v59 = vadd.f32 %v3305_v32, %v8423_v3  ;;  %v3091_v32 = vmax.f32 %v2981_v35, 0.0 }
 0x47a   : > { %v8945_v49 = vpop.permute.xlu1 %3613  ;;  %v3396_v4 = vadd.f32 %v3395_v20, %v8641_v11  ;;  %v3397_v5 = vpop.f32.mrb[65].mxu1 }
 0x47b   : > { %4093 = vperm.xlu1 %5984, %v8586_v28   ;;  %v3464_v50 = vmax.f32 %v3306_v59, 0.0  ;;  %v2852_v35 = vpop.permute.xlu0 %2851 }
 0x47c   : > { %v3310_v39 = vpop.f32.mrb[68].mxu0  ;;  %v3482_v26 = vmax.f32 %v3396_v4, 0.0 }
 0x47d   : > { %v3311_v61 = vadd.f32 %v3310_v39, %v8483_v19  ;;  %v3312_v8 = vpop.f32.mrb[69].mxu0  ;;  %v3400_v37 = vpop.f32.mrb[66].mxu1 }
 0x47e   : > { %v3401_v11 = vadd.f32 %v3400_v37, %v8626_v38  ;;  %v3402_v33 = vpop.f32.mrb[67].mxu1 }
 0x47f   : > { %v3465_v53 = vmax.f32 %v3311_v61, 0.0  ;;  %v2780_v63 = vpop.permute.xlu1 %2779  ;;  %5985 = vset.pattern.permute.xlu1 %v6248_v14 }
 0x480   : > { %v2986_v57 = vadd.f32 %v8858_v9, %v2780_v63  ;;  %v3315_v7 = vpop.f32.mrb[70].mxu0  ;;  %v3483_v3 = vmax.f32 %v3401_v11, 0.0  ;;  %4253 = vperm.xlu1 %5985, %v8586_v28   ;;  %v3076_v28 = vadd.f32 %v8931_v29, %v2852_v35 }
 0x481   : > { %v5543_v31 = vpack.c.bf16 %v3465_v53, %v3464_v50  ;;  %v3317_v42 = vpop.f32.mrb[71].mxu0  ;;  %v3405_v19 = vpop.f32.mrb[68].mxu1  ;;  %v3316_v4 = vadd.f32 %v3315_v7, %v8501_v17 }
 0x482   : > { %v3092_v27 = vmax.f32 %v2986_v57, 0.0  ;;  %v8960_v20 = vpack.c.bf16 %v3483_v3, %v3482_v26  ;;  %v3406_v44 = vadd.f32 %v3405_v19, %v8661_v0  ;;  %v3407_v38 = vpop.f32.mrb[69].mxu1  ;;  %v3110_v42 = vmax.f32 %v3076_v28, 0.0  ;;  %v2784_v28 = vpop.permute.xlu0 %2783 }
 0x483   : > { %5544 = vmatpush1.bf16.msra.mxu0 %v5543_v31  ;;  %v3466_v17 = vmax.f32 %v3316_v4, 0.0 }
 0x484   : > { %v5616_v9 = vpack.c.bf16 %v3092_v27, %v3091_v32  ;;  %v3320_v5 = vpop.f32.mrb[72].mxu0  ;;  %v8966_v41 = vpop.permute.xlu1 %3549  ;;  %5545 = vmatprep.subr.bf16.mxu0 %v10449_v36  ;;  %v3484_v0 = vmax.f32 %v3406_v44, 0.0  ;;  %5986 = vset.pattern.permute.xlu1 %v6249_v43  ;;  %v8985_v44 = vld [vmem:[%s10329_s5 + $0x40] sm:$0xff] }
 0x485   : > { %v3321_v59 = vadd.f32 %v3320_v5, %v8441_v51  ;;  %v3322_v39 = vpop.f32.mrb[73].mxu0  ;;  %v3410_v61 = vpop.f32.mrb[70].mxu1  ;;  %4433 = vperm.xlu1 %5986, %v8922_v52  }
 0x486   : > { %5617 = vmatpush3.bf16.msra.mxu1 %v5616_v9  ;;  %v3411_v8 = vadd.f32 %v3410_v61, %v8650_v23  ;;  %v3412_v37 = vpop.f32.mrb[71].mxu1 }
 0x487   : > { %v3467_v26 = vmax.f32 %v3321_v59, 0.0 }
 0x488   : > { %v3325_v11 = vpop.f32.mrb[74].mxu0  ;;  %v3485_v33 = vmax.f32 %v3411_v8, 0.0 }
 0x489   : > { %v5546_v50 = vpack.c.bf16 %v3467_v26, %v3466_v17  ;;  %v2848_v51 = vpop.permute.xlu1 %2847  ;;  %v3327_v53 = vpop.f32.mrb[75].mxu0  ;;  %v3326_v7 = vadd.f32 %v3325_v11, %v8516_v2  ;;  %5987 = vset.pattern.permute.xlu1 %v6247_v58 }
 0x48a   : > { %v3071_v63 = vadd.f32 %v8926_v55, %v2848_v51  ;;  %v8975_v57 = vpack.c.bf16 %v3485_v33, %v3484_v0  ;;  %v3415_v23 = vpop.f32.mrb[72].mxu1  ;;  %4097 = vperm.xlu1 %5987, %v8985_v44   ;;  %v2991_v53 = vadd.f32 %v8860_v25, %v2784_v28 }
 0x48b   : > { %5547 = vmatpush1.bf16.msra.mxu0 %v5546_v50  ;;  %v3416_v3 = vadd.f32 %v3415_v23, %v8678_v47  ;;  %v3417_v31 = vpop.f32.mrb[73].mxu1  ;;  %v3468_v5 = vmax.f32 %v3326_v7, 0.0 }
 0x48c   : > { %v3109_v29 = vmax.f32 %v3071_v63, 0.0  ;;  %v3330_v19 = vpop.f32.mrb[76].mxu0  ;;  %5548 = vmatprep.subr.bf16.mxu0 %v10449_v36 }
 0x48d   : > { %v3331_v32 = vadd.f32 %v3330_v19, %v8463_v24  ;;  %v3332_v27 = vpop.f32.mrb[77].mxu0  ;;  %v3420_v55 = vpop.f32.mrb[74].mxu1  ;;  %v3486_v38 = vmax.f32 %v3416_v3, 0.0 }
 0x48e   : > { %v8988_v2 = vpop.permute.xlu1 %3617  ;;  %v5618_v47 = vpack.c.bf16 %v3110_v42, %v3109_v29  ;;  %v3421_v4 = vadd.f32 %v3420_v55, %v8680_v12  ;;  %v3422_v9 = vpop.f32.mrb[75].mxu1  ;;  %4101 = vperm.xlu1 %5987, %v8695_v30   ;;  %v3093_v27 = vmax.f32 %v2991_v53, 0.0 }
 0x48f   : > { %v3469_v59 = vmax.f32 %v3331_v32, 0.0 }
 0x490   : > { %v3335_v39 = vpop.f32.mrb[78].mxu0  ;;  %5619 = vmatprep.subr.bf16.mxu1 %v5618_v47  ;;  %v3487_v24 = vmax.f32 %v3421_v4, 0.0  ;;  %v10587_v4 = vld [vmem:[#allocation30_spill] sm:$0xff] }
 0x491   : > { %v5549_v61 = vpack.c.bf16 %v3469_v59, %v3468_v5  ;;  %v3337_v0 = vpop.f32.mrb[79].mxu0  ;;  %v3425_v8 = vpop.f32.mrb[76].mxu1  ;;  %v3336_v12 = vadd.f32 %v3335_v39, %v8531_v45 }
 0x492   : > { %v8992_v37 = vpop.permute.xlu1 %3621  ;;  %v8994_v35 = vpack.c.bf16 %v3487_v24, %v3486_v38  ;;  %v3426_v17 = vadd.f32 %v3425_v8, %v8701_v13  ;;  %v3427_v26 = vpop.f32.mrb[77].mxu1  ;;  %5988 = vset.pattern.permute.xlu1 %v6248_v14  ;;  %v10588_v24 = vld [vmem:[#allocation31_spill] sm:$0xff] }
 0x493   : > { %5550 = vmatpush1.bf16.msra.mxu0 %v5549_v61  ;;  %4261 = vperm.xlu1 %5988, %v8695_v30   ;;  %v3470_v7 = vmax.f32 %v3336_v12, 0.0  ;;  %v9019_v26 = vld [vmem:[%s10329_s5 + $0x50] sm:$0xff] }
 0x494   : > { %v3340_v11 = vpop.f32.mrb[80].mxu0  ;;  %5551 = vmatprep.subr.bf16.mxu0 %v10449_v36  ;;  %v3488_v63 = vmax.f32 %v3426_v17, 0.0 }
 0x495   : > { %v3341_v33 = vadd.f32 %v3340_v11, %v8474_v21  ;;  %v3342_v50 = vpop.f32.mrb[81].mxu0  ;;  %v3430_v51 = vpop.f32.mrb[78].mxu1 }
 0x496   : > { %v3431_v23 = vadd.f32 %v3430_v51, %v8706_v46  ;;  %v3432_v13 = vpop.f32.mrb[79].mxu1  ;;  %v10589_v51 = vld [vmem:[#allocation13_spill] sm:$0xff] }
 0x497   : > { %v3471_v45 = vmax.f32 %v3341_v33, 0.0  ;;  %v2788_v3 = vpop.permute.xlu1 %2787  ;;  %5989 = vset.pattern.permute.xlu1 %v6249_v43 }
 0x498   : > { %v2996_v31 = vadd.f32 %v8866_v62, %v2788_v3  ;;  %v3345_v42 = vpop.f32.mrb[82].mxu0  ;;  %v3489_v29 = vmax.f32 %v3431_v23, 0.0  ;;  %4441 = vperm.xlu1 %5989, %v8951_v15  }
 0x499   : > { %v5552_v21 = vpack.c.bf16 %v3471_v45, %v3470_v7  ;;  %v3347_v19 = vpop.f32.mrb[83].mxu0  ;;  %v3435_v32 = vpop.f32.mrb[80].mxu1  ;;  %v3346_v30 = vadd.f32 %v3345_v42, %v8552_v6  ;;  %v10591_v7 = vld [vmem:[#allocation35_spill] sm:$0xff]  ;;  %v10592_v45 = vld [vmem:[#allocation36_spill] sm:$0xff] }
 0x49a   : > { %v3094_v55 = vmax.f32 %v2996_v31, 0.0  ;;  %v9005_v47 = vpack.c.bf16 %v3489_v29, %v3488_v63  ;;  %v3436_v25 = vadd.f32 %v3435_v32, %v8718_v16  ;;  %v3437_v46 = vpop.f32.mrb[81].mxu1  ;;  %v10590_v63 = vld [vmem:[#allocation26_spill] sm:$0xff]  ;;  %v10593_v29 = vld [vmem:[#allocation33_spill] sm:$0xff] }
 0x49b   : > { %5553 = vmatpush1.bf16.msra.mxu0 %v5552_v21  ;;  %v3472_v0 = vmax.f32 %v3346_v30, 0.0 }
 0x49c   : > { %v5620_v62 = vpack.c.bf16 %v3094_v55, %v3093_v27  ;;  %v3350_v38 = vpop.f32.mrb[84].mxu0  ;;  %5554 = vmatprep.subr.bf16.mxu0 %v10449_v36  ;;  %v3490_v39 = vmax.f32 %v3436_v25, 0.0  ;;  %5990 = vset.pattern.permute.xlu1 %v6247_v58 }
 0x49d   : > { %v3351_v9 = vadd.f32 %v3350_v38, %v10587_v4  ;;  %v3440_v5 = vpop.f32.mrb[82].mxu1  ;;  %v3352_v59 = vpop.f32.mrb[85].mxu0  ;;  %4105 = vperm.xlu1 %5990, %v9019_v26  }
 0x49e   : > { %v3441_v61 = vadd.f32 %v3440_v5, %v10588_v24  ;;  %5621 = vmatpush3.bf16.msra.mxu1 %v5620_v62  ;;  %v3442_v16 = vpop.f32.mrb[83].mxu1  ;;  %v10594_v5 = vld [vmem:[#allocation18_spill] sm:$0xff] }
 0x49f   : > { %v3473_v8 = vmax.f32 %v3351_v9, 0.0  ;;  %5654 = vmatprep.subr.bf16.mxu1 %v10449_v36  ;;  %v10596_v16 = vld [vmem:[#allocation39_spill] sm:$0xff] }
 0x4a0   : > { %v3491_v6 = vmax.f32 %v3441_v61, 0.0  ;;  %v3355_v17 = vpop.f32.mrb[86].mxu0 }
 0x4a1   : > { %v5555_v28 = vpack.c.bf16 %v3473_v8, %v3472_v0  ;;  %v3445_v12 = vpop.f32.mrb[84].mxu1  ;;  %v3357_v11 = vpop.f32.mrb[87].mxu0  ;;  %v3356_v53 = vadd.f32 %v3355_v17, %v10589_v51  ;;  %4109 = vperm.xlu1 %5990, %v10591_v7   ;;  %v10597_v17 = vld [vmem:[#allocation43_spill] sm:$0xff] }
 0x4a2   : > { %v9022_v33 = vpack.c.bf16 %v3491_v6, %v3490_v39  ;;  %v3447_v50 = vpop.f32.mrb[85].mxu1  ;;  %v3446_v23 = vadd.f32 %v3445_v12, %v10590_v63  ;;  %v10595_v39 = vld [vmem:[#allocation38_spill] sm:$0xff] }
 0x4a3   : > { %5556 = vmatpush1.bf16.msra.mxu0 %v5555_v28  ;;  %v3474_v32 = vmax.f32 %v3356_v53, 0.0 }
 0x4a4   : > { %v3360_v13 = vpop.f32.mrb[88].mxu0  ;;  %5557 = vmatprep.subr.bf16.mxu0 %v10449_v36  ;;  %v3492_v55 = vmax.f32 %v3446_v23, 0.0 }
 0x4a5   : > { %v3361_v3 = vadd.f32 %v3360_v13, %v10592_v45  ;;  %v3450_v31 = vpop.f32.mrb[86].mxu1  ;;  %v3362_v42 = vpop.f32.mrb[89].mxu0  ;;  %5991 = vset.pattern.permute.xlu1 %v6248_v14  ;;  %v10598_v45 = vld [vmem:[#allocation32_spill] sm:$0xff] }
 0x4a6   : > { %v3451_v21 = vadd.f32 %v3450_v31, %v10593_v29  ;;  %v3452_v19 = vpop.f32.mrb[87].mxu1  ;;  %4269 = vperm.xlu1 %5991, %v10591_v7   ;;  %v9046_v31 = vld [vmem:[%s10329_s5 + $0x60] sm:$0xff]  ;;  %v10599_v29 = vld [vmem:[#allocation14_spill] sm:$0xff] }
 0x4a7   : > { %v3475_v27 = vmax.f32 %v3361_v3, 0.0 }
 0x4a8   : > { %v3493_v25 = vmax.f32 %v3451_v21, 0.0  ;;  %v3365_v46 = vpop.f32.mrb[90].mxu0 }
 0x4a9   : > { %v5558_v30 = vpack.c.bf16 %v3475_v27, %v3474_v32  ;;  %v3455_v62 = vpop.f32.mrb[88].mxu1  ;;  %v3367_v38 = vpop.f32.mrb[91].mxu0  ;;  %v3366_v59 = vadd.f32 %v3365_v46, %v10594_v5  ;;  %v10602_v5 = vld [vmem:[#allocation20_spill] sm:$0xff] }
 0x4aa   : > { %v9032_v4 = vpack.c.bf16 %v3493_v25, %v3492_v55  ;;  %v3457_v9 = vpop.f32.mrb[89].mxu1  ;;  %v3456_v24 = vadd.f32 %v3455_v62, %v10595_v39  ;;  %5992 = vset.pattern.permute.xlu1 %v6249_v43  ;;  %v10600_v55 = vld [vmem:[#allocation21_spill] sm:$0xff]  ;;  %v10601_v62 = vld [vmem:[#allocation24_spill] sm:$0xff] }
 0x4ab   : > { %5559 = vmatpush1.bf16.msra.mxu0 %v5558_v30  ;;  %4449 = vperm.xlu1 %5992, %v8985_v44   ;;  %v3476_v11 = vmax.f32 %v3366_v59, 0.0 }
 0x4ac   : > { %v3370_v61 = vpop.f32.mrb[92].mxu0  ;;  %5560 = vmatprep.subr.bf16.mxu0 %v10449_v36  ;;  %v3494_v51 = vmax.f32 %v3456_v24, 0.0 }
 0x4ad   : > { %v3371_v0 = vadd.f32 %v3370_v61, %v10596_v16  ;;  %v3460_v8 = vpop.f32.mrb[90].mxu1  ;;  %v3372_v6 = vpop.f32.mrb[93].mxu0 }
 0x4ae   : > { %v3461_v28 = vadd.f32 %v3460_v8, %v10597_v17  ;;  %v3462_v12 = vpop.f32.mrb[91].mxu1  ;;  %v10603_v8 = vld [vmem:[#allocation40_spill] sm:$0xff]  ;;  %v2216_v6 = vld [vmem:[%s10327_s3 + $0x88] sm:$0xff] }
 0x4af   : > { %v3477_v50 = vmax.f32 %v3371_v0, 0.0  ;;  %5993 = vset.pattern.permute.xlu1 %v6247_v58  ;;  %v9064_v0 = vld [vmem:[%s10329_s5 + $0x70] sm:$0xff]  ;;  %v2218_v12 = vld [vmem:[%s10327_s3 + $0xd8] sm:$0xff] }
 0x4b0   : > { %v3495_v53 = vmax.f32 %v3461_v28, 0.0  ;;  %v3375_v63 = vpop.f32.mrb[94].mxu0  ;;  %4113 = vperm.xlu1 %5993, %v9046_v31   ;;  %v2215_v28 = vld [vmem:[%s10327_s3 + $0x80] sm:$0xff] }
 0x4b1   : > { %v5561_v23 = vpack.c.bf16 %v3477_v50, %v3476_v11  ;;  %v3377_v13 = vpop.f32.mrb[95].mxu0  ;;  %v3376_v3 = vadd.f32 %v3375_v63, %v10598_v45  ;;  %v2217_v11 = vld [vmem:[%s10327_s3 + $0xd0] sm:$0xff]  ;;  %v2220_v50 = vld [vmem:[%s10327_s3 + $0x128] sm:$0xff]  ;;  %v2223_v45 = vld [vmem:[%s10327_s3 + $0x1c0] sm:$0xff] }
 0x4b2   : > { %v5588_v7 = vpack.c.bf16 %v3495_v53, %v3494_v51  ;;  %v2219_v51 = vld [vmem:[%s10327_s3 + $0x120] sm:$0xff]  ;;  %v2222_v53 = vld [vmem:[%s10327_s3 + $0x178] sm:$0xff]  ;;  %v9137_v63 = vld [vmem:[%s10329_s5 + $0x90] sm:$0xff] }
 0x4b3   : > { %5562 = vmatpush1.bf16.msra.mxu0 %v5561_v23  ;;  %v3478_v32 = vmax.f32 %v3376_v3, 0.0  ;;  %v2221_v23 = vld [vmem:[%s10327_s3 + $0x170] sm:$0xff]  ;;  %v2224_v13 = vld [vmem:[%s10327_s3 + $0x1c8] sm:$0xff]  ;;  %v2226_v3 = vld [vmem:[%s10327_s3 + $0x218] sm:$0xff] }
 0x4b4   : > { %v3380_v42 = vpop.f32.mrb[96].mxu0  ;;  %5563 = vmatprep.subr.bf16.mxu0 %v10449_v36  ;;  %4117 = vperm.xlu1 %5993, %v10600_v55  }
 0x4b5   : > { %v3381_v21 = vadd.f32 %v3380_v42, %v10599_v29  ;;  %v3382_v19 = vpop.f32.mrb[97].mxu0  ;;  %v2225_v42 = vld [vmem:[%s10327_s3 + $0x210] sm:$0xff]  ;;  %v2228_v29 = vld [vmem:[%s10327_s3 + $0x268] sm:$0xff] }
 0x4b6   : > { %v2230_v19 = vld [vmem:[%s10327_s3 + $0x2b8] sm:$0xff] }
 0x4b7   : > { %v3479_v27 = vmax.f32 %v3381_v21, 0.0  ;;  %v2227_v21 = vld [vmem:[%s10327_s3 + $0x260] sm:$0xff] }
 0x4b8   : > { %v3385_v25 = vpop.f32.mrb[98].mxu0  ;;  %5994 = vset.pattern.permute.xlu1 %v6248_v14 }
 0x4b9   : > { %v5564_v46 = vpack.c.bf16 %v3479_v27, %v3478_v32  ;;  %v3387_v30 = vpop.f32.mrb[99].mxu0  ;;  %v3386_v38 = vadd.f32 %v3385_v25, %v10601_v62  ;;  %4277 = vperm.xlu1 %5994, %v10600_v55   ;;  %v2229_v32 = vld [vmem:[%s10327_s3 + $0x2b0] sm:$0xff]  ;;  %v9181_v27 = vld [vmem:[%s10329_s5 + $0xa0] sm:$0xff]  ;;  %v2232_v55 = vld [vmem:[%s10327_s3 + $0x308] sm:$0xff] }
 0x4ba   : > { %v2231_v25 = vld [vmem:[%s10327_s3 + $0x300] sm:$0xff]  ;;  %v2234_v30 = vld [vmem:[%s10327_s3 + $0x358] sm:$0xff]  ;;  %v2233_v62 = vld [vmem:[%s10327_s3 + $0x350] sm:$0xff] }
 0x4bb   : > { %5565 = vmatpush1.bf16.msra.mxu0 %v5564_v46  ;;  %v3480_v24 = vmax.f32 %v3386_v38, 0.0  ;;  %v9193_v46 = vld [vmem:[%s10329_s5 + $0xa8] sm:$0xff] }
 0x4bc   : > { %v3390_v9 = vpop.f32.mrb[100].mxu0  ;;  %5566 = vmatprep.subr.bf16.mxu0 %v10449_v36  ;;  %v2236_v38 = vld [vmem:[%s10327_s3 + $0x3a8] sm:$0xff] }
 0x4bd   : > { %v3391_v59 = vadd.f32 %v3390_v9, %v10602_v5  ;;  %v3392_v39 = vpop.f32.mrb[101].mxu0  ;;  %5995 = vset.pattern.permute.xlu1 %v6249_v43  ;;  %v2235_v9 = vld [vmem:[%s10327_s3 + $0x3a0] sm:$0xff]  ;;  %v2238_v5 = vld [vmem:[%s10327_s3 + $0x3f8] sm:$0xff] }
 0x4be   : > { %4457 = vperm.xlu1 %5995, %v9019_v26   ;;  %v2240_v39 = vld [vmem:[%s10327_s3 + $0x448] sm:$0xff] }
 0x4bf   : > { %v3481_v61 = vmax.f32 %v3391_v59, 0.0  ;;  %v2237_v59 = vld [vmem:[%s10327_s3 + $0x3f0] sm:$0xff] }
 0x4c1   : > { %v5567_v16 = vpack.c.bf16 %v3481_v61, %v3480_v24  ;;  %v9225_v24 = vld [vmem:[%s10329_s5 + $0xb0] sm:$0xff]  ;;  %v2239_v61 = vld [vmem:[%s10327_s3 + $0x440] sm:$0xff] }
 0x4c2   : > { %5996 = vset.pattern.permute.xlu1 %v6247_v58 }
 0x4c3   : > { %5568 = vmatpush1.bf16.msra.mxu0 %v5567_v16  ;;  %4121 = vperm.xlu1 %5996, %v9064_v0   ;;  %v2242_v16 = vld [vmem:[%s10327_s3 + $0x498] sm:$0xff] }
 0x4c4   : > { %5569 = vmatprep.subr.bf16.mxu0 %v10449_v36 }
 0x4c7   : > { %5571 = vmatpush1.bf16.msra.mxu0 %v8960_v20  ;;  %4125 = vperm.xlu1 %5996, %v10603_v8   ;;  %v9086_v20 = vld [vmem:[%s10329_s5 + $0x80] sm:$0xff] }
 0x4c8   : > { %5572 = vmatprep.subr.bf16.mxu0 %v10449_v36 }
 0x4cb   : > { %5574 = vmatpush1.bf16.msra.mxu0 %v8975_v57  ;;  %5997 = vset.pattern.permute.xlu1 %v6248_v14  ;;  %v9094_v57 = vld [vmem:[%s10329_s5 + $0x88] sm:$0xff] }
 0x4cc   : > { %5575 = vmatprep.subr.bf16.mxu0 %v10449_v36  ;;  %4285 = vperm.xlu1 %5997, %v10603_v8   ;;  %v9237_v8 = vld [vmem:[%s10329_s5 + $0xb8] sm:$0xff] }
 0x4cf   : > { %5577 = vmatpush1.bf16.msra.mxu0 %v8994_v35  ;;  %v3882_v35 = vld [vmem:[%s10328_s4 + $0x8] sm:$0xff] }
 0x4d0   : > { %5578 = vmatprep.subr.bf16.mxu0 %v10449_v36  ;;  %5998 = vset.pattern.permute.xlu1 %v6249_v43 }
 0x4d1   : > { %4465 = vperm.xlu1 %5998, %v9046_v31   ;;  %3957 = vmatprep.mubr.f32.mxu1 %v3882_v35  ;;  %v2241_v35 = vld [vmem:[%s10327_s3 + $0x490] sm:$0xff] }
 0x4d3   : > { %5580 = vmatpush1.bf16.msra.mxu0 %v9005_v47  ;;  %v3881_v47 = vld [vmem:[%s10328_s4] sm:$0xff] }
 0x4d4   : > { %5581 = vmatprep.subr.bf16.mxu0 %v10449_v36  ;;  %3958 = vmatmul.mubr.f32.vlgmr.msra.gmra.mrb[92].mxu1 %v3881_v47  ;;  %v2244_v47 = vld [vmem:[%s10327_s3 + $0x4e8] sm:$0xff] }
 0x4d5   : > { %5999 = vset.pattern.permute.xlu1 %v6247_v58 }
 0x4d6   : > { %4129 = vperm.xlu1 %5999, %v9086_v20  }
 0x4d7   : > { %5583 = vmatpush1.bf16.msra.mxu0 %v9022_v33  ;;  %v9103_v33 = vpop.permute.xlu1 %3557 }
 0x4d8   : > { %5584 = vmatprep.subr.bf16.mxu0 %v10449_v36 }
 0x4da   : > { %4133 = vperm.xlu1 %5999, %v9094_v57  }
 0x4db   : > { %5586 = vmatpush1.bf16.msra.mxu0 %v9032_v4  ;;  %v2213_v4 = vld [vmem:[%s10327_s3 + $0x30] sm:$0xff]  ;;  %v3889_v17 = vpop.permute.xlu1 %3888 }
 0x4dc   : > { %5587 = vmatprep.subr.bf16.mxu0 %v10449_v36  ;;  %5767 = vpush %v3889_v17  ;;  %v2245_v17 = vld [vmem:[%s10327_s3 + $0x530] sm:$0xff]  ;;  %v10614_v36 = vld [vmem:[#allocation2_spill] sm:$0xff] }
 0x4de   : > { %6000 = vset.pattern.permute.xlu1 %v6248_v14 }
 0x4df   : > { %5589 = vmatpush1.bf16.msra.mxu0 %v5588_v7  ;;  %4293 = vperm.xlu1 %6000, %v9094_v57   ;;  %v9149_v7 = vld [vmem:[%s10329_s5 + $0x98] sm:$0xff] }
 0x4e2   : > { %3689 = vmatmul.mubr.f32.vlgmr.msra.gmra.mrb[102].mxu0 %v2213_v4  ;;  %v2243_v4 = vld [vmem:[%s10327_s3 + $0x4e0] sm:$0xff] }
 0x4e3   : > { %3693 = vmatprep.mubr.f32.mxu0 %v2216_v6  ;;  %6001 = vset.pattern.permute.xlu1 %v6249_v43  ;;  %v2246_v6 = vld [vmem:[%s10327_s3 + $0x538] sm:$0xff] }
 0x4e4   : > { %4473 = vperm.xlu1 %6001, %v9064_v0  }
 0x4e6   : > { %3694 = vmatmul.mubr.f32.gmra.mrb[104].mxu0 %v2215_v28  ;;  %v2248_v28 = vld [vmem:[%s10327_s3 + $0x588] sm:$0xff] }
 0x4e7   : > { %3698 = vmatprep.mubr.f32.mxu0 %v2218_v12  ;;  %v9261_v12 = vpop.permute.xlu1 %4065 }
 0x4e8   : > { %6002 = vset.pattern.permute.xlu1 %v6247_v58 }
 0x4e9   : > { %4137 = vperm.xlu1 %6002, %v9137_v63  }
 0x4ea   : > { %3699 = vmatmul.mubr.f32.gmra.mrb[106].mxu0 %v2217_v11  ;;  %v2247_v11 = vld [vmem:[%s10327_s3 + $0x580] sm:$0xff] }
 0x4eb   : > { %3703 = vmatprep.mubr.f32.mxu0 %v2220_v50  ;;  %v2250_v50 = vld [vmem:[%s10327_s3 + $0x5d8] sm:$0xff] }
 0x4ed   : > { %4141 = vperm.xlu1 %6002, %v9149_v7  }
 0x4ee   : > { %3704 = vmatmul.mubr.f32.gmra.mrb[108].mxu0 %v2219_v51  ;;  %v9274_v51 = vld [vmem:[%s10329_s5 + $0xc0] sm:$0xff] }
 0x4ef   : > { %3708 = vmatprep.mubr.f32.mxu0 %v2222_v53  ;;  %v9277_v53 = vpop.permute.xlu1 %4225 }
 0x4f1   : > { %6003 = vset.pattern.permute.xlu1 %v6248_v14 }
 0x4f2   : > { %3709 = vmatmul.mubr.f32.gmra.mrb[110].mxu0 %v2221_v23  ;;  %4301 = vperm.xlu1 %6003, %v9149_v7   ;;  %v2249_v23 = vld [vmem:[%s10327_s3 + $0x5d0] sm:$0xff] }
 0x4f3   : > { %3713 = vmatprep.mubr.f32.mxu0 %v2224_v13  ;;  %v2252_v13 = vld [vmem:[%s10327_s3 + $0x628] sm:$0xff] }
 0x4f6   : > { %3714 = vmatmul.mubr.f32.gmra.mrb[112].mxu0 %v2223_v45  ;;  %6004 = vset.pattern.permute.xlu1 %v6249_v43  ;;  %v9288_v45 = vld [vmem:[%s10329_s5 + $0xc8] sm:$0xff] }
 0x4f7   : > { %3718 = vmatprep.mubr.f32.mxu0 %v2226_v3  ;;  %4481 = vperm.xlu1 %6004, %v9086_v20   ;;  %v2251_v3 = vld [vmem:[%s10327_s3 + $0x620] sm:$0xff] }
 0x4fa   : > { %3719 = vmatmul.mubr.f32.gmra.mrb[114].mxu0 %v2225_v42  ;;  %v2254_v42 = vld [vmem:[%s10327_s3 + $0x678] sm:$0xff] }
 0x4fb   : > { %3723 = vmatprep.mubr.f32.mxu0 %v2228_v29  ;;  %6005 = vset.pattern.permute.xlu1 %v6247_v58  ;;  %v9297_v29 = vpop.permute.xlu1 %4229 }
 0x4fc   : > { %4145 = vperm.xlu1 %6005, %v9181_v27  }
 0x4fe   : > { %3724 = vmatmul.mubr.f32.gmra.mrb[116].mxu0 %v2227_v21  ;;  %v2253_v21 = vld [vmem:[%s10327_s3 + $0x670] sm:$0xff] }
 0x4ff   : > { %3728 = vmatprep.mubr.f32.mxu0 %v2230_v19  ;;  %v2256_v19 = vld [vmem:[%s10327_s3 + $0x6c8] sm:$0xff] }
 0x500   : > { %4149 = vperm.xlu1 %6005, %v9193_v46  }
 0x502   : > { %3729 = vmatmul.mubr.f32.gmra.mrb[118].mxu0 %v2229_v32  ;;  %v9307_v32 = vpop.permute.xlu1 %4077 }
 0x503   : > { %3733 = vmatprep.mubr.f32.mxu0 %v2232_v55  ;;  %v2255_v55 = vld [vmem:[%s10327_s3 + $0x6c0] sm:$0xff] }
 0x504   : > { %6006 = vset.pattern.permute.xlu1 %v6248_v14 }
 0x505   : > { %4309 = vperm.xlu1 %6006, %v9193_v46  }
 0x506   : > { %3734 = vmatmul.mubr.f32.gmra.mrb[120].mxu0 %v2231_v25  ;;  %v2258_v25 = vld [vmem:[%s10327_s3 + $0x718] sm:$0xff] }
 0x507   : > { %3738 = vmatprep.mubr.f32.mxu0 %v2234_v30  ;;  %v2257_v30 = vld [vmem:[%s10327_s3 + $0x710] sm:$0xff] }
 0x509   : > { %6007 = vset.pattern.permute.xlu1 %v6249_v43 }
 0x50a   : > { %3739 = vmatmul.mubr.f32.gmra.mrb[122].mxu0 %v2233_v62  ;;  %4489 = vperm.xlu1 %6007, %v9137_v63   ;;  %v2260_v62 = vld [vmem:[%s10327_s3 + $0x768] sm:$0xff] }
 0x50b   : > { %3743 = vmatprep.mubr.f32.mxu0 %v2236_v38  ;;  %v9324_v38 = vpop.permute.xlu1 %4237 }
 0x50d   : > { %s5768_s22 = spop %5767 }
 0x50e   : > { %3744 = vmatmul.mubr.f32.gmra.mrb[124].mxu0 %v2235_v9  ;;  %6008 = vset.pattern.permute.xlu1 %v6247_v58  ;;  %v9329_v9 = vld [vmem:[%s10329_s5 + $0xd0] sm:$0xff] }
 0x50f   : > { %3748 = vmatprep.mubr.f32.mxu0 %v2238_v5  ;;  %4153 = vperm.xlu1 %6008, %v9225_v24   ;;  %v2259_v5 = vld [vmem:[%s10327_s3 + $0x760] sm:$0xff] }
 0x512   : > { %3749 = vmatmul.mubr.f32.gmra.mrb[126].mxu0 %v2237_v59  ;;  %v2262_v59 = vld [vmem:[%s10327_s3 + $0x7b8] sm:$0xff] }
 0x513   : > { %3753 = vmatprep.mubr.f32.mxu0 %v2240_v39  ;;  %4157 = vperm.xlu1 %6008, %v9237_v8   ;;  %v9341_v39 = vld [vmem:[%s10329_s5 + $0xd8] sm:$0xff] }
 0x516   : > { %3754 = vmatmul.mubr.f32.gmra.mrb[128].mxu0 %v2239_v61  ;;  %v9344_v61 = vpop.permute.xlu1 %4417 }
 0x517   : > { %3758 = vmatprep.mubr.f32.mxu0 %v2242_v16  ;;  %6009 = vset.pattern.permute.xlu1 %v6248_v14  ;;  %v2261_v16 = vld [vmem:[%s10327_s3 + $0x7b0] sm:$0xff] }
 0x518   : > { %4317 = vperm.xlu1 %6009, %v9237_v8  }
 0x51a   : > { %3759 = vmatmul.mubr.f32.gmra.mrb[130].mxu0 %v2241_v35  ;;  %v2264_v35 = vld [vmem:[%s10327_s3 + $0x808] sm:$0xff] }
 0x51b   : > { %3763 = vmatprep.mubr.f32.mxu0 %v2244_v47  ;;  %v2263_v47 = vld [vmem:[%s10327_s3 + $0x800] sm:$0xff] }
 0x51c   : > { %6010 = vset.pattern.permute.xlu1 %v6249_v43 }
 0x51d   : > { %4497 = vperm.xlu1 %6010, %v9181_v27  }
 0x51e   : > { %3764 = vmatmul.mubr.f32.gmra.mrb[132].mxu0 %v2243_v4  ;;  %v2266_v4 = vld [vmem:[%s10327_s3 + $0x858] sm:$0xff] }
 0x51f   : > { %3768 = vmatprep.mubr.f32.mxu0 %v2246_v6  ;;  %v9360_v6 = vpop.permute.xlu1 %4081 }
 0x521   : > { %6011 = vset.pattern.permute.xlu1 %v6247_v58 }
 0x522   : > { %3769 = vmatmul.mubr.f32.gmra.mrb[134].mxu0 %v2245_v17  ;;  %4161 = vperm.xlu1 %6011, %v9274_v51   ;;  %v2265_v17 = vld [vmem:[%s10327_s3 + $0x850] sm:$0xff] }
 0x523   : > { %3773 = vmatprep.mubr.f32.mxu0 %v2248_v28  ;;  %v2268_v28 = vld [vmem:[%s10327_s3 + $0x8a8] sm:$0xff] }
 0x526   : > { %3774 = vmatmul.mubr.f32.gmra.mrb[136].mxu0 %v2247_v11  ;;  %4165 = vperm.xlu1 %6011, %v9288_v45   ;;  %v9370_v11 = vpop.permute.xlu1 %4085 }
 0x527   : > { %3778 = vmatprep.mubr.f32.mxu0 %v2250_v50  ;;  %v2267_v50 = vld [vmem:[%s10327_s3 + $0x8a0] sm:$0xff] }
 0x52a   : > { %3779 = vmatmul.mubr.f32.gmra.mrb[138].mxu0 %v2249_v23  ;;  %6012 = vset.pattern.permute.xlu1 %v6248_v14  ;;  %v6153_v23 = vld [vmem:[%s10329_s5 + $0xe0] sm:$0xff] }
 0x52b   : > { %3783 = vmatprep.mubr.f32.mxu0 %v2252_v13  ;;  %4325 = vperm.xlu1 %6012, %v9288_v45   ;;  %v2270_v13 = vld [vmem:[%s10327_s3 + $0x8f8] sm:$0xff] }
 0x52e   : > { %3784 = vmatmul.mubr.f32.gmra.mrb[140].mxu0 %v2251_v3  ;;  %v2269_v3 = vld [vmem:[%s10327_s3 + $0x8f0] sm:$0xff] }
 0x52f   : > { %3788 = vmatprep.mubr.f32.mxu0 %v2254_v42  ;;  %6013 = vset.pattern.permute.xlu1 %v6249_v43  ;;  %v9388_v42 = vld [vmem:[%s10329_s5 + $0xe8] sm:$0xff] }
 0x530   : > { %4505 = vperm.xlu1 %6013, %v9225_v24  }
 0x532   : > { %3789 = vmatmul.mubr.f32.gmra.mrb[142].mxu0 %v2253_v21  ;;  %v2272_v21 = vld [vmem:[%s10327_s3 + $0x948] sm:$0xff] }
 0x533   : > { %3793 = vmatprep.mubr.f32.mxu0 %v2256_v19  ;;  %v9394_v19 = vpop.permute.xlu1 %4245 }
 0x534   : > { %6014 = vset.pattern.permute.xlu1 %v6247_v58 }
 0x535   : > { %4169 = vperm.xlu1 %6014, %v9329_v9  }
 0x536   : > { %3794 = vmatmul.mubr.f32.gmra.mrb[144].mxu0 %v2255_v55  ;;  %v2271_v55 = vld [vmem:[%s10327_s3 + $0x940] sm:$0xff] }
 0x537   : > { %3798 = vmatprep.mubr.f32.mxu0 %v2258_v25  ;;  %v2274_v25 = vld [vmem:[%s10327_s3 + $0x998] sm:$0xff] }
 0x539   : > { %4173 = vperm.xlu1 %6014, %v9341_v39  }
 0x53a   : > { %3799 = vmatmul.mubr.f32.gmra.mrb[146].mxu0 %v2257_v30  ;;  %v9404_v30 = vpop.permute.xlu1 %4425 }
 0x53b   : > { %3803 = vmatprep.mubr.f32.mxu0 %v2260_v62  ;;  %v2273_v62 = vld [vmem:[%s10327_s3 + $0x990] sm:$0xff] }
 0x53d   : > { %6015 = vset.pattern.permute.xlu1 %v6248_v14 }
 0x53e   : > { %3804 = vmatmul.mubr.f32.gmra.mrb[148].mxu0 %v2259_v5  ;;  %4333 = vperm.xlu1 %6015, %v9341_v39   ;;  %v2276_v5 = vld [vmem:[%s10327_s3 + $0x9e8] sm:$0xff] }
 0x53f   : > { %3808 = vmatprep.mubr.f32.mxu0 %v2262_v59  ;;  %v6155_v59 = vld [vmem:[%s10329_s5] sm:$0x1] }
 0x540   : > { %3963 = vrot.lane.b32.xlu0 %v6155_v59, %s6250_s15  ;;  %s368_s15 = scalar_lea.vmem %s10331_s7, %s5269_s17 }
 0x542   : > { %3809 = vmatmul.mubr.f32.gmra.mrb[150].mxu0 %v2261_v16  ;;  %6016 = vset.pattern.permute.xlu1 %v6249_v43  ;;  %v2275_v16 = vld [vmem:[%s10327_s3 + $0x9e0] sm:$0xff] }
 0x543   : > { %3813 = vmatprep.mubr.f32.mxu0 %v2264_v35  ;;  %4513 = vperm.xlu1 %6016, %v9274_v51   ;;  %v9420_v35 = vpop.permute.xlu1 %4089 }
 0x544   : > { %4069 = vperm.xlu0 %5975, %v8900_v56  }
 0x546   : > { %3814 = vmatmul.mubr.f32.gmra.mrb[152].mxu0 %v2263_v47  ;;  %v6156_v47 = vld [vmem:[%s10329_s5 + $0xf0] sm:$0xff] }
 0x547   : > { %3818 = vmatprep.mubr.f32.mxu0 %v2266_v4  ;;  %6017 = vset.pattern.permute.xlu1 %v6247_v58  ;;  %v9427_v4 = vpop.permute.xlu1 %4093 }
 0x548   : > { %4177 = vperm.xlu1 %6017, %v6153_v23   ;;  %4073 = vperm.xlu0 %5975, %v8939_v34  }
 0x54a   : > { %3819 = vmatmul.mubr.f32.gmra.mrb[154].mxu0 %v2265_v17  ;;  %v6157_v17 = vld [vmem:[%s10329_s5 + $0xf8] sm:$0xff] }
 0x54b   : > { %3823 = vmatprep.mubr.f32.mxu0 %v2268_v28 }
 0x54c   : > { %4181 = vperm.xlu1 %6017, %v9388_v42   ;;  %5978 = vset.pattern.permute.xlu0 %v6248_v14 }
 0x54d   : > { %4233 = vperm.xlu0 %5978, %v8939_v34   ;;  %v3498_v34 = vpop.permute.xlu0 %3497 }
 0x54e   : > { %3824 = vmatmul.mubr.f32.gmra.mrb[156].mxu0 %v2267_v50  ;;  %v9492_v50 = vld [vmem:[%s10329_s5 + $0x58] sm:$0xff] }
 0x54f   : > { %3828 = vmatprep.mubr.f32.mxu0 %v2270_v13  ;;  %10609 = vst [vmem:[#allocation17_spill] sm:$0xff] %v9492_v50 }
 0x550   : > { %6018 = vset.pattern.permute.xlu1 %v6248_v14 }
 0x551   : > { %4341 = vperm.xlu1 %6018, %v9388_v42   ;;  %4241 = vperm.xlu0 %5978, %v8922_v52   ;;  %v9465_v52 = vld [vmem:[%s10329_s5 + $0x18] sm:$0xff] }
 0x552   : > { %3829 = vmatmul.mubr.f32.gmra.mrb[158].mxu0 %v2269_v3  ;;  %10605 = vst [vmem:[#allocation4_spill] sm:$0xff] %v9465_v52 }
 0x553   : > { %3833 = vmatprep.mubr.f32.mxu0 %v2272_v21 }
 0x555   : > { %6019 = vset.pattern.permute.xlu1 %v6249_v43  ;;  %4249 = vperm.xlu0 %5978, %v8951_v15   ;;  %v9471_v15 = vld [vmem:[%s10329_s5 + $0x28] sm:$0xff] }
 0x556   : > { %3834 = vmatmul.mubr.f32.gmra.mrb[160].mxu0 %v2271_v55  ;;  %4521 = vperm.xlu1 %6019, %v9329_v9   ;;  %10606 = vst [vmem:[#allocation12_spill] sm:$0xff] %v9471_v15 }
 0x557   : > { %3838 = vmatprep.mubr.f32.mxu0 %v2274_v25 }
 0x559   : > { %4257 = vperm.xlu0 %5978, %v8985_v44   ;;  %v9477_v44 = vld [vmem:[%s10329_s5 + $0x38] sm:$0xff] }
 0x55a   : > { %3839 = vmatmul.mubr.f32.gmra.mrb[162].mxu0 %v2273_v62  ;;  %6020 = vset.pattern.permute.xlu1 %v6247_v58  ;;  %v9435_v58 = vpop.permute.xlu1 %4253  ;;  %10607 = vst [vmem:[#allocation5_spill] sm:$0xff] %v9477_v44 }
 0x55b   : > { %3843 = vmatprep.mubr.f32.mxu0 %v2276_v5  ;;  %4185 = vperm.xlu1 %6020, %v6156_v47  }
 0x55d   : > { %4265 = vperm.xlu0 %5978, %v9019_v26  }
 0x55e   : > { %3844 = vmatmul.mubr.f32.gmra.mrb[164].mxu0 %v2275_v16  ;;  %v9440_v56 = vpop.permute.xlu1 %4433  ;;  %v9501_v16 = vld [vmem:[%s10329_s5 + $0x68] sm:$0xff] }
 0x55f   : > { %4189 = vperm.xlu1 %6020, %v6157_v17   ;;  %10611 = vst [vmem:[#allocation19_spill] sm:$0xff] %v9501_v16 }
 0x561   : > { %4273 = vperm.xlu0 %5978, %v9046_v31  }
 0x562   : > { %v9443_v28 = vpop.permute.xlu1 %4097 }
 0x563   : > { %6022 = vset.pattern.permute.xlu1 %v6248_v14  ;;  %v9459_v14 = vld [vmem:[%s10329_s5 + $0x8] sm:$0xff] }
 0x564   : > { %4349 = vperm.xlu1 %6022, %v6157_v17   ;;  %10604 = vst [vmem:[#allocation41_spill] sm:$0xff] %v9459_v14 }
 0x565   : > { %4281 = vperm.xlu0 %5978, %v9064_v0   ;;  %v9483_v0 = vld [vmem:[%s10329_s5 + $0x48] sm:$0xff] }
 0x566   : > { %10608 = vst [vmem:[#allocation44_spill] sm:$0xff] %v9483_v0 }
 0x568   : > { %6023 = vset.pattern.permute.xlu1 %v6249_v43 }
 0x569   : > { %4529 = vperm.xlu1 %6023, %v6153_v23   ;;  %4289 = vperm.xlu0 %5978, %v9086_v20  }
 0x56d   : > { %4537 = vperm.xlu1 %6023, %v6156_v47   ;;  %4297 = vperm.xlu0 %5978, %v9137_v63  }
 0x571   : > { %4541 = vperm.xlu1 %6023, %v6157_v17   ;;  %4305 = vperm.xlu0 %5978, %v9181_v27  }
 0x575   : > { %4313 = vperm.xlu0 %5978, %v9225_v24  }
 0x579   : > { %4321 = vperm.xlu0 %5978, %v9274_v51  }
 0x57d   : > { %4329 = vperm.xlu0 %5978, %v9329_v9   ;;  %v3884_v9 = vld [vmem:[%s10328_s4 + $0x18] sm:$0xff] }
 0x57e   : > { %4032 = vmatprep.mubr.f32.mxu0 %v3884_v9 }
 0x581   : > { %4337 = vperm.xlu0 %5978, %v6153_v23   ;;  %v10610_v23 = vld [vmem:[#allocation22_spill] sm:$0xff] }
 0x585   : > { %4345 = vperm.xlu0 %5978, %v6156_v47  }
 0x589   : > { %6021 = vset.pattern.permute.xlu0 %v6249_v43  ;;  %v3506_v43 = vpop.permute.xlu0 %3505 }
 0x58a   : > { %4421 = vperm.xlu0 %6021, %v9459_v14  }
 0x58d   : > { %v3514_v26 = vpop.permute.xlu0 %3513 }
 0x58e   : > { %4429 = vperm.xlu0 %6021, %v9465_v52  }
 0x591   : > { %v3522_v27 = vpop.permute.xlu0 %3521 }
 0x592   : > { %4437 = vperm.xlu0 %6021, %v9471_v15  }
 0x595   : > { %v3530_v5 = vpop.permute.xlu0 %3529 }
 0x596   : > { %4445 = vperm.xlu0 %6021, %v9477_v44  }
 0x59a   : > { %4453 = vperm.xlu0 %6021, %v9483_v0  }
 0x59e   : > { %4461 = vperm.xlu0 %6021, %v9492_v50  }
 0x5a2   : > { %4469 = vperm.xlu0 %6021, %v9501_v16  }
 0x5a7   : > { %v5308_v24 = vpop.f32.mrb[92].mxu1 }
 0x5a8   : > { %v5309_v21 = vpop.f32.mrb[93].mxu1 }
 0x5a9   : > { %v9496_v55 = vadd.f32 %v5309_v21, %v5308_v24  ;;  %v10613_v24 = vld [vmem:[#allocation16_spill] sm:$0xff] }
 0x5b5   : > { %v3690_v31 = vpop.f32.mrb[102].mxu0 }
 0x5b6   : > { %v3692_v20 = vpop.f32.mrb[103].mxu0  ;;  %v3691_v63 = vadd.f32 %v3690_v31, %v3498_v34  ;;  %v3538_v31 = vpop.permute.xlu0 %3537 }
 0x5b8   : > { %v3849_v25 = vmax.f32 %v3691_v63, 0.0  ;;  %v9509_v63 = vld [vmem:[%s10329_s5 + $0x78] sm:$0xff] }
 0x5b9   : > { %v3695_v51 = vpop.f32.mrb[104].mxu0  ;;  %10612 = vst [vmem:[#allocation8_spill] sm:$0xff] %v9509_v63  ;;  %4477 = vperm.xlu0 %6021, %v9509_v63  }
 0x5ba   : > { %v3696_v13 = vadd.f32 %v3695_v51, %v10610_v23  ;;  %v3697_v3 = vpop.f32.mrb[105].mxu0 }
 0x5bb   : > { %v3546_v3 = vpop.permute.xlu0 %3545 }
 0x5bc   : > { %v3850_v62 = vmax.f32 %v3696_v13, 0.0 }
 0x5bd   : > { %v3700_v59 = vpop.f32.mrb[106].mxu0  ;;  %4485 = vperm.xlu0 %6021, %v9094_v57  }
 0x5be   : > { %v9504_v47 = vpack.c.bf16 %v3850_v62, %v3849_v25  ;;  %v3702_v17 = vpop.f32.mrb[107].mxu0  ;;  %v3701_v34 = vadd.f32 %v3700_v59, %v3506_v43 }
 0x5bf   : > { %v3554_v59 = vpop.permute.xlu0 %3553 }
 0x5c0   : > { %v3851_v23 = vmax.f32 %v3701_v34, 0.0 }
 0x5c1   : > { %v3705_v20 = vpop.f32.mrb[108].mxu0  ;;  %4493 = vperm.xlu0 %6021, %v9149_v7  }
 0x5c2   : > { %v3706_v51 = vadd.f32 %v3705_v20, %v10613_v24  ;;  %v3707_v9 = vpop.f32.mrb[109].mxu0 }
 0x5c3   : > { %v3964_v24 = vpop.permute.xlu0 %3963 }
 0x5c4   : > { %v3852_v13 = vmax.f32 %v3706_v51, 0.0  ;;  %5769 = vpush %v3964_v24 }
 0x5c5   : > { %v3710_v21 = vpop.f32.mrb[110].mxu0  ;;  %4501 = vperm.xlu0 %6021, %v9193_v46  }
 0x5c6   : > { %v9514_v25 = vpack.c.bf16 %v3852_v13, %v3851_v23  ;;  %v3712_v43 = vpop.f32.mrb[111].mxu0  ;;  %v3711_v62 = vadd.f32 %v3710_v21, %v3514_v26 }
 0x5c8   : > { %v3853_v50 = vmax.f32 %v3711_v62, 0.0 }
 0x5c9   : > { %v3715_v17 = vpop.f32.mrb[112].mxu0  ;;  %4509 = vperm.xlu0 %6021, %v9237_v8  }
 0x5ca   : > { %v3716_v16 = vadd.f32 %v3715_v17, %v10614_v36  ;;  %v3717_v63 = vpop.f32.mrb[113].mxu0 }
 0x5cc   : > { %v3854_v20 = vmax.f32 %v3716_v16, 0.0 }
 0x5cd   : > { %v3720_v34 = vpop.f32.mrb[114].mxu0  ;;  %4517 = vperm.xlu0 %6021, %v9288_v45  }
 0x5ce   : > { %v9519_v51 = vpack.c.bf16 %v3854_v20, %v3853_v50  ;;  %v3722_v57 = vpop.f32.mrb[115].mxu0  ;;  %v3721_v9 = vadd.f32 %v3720_v34, %v3522_v27 }
 0x5d0   : > { %v3855_v13 = vmax.f32 %v3721_v9, 0.0 }
 0x5d1   : > { %v3725_v23 = vpop.f32.mrb[116].mxu0  ;;  %4525 = vperm.xlu0 %6021, %v9341_v39  }
 0x5d2   : > { %v3726_v26 = vadd.f32 %v3725_v23, %v8873_v40  ;;  %v3727_v7 = vpop.f32.mrb[117].mxu0 }
 0x5d4   : > { %v3856_v36 = vmax.f32 %v3726_v26, 0.0 }
 0x5d5   : > { %v3730_v63 = vpop.f32.mrb[118].mxu0  ;;  %4533 = vperm.xlu0 %6021, %v9388_v42  }
 0x5d6   : > { %v9524_v16 = vpack.c.bf16 %v3856_v36, %v3855_v13  ;;  %v3732_v21 = vpop.f32.mrb[119].mxu0  ;;  %v3731_v46 = vadd.f32 %v3730_v63, %v3530_v5 }
 0x5d8   : > { %v3857_v62 = vmax.f32 %v3731_v46, 0.0 }
 0x5d9   : > { %v3735_v43 = vpop.f32.mrb[120].mxu0 }
 0x5da   : > { %v3736_v27 = vadd.f32 %v3735_v43, %v8903_v18  ;;  %v3737_v50 = vpop.f32.mrb[121].mxu0 }
 0x5dc   : > { %v3858_v8 = vmax.f32 %v3736_v27, 0.0 }
 0x5dd   : > { %v3740_v17 = vpop.f32.mrb[122].mxu0 }
 0x5de   : > { %v9529_v40 = vpack.c.bf16 %v3858_v8, %v3857_v62  ;;  %v3742_v20 = vpop.f32.mrb[123].mxu0  ;;  %v3741_v24 = vadd.f32 %v3740_v17, %v3538_v31 }
 0x5e0   : > { %v3859_v5 = vmax.f32 %v3741_v24, 0.0  ;;  %v10615_v24 = vld [vmem:[#allocation34_spill] sm:$0xff] }
 0x5e1   : > { %v3745_v45 = vpop.f32.mrb[124].mxu0 }
 0x5e2   : > { %v3746_v34 = vadd.f32 %v3745_v45, %v8929_v60  ;;  %v3747_v57 = vpop.f32.mrb[125].mxu0 }
 0x5e4   : > { %v3860_v9 = vmax.f32 %v3746_v34, 0.0  ;;  %v10616_v34 = vld [vmem:[#allocation37_spill] sm:$0xff] }
 0x5e5   : > { %v3750_v23 = vpop.f32.mrb[126].mxu0 }
 0x5e6   : > { %v9532_v39 = vpack.c.bf16 %v3860_v9, %v3859_v5  ;;  %v3752_v18 = vpop.f32.mrb[127].mxu0  ;;  %v3751_v26 = vadd.f32 %v3750_v23, %v3546_v3 }
 0x5e8   : > { %v3861_v42 = vmax.f32 %v3751_v26, 0.0 }
 0x5e9   : > { %v3755_v7 = vpop.f32.mrb[128].mxu0 }
 0x5ea   : > { %v3756_v13 = vadd.f32 %v3755_v7, %v8966_v41  ;;  %v3757_v36 = vpop.f32.mrb[129].mxu0  ;;  %v10617_v7 = vld [vmem:[#allocation28_spill] sm:$0xff] }
 0x5eb   : > { %v10618_v36 = vld [vmem:[#allocation3_spill] sm:$0xff] }
 0x5ec   : > { %v3862_v63 = vmax.f32 %v3756_v13, 0.0 }
 0x5ed   : > { %v3760_v21 = vpop.f32.mrb[130].mxu0 }
 0x5ee   : > { %v9535_v46 = vpack.c.bf16 %v3862_v63, %v3861_v42  ;;  %v3762_v31 = vpop.f32.mrb[131].mxu0  ;;  %v3761_v43 = vadd.f32 %v3760_v21, %v3554_v59 }
 0x5f0   : > { %v3863_v62 = vmax.f32 %v3761_v43, 0.0 }
 0x5f1   : > { %v3765_v60 = vpop.f32.mrb[132].mxu0 }
 0x5f2   : > { %v3766_v27 = vadd.f32 %v3765_v60, %v9103_v33  ;;  %v3767_v50 = vpop.f32.mrb[133].mxu0 }
 0x5f3   : > { %v10619_v50 = vld [vmem:[#allocation46_spill] sm:$0xff] }
 0x5f4   : > { %v3864_v8 = vmax.f32 %v3766_v27, 0.0 }
 0x5f5   : > { %v3770_v17 = vpop.f32.mrb[134].mxu0  ;;  %s5770_s23 = spop %5769 }
 0x5f6   : > { %v9538_v20 = vpack.c.bf16 %v3864_v8, %v3863_v62  ;;  %v3772_v3 = vpop.f32.mrb[135].mxu0  ;;  %v3771_v41 = vadd.f32 %v3770_v17, %v10615_v24  ;;  %v10620_v17 = vld [vmem:[#allocation9_spill] sm:$0xff] }
 0x5f8   : > { %v3865_v9 = vmax.f32 %v3771_v41, 0.0 }
 0x5f9   : > { %v3775_v45 = vpop.f32.mrb[136].mxu0 }
 0x5fa   : > { %v3776_v57 = vadd.f32 %v3775_v45, %v10616_v34  ;;  %v3777_v5 = vpop.f32.mrb[137].mxu0 }
 0x5fb   : > { %v10621_v5 = vld [vmem:[#allocation42_spill] sm:$0xff] }
 0x5fc   : > { %v3866_v23 = vmax.f32 %v3776_v57, 0.0 }
 0x5fd   : > { %v3780_v18 = vpop.f32.mrb[138].mxu0 }
 0x5fe   : > { %v5622_v59 = vpack.c.bf16 %v3866_v23, %v3865_v9  ;;  %v3782_v26 = vpop.f32.mrb[139].mxu0  ;;  %v3781_v33 = vadd.f32 %v3780_v18, %v10617_v7  ;;  %v10622_v18 = vld [vmem:[#allocation6_spill] sm:$0xff] }
 0x600   : > { %5623 = vmatprep.subr.bf16.mxu0 %v5622_v59  ;;  %v3867_v21 = vmax.f32 %v3781_v33, 0.0 }
 0x601   : > { %v3785_v13 = vpop.f32.mrb[140].mxu0  ;;  %5625 = vmatpush3.bf16.msra.mxu0 %v9504_v47 }
 0x602   : > { %v3786_v42 = vadd.f32 %v3785_v13, %v10618_v36  ;;  %v3787_v63 = vpop.f32.mrb[141].mxu0 }
 0x604   : > { %v3868_v31 = vmax.f32 %v3786_v42, 0.0 }
 0x605   : > { %v3790_v43 = vpop.f32.mrb[142].mxu0 }
 0x606   : > { %v5626_v60 = vpack.c.bf16 %v3868_v31, %v3867_v21  ;;  %v3792_v27 = vpop.f32.mrb[143].mxu0  ;;  %v3791_v62 = vadd.f32 %v3790_v43, %v10619_v50 }
 0x608   : > { %5627 = vmatprep.subr.bf16.mxu0 %v5626_v60  ;;  %v3869_v41 = vmax.f32 %v3791_v62, 0.0 }
 0x609   : > { %v3795_v8 = vpop.f32.mrb[144].mxu0  ;;  %5629 = vmatpush3.bf16.msra.mxu0 %v9514_v25 }
 0x60a   : > { %v3796_v3 = vadd.f32 %v3795_v8, %v10620_v17  ;;  %v3797_v24 = vpop.f32.mrb[145].mxu0 }
 0x60c   : > { %v3870_v45 = vmax.f32 %v3796_v3, 0.0 }
 0x60d   : > { %v3800_v47 = vpop.f32.mrb[146].mxu0 }
 0x60e   : > { %v5630_v34 = vpack.c.bf16 %v3870_v45, %v3869_v41  ;;  %v3802_v57 = vpop.f32.mrb[147].mxu0  ;;  %v3801_v9 = vadd.f32 %v3800_v47, %v10621_v5 }
 0x610   : > { %5631 = vmatprep.subr.bf16.mxu0 %v5630_v34  ;;  %v3871_v7 = vmax.f32 %v3801_v9, 0.0 }
 0x611   : > { %v3805_v23 = vpop.f32.mrb[148].mxu0  ;;  %5633 = vmatpush3.bf16.msra.mxu0 %v9519_v51 }
 0x612   : > { %v3806_v59 = vadd.f32 %v3805_v23, %v10622_v18  ;;  %v3807_v26 = vpop.f32.mrb[149].mxu0 }
 0x614   : > { %v3872_v33 = vmax.f32 %v3806_v59, 0.0 }
 0x615   : > { %v3810_v25 = vpop.f32.mrb[150].mxu0 }
 0x616   : > { %v5634_v13 = vpack.c.bf16 %v3872_v33, %v3871_v7  ;;  %v3812_v36 = vpop.f32.mrb[151].mxu0  ;;  %v3811_v42 = vadd.f32 %v3810_v25, %v8882_v22  ;;  %v9567_v33 = vpop.permute.xlu1 %4101 }
 0x618   : > { %5635 = vmatprep.subr.bf16.mxu0 %v5634_v13  ;;  %v3873_v43 = vmax.f32 %v3811_v42, 0.0 }
 0x619   : > { %v3815_v63 = vpop.f32.mrb[152].mxu0  ;;  %5637 = vmatpush3.bf16.msra.mxu0 %v9524_v16 }
 0x61a   : > { %v3816_v21 = vadd.f32 %v3815_v63, %v8887_v54  ;;  %v3817_v31 = vpop.f32.mrb[153].mxu0 }
 0x61c   : > { %v3874_v60 = vmax.f32 %v3816_v21, 0.0 }
 0x61d   : > { %v3820_v51 = vpop.f32.mrb[154].mxu0 }
 0x61e   : > { %v5638_v27 = vpack.c.bf16 %v3874_v60, %v3873_v43  ;;  %v3822_v50 = vpop.f32.mrb[155].mxu0  ;;  %v3821_v62 = vadd.f32 %v3820_v51, %v8909_v48 }
 0x620   : > { %5639 = vmatprep.subr.bf16.mxu0 %v5638_v27  ;;  %v3875_v3 = vmax.f32 %v3821_v62, 0.0  ;;  %v4070_v62 = vpop.permute.xlu0 %4069 }
 0x621   : > { %v3825_v8 = vpop.f32.mrb[156].mxu0  ;;  %5641 = vmatpush3.bf16.msra.mxu0 %v9529_v40 }
 0x622   : > { %v3826_v22 = vadd.f32 %v3825_v8, %v8915_v1  ;;  %v3827_v17 = vpop.f32.mrb[157].mxu0 }
 0x624   : > { %v3876_v24 = vmax.f32 %v3826_v22, 0.0  ;;  %v4074_v22 = vpop.permute.xlu0 %4073 }
 0x625   : > { %v3830_v16 = vpop.f32.mrb[158].mxu0 }
 0x626   : > { %v5642_v41 = vpack.c.bf16 %v3876_v24, %v3875_v3  ;;  %v3832_v54 = vpop.f32.mrb[159].mxu0  ;;  %v3831_v45 = vadd.f32 %v3830_v16, %v8942_v10 }
 0x628   : > { %5643 = vmatprep.subr.bf16.mxu0 %v5642_v41  ;;  %v3877_v57 = vmax.f32 %v3831_v45, 0.0  ;;  %v4234_v3 = vpop.permute.xlu0 %4233 }
 0x629   : > { %v3835_v47 = vpop.f32.mrb[160].mxu0  ;;  %5645 = vmatpush3.bf16.msra.mxu0 %v9532_v39 }
 0x62a   : > { %v3836_v48 = vadd.f32 %v3835_v47, %v8945_v49  ;;  %v3837_v34 = vpop.f32.mrb[161].mxu0  ;;  %v3883_v49 = vld [vmem:[%s10328_s4 + $0x10] sm:$0xff] }
 0x62c   : > { %v3878_v5 = vmax.f32 %v3836_v48, 0.0  ;;  %v4242_v16 = vpop.permute.xlu0 %4241 }
 0x62d   : > { %v3840_v40 = vpop.f32.mrb[162].mxu0 }
 0x62e   : > { %v5646_v9 = vpack.c.bf16 %v3878_v5, %v3877_v57  ;;  %v3842_v1 = vpop.f32.mrb[163].mxu0  ;;  %v3841_v23 = vadd.f32 %v3840_v40, %v8988_v2  ;;  %v9569_v2 = vpop.permute.xlu1 %4261 }
 0x630   : > { %5647 = vmatprep.subr.bf16.mxu0 %v5646_v9  ;;  %v3879_v26 = vmax.f32 %v3841_v23, 0.0  ;;  %v4250_v54 = vpop.permute.xlu0 %4249 }
 0x631   : > { %v3845_v18 = vpop.f32.mrb[164].mxu0  ;;  %5649 = vmatpush3.bf16.msra.mxu0 %v9535_v46 }
 0x632   : > { %v3846_v10 = vadd.f32 %v3845_v18, %v8992_v37  ;;  %v3847_v59 = vpop.f32.mrb[165].mxu0  ;;  %v9571_v25 = vpop.permute.xlu1 %4441 }
 0x634   : > { %v3880_v7 = vmax.f32 %v3846_v10, 0.0  ;;  %v9611_v47 = vpop.permute.xlu0 %4257 }
 0x636   : > { %v5650_v39 = vpack.c.bf16 %v3880_v7, %v3879_v26  ;;  %v9573_v46 = vpop.permute.xlu1 %4105 }
 0x638   : > { %5651 = vmatprep.subr.bf16.mxu0 %v5650_v39  ;;  %v9615_v34 = vpop.permute.xlu0 %4265 }
 0x639   : > { %5653 = vmatpush3.bf16.msra.mxu0 %v9538_v20 }
 0x63a   : > { %v9575_v37 = vpop.permute.xlu1 %4109 }
 0x63c   : > { %4033 = vmatmul.mubr.f32.vlgmr.msra.gmra.mrb[166].mxu0 %v3883_v49  ;;  %v9619_v5 = vpop.permute.xlu0 %4273 }
 0x63e   : > { %v9577_v13 = vpop.permute.xlu1 %4269 }
 0x640   : > { %v9623_v9 = vpop.permute.xlu0 %4281 }
 0x642   : > { %v9579_v36 = vpop.permute.xlu1 %4449 }
 0x644   : > { %v9627_v23 = vpop.permute.xlu0 %4289 }
 0x646   : > { %v9581_v20 = vpop.permute.xlu1 %4113 }
 0x648   : > { %v9631_v10 = vpop.permute.xlu0 %4297 }
 0x64a   : > { %v9583_v42 = vpop.permute.xlu1 %4117 }
 0x64c   : > { %v9635_v26 = vpop.permute.xlu0 %4305 }
 0x64e   : > { %v9585_v63 = vpop.permute.xlu1 %4277 }
 0x650   : > { %v9639_v39 = vpop.permute.xlu0 %4313 }
 0x651   : > { %10632 = vst [vmem:[#allocation47_spill] sm:$0xff] %v9639_v39 }
 0x652   : > { %v9587_v21 = vpop.permute.xlu1 %4457 }
 0x654   : > { %v9643_v0 = vpop.permute.xlu0 %4321 }
 0x655   : > { %10634 = vst [vmem:[#allocation31_spill] sm:$0xff] %v9643_v0 }
 0x656   : > { %v9589_v31 = vpop.permute.xlu1 %4121 }
 0x658   : > { %v9647_v15 = vpop.permute.xlu0 %4329 }
 0x659   : > { %10636 = vst [vmem:[#allocation26_spill] sm:$0xff] %v9647_v15 }
 0x65a   : > { %v9591_v43 = vpop.permute.xlu1 %4125 }
 0x65c   : > { %v9651_v14 = vpop.permute.xlu0 %4337 }
 0x65d   : > { %10638 = vst [vmem:[#allocation36_spill] sm:$0xff] %v9651_v14  ;;  %v3966_v14 = vstv %s5770_s23 }
 0x65e   : > { %v9593_v60 = vpop.permute.xlu1 %4285 }
 0x662   : > { %v9595_v51 = vpop.permute.xlu1 %4465 }
 0x666   : > { %v9597_v27 = vpop.permute.xlu1 %4129 }
 0x66a   : > { %v9599_v50 = vpop.permute.xlu1 %4133 }
 0x66b   : > { %10623 = vst [vmem:[#allocation23_spill] sm:$0xff] %v9599_v50 }
 0x66e   : > { %v9601_v8 = vpop.permute.xlu1 %4293 }
 0x672   : > { %v9603_v17 = vpop.permute.xlu1 %4473 }
 0x676   : > { %v9605_v24 = vpop.permute.xlu1 %4137 }
 0x67a   : > { %v9607_v41 = vpop.permute.xlu1 %4141 }
 0x67b   : > { %10624 = vst [vmem:[#allocation29_spill] sm:$0xff] %v9607_v41 }
 0x67e   : > { %v9609_v45 = vpop.permute.xlu1 %4301 }
 0x67f   : > { %10625 = vst [vmem:[#allocation25_spill] sm:$0xff] %v9609_v45 }
 0x682   : > { %v9613_v48 = vpop.permute.xlu1 %4481 }
 0x686   : > { %v9617_v57 = vpop.permute.xlu1 %4145 }
 0x687   : > { %10626 = vst [vmem:[#allocation45_spill] sm:$0xff] %v9617_v57 }
 0x68a   : > { %v9621_v40 = vpop.permute.xlu1 %4149 }
 0x68b   : > { %10627 = vst [vmem:[#allocation10_spill] sm:$0xff] %v9621_v40 }
 0x68e   : > { %v9625_v1 = vpop.permute.xlu1 %4309 }
 0x68f   : > { %10628 = vst [vmem:[#allocation15_spill] sm:$0xff] %v9625_v1  ;;  %v9655_v1 = vpop.permute.xlu0 %4345 }
 0x690   : > { %10640 = vst [vmem:[#allocation18_spill] sm:$0xff] %v9655_v1 }
 0x692   : > { %v9629_v18 = vpop.permute.xlu1 %4489 }
 0x693   : > { %10629 = vst [vmem:[#allocation27_spill] sm:$0xff] %v9629_v18 }
 0x696   : > { %v9633_v59 = vpop.permute.xlu1 %4153 }
 0x697   : > { %10630 = vst [vmem:[#allocation11_spill] sm:$0xff] %v9633_v59 }
 0x69a   : > { %v9637_v7 = vpop.permute.xlu1 %4157 }
 0x69b   : > { %10631 = vst [vmem:[#allocation7_spill] sm:$0xff] %v9637_v7  ;;  %v4422_v7 = vpop.permute.xlu0 %4421 }
 0x69e   : > { %v9641_v49 = vpop.permute.xlu1 %4317 }
 0x69f   : > { %10633 = vst [vmem:[#allocation30_spill] sm:$0xff] %v9641_v49  ;;  %v4430_v18 = vpop.permute.xlu0 %4429 }
 0x6a2   : > { %v9645_v44 = vpop.permute.xlu1 %4497 }
 0x6a3   : > { %10635 = vst [vmem:[#allocation13_spill] sm:$0xff] %v9645_v44  ;;  %v4438_v15 = vpop.permute.xlu0 %4437 }
 0x6a6   : > { %v9649_v52 = vpop.permute.xlu1 %4161 }
 0x6a7   : > { %10637 = vst [vmem:[#allocation35_spill] sm:$0xff] %v9649_v52  ;;  %v3891_v52 = vstv %s5768_s22  ;;  %s5265_s22 = sshll.u32 %s6214_s24, 3 }
 0x6a8   : > { %v9666_v1 = vadd.f32 %v9496_v55, %v3891_v52  ;;  %s5104_s23 = scalar_lea.vmem %s363_s21, %s5265_s22  ;;  %s5107_s25 = scalar_lea.vmem %s368_s15, %s5265_s22 }
 0x6aa   : > { %v9653_v40 = vpop.permute.xlu1 %4165 }
 0x6ab   : > { %10639 = vst [vmem:[#allocation33_spill] sm:$0xff] %v9653_v40 }
 0x6ae   : > { %v9657_v59 = vpop.permute.xlu1 %4325 }
 0x6af   : > { %10641 = vst [vmem:[#allocation38_spill] sm:$0xff] %v9657_v59  ;;  %v9670_v59 = vpop.permute.xlu0 %4445 }
 0x6b2   : > { %v9659_v41 = vpop.permute.xlu1 %4505 }
 0x6b3   : > { %10642 = vst [vmem:[#allocation39_spill] sm:$0xff] %v9659_v41 }
 0x6b6   : > { %v9661_v44 = vpop.permute.xlu1 %4169 }
 0x6b7   : > { %10643 = vst [vmem:[#allocation43_spill] sm:$0xff] %v9661_v44  ;;  %v4193_v44 = vmul.f32 %v4070_v62, %v9666_v1 }
 0x6ba   : > { %v9668_v40 = vpop.permute.xlu1 %4173 }
 0x6bb   : > { %10644 = vst [vmem:[#allocation32_spill] sm:$0xff] %v9668_v40  ;;  %v9682_v40 = vpop.permute.xlu0 %4453 }
 0x70f   : > { %v5343_v49 = vpop.f32.mrb[166].mxu0 }
 0x710   : > { %v5344_v0 = vpop.f32.mrb[167].mxu0 }
 0x711   : > { %v5345_v39 = vadd.f32 %v5344_v0, %v5343_v49  ;;  %v4192_v49 = vmul.f32 %v9261_v12, %v9666_v1 }
 0x713   : > { %v9663_v45 = vadd.f32 %v5345_v39, %v3966_v14  ;;  %v9679_v14 = vpop.permute.xlu1 %4333 }
 0x714   : > { %10645 = vst [vmem:[#allocation14_spill] sm:$0xff] %v9679_v14 }
 0x715   : > { %v4352_v41 = vmul.f32 %v9277_v53, %v9663_v45  ;;  %v4353_v0 = vmul.f32 %v9297_v29, %v9663_v45  ;;  %v4356_v52 = vmul.f32 %v4242_v16, %v9663_v45  ;;  %v4354_v57 = vmul.f32 %v4234_v3, %v9663_v45 }
 0x716   : > { %v4196_v53 = vmul.f32 %v9360_v6, %v9666_v1  ;;  %v4194_v29 = vmul.f32 %v4074_v22, %v9666_v1  ;;  %v4355_v12 = vmul.f32 %v9324_v38, %v9663_v45  ;;  %v4358_v62 = vmul.f32 %v4250_v54, %v9663_v45  ;;  %v9698_v6 = vpop.permute.xlu0 %4461 }
 0x717   : > { %v4384_v55 = vadd.f32 %v4352_v41, %v4192_v49  ;;  %v4385_v39 = vadd.f32 %v4353_v0, %v4193_v44  ;;  %v4195_v44 = vmul.f32 %v9307_v32, %v9666_v1  ;;  %v4198_v3 = vmul.f32 %v9420_v35, %v9666_v1  ;;  %v9696_v0 = vpop.permute.xlu1 %4513 }
 0x718   : > { %v4388_v50 = vadd.f32 %v4356_v52, %v4196_v53  ;;  %v4386_v41 = vadd.f32 %v4354_v57, %v4194_v29  ;;  %v4357_v38 = vmul.f32 %v9394_v19, %v9663_v45  ;;  %v4360_v22 = vmul.f32 %v9611_v47, %v9663_v45 }
 0x719   : > { %v4544_v14 = vadd.f32 %v9344_v61, %v4384_v55  ;;  %v4545_v16 = vadd.f32 %v4422_v7, %v4385_v39  ;;  %v4387_v54 = vadd.f32 %v4355_v12, %v4195_v44  ;;  %v4390_v61 = vadd.f32 %v4358_v62, %v4198_v3 }
 0x71a   : > { %v4548_v57 = vadd.f32 %v9440_v56, %v4388_v50  ;;  %v4197_v35 = vmul.f32 %v9370_v11, %v9666_v1  ;;  %v4200_v49 = vmul.f32 %v9443_v28, %v9666_v1  ;;  %v4546_v19 = vadd.f32 %v9404_v30, %v4386_v41  ;;  %v4470_v53 = vpop.permute.xlu0 %4469 }
 0x71b   : > { %v4579_v7 = vsel %vm4041_vm6, %v4545_v16, -inf  ;;  %v4576_v32 = vsel %vm4041_vm6, %v4544_v14, -inf  ;;  %v4359_v47 = vmul.f32 %v9435_v58, %v9663_v45  ;;  %v4362_v52 = vmul.f32 %v9615_v34, %v9663_v45  ;;  %v9716_v39 = vpop.permute.xlu1 %4177 }
 0x71c   : > { %4580 = vmax.xlane.f32.xlu1 %v4579_v7  ;;  %4577 = vmax.xlane.f32.xlu0 %v4576_v32  ;;  %v4389_v55 = vadd.f32 %v4357_v38, %v4197_v35  ;;  %v4392_v14 = vadd.f32 %v4360_v22, %v4200_v49  ;;  %v4547_v56 = vadd.f32 %v4430_v18, %v4387_v54  ;;  %v4588_v11 = vsel %vm4041_vm6, %v4548_v57, -inf }
 0x71d   : > { %v4582_v50 = vsel %vm4041_vm6, %v4546_v19, -inf  ;;  %v4550_v28 = vadd.f32 %v9571_v25, %v4390_v61  ;;  %v4199_v30 = vmul.f32 %v9427_v4, %v9666_v1  ;;  %v4202_v58 = vmul.f32 %v9573_v46, %v9666_v1 }
 0x71e   : > { %v4361_v34 = vmul.f32 %v9569_v2, %v9663_v45  ;;  %v4364_v18 = vmul.f32 %v9619_v5, %v9663_v45  ;;  %v4549_v62 = vadd.f32 %v4438_v15, %v4389_v55  ;;  %v4585_v16 = vsel %vm4041_vm6, %v4547_v56, -inf  ;;  %v4478_v5 = vpop.permute.xlu0 %4477 }
 0x71f   : > { %v4391_v29 = vadd.f32 %v4359_v47, %v4199_v30  ;;  %v4394_v12 = vadd.f32 %v4362_v52, %v4202_v58  ;;  %v4594_v25 = vsel %vm4041_vm6, %v4550_v28, -inf  ;;  %v4552_v4 = vadd.f32 %v9579_v36, %v4392_v14  ;;  %v9736_v2 = vpop.permute.xlu1 %4181  ;;  %v10646_v30 = vld [vmem:[#allocation23_spill] sm:$0xff] }
 0x720   : > { %4589 = vmax.xlane.f32.xlu1 %v4588_v11  ;;  %4583 = vmax.xlane.f32.xlu0 %v4582_v50  ;;  %v4201_v46 = vmul.f32 %v9567_v33, %v9666_v1  ;;  %v4204_v44 = vmul.f32 %v9581_v20, %v9666_v1  ;;  %v4363_v15 = vmul.f32 %v9577_v13, %v9663_v45  ;;  %v4591_v22 = vsel %vm4041_vm6, %v4549_v62, -inf }
 0x721   : > { %v4366_v41 = vmul.f32 %v9623_v9, %v9663_v45  ;;  %v4551_v36 = vadd.f32 %v9670_v59, %v4391_v29  ;;  %v4600_v33 = vsel %vm4041_vm6, %v4552_v4, -inf  ;;  %v4554_v20 = vadd.f32 %v9587_v21, %v4394_v12  ;;  %v10649_v29 = vld [vmem:[#allocation47_spill] sm:$0xff] }
 0x722   : > { %v4393_v3 = vadd.f32 %v4361_v34, %v4201_v46  ;;  %v4396_v38 = vadd.f32 %v4364_v18, %v4204_v44  ;;  %v4203_v54 = vmul.f32 %v9575_v37, %v9666_v1  ;;  %v4206_v61 = vmul.f32 %v9589_v31, %v9666_v1  ;;  %v4486_v49 = vpop.permute.xlu0 %4485  ;;  %v10647_v34 = vld [vmem:[#allocation45_spill] sm:$0xff]  ;;  %v10650_v46 = vld [vmem:[#allocation27_spill] sm:$0xff] }
 0x723   : > { %v4365_v13 = vmul.f32 %v9585_v63, %v9663_v45  ;;  %v4368_v9 = vmul.f32 %v9627_v23, %v9663_v45  ;;  %v9754_v32 = vpop.permute.xlu1 %4341  ;;  %v4606_v57 = vsel %vm4041_vm6, %v4554_v20, -inf  ;;  %v4597_v37 = vsel %vm4041_vm6, %v4551_v36, -inf }
 0x724   : > { %4595 = vmax.xlane.f32.xlu1 %v4594_v25  ;;  %4586 = vmax.xlane.f32.xlu0 %v4585_v16  ;;  %v4395_v59 = vadd.f32 %v4363_v15, %v4203_v54  ;;  %v4398_v7 = vadd.f32 %v4366_v41, %v4206_v61  ;;  %v4553_v21 = vadd.f32 %v9682_v40, %v4393_v3  ;;  %v10651_v15 = vld [vmem:[#allocation29_spill] sm:$0xff]  ;;  %v10652_v3 = vld [vmem:[#allocation11_spill] sm:$0xff] }
 0x725   : > { %v4556_v31 = vadd.f32 %v9595_v51, %v4396_v38  ;;  %v4205_v35 = vmul.f32 %v9583_v42, %v9666_v1  ;;  %v4208_v63 = vmul.f32 %v9597_v27, %v9666_v1  ;;  %v4367_v23 = vmul.f32 %v9593_v60, %v9663_v45 }
 0x726   : > { %v4370_v40 = vmul.f32 %v9631_v10, %v9663_v45  ;;  %v4555_v52 = vadd.f32 %v9698_v6, %v4395_v59  ;;  %v4603_v42 = vsel %vm4041_vm6, %v4553_v21, -inf  ;;  %v4558_v55 = vadd.f32 %v9603_v17, %v4398_v7  ;;  %v4494_v10 = vpop.permute.xlu0 %4493  ;;  %v10655_v7 = vld [vmem:[#allocation13_spill] sm:$0xff] }
 0x727   : > { %v4397_v19 = vadd.f32 %v4365_v13, %v4205_v35  ;;  %v4400_v47 = vadd.f32 %v4368_v9, %v4208_v63  ;;  %v4612_v51 = vsel %vm4041_vm6, %v4556_v31, -inf  ;;  %v4207_v27 = vmul.f32 %v9591_v43, %v9666_v1  ;;  %v9776_v60 = vpop.permute.xlu1 %4521  ;;  %v10657_v31 = vld [vmem:[#allocation35_spill] sm:$0xff] }
 0x728   : > { %4601 = vmax.xlane.f32.xlu1 %v4600_v33  ;;  %4592 = vmax.xlane.f32.xlu0 %v4591_v22  ;;  %v4210_v14 = vmul.f32 %v9605_v24, %v9666_v1  ;;  %v4369_v6 = vmul.f32 %v9601_v8, %v9663_v45  ;;  %v4372_v56 = vmul.f32 %v9635_v26, %v9663_v45  ;;  %v4618_v28 = vsel %vm4041_vm6, %v4558_v55, -inf  ;;  %v10648_v8 = vld [vmem:[#allocation25_spill] sm:$0xff]  ;;  %v10653_v33 = vld [vmem:[#allocation15_spill] sm:$0xff] }
 0x729   : > { %v4399_v11 = vadd.f32 %v4367_v23, %v4207_v27  ;;  %v4557_v17 = vadd.f32 %v4470_v53, %v4397_v19  ;;  %v4609_v43 = vsel %vm4041_vm6, %v4555_v52, -inf  ;;  %v4560_v24 = vadd.f32 %v9613_v48, %v4400_v47 }
 0x72a   : > { %v4402_v50 = vadd.f32 %v4370_v40, %v4210_v14  ;;  %v4209_v58 = vmul.f32 %v10646_v30, %v9666_v1  ;;  %v4212_v18 = vmul.f32 %v10647_v34, %v9666_v1  ;;  %v4371_v26 = vmul.f32 %v10648_v8, %v9663_v45  ;;  %v4502_v36 = vpop.permute.xlu0 %4501  ;;  %v10658_v40 = vld [vmem:[#allocation30_spill] sm:$0xff]  ;;  %v10660_v14 = vld [vmem:[#allocation39_spill] sm:$0xff] }
 0x72b   : > { %v4374_v53 = vmul.f32 %v10649_v29, %v9663_v45  ;;  %v4186_v25 = vpop.permute.xlu1 %4185  ;;  %v4559_v16 = vadd.f32 %v4478_v5, %v4399_v11  ;;  %v4624_v48 = vsel %vm4041_vm6, %v4560_v24, -inf  ;;  %v4615_v4 = vsel %vm4041_vm6, %v4557_v17, -inf  ;;  %v10654_v5 = vld [vmem:[#allocation31_spill] sm:$0xff] }
 0x72c   : > { %4607 = vmax.xlane.f32.xlu1 %v4606_v57  ;;  %4598 = vmax.xlane.f32.xlu0 %v4597_v37  ;;  %v4401_v12 = vadd.f32 %v4369_v6, %v4209_v58  ;;  %v4404_v62 = vadd.f32 %v4372_v56, %v4212_v18  ;;  %v4562_v44 = vadd.f32 %v10650_v46, %v4402_v50  ;;  %v10656_v57 = vld [vmem:[#allocation10_spill] sm:$0xff]  ;;  %v10661_v56 = vld [vmem:[#allocation7_spill] sm:$0xff] }
 0x72d   : > { %v4211_v41 = vmul.f32 %v10651_v15, %v9666_v1  ;;  %v4214_v38 = vmul.f32 %v10652_v3, %v9666_v1  ;;  %v4373_v22 = vmul.f32 %v10653_v33, %v9663_v45  ;;  %v4376_v20 = vmul.f32 %v10654_v5, %v9663_v45  ;;  %v10662_v50 = vld [vmem:[#allocation43_spill] sm:$0xff]  ;;  %v10667_v46 = vld [vmem:[#allocation18_spill] sm:$0xff] }
 0x72e   : > { %v4561_v13 = vadd.f32 %v4486_v49, %v4401_v12  ;;  %v4630_v9 = vsel %vm4041_vm6, %v4562_v44, -inf  ;;  %v4621_v59 = vsel %vm4041_vm6, %v4559_v16, -inf  ;;  %v4564_v21 = vadd.f32 %v10655_v7, %v4404_v62  ;;  %v4510_v23 = vpop.permute.xlu0 %4509  ;;  %v10659_v49 = vld [vmem:[#allocation26_spill] sm:$0xff] }
 0x72f   : > { %v4403_v54 = vadd.f32 %v4371_v26, %v4211_v41  ;;  %v4406_v61 = vadd.f32 %v4374_v53, %v4214_v38  ;;  %v4213_v37 = vmul.f32 %v10656_v57, %v9666_v1  ;;  %v4216_v35 = vmul.f32 %v10657_v31, %v9666_v1  ;;  %v4190_v63 = vpop.permute.xlu1 %4189  ;;  %v10665_v53 = vld [vmem:[#allocation33_spill] sm:$0xff] }
 0x730   : > { %4613 = vmax.xlane.f32.xlu1 %v4612_v51  ;;  %4604 = vmax.xlane.f32.xlu0 %v4603_v42  ;;  %v4375_v19 = vmul.f32 %v10658_v40, %v9663_v45  ;;  %v4378_v47 = vmul.f32 %v10659_v49, %v9663_v45  ;;  %v4636_v55 = vsel %vm4041_vm6, %v4564_v21, -inf  ;;  %v4627_v27 = vsel %vm4041_vm6, %v4561_v13, -inf }
 0x731   : > { %v4405_v52 = vadd.f32 %v4373_v22, %v4213_v37  ;;  %v4408_v51 = vadd.f32 %v4376_v20, %v4216_v35  ;;  %v4563_v42 = vadd.f32 %v4494_v10, %v4403_v54  ;;  %v4566_v6 = vadd.f32 %v10660_v14, %v4406_v61  ;;  %v10664_v10 = vld [vmem:[#allocation36_spill] sm:$0xff]  ;;  %v6167_v14 = vld [vmem:[%s10329_s5] sm:$0xff] }
 0x732   : > { %v4215_v11 = vmul.f32 %v10661_v56, %v9666_v1  ;;  %v4218_v17 = vmul.f32 %v10662_v50, %v9666_v1  ;;  %v4380_v30 = vmul.f32 %v10664_v10, %v9663_v45  ;;  %v4217_v12 = vmul.f32 %v10665_v53, %v9666_v1  ;;  %v4518_v16 = vpop.permute.xlu0 %4517  ;;  %v10669_v56 = vld [vmem:[#allocation41_spill] sm:$0xff]  ;;  %v6169_v50 = vld [vmem:[%s10329_s5 + $0x88] sm:$0xff]  ;;  %v10671_v10 = vld [vmem:[#allocation12_spill] sm:$0xff] }
 0x733   : > { %v4565_v18 = vadd.f32 %v4502_v36, %v4405_v52  ;;  %v4642_v8 = vsel %vm4041_vm6, %v4566_v6, -inf  ;;  %v4633_v26 = vsel %vm4041_vm6, %v4563_v42, -inf  ;;  %v4568_v29 = vadd.f32 %v9696_v0, %v4408_v51  ;;  %v2278_v6 = vld [vmem:[%s10327_s3 + $0x48] sm:$0xff]  ;;  %v10673_v53 = vld [vmem:[#allocation44_spill] sm:$0xff] }
 0x734   : > { %4619 = vmax.xlane.f32.xlu1 %v4618_v28  ;;  %4610 = vmax.xlane.f32.xlu0 %v4609_v43  ;;  %v4350_v28 = vpop.permute.xlu1 %4349  ;;  %v10663_v43 = vld [vmem:[#allocation38_spill] sm:$0xff]  ;;  %v4407_v58 = vadd.f32 %v4375_v19, %v4215_v11  ;;  %v4410_v34 = vadd.f32 %v4378_v47, %v4218_v17  ;;  %v4220_v62 = vmul.f32 %v9716_v39, %v9666_v1  ;;  %v10668_v39 = vld [vmem:[#allocation32_spill] sm:$0xff] }
 0x735   : > { %v4377_v24 = vmul.f32 %v10663_v43, %v9663_v45  ;;  %v4382_v44 = vmul.f32 %v10667_v46, %v9663_v45  ;;  %v4648_v0 = vsel %vm4041_vm6, %v4568_v29, -inf  ;;  %v4639_v36 = vsel %vm4041_vm6, %v4565_v18, -inf  ;;  %4832 = vmatprep.mubr.f32.mxu1 %v2278_v6  ;;  %v6168_v11 = vld [vmem:[%s10329_s5 + $0x98] sm:$0xff]  ;;  %v6171_v43 = vld [vmem:[%s10329_s5 + $0xa8] sm:$0xff]  ;;  %v10672_v18 = vld [vmem:[#allocation5_spill] sm:$0xff] }
 0x736   : > { %v4412_v41 = vadd.f32 %v4380_v30, %v4220_v62  ;;  %v4567_v38 = vadd.f32 %v4510_v23, %v4407_v58  ;;  %v4570_v33 = vadd.f32 %v9776_v60, %v4410_v34  ;;  %v4219_v22 = vmul.f32 %v10668_v39, %v9666_v1  ;;  %v4526_v61 = vpop.permute.xlu0 %4525  ;;  %v10670_v17 = vld [vmem:[#allocation4_spill] sm:$0xff]  ;;  %v6173_v30 = vld [vmem:[%s10329_s5 + $0xa0] sm:$0xff]  ;;  %v6178_v29 = vld [vmem:[%s10329_s5 + $0x30] sm:$0xff] }
 0x737   : > { %v4409_v15 = vadd.f32 %v4377_v24, %v4217_v12  ;;  %v4222_v5 = vmul.f32 %v4186_v25, %v9666_v1  ;;  %v4381_v20 = vmul.f32 %v9754_v32, %v9663_v45  ;;  %v4221_v60 = vmul.f32 %v9736_v2, %v9666_v1  ;;  %v6172_v24 = vld [vmem:[%s10329_s5 + $0x10] sm:$0xff]  ;;  %v6174_v58 = vld [vmem:[%s10329_s5 + $0xb8] sm:$0xff]  ;;  %v6175_v34 = vld [vmem:[%s10329_s5 + $0x20] sm:$0xff] }
 0x738   : > { %4625 = vmax.xlane.f32.xlu1 %v4624_v48  ;;  %4616 = vmax.xlane.f32.xlu0 %v4615_v4  ;;  %v10666_v48 = vld [vmem:[#allocation14_spill] sm:$0xff]  ;;  %v4530_v3 = vpop.permute.xlu1 %4529  ;;  %v4654_v7 = vsel %vm4041_vm6, %v4570_v33, -inf  ;;  %v4645_v21 = vsel %vm4041_vm6, %v4567_v38, -inf  ;;  %v4383_v57 = vmul.f32 %v4350_v28, %v9663_v45  ;;  %v4223_v19 = vmul.f32 %v4190_v63, %v9666_v1  ;;  %v6166_v63 = vld [vmem:[%s10329_s5 + $0x80] sm:$0xff]  ;;  %v6170_v28 = vld [vmem:[%s10329_s5 + $0x90] sm:$0xff] }
 0x739   : > { %v4379_v4 = vmul.f32 %v10666_v48, %v9663_v45  ;;  %v4414_v54 = vadd.f32 %v4382_v44, %v4222_v5  ;;  %v4413_v32 = vadd.f32 %v4381_v20, %v4221_v60  ;;  %v6179_v12 = vld [vmem:[%s10329_s5 + $0xc0] sm:$0xff]  ;;  %v6180_v62 = vld [vmem:[%s10329_s5 + $0xd8] sm:$0xff]  ;;  %v6183_v46 = vld [vmem:[%s10329_s5 + $0xe8] sm:$0xff] }
 0x73a   : > { %v4534_v40 = vpop.permute.xlu0 %4533  ;;  %v4415_v49 = vadd.f32 %v4383_v57, %v4223_v19  ;;  %v10674_v48 = vld [vmem:[#allocation17_spill] sm:$0xff]  ;;  %v6184_v44 = vld [vmem:[%s10329_s5 + $0x50] sm:$0xff] }
 0x73b   : > { %v4411_v13 = vadd.f32 %v4379_v4, %v4219_v22  ;;  %v4573_v47 = vadd.f32 %v4534_v40, %v4413_v32  ;;  %v6182_v4 = vld [vmem:[%s10329_s5 + $0xd0] sm:$0xff]  ;;  %v6187_v38 = vld [vmem:[%s10329_s5 + $0x60] sm:$0xff] }
 0x73c   : > { %4631 = vmax.xlane.f32.xlu1 %v4630_v9  ;;  %4622 = vmax.xlane.f32.xlu0 %v4621_v59  ;;  %v4569_v9 = vadd.f32 %v4518_v16, %v4409_v15  ;;  %v4572_v59 = vadd.f32 %v4530_v3, %v4412_v41  ;;  %v4538_v25 = vpop.permute.xlu1 %4537  ;;  %v6181_v16 = vld [vmem:[%s10329_s5 + $0x40] sm:$0xff]  ;;  %v10675_v15 = vld [vmem:[#allocation19_spill] sm:$0xff]  ;;  %v6186_v3 = vld [vmem:[%s10329_s5 + $0xf8] sm:$0xff] }
 0x73d   : > { %v4574_v37 = vadd.f32 %v4538_v25, %v4414_v54  ;;  %v4571_v31 = vadd.f32 %v4526_v61, %v4411_v13  ;;  %v6185_v41 = vld [vmem:[%s10329_s5 + $0xe0] sm:$0xff]  ;;  %v6189_v5 = vld [vmem:[%s10329_s5 + $0x70] sm:$0xff]  ;;  %v10677_v61 = vmov 0.0|0.0  }
 0x73e   : > { %v4660_v35 = vsel %vm4041_vm6, %v4572_v59, -inf  ;;  %v4651_v23 = vsel %vm4041_vm6, %v4569_v9, -inf }
 0x73f   : > { %v4666_v52 = vsel %vm4041_vm6, %v4574_v37, -inf  ;;  %v4657_v2 = vsel %vm4041_vm6, %v4571_v31, -inf }
 0x740   : > { %4637 = vmax.xlane.f32.xlu1 %v4636_v55  ;;  %4628 = vmax.xlane.f32.xlu0 %v4627_v27  ;;  %v4542_v51 = vpop.permute.xlu1 %4541  ;;  %v4663_v55 = vsel %vm4041_vm6, %v4573_v47, -inf }
 0x741   : > { %v4575_v42 = vadd.f32 %v4542_v51, %v4415_v49 }
 0x743   : > { %v4669_v27 = vsel %vm4041_vm6, %v4575_v42, -inf }
 0x744   : > { %4643 = vmax.xlane.f32.xlu1 %v4642_v8  ;;  %4634 = vmax.xlane.f32.xlu0 %v4633_v26  ;;  %v6176_v8 = vld [vmem:[%s10329_s5 + $0xb0] sm:$0xff]  ;;  %v6177_v26 = vld [vmem:[%s10329_s5 + $0xc8] sm:$0xff] }
 0x748   : > { %4649 = vmax.xlane.f32.xlu1 %v4648_v0  ;;  %4640 = vmax.xlane.f32.xlu0 %v4639_v36  ;;  %v10676_v0 = vld [vmem:[#allocation8_spill] sm:$0xff]  ;;  %v6188_v36 = vld [vmem:[%s10329_s5 + $0xf0] sm:$0xff] }
 0x74c   : > { %4655 = vmax.xlane.f32.xlu1 %v4654_v7  ;;  %4646 = vmax.xlane.f32.xlu0 %v4645_v21 }
 0x750   : > { %4661 = vmax.xlane.f32.xlu1 %v4660_v35  ;;  %4652 = vmax.xlane.f32.xlu0 %v4651_v23  ;;  %v9978_v23 = vadd.f32 %v9663_v45, %v9666_v1 }
 0x752   : > { %v5264_v47 = vclamps-f32 %v9978_v23, 20.0 }
 0x754   : > { %4667 = vmax.xlane.f32.xlu1 %v4666_v52  ;;  %4658 = vmax.xlane.f32.xlu0 %v4657_v2  ;;  %v4042_v42 = vsel %vm4041_vm6, %v5264_v47, -inf }
 0x758   : > { %4664 = vmax.xlane.f32.xlu0 %v4663_v55 }
 0x75c   : > { %4670 = vmax.xlane.f32.xlu0 %v4669_v27 }
 0x765   : > { %4704 = vrot.lane.b32.xlu1 %v6166_v63, %s6251_s9 }
 0x769   : > { %4672 = vrot.lane.b32.xlu1 %v6167_v14, %s6251_s9 }
 0x76d   : > { %4674 = vrot.lane.b32.xlu1 %v10669_v56, %s6251_s9 }
 0x771   : > { %4710 = vrot.lane.b32.xlu1 %v6168_v11, %s6251_s9 }
 0x772   : > { %4706 = vrot.lane.b32.xlu0 %v6169_v50, %s6251_s9 }
 0x775   : > { %4678 = vrot.lane.b32.xlu1 %v10670_v17, %s6251_s9 }
 0x776   : > { %4708 = vrot.lane.b32.xlu0 %v6170_v28, %s6251_s9 }
 0x779   : > { %4714 = vrot.lane.b32.xlu1 %v6171_v43, %s6251_s9 }
 0x77a   : > { %4676 = vrot.lane.b32.xlu0 %v6172_v24, %s6251_s9 }
 0x77d   : > { %4682 = vrot.lane.b32.xlu1 %v10671_v10, %s6251_s9 }
 0x77e   : > { %4712 = vrot.lane.b32.xlu0 %v6173_v30, %s6251_s9 }
 0x781   : > { %4718 = vrot.lane.b32.xlu1 %v6174_v58, %s6251_s9 }
 0x782   : > { %4680 = vrot.lane.b32.xlu0 %v6175_v34, %s6251_s9 }
 0x785   : > { %4686 = vrot.lane.b32.xlu1 %v10672_v18, %s6251_s9 }
 0x786   : > { %4716 = vrot.lane.b32.xlu0 %v6176_v8, %s6251_s9 }
 0x789   : > { %4722 = vrot.lane.b32.xlu1 %v6177_v26, %s6251_s9 }
 0x78a   : > { %4684 = vrot.lane.b32.xlu0 %v6178_v29, %s6251_s9 }
 0x78d   : > { %4690 = vrot.lane.b32.xlu1 %v10673_v53, %s6251_s9 }
 0x78e   : > { %4720 = vrot.lane.b32.xlu0 %v6179_v12, %s6251_s9 }
 0x791   : > { %4726 = vrot.lane.b32.xlu1 %v6180_v62, %s6251_s9 }
 0x792   : > { %4688 = vrot.lane.b32.xlu0 %v6181_v16, %s6251_s9  ;;  %v2277_v16 = vld [vmem:[%s10327_s3 + $0x40] sm:$0xff] }
 0x795   : > { %4694 = vrot.lane.b32.xlu1 %v10674_v48, %s6251_s9  ;;  %v2280_v48 = vld [vmem:[%s10327_s3 + $0x98] sm:$0xff] }
 0x796   : > { %4724 = vrot.lane.b32.xlu0 %v6182_v4, %s6251_s9  ;;  %v2279_v4 = vld [vmem:[%s10327_s3 + $0x90] sm:$0xff] }
 0x799   : > { %4730 = vrot.lane.b32.xlu1 %v6183_v46, %s6251_s9  ;;  %v2282_v46 = vld [vmem:[%s10327_s3 + $0xe8] sm:$0xff] }
 0x79a   : > { %4692 = vrot.lane.b32.xlu0 %v6184_v44, %s6251_s9  ;;  %v2281_v44 = vld [vmem:[%s10327_s3 + $0xe0] sm:$0xff] }
 0x79d   : > { %4698 = vrot.lane.b32.xlu1 %v10675_v15, %s6251_s9  ;;  %v2284_v15 = vld [vmem:[%s10327_s3 + $0x138] sm:$0xff] }
 0x79e   : > { %4728 = vrot.lane.b32.xlu0 %v6185_v41, %s6251_s9  ;;  %v2283_v41 = vld [vmem:[%s10327_s3 + $0x130] sm:$0xff] }
 0x7a1   : > { %4734 = vrot.lane.b32.xlu1 %v6186_v3, %s6251_s9  ;;  %v2286_v3 = vld [vmem:[%s10327_s3 + $0x188] sm:$0xff] }
 0x7a2   : > { %4696 = vrot.lane.b32.xlu0 %v6187_v38, %s6251_s9  ;;  %v2285_v38 = vld [vmem:[%s10327_s3 + $0x180] sm:$0xff] }
 0x7a5   : > { %4702 = vrot.lane.b32.xlu1 %v10676_v0, %s6251_s9 }
 0x7a6   : > { %4732 = vrot.lane.b32.xlu0 %v6188_v36, %s6251_s9  ;;  %v2288_v36 = vld [vmem:[%s10327_s3 + $0x1d8] sm:$0xff] }
 0x7a9   : > { %v4581_v33 = vpop.xlane.xlu1 %4580  ;;  %v4578_v39 = vpop.xlane.xlu0 %4577 }
 0x7aa   : > { %v5655_v22 = vpack.c.bf16 %v4581_v33, %v4578_v39  ;;  %4700 = vrot.lane.b32.xlu0 %v6189_v5, %s6251_s9  ;;  %v2287_v33 = vld [vmem:[%s10327_s3 + $0x1d0] sm:$0xff]  ;;  %v2290_v39 = vld [vmem:[%s10327_s3 + $0x228] sm:$0xff]  ;;  %v2289_v5 = vld [vmem:[%s10327_s3 + $0x220] sm:$0xff] }
 0x7ac   : > { %5656 = vmatpush1.bf16.msra.mxu1 %v5655_v22 }
 0x7ad   : > { %v4590_v20 = vpop.xlane.xlu1 %4589  ;;  %v4584_v54 = vpop.xlane.xlu0 %4583  ;;  %5657 = vmatprep.subr.bf16.mxu1 %v10677_v61 }
 0x7b1   : > { %v4596_v13 = vpop.xlane.xlu1 %4595  ;;  %v4587_v9 = vpop.xlane.xlu0 %4586 }
 0x7b2   : > { %v5658_v59 = vpack.c.bf16 %v4587_v9, %v4584_v54  ;;  %v2291_v54 = vld [vmem:[%s10327_s3 + $0x270] sm:$0xff]  ;;  %v2293_v9 = vld [vmem:[%s10327_s3 + $0x2c0] sm:$0xff] }
 0x7b4   : > { %5659 = vmatpush1.bf16.msra.mxu1 %v5658_v59  ;;  %v2296_v59 = vld [vmem:[%s10327_s3 + $0x318] sm:$0xff] }
 0x7b5   : > { %v4602_v7 = vpop.xlane.xlu1 %4601  ;;  %v4593_v21 = vpop.xlane.xlu0 %4592  ;;  %5660 = vmatprep.subr.bf16.mxu1 %v10677_v61 }
 0x7b6   : > { %v5661_v60 = vpack.c.bf16 %v4593_v21, %v4590_v20  ;;  %v2292_v20 = vld [vmem:[%s10327_s3 + $0x278] sm:$0xff]  ;;  %v2295_v21 = vld [vmem:[%s10327_s3 + $0x310] sm:$0xff] }
 0x7b8   : > { %5662 = vmatpush1.bf16.msra.mxu1 %v5661_v60  ;;  %v2298_v60 = vld [vmem:[%s10327_s3 + $0x368] sm:$0xff] }
 0x7b9   : > { %v4608_v25 = vpop.xlane.xlu1 %4607  ;;  %v4599_v57 = vpop.xlane.xlu0 %4598  ;;  %5663 = vmatprep.subr.bf16.mxu1 %v10677_v61 }
 0x7ba   : > { %v5664_v37 = vpack.c.bf16 %v4599_v57, %v4596_v13  ;;  %v2294_v13 = vld [vmem:[%s10327_s3 + $0x2c8] sm:$0xff] }
 0x7bc   : > { %5665 = vmatpush1.bf16.msra.mxu1 %v5664_v37  ;;  %v2300_v37 = vld [vmem:[%s10327_s3 + $0x3b8] sm:$0xff] }
 0x7bd   : > { %v4614_v31 = vpop.xlane.xlu1 %4613  ;;  %v4605_v32 = vpop.xlane.xlu0 %4604  ;;  %5666 = vmatprep.subr.bf16.mxu1 %v10677_v61 }
 0x7be   : > { %v5667_v35 = vpack.c.bf16 %v4605_v32, %v4602_v7  ;;  %v2302_v32 = vld [vmem:[%s10327_s3 + $0x408] sm:$0xff] }
 0x7c0   : > { %5668 = vmatpush1.bf16.msra.mxu1 %v5667_v35 }
 0x7c1   : > { %v4620_v40 = vpop.xlane.xlu1 %4619  ;;  %v4611_v19 = vpop.xlane.xlu0 %4610  ;;  %5669 = vmatprep.subr.bf16.mxu1 %v10677_v61 }
 0x7c2   : > { %v5670_v49 = vpack.c.bf16 %v4611_v19, %v4608_v25  ;;  %v2297_v25 = vld [vmem:[%s10327_s3 + $0x360] sm:$0xff]  ;;  %v2304_v19 = vld [vmem:[%s10327_s3 + $0x458] sm:$0xff] }
 0x7c4   : > { %5671 = vmatpush1.bf16.msra.mxu1 %v5670_v49  ;;  %v2303_v49 = vld [vmem:[%s10327_s3 + $0x450] sm:$0xff] }
 0x7c5   : > { %v4626_v52 = vpop.xlane.xlu1 %4625  ;;  %v4617_v2 = vpop.xlane.xlu0 %4616  ;;  %5672 = vmatprep.subr.bf16.mxu1 %v10677_v61 }
 0x7c6   : > { %v5673_v51 = vpack.c.bf16 %v4617_v2, %v4614_v31  ;;  %v2299_v31 = vld [vmem:[%s10327_s3 + $0x3b0] sm:$0xff]  ;;  %v2306_v2 = vld [vmem:[%s10327_s3 + $0x4a8] sm:$0xff] }
 0x7c8   : > { %5674 = vmatpush1.bf16.msra.mxu1 %v5673_v51  ;;  %v2305_v51 = vld [vmem:[%s10327_s3 + $0x4a0] sm:$0xff] }
 0x7c9   : > { %v4632_v45 = vpop.xlane.xlu1 %4631  ;;  %v4623_v1 = vpop.xlane.xlu0 %4622  ;;  %4043 = vmax.xlane.f32.xlu0 %v4042_v42  ;;  %5675 = vmatprep.subr.bf16.mxu1 %v10677_v61  ;;  %v2308_v42 = vld [vmem:[%s10327_s3 + $0x4f8] sm:$0xff] }
 0x7ca   : > { %v5676_v55 = vpack.c.bf16 %v4623_v1, %v4620_v40  ;;  %v2301_v40 = vld [vmem:[%s10327_s3 + $0x400] sm:$0xff]  ;;  %v2307_v1 = vld [vmem:[%s10327_s3 + $0x4f0] sm:$0xff] }
 0x7cc   : > { %5677 = vmatpush1.bf16.msra.mxu1 %v5676_v55  ;;  %v2310_v55 = vld [vmem:[%s10327_s3 + $0x548] sm:$0xff] }
 0x7cd   : > { %v4638_v27 = vpop.xlane.xlu1 %4637  ;;  %v4629_v63 = vpop.xlane.xlu0 %4628  ;;  %5678 = vmatprep.subr.bf16.mxu1 %v10677_v61 }
 0x7ce   : > { %v5679_v14 = vpack.c.bf16 %v4629_v63, %v4626_v52 }
 0x7d0   : > { %5680 = vmatpush1.bf16.msra.mxu1 %v5679_v14  ;;  %v2312_v14 = vld [vmem:[%s10327_s3 + $0x598] sm:$0xff] }
 0x7d1   : > { %v4644_v6 = vpop.xlane.xlu1 %4643  ;;  %v4635_v56 = vpop.xlane.xlu0 %4634  ;;  %5681 = vmatprep.subr.bf16.mxu1 %v10677_v61 }
 0x7d2   : > { %v5682_v11 = vpack.c.bf16 %v4635_v56, %v4632_v45  ;;  %v2314_v56 = vld [vmem:[%s10327_s3 + $0x5e8] sm:$0xff] }
 0x7d4   : > { %5683 = vmatpush1.bf16.msra.mxu1 %v5682_v11 }
 0x7d5   : > { %v4641_v50 = vpop.xlane.xlu0 %4640  ;;  %5684 = vmatprep.subr.bf16.mxu1 %v10677_v61  ;;  %v4650_v28 = vpop.xlane.xlu1 %4649 }
 0x7d6   : > { %v5685_v17 = vpack.c.bf16 %v4641_v50, %v4638_v27  ;;  %v2309_v27 = vld [vmem:[%s10327_s3 + $0x540] sm:$0xff] }
 0x7d7   : > { %v2313_v50 = vld [vmem:[%s10327_s3 + $0x5e0] sm:$0xff] }
 0x7d8   : > { %5686 = vmatpush1.bf16.msra.mxu1 %v5685_v17  ;;  %v2316_v17 = vld [vmem:[%s10327_s3 + $0x638] sm:$0xff] }
 0x7d9   : > { %v4647_v43 = vpop.xlane.xlu0 %4646  ;;  %5687 = vmatprep.subr.bf16.mxu1 %v10677_v61  ;;  %v4656_v10 = vpop.xlane.xlu1 %4655 }
 0x7da   : > { %v5688_v24 = vpack.c.bf16 %v4647_v43, %v4644_v6  ;;  %v2311_v6 = vld [vmem:[%s10327_s3 + $0x590] sm:$0xff] }
 0x7dc   : > { %5689 = vmatpush1.bf16.msra.mxu1 %v5688_v24  ;;  %v2318_v24 = vld [vmem:[%s10327_s3 + $0x688] sm:$0xff] }
 0x7dd   : > { %v4653_v30 = vpop.xlane.xlu0 %4652  ;;  %5690 = vmatprep.subr.bf16.mxu1 %v10677_v61  ;;  %v4662_v8 = vpop.xlane.xlu1 %4661 }
 0x7de   : > { %v5691_v58 = vpack.c.bf16 %v4653_v30, %v4650_v28  ;;  %v2315_v28 = vld [vmem:[%s10327_s3 + $0x630] sm:$0xff]  ;;  %v2320_v30 = vld [vmem:[%s10327_s3 + $0x6d8] sm:$0xff] }
 0x7e0   : > { %5692 = vmatpush1.bf16.msra.mxu1 %v5691_v58 }
 0x7e1   : > { %v4659_v34 = vpop.xlane.xlu0 %4658  ;;  %5693 = vmatprep.subr.bf16.mxu1 %v10677_v61  ;;  %v4668_v53 = vpop.xlane.xlu1 %4667 }
 0x7e2   : > { %v5694_v18 = vpack.c.bf16 %v4659_v34, %v4656_v10  ;;  %v2317_v10 = vld [vmem:[%s10327_s3 + $0x680] sm:$0xff]  ;;  %v2319_v34 = vld [vmem:[%s10327_s3 + $0x6d0] sm:$0xff] }
 0x7e4   : > { %5695 = vmatpush1.bf16.msra.mxu1 %v5694_v18  ;;  %v2322_v18 = vld [vmem:[%s10327_s3 + $0x728] sm:$0xff] }
 0x7e5   : > { %v4665_v26 = vpop.xlane.xlu0 %4664  ;;  %5696 = vmatprep.subr.bf16.mxu1 %v10677_v61 }
 0x7e6   : > { %v5697_v29 = vpack.c.bf16 %v4665_v26, %v4662_v8  ;;  %v2321_v8 = vld [vmem:[%s10327_s3 + $0x720] sm:$0xff] }
 0x7e8   : > { %5698 = vmatpush1.bf16.msra.mxu1 %v5697_v29  ;;  %v2324_v29 = vld [vmem:[%s10327_s3 + $0x778] sm:$0xff] }
 0x7e9   : > { %v4671_v12 = vpop.xlane.xlu0 %4670  ;;  %5699 = vmatprep.subr.bf16.mxu1 %v10677_v61 }
 0x7ea   : > { %v5700_v62 = vpack.c.bf16 %v4671_v12, %v4668_v53  ;;  %v2323_v53 = vld [vmem:[%s10327_s3 + $0x770] sm:$0xff]  ;;  %v2326_v12 = vld [vmem:[%s10327_s3 + $0x7c8] sm:$0xff] }
 0x7ec   : > { %5701 = vmatpush1.bf16.msra.mxu1 %v5700_v62 }
 0x7ed   : > { %v10022_v0 = vpop.permute.xlu0 %4706 }
 0x7ef   : > { %4833 = vmatmul.mubr.f32.vlgmr.msra.gmra.mrb[94].mxu1 %v2277_v16  ;;  %v2325_v16 = vld [vmem:[%s10327_s3 + $0x7c0] sm:$0xff] }
 0x7f0   : > { %4837 = vmatprep.mubr.f32.mxu1 %v2280_v48  ;;  %v2328_v48 = vld [vmem:[%s10327_s3 + $0x818] sm:$0xff] }
 0x7f1   : > { %v10033_v22 = vpop.permute.xlu0 %4708 }
 0x7f3   : > { %4838 = vmatmul.mubr.f32.gmra.mrb[96].mxu1 %v2279_v4 }
 0x7f4   : > { %4842 = vmatprep.mubr.f32.mxu1 %v2282_v46  ;;  %v2327_v46 = vld [vmem:[%s10327_s3 + $0x810] sm:$0xff] }
 0x7f5   : > { %v10044_v61 = vpop.permute.xlu0 %4676 }
 0x7f7   : > { %4843 = vmatmul.mubr.f32.gmra.mrb[98].mxu1 %v2281_v44  ;;  %v4045_v44 = vlaneseq }
 0x7f8   : > { %4847 = vmatprep.mubr.f32.mxu1 %v2284_v15  ;;  %v2330_v15 = vld [vmem:[%s10327_s3 + $0x868] sm:$0xff] }
 0x7f9   : > { %v10055_v7 = vpop.permute.xlu0 %4712 }
 0x7fb   : > { %4848 = vmatmul.mubr.f32.gmra.mrb[100].mxu1 %v2283_v41  ;;  %v4046_v41 = vand.u32 127, %v4045_v44 }
 0x7fc   : > { %4852 = vmatprep.mubr.f32.mxu1 %v2286_v3  ;;  %v2329_v3 = vld [vmem:[%s10327_s3 + $0x860] sm:$0xff] }
 0x7fd   : > { %v10066_v57 = vpop.permute.xlu0 %4680 }
 0x7ff   : > { %4853 = vmatmul.mubr.f32.gmra.mrb[102].mxu1 %v2285_v38  ;;  %v2332_v38 = vld [vmem:[%s10327_s3 + $0x8b8] sm:$0xff] }
 0x800   : > { %4857 = vmatprep.mubr.f32.mxu1 %v2288_v36 }
 0x801   : > { %v10077_v35 = vpop.permute.xlu0 %4716 }
 0x803   : > { %4858 = vmatmul.mubr.f32.gmra.mrb[104].mxu1 %v2287_v33 }
 0x804   : > { %4862 = vmatprep.mubr.f32.mxu1 %v2290_v39  ;;  %v2331_v39 = vld [vmem:[%s10327_s3 + $0x8b0] sm:$0xff] }
 0x805   : > { %v10088_v52 = vpop.permute.xlu0 %4684 }
 0x807   : > { %4863 = vmatmul.mubr.f32.gmra.mrb[106].mxu1 %v2289_v5 }
 0x808   : > { %4867 = vmatprep.mubr.f32.mxu1 %v2292_v20  ;;  %v2334_v20 = vld [vmem:[%s10327_s3 + $0x908] sm:$0xff] }
 0x809   : > { %v10099_v45 = vpop.permute.xlu0 %4720 }
 0x80b   : > { %4868 = vmatmul.mubr.f32.gmra.mrb[108].mxu1 %v2291_v54 }
 0x80c   : > { %4872 = vmatprep.mubr.f32.mxu1 %v2294_v13  ;;  %v2336_v13 = vld [vmem:[%s10327_s3 + $0x958] sm:$0xff] }
 0x80d   : > { %v10110_v63 = vpop.permute.xlu0 %4688 }
 0x80f   : > { %4873 = vmatmul.mubr.f32.gmra.mrb[110].mxu1 %v2293_v9  ;;  %v2335_v9 = vld [vmem:[%s10327_s3 + $0x950] sm:$0xff] }
 0x810   : > { %4877 = vmatprep.mubr.f32.mxu1 %v2296_v59  ;;  %v2338_v59 = vld [vmem:[%s10327_s3 + $0x9a8] sm:$0xff] }
 0x811   : > { %v10121_v11 = vpop.permute.xlu0 %4724 }
 0x813   : > { %4878 = vmatmul.mubr.f32.gmra.mrb[112].mxu1 %v2295_v21  ;;  %v2337_v21 = vld [vmem:[%s10327_s3 + $0x9a0] sm:$0xff] }
 0x814   : > { %4882 = vmatprep.mubr.f32.mxu1 %v2298_v60  ;;  %v2340_v60 = vld [vmem:[%s10327_s3 + $0x9f8] sm:$0xff] }
 0x815   : > { %v10132_v43 = vpop.permute.xlu0 %4692 }
 0x817   : > { %4883 = vmatmul.mubr.f32.gmra.mrb[114].mxu1 %v2297_v25  ;;  %v2339_v25 = vld [vmem:[%s10327_s3 + $0x9f0] sm:$0xff] }
 0x818   : > { %4887 = vmatprep.mubr.f32.mxu1 %v2300_v37  ;;  %v10223_v37 = vpop.permute.xlu1 %4704 }
 0x819   : > { %v10143_v58 = vpop.permute.xlu0 %4728 }
 0x81b   : > { %4888 = vmatmul.mubr.f32.gmra.mrb[116].mxu1 %v2299_v31 }
 0x81c   : > { %4892 = vmatprep.mubr.f32.mxu1 %v2302_v32  ;;  %v4673_v31 = vpop.permute.xlu1 %4672 }
 0x81d   : > { %v10154_v26 = vpop.permute.xlu0 %4696 }
 0x81f   : > { %4893 = vmatmul.mubr.f32.gmra.mrb[118].mxu1 %v2301_v40 }
 0x820   : > { %4897 = vmatprep.mubr.f32.mxu1 %v2304_v19  ;;  %v4675_v32 = vpop.permute.xlu1 %4674 }
 0x821   : > { %v10165_v62 = vpop.permute.xlu0 %4732 }
 0x823   : > { %4898 = vmatmul.mubr.f32.gmra.mrb[120].mxu1 %v2303_v49 }
 0x824   : > { %4902 = vmatprep.mubr.f32.mxu1 %v2306_v2  ;;  %v10225_v40 = vpop.permute.xlu1 %4710 }
 0x825   : > { %v10173_v4 = vpop.permute.xlu0 %4700 }
 0x827   : > { %4903 = vmatmul.mubr.f32.gmra.mrb[122].mxu1 %v2305_v51 }
 0x828   : > { %4907 = vmatprep.mubr.f32.mxu1 %v2308_v42  ;;  %v4679_v19 = vpop.permute.xlu1 %4678 }
 0x82b   : > { %4908 = vmatmul.mubr.f32.gmra.mrb[124].mxu1 %v2307_v1 }
 0x82c   : > { %4912 = vmatprep.mubr.f32.mxu1 %v2310_v55  ;;  %v10227_v49 = vpop.permute.xlu1 %4714 }
 0x82f   : > { %4913 = vmatmul.mubr.f32.gmra.mrb[126].mxu1 %v2309_v27 }
 0x830   : > { %4917 = vmatprep.mubr.f32.mxu1 %v2312_v14  ;;  %v4683_v2 = vpop.permute.xlu1 %4682 }
 0x833   : > { %4918 = vmatmul.mubr.f32.gmra.mrb[128].mxu1 %v2311_v6 }
 0x834   : > { %4922 = vmatprep.mubr.f32.mxu1 %v2314_v56  ;;  %v10229_v51 = vpop.permute.xlu1 %4718 }
 0x837   : > { %4923 = vmatmul.mubr.f32.gmra.mrb[130].mxu1 %v2313_v50 }
 0x838   : > { %4927 = vmatprep.mubr.f32.mxu1 %v2316_v17  ;;  %v4687_v42 = vpop.permute.xlu1 %4686 }
 0x83b   : > { %4928 = vmatmul.mubr.f32.gmra.mrb[132].mxu1 %v2315_v28 }
 0x83c   : > { %4932 = vmatprep.mubr.f32.mxu1 %v2318_v24  ;;  %v10231_v1 = vpop.permute.xlu1 %4722 }
 0x83f   : > { %4933 = vmatmul.mubr.f32.gmra.mrb[134].mxu1 %v2317_v10 }
 0x840   : > { %4937 = vmatprep.mubr.f32.mxu1 %v2320_v30  ;;  %v4691_v55 = vpop.permute.xlu1 %4690 }
 0x843   : > { %4938 = vmatmul.mubr.f32.gmra.mrb[136].mxu1 %v2319_v34 }
 0x844   : > { %4942 = vmatprep.mubr.f32.mxu1 %v2322_v18  ;;  %v10233_v28 = vpop.permute.xlu1 %4726 }
 0x847   : > { %4943 = vmatmul.mubr.f32.gmra.mrb[138].mxu1 %v2321_v8 }
 0x848   : > { %4947 = vmatprep.mubr.f32.mxu1 %v2324_v29  ;;  %v4695_v29 = vpop.permute.xlu1 %4694 }
 0x84b   : > { %4948 = vmatmul.mubr.f32.gmra.mrb[140].mxu1 %v2323_v53 }
 0x84c   : > { %4952 = vmatprep.mubr.f32.mxu1 %v2326_v12 }
 0x84f   : > { %4953 = vmatmul.mubr.f32.gmra.mrb[142].mxu1 %v2325_v16 }
 0x850   : > { %4957 = vmatprep.mubr.f32.mxu1 %v2328_v48 }
 0x853   : > { %4958 = vmatmul.mubr.f32.gmra.mrb[144].mxu1 %v2327_v46 }
 0x854   : > { %4962 = vmatprep.mubr.f32.mxu1 %v2330_v15 }
 0x856   : > { %v4044_v36 = vpop.xlane.xlu0 %4043 }
 0x857   : > { %vm4047_vm7 = vcmp.ge.f32.partialorder %v5264_v47, %v4044_v36  ;;  %4963 = vmatmul.mubr.f32.gmra.mrb[146].mxu1 %v2329_v3  ;;  %v2333_v47 = vld [vmem:[%s10327_s3 + $0x900] sm:$0xff]  ;;  %v10240_v3 = vpop.permute.xlu1 %4730 }
 0x858   : > { %v4048_v33 = vsel %vm4047_vm7, %v4046_v41, 16  ;;  %4967 = vmatprep.mubr.f32.mxu1 %v2332_v38 }
 0x859   : > { %v10193_v5 = vsel %vm4041_vm6, %v4048_v33, 2147483647 }
 0x85a   : > { %v4051_v54 = vshra.s32 %v10193_v5, 16 }
 0x85b   : > { %4968 = vmatmul.mubr.f32.gmra.mrb[148].mxu1 %v2331_v39 }
 0x85c   : > { %4972 = vmatprep.mubr.f32.mxu1 %v2334_v20  ;;  %v10199_v23 = vcvt.s32.f32 %v4051_v54 }
 0x85e   : > { %4054 = vmin.xlane.f32.xlu1 %v10199_v23 }
 0x85f   : > { %4973 = vmatmul.mubr.f32.gmra.mrb[150].mxu1 %v2333_v47  ;;  %v3886_v47 = vld [vmem:[%s10328_s4 + $0x28] sm:$0xff] }
 0x860   : > { %4977 = vmatprep.mubr.f32.mxu1 %v2336_v13  ;;  %5097 = vmatprep.mubr.f32.mxu0 %v3886_v47 }
 0x863   : > { %4978 = vmatmul.mubr.f32.gmra.mrb[152].mxu1 %v2335_v9 }
 0x864   : > { %4982 = vmatprep.mubr.f32.mxu1 %v2338_v59 }
 0x867   : > { %4983 = vmatmul.mubr.f32.gmra.mrb[154].mxu1 %v2337_v21 }
 0x868   : > { %4987 = vmatprep.mubr.f32.mxu1 %v2340_v60 }
 0x86b   : > { %4988 = vmatmul.mubr.f32.gmra.mrb[156].mxu1 %v2339_v25 }
 0x8c2   : > { %v4834_v27 = vpop.f32.mrb[94].mxu1 }
 0x8c3   : > { %v4836_v14 = vpop.f32.mrb[95].mxu1  ;;  %v4835_v6 = vadd.f32 %v4834_v27, %v4673_v31 }
 0x8c5   : > { %v4993_v24 = vmax.f32 %v4835_v6, 0.0 }
 0x8c6   : > { %v4839_v56 = vpop.f32.mrb[96].mxu1 }
 0x8c7   : > { %v4840_v50 = vadd.f32 %v4839_v56, %v4675_v32  ;;  %v4841_v17 = vpop.f32.mrb[97].mxu1 }
 0x8c8   : > { %v4050_v17 = vand.u32 65535, %v10193_v5 }
 0x8c9   : > { %v4994_v10 = vmax.f32 %v4840_v50, 0.0 }
 0x8ca   : > { %v4844_v30 = vpop.f32.mrb[98].mxu1 }
 0x8cb   : > { %v10235_v34 = vpack.c.bf16 %v4994_v10, %v4993_v24  ;;  %v4846_v18 = vpop.f32.mrb[99].mxu1  ;;  %v4845_v8 = vadd.f32 %v4844_v30, %v10044_v61  ;;  %v4699_v61 = vpop.permute.xlu1 %4698 }
 0x8cd   : > { %v4995_v48 = vmax.f32 %v4845_v8, 0.0 }
 0x8ce   : > { %v4849_v53 = vpop.f32.mrb[100].mxu1 }
 0x8cf   : > { %v4850_v12 = vadd.f32 %v4849_v53, %v4679_v19  ;;  %v4851_v16 = vpop.f32.mrb[101].mxu1  ;;  %v4052_v53 = vcvt.s32.f32 %v4050_v17 }
 0x8d1   : > { %v4996_v46 = vmax.f32 %v4850_v12, 0.0 }
 0x8d2   : > { %v4854_v44 = vpop.f32.mrb[102].mxu1 }
 0x8d3   : > { %v10238_v15 = vpack.c.bf16 %v4996_v46, %v4995_v48  ;;  %v4856_v41 = vpop.f32.mrb[103].mxu1  ;;  %v4855_v38 = vadd.f32 %v4854_v44, %v10066_v57  ;;  %v10249_v57 = vpop.permute.xlu1 %4734 }
 0x8d5   : > { %v4997_v20 = vmax.f32 %v4855_v38, 0.0 }
 0x8d6   : > { %v4859_v36 = vpop.f32.mrb[104].mxu1 }
 0x8d7   : > { %v4860_v33 = vadd.f32 %v4859_v36, %v4683_v2  ;;  %v4861_v39 = vpop.f32.mrb[105].mxu1  ;;  %v4703_v6 = vpop.permute.xlu1 %4702 }
 0x8d9   : > { %v4998_v54 = vmax.f32 %v4860_v33, 0.0 }
 0x8da   : > { %v4864_v13 = vpop.f32.mrb[106].mxu1 }
 0x8db   : > { %v10246_v9 = vpack.c.bf16 %v4998_v54, %v4997_v20  ;;  %v4866_v59 = vpop.f32.mrb[107].mxu1  ;;  %v4865_v21 = vadd.f32 %v4864_v13, %v10088_v52 }
 0x8dd   : > { %v4999_v32 = vmax.f32 %v4865_v21, 0.0 }
 0x8de   : > { %v4869_v60 = vpop.f32.mrb[108].mxu1 }
 0x8df   : > { %v4870_v25 = vadd.f32 %v4869_v60, %v4687_v42  ;;  %v4871_v31 = vpop.f32.mrb[109].mxu1 }
 0x8e0   : > { %v6191_v31 = vld [vmem:[%s10329_s5] ss:$0 sm:$0xff] }
 0x8e1   : > { %v5000_v19 = vmax.f32 %v4870_v25, 0.0 }
 0x8e2   : > { %v4874_v2 = vpop.f32.mrb[110].mxu1 }
 0x8e3   : > { %v10251_v27 = vpack.c.bf16 %v5000_v19, %v4999_v32  ;;  %v4876_v14 = vpop.f32.mrb[111].mxu1  ;;  %v4875_v56 = vadd.f32 %v4874_v2, %v10110_v63 }
 0x8e5   : > { %v5001_v52 = vmax.f32 %v4875_v56, 0.0 }
 0x8e6   : > { %v4879_v50 = vpop.f32.mrb[112].mxu1 }
 0x8e7   : > { %v4880_v24 = vadd.f32 %v4879_v50, %v4691_v55  ;;  %v4881_v10 = vpop.f32.mrb[113].mxu1 }
 0x8e9   : > { %v5002_v30 = vmax.f32 %v4880_v24, 0.0 }
 0x8ea   : > { %v4884_v42 = vpop.f32.mrb[114].mxu1 }
 0x8eb   : > { %v10255_v18 = vpack.c.bf16 %v5002_v30, %v5001_v52  ;;  %v10257_v8 = vpop.xlane.xlu1 %4054  ;;  %v4886_v12 = vpop.f32.mrb[115].mxu1  ;;  %v4885_v63 = vadd.f32 %v4884_v42, %v10132_v43 }
 0x8ec   : > { %vm4056_vm8 = vcmp.eq.f32.partialorder %v10199_v23, %v10257_v8 }
 0x8ed   : > { %v4057_v16 = vsel %vm4056_vm8, %v4052_v53, inf  ;;  %v5003_v46 = vmax.f32 %v4885_v63, 0.0 }
 0x8ee   : > { %4058 = vmin.xlane.f32.xlu0 %v4057_v16  ;;  %v4889_v48 = vpop.f32.mrb[116].mxu1 }
 0x8ef   : > { %v4890_v5 = vadd.f32 %v4889_v48, %v4695_v29  ;;  %v4891_v55 = vpop.f32.mrb[117].mxu1 }
 0x8f1   : > { %v5004_v44 = vmax.f32 %v4890_v5, 0.0 }
 0x8f2   : > { %v4894_v41 = vpop.f32.mrb[118].mxu1 }
 0x8f3   : > { %v10262_v38 = vpack.c.bf16 %v5004_v44, %v5003_v46  ;;  %v4896_v36 = vpop.f32.mrb[119].mxu1  ;;  %v4895_v33 = vadd.f32 %v4894_v41, %v10154_v26 }
 0x8f5   : > { %v5005_v47 = vmax.f32 %v4895_v33, 0.0 }
 0x8f6   : > { %v4899_v39 = vpop.f32.mrb[120].mxu1 }
 0x8f7   : > { %v4900_v20 = vadd.f32 %v4899_v39, %v4699_v61  ;;  %v4901_v54 = vpop.f32.mrb[121].mxu1 }
 0x8f9   : > { %v5006_v23 = vmax.f32 %v4900_v20, 0.0 }
 0x8fa   : > { %v4904_v13 = vpop.f32.mrb[122].mxu1 }
 0x8fb   : > { %v10265_v59 = vpack.c.bf16 %v5006_v23, %v5005_v47  ;;  %v4906_v43 = vpop.f32.mrb[123].mxu1  ;;  %v4905_v29 = vadd.f32 %v4904_v13, %v10173_v4 }
 0x8fd   : > { %v5007_v32 = vmax.f32 %v4905_v29, 0.0 }
 0x8fe   : > { %v4909_v21 = vpop.f32.mrb[124].mxu1 }
 0x8ff   : > { %v4910_v60 = vadd.f32 %v4909_v21, %v4703_v6  ;;  %v4911_v25 = vpop.f32.mrb[125].mxu1 }
 0x901   : > { %v5008_v26 = vmax.f32 %v4910_v60, 0.0 }
 0x902   : > { %v4914_v19 = vpop.f32.mrb[126].mxu1 }
 0x903   : > { %v10271_v61 = vpack.c.bf16 %v5008_v26, %v5007_v32  ;;  %v4916_v2 = vpop.f32.mrb[127].mxu1  ;;  %v4915_v14 = vadd.f32 %v4914_v19, %v10223_v37 }
 0x904   : > { %5030 = vrot.lane.b32.xlu0 %v6191_v31, %s6252_s12 }
 0x905   : > { %v5009_v6 = vmax.f32 %v4915_v14, 0.0 }
 0x906   : > { %v4919_v56 = vpop.f32.mrb[128].mxu1 }
 0x907   : > { %v4920_v4 = vadd.f32 %v4919_v56, %v10022_v0  ;;  %v4921_v50 = vpop.f32.mrb[129].mxu1 }
 0x909   : > { %v5010_v17 = vmax.f32 %v4920_v4, 0.0 }
 0x90a   : > { %v4924_v24 = vpop.f32.mrb[130].mxu1 }
 0x90b   : > { %v5702_v10 = vpack.c.bf16 %v5010_v17, %v5009_v6  ;;  %v4926_v52 = vpop.f32.mrb[131].mxu1  ;;  %v4925_v30 = vadd.f32 %v4924_v24, %v10033_v22 }
 0x90d   : > { %5703 = vmatprep.subr.bf16.mxu0 %v5702_v10  ;;  %v5011_v16 = vmax.f32 %v4925_v30, 0.0 }
 0x90e   : > { %v4929_v42 = vpop.f32.mrb[132].mxu1  ;;  %5705 = vmatpush3.bf16.msra.mxu0 %v10235_v34 }
 0x90f   : > { %v4930_v53 = vadd.f32 %v4929_v42, %v10225_v40  ;;  %v4931_v12 = vpop.f32.mrb[133].mxu1 }
 0x911   : > { %v5012_v37 = vmax.f32 %v4930_v53, 0.0  ;;  %v3885_v53 = vld [vmem:[%s10328_s4 + $0x20] sm:$0xff] }
 0x912   : > { %v4934_v63 = vpop.f32.mrb[134].mxu1 }
 0x913   : > { %v5706_v48 = vpack.c.bf16 %v5012_v37, %v5011_v16  ;;  %v4936_v0 = vpop.f32.mrb[135].mxu1  ;;  %v4935_v5 = vadd.f32 %v4934_v63, %v10055_v7 }
 0x915   : > { %5707 = vmatprep.subr.bf16.mxu0 %v5706_v48  ;;  %v5013_v44 = vmax.f32 %v4935_v5, 0.0 }
 0x916   : > { %v4939_v55 = vpop.f32.mrb[136].mxu1  ;;  %5709 = vmatpush3.bf16.msra.mxu0 %v10238_v15 }
 0x917   : > { %v4940_v22 = vadd.f32 %v4939_v55, %v10227_v49  ;;  %v4941_v46 = vpop.f32.mrb[137].mxu1 }
 0x919   : > { %v5014_v41 = vmax.f32 %v4940_v22, 0.0 }
 0x91a   : > { %v4944_v34 = vpop.f32.mrb[138].mxu1 }
 0x91b   : > { %v5710_v36 = vpack.c.bf16 %v5014_v41, %v5013_v44  ;;  %v4946_v40 = vpop.f32.mrb[139].mxu1  ;;  %v4945_v33 = vadd.f32 %v4944_v34, %v10077_v35 }
 0x91d   : > { %5711 = vmatprep.subr.bf16.mxu0 %v5710_v36  ;;  %v5015_v54 = vmax.f32 %v4945_v33, 0.0 }
 0x91e   : > { %v4949_v39 = vpop.f32.mrb[140].mxu1  ;;  %5713 = vmatpush3.bf16.msra.mxu0 %v10246_v9 }
 0x91f   : > { %v4950_v7 = vadd.f32 %v4949_v39, %v10229_v51  ;;  %v4951_v20 = vpop.f32.mrb[141].mxu1 }
 0x921   : > { %v5016_v47 = vmax.f32 %v4950_v7, 0.0 }
 0x922   : > { %v4954_v15 = vpop.f32.mrb[142].mxu1 }
 0x923   : > { %v5714_v23 = vpack.c.bf16 %v5016_v47, %v5015_v54  ;;  %v4956_v49 = vpop.f32.mrb[143].mxu1  ;;  %v4955_v13 = vadd.f32 %v4954_v15, %v10099_v45 }
 0x925   : > { %5715 = vmatprep.subr.bf16.mxu0 %v5714_v23  ;;  %v5017_v21 = vmax.f32 %v4955_v13, 0.0 }
 0x926   : > { %v4959_v43 = vpop.f32.mrb[144].mxu1  ;;  %5717 = vmatpush3.bf16.msra.mxu0 %v10251_v27 }
 0x927   : > { %v4960_v35 = vadd.f32 %v4959_v43, %v10231_v1  ;;  %v4961_v29 = vpop.f32.mrb[145].mxu1 }
 0x929   : > { %v5018_v60 = vmax.f32 %v4960_v35, 0.0 }
 0x92a   : > { %v4964_v9 = vpop.f32.mrb[146].mxu1 }
 0x92b   : > { %v5718_v25 = vpack.c.bf16 %v5018_v60, %v5017_v21  ;;  %v4966_v51 = vpop.f32.mrb[147].mxu1  ;;  %v4965_v31 = vadd.f32 %v4964_v9, %v10121_v11 }
 0x92d   : > { %5719 = vmatprep.subr.bf16.mxu0 %v5718_v25  ;;  %v5019_v19 = vmax.f32 %v4965_v31, 0.0 }
 0x92e   : > { %v4969_v32 = vpop.f32.mrb[148].mxu1  ;;  %5721 = vmatpush3.bf16.msra.mxu0 %v10255_v18 }
 0x92f   : > { %v4970_v45 = vadd.f32 %v4969_v32, %v10233_v28  ;;  %v4971_v26 = vpop.f32.mrb[149].mxu1 }
 0x931   : > { %v5020_v2 = vmax.f32 %v4970_v45, 0.0 }
 0x932   : > { %v4974_v27 = vpop.f32.mrb[150].mxu1 }
 0x933   : > { %v5722_v14 = vpack.c.bf16 %v5020_v2, %v5019_v19  ;;  %v4976_v1 = vpop.f32.mrb[151].mxu1  ;;  %v4975_v56 = vadd.f32 %v4974_v27, %v10143_v58 }
 0x935   : > { %5723 = vmatprep.subr.bf16.mxu0 %v5722_v14  ;;  %v5021_v6 = vmax.f32 %v4975_v56, 0.0 }
 0x936   : > { %v4979_v4 = vpop.f32.mrb[152].mxu1  ;;  %5725 = vmatpush3.bf16.msra.mxu0 %v10262_v38 }
 0x937   : > { %v4980_v11 = vadd.f32 %v4979_v4, %v10240_v3  ;;  %v4981_v50 = vpop.f32.mrb[153].mxu1 }
 0x939   : > { %v5022_v17 = vmax.f32 %v4980_v11, 0.0 }
 0x93a   : > { %v4984_v18 = vpop.f32.mrb[154].mxu1 }
 0x93b   : > { %v5726_v28 = vpack.c.bf16 %v5022_v17, %v5021_v6  ;;  %v4986_v24 = vpop.f32.mrb[155].mxu1  ;;  %v4985_v10 = vadd.f32 %v4984_v18, %v10165_v62  ;;  %v4061_v62 = vcvt.f32.s32 %v10257_v8 }
 0x93d   : > { %5727 = vmatprep.subr.bf16.mxu0 %v5726_v28  ;;  %v5023_v38 = vmax.f32 %v4985_v10, 0.0 }
 0x93e   : > { %v4989_v52 = vpop.f32.mrb[156].mxu1  ;;  %5729 = vmatpush3.bf16.msra.mxu0 %v10265_v59  ;;  %v4062_v59 = vshll.u32 %v4061_v62, 16 }
 0x93f   : > { %v4990_v58 = vadd.f32 %v4989_v52, %v10249_v57  ;;  %v4991_v30 = vpop.f32.mrb[157].mxu1 }
 0x941   : > { %v5024_v42 = vmax.f32 %v4990_v58, 0.0 }
 0x943   : > { %v5730_v3 = vpack.c.bf16 %v5024_v42, %v5023_v38 }
 0x945   : > { %5731 = vmatprep.subr.bf16.mxu0 %v5730_v3 }
 0x946   : > { %5733 = vmatpush3.bf16.msra.mxu0 %v10271_v61 }
 0x949   : > { %5098 = vmatmul.mubr.f32.vlgmr.msra.gmra.mrb[168].mxu0 %v3885_v53 }
 0x97b   : > { %v4059_v57 = vpop.xlane.xlu0 %4058 }
 0x97c   : > { %v4060_v12 = vcvt.f32.s32 %v4059_v57 }
 0x97e   : > { %v4063_v16 = vadd.s32 %v4062_v59, %v4060_v12 }
 0x97f   : > { %v5031_v63 = vpop.permute.xlu0 %5030 }
 0x980   : > { %5106 = vst.msk [vmem:[%s5104_s23] sm:$0xff] %vm5105_vm9, %v4063_v16 }
 0xa1c   : > { %v5378_v61 = vpop.f32.mrb[168].mxu0 }
 0xa1d   : > { %v5379_v37 = vpop.f32.mrb[169].mxu0 }
 0xa1e   : > { %v5380_v8 = vadd.f32 %v5379_v37, %v5378_v61 }
 0xa20   : > { %v5100_v48 = vadd.f32 %v5380_v8, %v5031_v63 }
 0xa22   : > { %5108 = vst.msk [vmem:[%s5107_s25] sm:$0xff] %vm5105_vm9, %v5100_v48 }
 0xa23 PF: > { %s18_s28 = sadd.s32 1, %s6230_s28   ;;  %s10678_s24 = smov %s6222_s26 }
 0xa24   : > { %p15_p8 = scmp.ge.s32.totalorder %s18_s28, 6   ;;  %s10679_s25 = smov %s6226_s27 }
 0xa25   : > { %s10680_s26 = smov %s10683_s29  ;;  %s10681_s27 = smov %s10687_s30 }
 0xa26   :  { %17 = sbr.rel (!%p15_p8) target bundleno = 3 (0x3), region = 94 }

// kernel: custom-call.112
= control target key start
LH: loop header
LB: loop body
LE: loop exit
PB: predicated region body
PF: predicated region fallthrough
CT: control target
= control target key end

     0   :  { %s645_s9 = smov 0   ;;  %s647_s10 = smov 0   ;;  %s795_s0 = inlined_call_operand.vmem [shape: f32[2,6,3], index: 0, kind: input, shape index: {}]   ;;  %s796_s1 = inlined_call_operand.vmem [shape: f32[2,6,3], index: 1, kind: output, shape index: {0}]   ;;  %s797_s2 = inlined_call_operand.vmem [shape: f32[2,3], index: 2, kind: output, shape index: {1}]  }
   0x1   :  { %s649_s11 = smov 0   ;;  %s651_s12 = smov 0  }
   0x2   :  { %s653_s13 = smov 0  }
   0x3 LB: > { %s28_s14 = sadd.s32 1, %s618_s12  ;;  %s500_s15 = sadd.s32 4294967295, %s622_s13   ;;  %s622_s13 = sphi %s653_s13, %s9_s13   ;;  %s618_s12 = sphi %s651_s12, %s804_s12   ;;  %s614_s11 = sphi %s649_s11, %s803_s11   ;;  %s610_s10 = sphi %s647_s10, %s802_s10   ;;  %s606_s9 = sphi %s645_s9, %s801_s9  }
   0x4   : > { %p30_p0 = scmp.ge.s32.totalorder %s28_s14, 2  ;;  %s33_s16 = ssub.s32 0, %s618_s12 }
   0x5   : > { %s502_s17 = smin.u32 %s618_s12, %s33_s16  ;;  %p57_p1 = scmp.ne.s32.totalorder %s610_s10, %s606_s9 }
   0x6   : > { %s806_s14 = smov (%p30_p0, %s28_s14), 0  ;;  %s35_s18 = sshrl.u32 %s502_s17, 3 }
   0x7   : > { %s39_s19 = ssub.s32 0, %s806_s14  ;;  %p58_p2 = scmp.eq.s32.totalorder %s500_s15, 1 }
   0x8   : > { %s503_s20 = smin.u32 %s39_s19, %s806_s14  ;;  %s47_s24 = sadd.s32 1, %s610_s10 }
   0x9   : > { %s41_s21 = sshrl.u32 %s503_s20, 3  ;;  %p680_p3 = por %p58_p2, %p57_p1 }
   0xa   : > { %s44_s23 = ssub.s32 %s35_s18, %s41_s21  ;;  %p505_p5 = scmp.ge.s32.totalorder %s622_s13, 2 }
   0xb   : > { %p45_p4 = scmp.eq.s32.totalorder %s44_s23, 0  ;;  %s82_s26 = sand.u32 (!%p505_p5), 1, %s622_s13  }
   0xc   : > { %80 = sbr.rel (%p505_p5) target bundleno = 19 (0x13), region = 16  ;;  %s507_s27 = sshll.u32 (!%p505_p5), %s618_s12, 3 }
   0xd   : > { %s686_s25 = scalar_select %p45_p4, %s610_s10, %s47_s24  }
   0xe   : > { %s506_s28 = sshll.u32 (!%p505_p5), %s82_s26, 3  ;;  %s88_s3 = scalar_lea.vmem (!%p505_p5), %s795_s0, %s507_s27 }
   0xf   : > { %v116_v0 = vld [vmem:[%s88_s3] sm:$0xff] (!%p505_p5)  ;;  %s84_s4 = scalar_lea.vmem (!%p505_p5), [#allocation0], %s506_s28 }
  0x10   : > { %117 = vst [vmem:[%s84_s4] sm:$0xff] (!%p505_p5), %v116_v0 }
  0x13 PF: > { %p508_p6 = scmp.ge.s32.totalorder %s622_s13, 1  ;;  %p122_p7 = scmp.lt.s32.totalorder %s622_s13, 3 }
  0x15   : > { %p123_p8 = pnand %p508_p6, %p122_p7 }
  0x17   : > { %126 = sbr.rel (%p123_p8) target bundleno = 330 (0x14a), region = 54 }
  0x1e   : > { %s129_s5 = sand.u32 1, %s500_s15   ;;  %s143_s6 = sand.u32 1, %s606_s9   ;;  %v628_v2 = vmov 0.0  }
  0x1f   : > { %s509_s7 = sshll.u32 %s129_s5, 3  ;;  %s697_s8 = sshll.u32 %s143_s6, 1 }
  0x20   : > { %s152_s16 = sand.u32 7, %s614_s11   ;;  %s131_s17 = scalar_lea.vmem [#allocation0], %s509_s7 }
  0x21   : > { %v154_v1 = vld [vmem:[%s131_s17] sm:$0xff]  ;;  %s700_s18 = scalar_lea.vmem [#allocation1], %s509_s7  ;;  %s703_s19 = scalar_lea.vmem [#allocation2], %s152_s16 }
  0x22   : > { %155 = vst [vmem:[%s700_s18] sm:$0xff] %v154_v1  ;;  %156 = vst [vmem:[%s703_s19] sm:$0x1] %v628_v2  ;;  %s145_s15 = scalar_lea.vmem [#allocation3], %s697_s8  ;;  %s707_s20 = smov 0  }
  0x23 LB: >> { %v164_v3 = vlaneseq  ;;  %v716_v5 = vstv %s626_s20  ;;  %s191_s9 = scalar_lea.vmem %s700_s18, %s626_s20 [#allocation1]  ;;  %s249_s21 = scalar_lea.vmem [#allocation4], %s626_s20  ;;  %v629_v59 = vmov 1.0   ;;  %s626_s20 = sphi %s707_s20, %s162_s20  }
  0x24   : >> { %s266_s23 = smov [#allocation4] }
  0x25   : >> { %v713_v4 = vshrl.u32 %v164_v3, 7  ;;  %v243_v48 = vand.u32 127, %v164_v3 }
  0x27   : >> { %vm168_vm0 = vcmp.gt.s32.totalorder %v713_v4, %v716_v5  ;;  %vm169_vm1 = vcmp.lt.s32.totalorder %v713_v4, 6  ;;  %v230_v4 = vmov %v713_v4  ;;  %vm734_vm12 = vcmp.eq.s32.totalorder %v243_v48, %v716_v5 }
  0x28   : >> { %vm170_vm2 = vmand %vm168_vm0, %vm169_vm1  ;;  %vm234_vm9 = vcmp.gt.s32.totalorder %v230_v4, %v716_v5  ;;  %vm235_vm10 = vcmp.lt.s32.totalorder %v230_v4, 6  ;;  %v269_v4 = vmov %v713_v4  ;;  %vm295_vm15 = vcmp.gt.s32.totalorder %v243_v48, %v716_v5 }
  0x29   : >> { %v163_v6 = vld [vmem:[%s700_s18] sm:$0xff]  ;;  %s227_s18 = smov %s700_s18  ;;  %vm236_vm11 = vmand %vm234_vm9, %vm235_vm10  ;;  %vm274_vm13 = vcmp.lt.s32.totalorder %v269_v4, 6  ;;  %v286_v4 = vmov %v713_v4 }
  0x2a   : >> { %v171_v7 = vsel %vm170_vm2, %v163_v6, 0.0  ;;  %v192_v15 = vld [vmem:[%s191_s9] ss:$0 sm:$0xff]  ;;  %vm303_vm14 = vcmp.ge.s32.totalorder %v286_v4, %v716_v5 }
  0x2b   : >> { %v172_v8 = vmul.f32 %v171_v7, %v171_v7  ;;  %v193_v16 = vand.u32 2147483647, %v192_v15  ;;  %vm218_vm8 = vcmp.lt.f32.partialorder %v192_v15, 0.0  ;;  %v231_v45 = vld [vmem:[%s227_s18] sm:$0xff]  ;;  %s265_s18 = smov %s700_s18  ;;  %vm304_vm0 = vmand %vm734_vm12, %vm303_vm14 }
  0x2c   : >> { %v237_v49 = vsel %vm236_vm11, %v231_v45, 0.0  ;;  %v262_v60 = vld [vmem:[%s703_s19] ss:$0 sm:$0xff] }
  0x2d   : >> { %v173_v9 = vrot.slane %v172_v8, 4  ;;  %v194_v21 = vmax.f32 %v193_v16, 0.0  ;;  %v272_v63 = vld [vmem:[%s265_s18] sm:$0xff]  ;;  %s282_s18 = smov %s265_s18 }
  0x2e   : >> { %s307_s24 = scalar_lea.vmem %s282_s18, %s626_s20  ;;  %s162_s20 = sadd.s32 1, %s626_s20  }
  0x2f   : >> { %v174_v10 = vadd.f32 %v173_v9, %v172_v8  ;;  %p159_p9 = scmp.ge.s32.totalorder %s162_s20, 3  }
  0x30   : > { %s515_s26 = sshll.u32 (%p159_p9), %s614_s11, 3 }
  0x31   : >> { %v175_v11 = vrot.slane %v174_v10, 2  ;;  %s332_s29 = scalar_lea.vmem (%p159_p9), %s796_s1, %s515_s26 }
  0x33   : >> { %v176_v12 = vadd.f32 %v175_v11, %v174_v10 }
  0x35   : >> { %v177_v13 = vrot.slane %v176_v12, 1 }
  0x37   : >> { %v178_v14 = vadd.f32 %v177_v13, %v176_v12  ;;  %v293_v13 = vld [vmem:[%s282_s18] sm:$0xff] }
  0x39   : >> { %570 = vrsqrt.f32 %v178_v14  ;;  %vm181_vm3 = vcmp.eq.f32.partialorder %v178_v14, inf  ;;  %v184_v18 = vand.u32 2147483648, %v178_v14  ;;  %vm183_vm4 = vcmp.eq.f32.partialorder %v178_v14, 0.0 }
  0x43   : >> { %v571_v17 = vpop.eup %570 }
  0x44   : >> { %v180_v19 = vmul.f32 %v571_v17, %v178_v14 }
  0x46   : >> { %v182_v20 = vsel %vm181_vm3, %v178_v14, %v180_v19 }
  0x47   : >> { %v185_v22 = vsel %vm183_vm4, %v184_v18, %v182_v20 }
  0x48   : >> { %v195_v23 = vand.u32 2147483647, %v185_v22 }
  0x4a   : >> { %v196_v24 = vmax.f32 %v194_v21, %v195_v23 }
  0x4c   : >> { %572 = vrcp.f32 %v196_v24  ;;  %vm208_vm7 = vcmp.eq.f32.partialorder %v196_v24, 0.0 }
  0x56   : >> { %v573_v25 = vpop.eup %572 }
  0x57   : >> { %v198_v26 = vmul.f32 %v573_v25, %v193_v16  ;;  %v201_v27 = vmul.f32 0.0, %v573_v25  ;;  %v205_v28 = vmul.f32 %v573_v25, %v195_v23 }
  0x59   : >> { %v199_v29 = vmul.f32 %v198_v26, %v198_v26  ;;  %v202_v30 = vmul.f32 %v201_v27, %v201_v27  ;;  %v206_v31 = vmul.f32 %v205_v28, %v205_v28 }
  0x5b   : >> { %v203_v32 = vadd.f32 %v202_v30, %v199_v29 }
  0x5d   : >> { %v207_v33 = vadd.f32 %v206_v31, %v203_v32 }
  0x5f   : >> { %574 = vrsqrt.f32 %v207_v33  ;;  %vm211_vm5 = vcmp.eq.f32.partialorder %v207_v33, inf  ;;  %v214_v35 = vand.u32 2147483648, %v207_v33  ;;  %vm213_vm6 = vcmp.eq.f32.partialorder %v207_v33, 0.0 }
  0x69   : >> { %v575_v34 = vpop.eup %574 }
  0x6a   : >> { %v210_v36 = vmul.f32 %v575_v34, %v207_v33 }
  0x6c   : >> { %v212_v37 = vsel %vm211_vm5, %v207_v33, %v210_v36 }
  0x6d   : >> { %v215_v38 = vsel %vm213_vm6, %v214_v35, %v212_v37 }
  0x6e   : >> { %v216_v39 = vmul.f32 %v215_v38, %v196_v24 }
  0x70   : >> { %v217_v40 = vsel %vm208_vm7, 0.0, %v216_v39 }
  0x71   : >> { %v219_v41 = vxor.u32 2147483648, %v217_v40 }
  0x73   : >> { %v220_v42 = vsel %vm218_vm8, %v217_v40, %v219_v41 }
  0x74   : >> { %v726_v43 = vsel %vm183_vm4, %v192_v15, %v220_v42  ;;  %576 = vrcp.f32 %v220_v42  ;;  %v221_v46 = vsub.f32 %v220_v42, %v192_v15 }
  0x75   : >> { %v226_v44 = vsub.f32 %v192_v15, %v726_v43 }
  0x77   : >> { %578 = vrcp.f32 %v226_v44 }
  0x7e   : >> { %v577_v47 = vpop.eup %576 }
  0x7f   : >> { %v223_v50 = vmul.f32 %v577_v47, %v221_v46 }
  0x81   : >> { %v579_v51 = vpop.eup %578  ;;  %v225_v55 = vsel %vm183_vm4, 0.0, %v223_v50 }
  0x82   : >> { %v239_v52 = vmul.f32 %v579_v51, %v237_v49  ;;  %v255_v57 = vsel %vm734_vm12, %v225_v55, 0.0 }
  0x84   : >> { %v240_v54 = vsel %vm183_vm4, 0.0, %v239_v52 }
  0x85   : >> { %v245_v56 = vsel %vm734_vm12, %v240_v54, 0.0 }
  0x86   : >> { %246 = vadd.xlane.f32.xlu0 %v245_v56 }
  0x8a   : >> { %256 = vadd.xlane.f32.xlu0 %v255_v57 }
 0x113   : >> { %v247_v58 = vpop.xlane.xlu0 %246 }
 0x114   : >> { %248 = vst [vmem:[#allocation4] sm:$0xff] %v247_v58 }
 0x115   : >> { %250 = vst [vmem:[%s249_s21] sm:$0x1] %v629_v59 }
 0x117   : >> { %v257_v61 = vpop.xlane.xlu0 %256 }
 0x118   : >> { %v263_v62 = vsel %vm734_vm12, %v257_v61, %v262_v60 }
 0x119   : >> { %264 = vst [vmem:[%s703_s19] sm:$0x1] %v263_v62 }
 0x11c   : >> { %v271_v0 = vld [vmem:[%s266_s23] sm:$0xff]  ;;  %s283_s23 = smov %s266_s23 }
 0x11d   : >> { %v273_v1 = vmul.f32 %v272_v63, %v271_v0  ;;  %v291_v12 = vld [vmem:[%s283_s23] sm:$0xff] }
 0x11f   : >> { %v275_v2 = vsel %vm274_vm13, %v273_v1, 0.0 }
 0x120   : >> { %v276_v3 = vrot.slane %v275_v2, 4  ;;  %v318_v4 = vld [vmem:[#allocation2] sm:$0x3] (%p159_p9) }
 0x121   : > { %320 = vst [vmem:[%s145_s15] sm:$0x3] (%p159_p9), %v318_v4 }
 0x122   : >> { %v277_v6 = vadd.f32 %v276_v3, %v275_v2 }
 0x124   : >> { %v278_v7 = vrot.slane %v277_v6, 2 }
 0x126   : >> { %v279_v8 = vadd.f32 %v278_v7, %v277_v6 }
 0x128   : >> { %v280_v9 = vrot.slane %v279_v8, 1 }
 0x12a   : >> { %v281_v10 = vadd.f32 %v280_v9, %v279_v8 }
 0x12c   : >> { %v287_v11 = vmul.f32 %v281_v10, %v257_v61 }
 0x12e   : >> { %v292_v14 = vmul.f32 %v291_v12, %v287_v11 }
 0x130   : >> { %v296_v15 = vsub.f32 %v293_v13, %v292_v14 }
 0x132   : >> { %v297_v16 = vsel %vm295_vm15, %v296_v15, %v293_v13 }
 0x133   : >> { %v305_v17 = vsel %vm304_vm0, %v291_v12, %v297_v16 }
 0x134   : >> { %306 = vst [vmem:[%s282_s18] sm:$0xff] %v305_v17 }
 0x137   : > { %161 = sbr.rel (!%p159_p9) target bundleno = 35 (0x23), region = 175 }
 0x13b   : >> { %v308_v18 = vld [vmem:[%s307_s24] ss:$0 sm:$0xff] }
 0x13c   : >> { %v313_v19 = vsel %vm734_vm12, %v726_v43, %v308_v18 }
 0x13d   : >> { %314 = vst [vmem:[%s307_s24] sm:$0x1] %v313_v19 }
 0x13e   : > { %p368_p10 = scmp.lt.s32.totalorder (%p680_p3), %s614_s11, 0  ;;  %s369_s30 = ssub.s32 (%p680_p3), 0, %s614_s11  ;;  %v391_v20 = vld [vmem:[%s145_s15] sm:$0x3] (%p680_p3) }
 0x13f   : > { %367 = sbr.rel (!%p680_p3) target bundleno = 330 (0x14a), region = 99  ;;  %s516_s3 = smin.u32 (%p680_p3), %s614_s11, %s369_s30 }
 0x140   : > { %s371_s4 = sshrl.u32 (%p680_p3), %s516_s3, 3 }
 0x141   : > { %s372_s5 = ssub.s32 (%p680_p3), 0, %s371_s4 }
 0x144   : > { %v360_v5 = vld [vmem:[%s700_s18] sm:$0xff] }
 0x145   : > { %361 = vst [vmem:[%s332_s29] sm:$0xff] %v360_v5 }
 0x146   : > { %s808_s5 = smov (!%p368_p10, %s372_s5), %s371_s4 }
 0x147   : > { %s517_s6 = sshll.u32 %s808_s5, 1 }
 0x148   : > { %s375_s17 = scalar_lea.vmem %s797_s2, %s517_s6 }
 0x149   : > { %392 = vst [vmem:[%s375_s17] sm:$0x3] %v391_v20 }
 0x14a PF: > { %s9_s13 = sadd.s32 1, %s622_s13   ;;  %s801_s9 = smov %s610_s10 }
 0x14b   : > { %p6_p11 = scmp.ge.s32.totalorder %s9_s13, 4   ;;  %s802_s10 = smov %s686_s25 }
 0x14c   : > { %s803_s11 = smov %s618_s12  ;;  %s804_s12 = smov %s806_s14 }
 0x14d   :  { %8 = sbr.rel (!%p6_p11) target bundleno = 3 (0x3), region = 186 }

// kernel: custom-call.113
= control target key start
LH: loop header
LB: loop body
LE: loop exit
PB: predicated region body
PF: predicated region fallthrough
CT: control target
= control target key end

     0   :  { %s236_s6 = smov 0   ;;  %s263_s0 = inlined_call_operand.vmem [shape: f32[2,3,3], index: 0, kind: input, shape index: {}]   ;;  %s264_s1 = inlined_call_operand.vmem [shape: f32[2,3,3], index: 1, kind: output, shape index: {}]  }
   0x1 LB: > { %s198_s7 = sadd.s32 4294967295, %s224_s6   ;;  %p200_p0 = scmp.ge.s32.totalorder %s224_s6, 2  ;;  %s224_s6 = sphi %s236_s6, %s7_s6  }
   0x2   : > { %s23_s8 = sand.u32 (!%p200_p0), 1, %s224_s6   ;;  %s202_s9 = sshll.u32 (!%p200_p0), %s224_s6, 2 }
   0x3   : > { %21 = sbr.rel (%p200_p0) target bundleno = 10 (0xa), region = 16  ;;  %s201_s10 = sshll.u32 (!%p200_p0), %s23_s8, 2 }
   0x4   : > { %s27_s13 = scalar_lea.vmem (!%p200_p0), %s263_s0, %s202_s9  ;;  %s25_s14 = scalar_lea.vmem (!%p200_p0), [#allocation1], %s201_s10 }
   0x5   : > { %v43_v0 = vld [vmem:[%s27_s13] sm:$0xf] (!%p200_p0) }
   0x6   : > { %44 = vst [vmem:[%s25_s14] sm:$0xf] (!%p200_p0), %v43_v0 }
   0xa PF: > { %p203_p1 = scmp.ge.s32.totalorder %s224_s6, 1  ;;  %p60_p2 = scmp.lt.s32.totalorder %s224_s6, 3 }
   0xc   : > { %p61_p3 = pnand %p203_p1, %p60_p2 }
   0xd   : > { %s252_s15 = sand.u32 (!%p61_p3), 1, %s198_s7   ;;  %v82_v1 = vlaneseq (!%p61_p3)  ;;  %vm96_vm1 = vcmask (!%p61_p3), 23552   ;;  %s207_s19 = sshll.u32 (!%p61_p3), %s198_s7, 2 }
   0xe   : > { %64 = sbr.rel (%p61_p3) target bundleno = 334 (0x14e), region = 50  ;;  %s204_s16 = sshll.u32 (!%p61_p3), %s252_s15, 2 }
   0xf   : > { %s73_s17 = scalar_lea.vmem (!%p61_p3), [#allocation1], %s204_s16  ;;  %v83_v3 = vand.u32 (!%p61_p3), 127, %v82_v1  ;;  %v85_v4 = vshrl.u32 (!%p61_p3), %v82_v1, 7  ;;  %s77_s18 = scalar_lea.vmem (!%p61_p3), [#allocation3], %s204_s16 }
  0x10   : > { %v80_v2 = vld [vmem:[%s73_s17] sm:$0xf] (!%p61_p3)  ;;  %s128_s22 = scalar_lea.vmem (!%p61_p3), %s264_s1, %s207_s19 }
  0x11   : > { %81 = vst [vmem:[#allocation0] sm:$0xf] (!%p61_p3), %v80_v2  ;;  %vm91_vm0 = vcmp.eq.s32.totalorder (!%p61_p3), %v83_v3, 0  ;;  %vm87_vm2 = vcmp.eq.s32.totalorder (!%p61_p3), %v83_v3, %v85_v4  ;;  %vm100_vm3 = vcmp.eq.s32.totalorder (!%p61_p3), %v83_v3, 1  ;;  %vm111_vm4 = vcmp.eq.s32.totalorder (!%p61_p3), %v83_v3, 2 }
  0x18   : > { %v88_v5 = vld [vmem:[#allocation0] sm:$0xff] }
  0x19   : > { %v95_v6 = vld [vmem:[#allocation0 + $0x1] ss:$0 sm:$0xff]  ;;  %v92_v7 = vsel %vm91_vm0, %v88_v5, 1.0  ;;  %v106_v11 = vld [vmem:[#allocation0 + $0x2] ss:$0 sm:$0xff] }
  0x1a   : > { %v97_v8 = vsel %vm96_vm1, %v95_v6, 0.0  ;;  %v93_v9 = vsel %vm87_vm2, %v92_v7, 0.0  ;;  %v108_v12 = vsel %vm96_vm1, %v106_v11, 0.0 }
  0x1b   : > { %v101_v10 = vmul.f32 %v97_v8, %v93_v9 }
  0x1d   : > { %102 = vadd.xlane.f32.xlu0 %v101_v10 }
  0xaa   : > { %v103_v13 = vpop.xlane.xlu0 %102 }
  0xab   : > { %v104_v14 = vsel %vm100_vm3, %v103_v13, %v93_v9 }
  0xac   : > { %v112_v15 = vmul.f32 %v108_v12, %v104_v14 }
  0xae   : > { %113 = vadd.xlane.f32.xlu0 %v112_v15 }
 0x13b   : > { %v114_v16 = vpop.xlane.xlu0 %113 }
 0x13c   : > { %v115_v17 = vsel %vm111_vm4, %v114_v16, %v104_v14 }
 0x13d   : > { %116 = vst [vmem:[#allocation2] sm:$0xff] %v115_v17 }
 0x144   : > { %v120_v18 = vld [vmem:[#allocation2] sm:$0xf] }
 0x145   : > { %122 = vst [vmem:[%s77_s18] sm:$0xf] %v120_v18 }
 0x14c   : > { %v144_v19 = vld [vmem:[%s77_s18] sm:$0xf] }
 0x14d   : > { %145 = vst [vmem:[%s128_s22] sm:$0xf] %v144_v19 }
 0x14e PF: > { %s7_s6 = sadd.s32 1, %s224_s6  }
 0x14f   : > { %p4_p4 = scmp.ge.s32.totalorder %s7_s6, 4  }
 0x151   :  { %6 = sbr.rel (!%p4_p4) target bundleno = 1 (0x1), region = 112 }

// kernel: custom-call.114
= control target key start
LH: loop header
LB: loop body
LE: loop exit
PB: predicated region body
PF: predicated region fallthrough
CT: control target
= control target key end

     0   :  { %s343_s6 = smov 0   ;;  %s345_s7 = smov 0   ;;  %s390_s0 = inlined_call_operand.vmem [shape: f32[2,3,3], index: 0, kind: input, shape index: {}]   ;;  %s391_s1 = inlined_call_operand.vmem [shape: f32[2,3,3], index: 1, kind: output, shape index: {}]  }
   0x1   :  { %s347_s8 = smov 0  }
   0x2 LB: > { %s265_s9 = sadd.s32 4294967295, %s330_s8   ;;  %s26_s10 = sadd.s32 1, %s326_s7  ;;  %s330_s8 = sphi %s347_s8, %s7_s8   ;;  %s326_s7 = sphi %s345_s7, %s393_s7   ;;  %s322_s6 = sphi %s343_s6, %s392_s6  }
   0x3   : > { %p28_p0 = scmp.ge.s32.totalorder %s26_s10, 2  ;;  %p267_p1 = scmp.ge.s32.totalorder %s330_s8, 2 }
   0x4   : > { %s42_s11 = sand.u32 (!%p267_p1), 1, %s330_s8   ;;  %s269_s12 = sshll.u32 (!%p267_p1), %s326_s7, 2 }
   0x5   : > { %s395_s10 = smov (%p28_p0, %s26_s10), 0  ;;  %40 = sbr.rel (%p267_p1) target bundleno = 12 (0xc), region = 16 }
   0x6   : > { %s268_s13 = sshll.u32 (!%p267_p1), %s42_s11, 2  ;;  %s48_s16 = scalar_lea.vmem (!%p267_p1), %s390_s0, %s269_s12 }
   0x7   : > { %v64_v0 = vld [vmem:[%s48_s16] sm:$0xf] (!%p267_p1)  ;;  %s44_s17 = scalar_lea.vmem (!%p267_p1), [#allocation1], %s268_s13 }
   0x8   : > { %65 = vst [vmem:[%s44_s17] sm:$0xf] (!%p267_p1), %v64_v0 }
   0xc PF: > { %p270_p2 = scmp.ge.s32.totalorder %s330_s8, 1  ;;  %p81_p3 = scmp.lt.s32.totalorder %s330_s8, 3 }
   0xe   : > { %p82_p4 = pnand %p270_p2, %p81_p3 }
   0xf   : > { %v332_v1 = vmov (!%p82_p4), 0.0   ;;  %s370_s18 = sand.u32 (!%p82_p4), 1, %s265_s9   ;;  %vm104_vm0 = vcmask (!%p82_p4), 7168   ;;  %vm122_vm1 = vcmask (!%p82_p4), 15368   ;;  %vm139_vm2 = vcmask (!%p82_p4), 1047553   ;;  %s274_s22 = sshll.u32 (!%p82_p4), %s322_s6, 2 }
  0x10   : > { %85 = sbr.rel (%p82_p4) target bundleno = 541 (0x21d), region = 50  ;;  %103 = vst [vmem:[#allocation2] sm:$0xff] (!%p82_p4), %v332_v1  ;;  %s271_s19 = sshll.u32 (!%p82_p4), %s370_s18, 2  ;;  %vm140_vm3 = vmand (!%p82_p4), %vm122_vm1, %vm139_vm2  ;;  %vm144_vm4 = vcmask (!%p82_p4), 23568   ;;  %vm161_vm5 = vcmask (!%p82_p4), 1047554  }
  0x11   : > { %s94_s20 = scalar_lea.vmem (!%p82_p4), [#allocation1], %s271_s19  ;;  %vm162_vm6 = vmand (!%p82_p4), %vm144_vm4, %vm161_vm5  ;;  %s98_s21 = scalar_lea.vmem (!%p82_p4), [#allocation3], %s271_s19 }
  0x12   : > { %v101_v5 = vld [vmem:[%s94_s20] sm:$0xf] (!%p82_p4)  ;;  %s179_s25 = scalar_lea.vmem (!%p82_p4), %s391_s1, %s274_s22 }
  0x13   : > { %102 = vst [vmem:[#allocation0] sm:$0xf] (!%p82_p4), %v101_v5 }
  0x17   : > { %v105_v2 = vld [vmem:[#allocation2] ss:$0 sm:$0xff] }
  0x18   : > { %v107_v3 = vmul.f32 %v105_v2, %v105_v2  ;;  %v114_v4 = vmul.f32 0.0, %v105_v2 }
  0x1a   : > { %108 = vadd.xlane.f32.xlu0 %v107_v3  ;;  %v106_v6 = vld [vmem:[#allocation0] ss:$0 sm:$0xff]  ;;  %v126_v18 = vld [vmem:[#allocation0 + $0x1] ss:$0 sm:$0xff]  ;;  %v148_v30 = vld [vmem:[#allocation0 + $0x2] ss:$0 sm:$0xff] }
  0x1b   : > { %v112_v10 = vld [vmem:[#allocation0] sm:$0xff] }
  0x1e   : > { %115 = vadd.xlane.f32.xlu0 %v114_v4 }
  0xa7   : > { %v109_v7 = vpop.xlane.xlu0 %108 }
  0xa8   : > { %v110_v8 = vsub.f32 %v106_v6, %v109_v7 }
  0xaa   : > { %302 = vrsqrt.f32 %v110_v8 }
  0xab   : > { %v116_v9 = vpop.xlane.xlu0 %115 }
  0xac   : > { %v117_v11 = vsub.f32 %v112_v10, %v116_v9 }
  0xb4   : > { %v303_v12 = vpop.eup %302 }
  0xb5   : > { %v118_v13 = vmul.f32 %v303_v12, %v117_v11 }
  0xb7   : > { %v119_v14 = vsel %vm104_vm0, %v118_v13, 0.0 }
  0xb8   : > { %121 = vst [vmem:[#allocation2] sm:$0xff] %v119_v14 }
  0xbf   : > { %v124_v15 = vld [vmem:[#allocation2 + $0x1] ss:$0 sm:$0xff] }
  0xc0   : > { %v127_v16 = vmul.f32 %v124_v15, %v124_v15  ;;  %v134_v17 = vmul.f32 %v124_v15, %v119_v14 }
  0xc2   : > { %128 = vadd.xlane.f32.xlu1 %v127_v16 }
  0xc6   : > { %135 = vadd.xlane.f32.xlu1 %v134_v17 }
 0x14f   : > { %v129_v19 = vpop.xlane.xlu1 %128 }
 0x150   : > { %v130_v20 = vsub.f32 %v126_v18, %v129_v19 }
 0x152   : > { %304 = vrsqrt.f32 %v130_v20 }
 0x153   : > { %v136_v21 = vpop.xlane.xlu1 %135 }
 0x154   : > { %v137_v22 = vsub.f32 %v112_v10, %v136_v21 }
 0x15c   : > { %v305_v23 = vpop.eup %304 }
 0x15d   : > { %v138_v24 = vmul.f32 %v305_v23, %v137_v22 }
 0x15f   : > { %v141_v25 = vsel %vm140_vm3, %v138_v24, 0.0 }
 0x160   : > { %v142_v26 = vadd.f32 %v141_v25, %v119_v14 }
 0x162   : > { %143 = vst [vmem:[#allocation2] sm:$0xff] %v142_v26 }
 0x169   : > { %v146_v27 = vld [vmem:[#allocation2 + $0x2] ss:$0 sm:$0xff] }
 0x16a   : > { %v156_v28 = vmul.f32 %v146_v27, %v142_v26  ;;  %v149_v29 = vmul.f32 %v146_v27, %v146_v27 }
 0x16c   : > { %157 = vadd.xlane.f32.xlu1 %v156_v28  ;;  %150 = vadd.xlane.f32.xlu0 %v149_v29 }
 0x1f9   : > { %v151_v31 = vpop.xlane.xlu0 %150  ;;  %v158_v33 = vpop.xlane.xlu1 %157 }
 0x1fa   : > { %v152_v32 = vsub.f32 %v148_v30, %v151_v31  ;;  %v159_v34 = vsub.f32 %v112_v10, %v158_v33 }
 0x1fc   : > { %306 = vrsqrt.f32 %v152_v32 }
 0x206   : > { %v307_v35 = vpop.eup %306 }
 0x207   : > { %v160_v36 = vmul.f32 %v307_v35, %v159_v34 }
 0x209   : > { %v163_v37 = vsel %vm162_vm6, %v160_v36, 0.0 }
 0x20a   : > { %v164_v38 = vadd.f32 %v163_v37, %v142_v26 }
 0x20c   : > { %165 = vst [vmem:[#allocation2] sm:$0xff] %v164_v38 }
 0x213   : > { %v169_v39 = vld [vmem:[#allocation2] sm:$0xf] }
 0x214   : > { %171 = vst [vmem:[%s98_s21] sm:$0xf] %v169_v39 }
 0x21b   : > { %v195_v40 = vld [vmem:[%s98_s21] sm:$0xf] }
 0x21c   : > { %196 = vst [vmem:[%s179_s25] sm:$0xf] %v195_v40 }
 0x21d PF: > { %s7_s8 = sadd.s32 1, %s330_s8   ;;  %s392_s6 = smov %s326_s7 }
 0x21e   : > { %p4_p5 = scmp.ge.s32.totalorder %s7_s8, 4   ;;  %s393_s7 = smov %s395_s10 }
 0x220   :  { %6 = sbr.rel (!%p4_p5) target bundleno = 2 (0x2), region = 114 }

// kernel: custom-call.115
= control target key start
LH: loop header
LB: loop body
LE: loop exit
PB: predicated region body
PF: predicated region fallthrough
CT: control target
= control target key end

     0   :  { %s343_s6 = smov 0   ;;  %s345_s7 = smov 0   ;;  %s390_s0 = inlined_call_operand.vmem [shape: f32[2,1,3,3], index: 0, kind: input, shape index: {}]   ;;  %s391_s1 = inlined_call_operand.vmem [shape: f32[2,1,3,3], index: 1, kind: output, shape index: {}]  }
   0x1   :  { %s347_s8 = smov 0  }
   0x2 LB: > { %s269_s9 = sadd.s32 4294967295, %s330_s8   ;;  %s33_s10 = sadd.s32 1, %s326_s7  ;;  %s330_s8 = sphi %s347_s8, %s7_s8   ;;  %s326_s7 = sphi %s345_s7, %s393_s7   ;;  %s322_s6 = sphi %s343_s6, %s392_s6  }
   0x3   : > { %p35_p0 = scmp.ge.s32.totalorder %s33_s10, 2  ;;  %p271_p1 = scmp.ge.s32.totalorder %s330_s8, 2 }
   0x4   : > { %s49_s11 = sand.u32 (!%p271_p1), 1, %s330_s8   ;;  %s273_s12 = sshll.u32 (!%p271_p1), %s326_s7, 2 }
   0x5   : > { %s395_s10 = smov (%p35_p0, %s33_s10), 0  ;;  %47 = sbr.rel (%p271_p1) target bundleno = 12 (0xc), region = 16 }
   0x6   : > { %s272_s13 = sshll.u32 (!%p271_p1), %s49_s11, 2  ;;  %s56_s16 = scalar_lea.vmem (!%p271_p1), %s390_s0, %s273_s12 }
   0x7   : > { %v72_v0 = vld [vmem:[%s56_s16] sm:$0xf] (!%p271_p1)  ;;  %s51_s17 = scalar_lea.vmem (!%p271_p1), [#allocation1], %s272_s13 }
   0x8   : > { %73 = vst [vmem:[%s51_s17] sm:$0xf] (!%p271_p1), %v72_v0 }
   0xc PF: > { %p274_p2 = scmp.ge.s32.totalorder %s330_s8, 1  ;;  %p89_p3 = scmp.lt.s32.totalorder %s330_s8, 3 }
   0xe   : > { %p90_p4 = pnand %p274_p2, %p89_p3 }
  0x10   : > { %93 = sbr.rel (%p90_p4) target bundleno = 511 (0x1ff), region = 50 }
  0x17   : > { %s370_s18 = sand.u32 1, %s269_s9   ;;  %v111_v1 = vlaneseq  ;;  %v332_v11 = vmov -1.0   ;;  %s278_s22 = sshll.u32 %s322_s6, 2 }
  0x18   : > { %s275_s19 = sshll.u32 %s370_s18, 2  ;;  %s178_s25 = scalar_lea.vmem %s391_s1, %s278_s22 }
  0x19   : > { %s102_s20 = scalar_lea.vmem [#allocation1], %s275_s19  ;;  %v112_v3 = vand.u32 127, %v111_v1  ;;  %v115_v4 = vshrl.u32 %v111_v1, 7  ;;  %s106_s21 = scalar_lea.vmem [#allocation3], %s275_s19 }
  0x1a   : > { %v109_v2 = vld [vmem:[%s102_s20] sm:$0xf] }
  0x1b   : > { %110 = vst [vmem:[#allocation0] sm:$0xf] %v109_v2  ;;  %vm113_vm0 = vcmp.lt.s32.totalorder %v112_v3, 3  ;;  %vm122_vm1 = vcmp.ge.s32.totalorder %v115_v4, %v112_v3  ;;  %vm117_vm2 = vcmp.eq.s32.totalorder %v115_v4, %v112_v3  ;;  %vm136_vm4 = vcmp.eq.s32.totalorder %v112_v3, 0 }
  0x1c   : > { %vm123_vm3 = vmand %vm122_vm1, %vm113_vm0  ;;  %vm133_vm5 = vcmp.eq.s32.totalorder %v112_v3, %v115_v4  ;;  %v137_v12 = vsel %vm136_vm4, 1.0, %v332_v11  ;;  %vm144_vm6 = vcmp.eq.s32.totalorder %v112_v3, 1  ;;  %vm154_vm7 = vcmp.eq.s32.totalorder %v112_v3, 2 }
  0x1d   : > { %v138_v13 = vsel %vm133_vm5, %v137_v12, 0.0 }
  0x22   : > { %v118_v5 = vld [vmem:[#allocation0] sm:$0xff] }
  0x23   : > { %v119_v6 = vsel %vm117_vm2, %v118_v5, 0.0  ;;  %v124_v7 = vsel %vm123_vm3, %v118_v5, 0.0 }
  0x24   : > { %120 = vadd.xlane.f32.xlu0 %v119_v6 }
  0xb1   : > { %v121_v8 = vpop.xlane.xlu0 %120 }
  0xb2   : > { %306 = vrcp.f32 %v121_v8  ;;  %vm161_vm8 = vweird.f32 %v121_v8 }
  0xbc   : > { %v307_v9 = vpop.eup %306 }
  0xbd   : > { %v126_v10 = vmul.f32 %v307_v9, %v124_v7 }
  0xbf   : > { %127 = vst [vmem:[#allocation4] sm:$0xff] %v126_v10 }
  0xc6   : > { %v140_v14 = vld [vmem:[#allocation4 + $0x1] ss:$0 sm:$0xff]  ;;  %v150_v17 = vld [vmem:[#allocation4 + $0x2] ss:$0 sm:$0xff] }
  0xc7   : > { %v141_v15 = vxor.u32 2147483648, %v140_v14  ;;  %v151_v19 = vxor.u32 2147483648, %v150_v17 }
  0xc9   : > { %v145_v16 = vmul.f32 %v141_v15, %v138_v13 }
  0xcb   : > { %146 = vadd.xlane.f32.xlu0 %v145_v16 }
 0x158   : > { %v147_v18 = vpop.xlane.xlu0 %146 }
 0x159   : > { %v148_v20 = vsel %vm144_vm6, %v147_v18, %v138_v13 }
 0x15a   : > { %v155_v21 = vmul.f32 %v151_v19, %v148_v20 }
 0x15c   : > { %156 = vadd.xlane.f32.xlu1 %v155_v21 }
 0x1e9   : > { %v157_v22 = vpop.xlane.xlu1 %156 }
 0x1ea   : > { %v158_v23 = vsel %vm154_vm7, %v157_v22, %v148_v20 }
 0x1eb   : > { %v160_v24 = vmul.f32 %v307_v9, %v158_v23 }
 0x1ed   : > { %v162_v25 = vsel %vm161_vm8, %v158_v23, %v160_v24 }
 0x1ee   : > { %163 = vst [vmem:[#allocation2] sm:$0xff] %v162_v25 }
 0x1f5   : > { %v167_v26 = vld [vmem:[#allocation2] sm:$0xf] }
 0x1f6   : > { %169 = vst [vmem:[%s106_s21] sm:$0xf] %v167_v26 }
 0x1fd   : > { %v194_v27 = vld [vmem:[%s106_s21] sm:$0xf] }
 0x1fe   : > { %195 = vst [vmem:[%s178_s25] sm:$0xf] %v194_v27 }
 0x1ff PF: > { %s7_s8 = sadd.s32 1, %s330_s8   ;;  %s392_s6 = smov %s326_s7 }
 0x200   : > { %p4_p5 = scmp.ge.s32.totalorder %s7_s8, 4   ;;  %s393_s7 = smov %s395_s10 }
 0x202   :  { %6 = sbr.rel (!%p4_p5) target bundleno = 2 (0x2), region = 112 }

// kernel: custom-call.89
= control target key start
LH: loop header
LB: loop body
LE: loop exit
PB: predicated region body
PF: predicated region fallthrough
CT: control target
= control target key end

     0   :  { %s1704_s30 = smov 0   ;;  %s1706_s10 = smov 0   ;;  %s2030_s0 = inlined_call_operand.vmem [shape: f32[2,2,2], index: 0, kind: input, shape index: {}]   ;;  %s2031_s1 = inlined_call_operand.vmem [shape: f32[2,2,2], index: 1, kind: input, shape index: {}]   ;;  %s2032_s2 = inlined_call_operand.vmem [shape: f32[2,2,2], index: 2, kind: input, shape index: {}]   ;;  %s2033_s3 = inlined_call_operand.vmem [shape: f32[2,2,2], index: 3, kind: input, shape index: {}]   ;;  %s2034_s4 = inlined_call_operand.vmem [shape: f32[2,2], index: 4, kind: output, shape index: {0}]   ;;  %s2035_s5 = inlined_call_operand.vmem [shape: f32[2,2], index: 5, kind: output, shape index: {1}]   ;;  %s2036_s6 = inlined_call_operand.vmem [shape: f32[2,2,2], index: 6, kind: output, shape index: {2}]   ;;  %s2037_s7 = inlined_call_operand.vmem [shape: f32[2,2,2], index: 7, kind: output, shape index: {3}]   ;;  %s2038_s8 = inlined_call_operand.vmem [shape: f32[2,2,2], index: 8, kind: output, shape index: {4}]   ;;  %s2039_s9 = inlined_call_operand.vmem [shape: f32[2,2,2], index: 9, kind: output, shape index: {5}]  }
   0x1   :  { %s1708_s11 = smov 0  }
   0x2 LB: > { %s1720_s12 = sadd.s32 4294967295, %s1641_s11   ;;  %s1723_s13 = sadd.s32 1, %s1641_s11   ;;  %s1641_s11 = sphi %s1708_s11, %s2058_s11   ;;  %s1637_s10 = sphi %s1706_s10, %s2057_s10   ;;  %s1633_s30 = sphi %s1704_s30, %s2056_s30  }
   0x3   : > { %s20_s14 = sshrl.u32 %s1641_s11, 3  ;;  %s21_s15 = sshrl.u32 %s1723_s13, 3 }
   0x4   : > { %s22_s16 = ssub.s32 %s20_s14, %s21_s15  ;;  %s25_s17 = sadd.s32 1, %s1637_s10 }
   0x5   : > { %p23_p0 = scmp.eq.s32.totalorder %s22_s16, 0  ;;  %p35_p1 = scmp.ne.s32.totalorder %s1637_s10, %s1633_s30 }
   0x6   : > { %p36_p2 = scmp.eq.s32.totalorder %s1720_s12, 1  ;;  %p1502_p4 = scmp.ge.s32.totalorder %s1641_s11, 2 }
   0x7   : > { %s1732_s18 = scalar_select %p23_p0, %s1637_s10, %s25_s17  }
   0x8   : > { %p1734_p3 = por %p36_p2, %p35_p1  ;;  %86 = sbr.rel (%p1502_p4) target bundleno = 17 (0x11), region = 16 }
   0x9   : > { %2040 = sst [smem:[#allocation33_spill]] %s1732_s18  ;;  %s88_s20 = sand.u32 (!%p1502_p4), 1, %s1641_s11  }
   0xa   : > { %s1504_s21 = sshll.u32 (!%p1502_p4), %s1641_s11, 1  ;;  %s1503_s22 = sshll.u32 (!%p1502_p4), %s88_s20, 1 }
   0xb   : > { %s92_s25 = scalar_lea.vmem (!%p1502_p4), %s2030_s0, %s1504_s21  ;;  %s90_s26 = scalar_lea.vmem (!%p1502_p4), [#allocation1], %s1503_s22 }
   0xc   : > { %v108_v0 = vld [vmem:[%s92_s25] sm:$0x3] (!%p1502_p4)  ;;  %s129_s29 = scalar_lea.vmem (!%p1502_p4), %s2031_s1, %s1504_s21  ;;  %s166_s16 = scalar_lea.vmem (!%p1502_p4), %s2032_s2, %s1504_s21 }
   0xd   : > { %109 = vst [vmem:[%s90_s26] sm:$0x3] (!%p1502_p4), %v108_v0  ;;  %v145_v1 = vld [vmem:[%s129_s29] sm:$0x3] (!%p1502_p4)  ;;  %s127_s17 = scalar_lea.vmem (!%p1502_p4), [#allocation3], %s1503_s22  ;;  %s203_s23 = scalar_lea.vmem (!%p1502_p4), %s2033_s3, %s1504_s21 }
   0xe   : > { %146 = vst [vmem:[%s127_s17] sm:$0x3] (!%p1502_p4), %v145_v1  ;;  %v182_v2 = vld [vmem:[%s166_s16] sm:$0x3] (!%p1502_p4)  ;;  %s164_s24 = scalar_lea.vmem (!%p1502_p4), [#allocation5], %s1503_s22  ;;  %s201_s25 = scalar_lea.vmem (!%p1502_p4), [#allocation7], %s1503_s22 }
   0xf   : > { %183 = vst [vmem:[%s164_s24] sm:$0x3] %v182_v2  ;;  %v219_v3 = vld [vmem:[%s203_s23] sm:$0x3] }
  0x10   : > { %220 = vst [vmem:[%s201_s25] sm:$0x3] %v219_v3 }
  0x11 PF: > { %p1511_p5 = scmp.ge.s32.totalorder %s1641_s11, 1  ;;  %p236_p6 = scmp.lt.s32.totalorder %s1641_s11, 3 }
  0x13   : > { %p237_p7 = pnand %p1511_p5, %p236_p6 }
  0x15   : > { %240 = sbr.rel (%p237_p7) target bundleno = 999 (0x3e7), region = 140 }
  0x1c   : > { %s259_s26 = sand.u32 1, %s1720_s12   ;;  %s277_s27 = sand.u32 1, %s1633_s30   ;;  %v337_v4 = vlaneseq  ;;  %v1651_v5 = vmov 0.0  }
  0x1d   : > { %s1757_s28 = sshll.u32 %s259_s26, 1  ;;  %s1759_s18 = sshll.u32 %s277_s27, 1  ;;  %332 = vst [vmem:[#allocation12] sm:$0xff] %v1651_v5  ;;  %333 = vst [vmem:[#allocation14] sm:$0xff] %v1651_v5 }
  0x1e   : > { %334 = vst [vmem:[#allocation16] sm:$0xff] %v1651_v5  ;;  %335 = vst [vmem:[#allocation18] sm:$0xff] %v1651_v5  ;;  %v1761_v6 = vand.u32 127, %v337_v4  ;;  %v1763_v7 = vshrl.u32 %v337_v4, 7  ;;  %s261_s11 = scalar_lea.vmem [#allocation1], %s1757_s28  ;;  %s265_s30 = scalar_lea.vmem [#allocation3], %s1757_s28 }
  0x1f   : > { %v304_v8 = vld [vmem:[%s261_s11] sm:$0x3]  ;;  %v308_v9 = vld [vmem:[%s265_s30] sm:$0x3]  ;;  %s269_s21 = scalar_lea.vmem [#allocation5], %s1757_s28  ;;  %s273_s22 = scalar_lea.vmem [#allocation7], %s1757_s28 }
  0x20   : > { %305 = vst [vmem:[#allocation0] sm:$0x3] %v304_v8  ;;  %309 = vst [vmem:[#allocation2] sm:$0x3] %v308_v9  ;;  %v312_v10 = vld [vmem:[%s269_s21] sm:$0x3]  ;;  %v339_v6 = vmov %v1761_v6  ;;  %v342_v7 = vmov %v1763_v7 }
  0x21   : > { %v316_v11 = vld [vmem:[%s273_s22] sm:$0x3]  ;;  %313 = vst [vmem:[#allocation4] sm:$0x3] %v312_v10  ;;  %v352_v6 = vmov %v1761_v6  ;;  %v355_v7 = vmov %v1763_v7  ;;  %s320_s29 = smov [#allocation20]  ;;  %s323_s14 = smov [#allocation21]  ;;  %vm346_vm0 = vcmp.eq.s32.totalorder %v342_v7, %v339_v6 }
  0x22   : > { %317 = vst [vmem:[#allocation6] sm:$0x3] %v316_v11  ;;  %vm359_vm1 = vcmp.eq.s32.totalorder %v355_v7, %v352_v6  ;;  %s336_s15 = smov [#allocation12]  ;;  %s349_s16 = smov [#allocation18]  ;;  %vm1391_vm2 = vcmp.lt.s32.totalorder %v1761_v6, 2  ;;  %v1383_v6 = vmov %v1761_v6  ;;  %v1386_v7 = vmov %v1763_v7 }
  0x23   : > { %s326_s17 = smov [#allocation22]  ;;  %s329_s20 = smov [#allocation23]  ;;  %vm1396_vm3 = vcmp.eq.s32.totalorder %v1386_v7, %v1383_v6  ;;  %v1434_v6 = vmov %v1761_v6  ;;  %v1403_v7 = vmov %v1763_v7 }
  0x24   : > { %v343_v12 = vld [vmem:[%s336_s15] sm:$0x3]  ;;  %s1387_s30 = smov [#allocation20]  ;;  %s1404_s21 = smov [#allocation21]  ;;  %v1400_v6 = vmov %v1761_v6  ;;  %v1437_v7 = vmov %v1763_v7 }
  0x25   : > { %v356_v13 = vld [vmem:[%s349_s16] sm:$0x3]  ;;  %v347_v16 = vsel %vm346_vm0, 1.0, %v343_v12  ;;  %s1421_s22 = smov [#allocation22]  ;;  %v1417_v6 = vmov %v1761_v6  ;;  %v1420_v7 = vmov %v1763_v7  ;;  %vm1447_vm4 = vcmp.eq.s32.totalorder %v1437_v7, %v1434_v6 }
  0x26   : > { %v360_v17 = vsel %vm359_vm1, 1.0, %v356_v13  ;;  %348 = vst [vmem:[%s336_s15] sm:$0x3] %v347_v16 }
  0x27   : > { %v321_v14 = vld [vmem:[#allocation0] sm:$0xff]  ;;  %v324_v15 = vld [vmem:[#allocation2] sm:$0xff]  ;;  %361 = vst [vmem:[%s349_s16] sm:$0x3] %v360_v17 }
  0x28   : > { %322 = vst [vmem:[%s320_s29] sm:$0xff] %v321_v14  ;;  %325 = vst [vmem:[%s323_s14] sm:$0xff] %v324_v15  ;;  %v327_v18 = vld [vmem:[#allocation4] sm:$0xff]  ;;  %s1438_s29 = smov [#allocation23] }
  0x29   : > { %v330_v19 = vld [vmem:[#allocation6] sm:$0xff]  ;;  %328 = vst [vmem:[%s326_s17] sm:$0xff] %v327_v18 }
  0x2a   : > { %331 = vst [vmem:[%s329_s20] sm:$0xff] %v330_v19 }
  0x2f   : > { %v1393_v20 = vld [vmem:[%s1387_s30] sm:$0x3] }
  0x30   : > { %v1410_v21 = vld [vmem:[%s1404_s21] sm:$0x3]  ;;  %v1394_v22 = vsel %vm1391_vm2, %v1393_v20, 0.0 }
  0x31   : > { %v1411_v23 = vsel %vm1391_vm2, %v1410_v21, 0.0  ;;  %v1427_v24 = vld [vmem:[%s1421_s22] sm:$0x3]  ;;  %v1395_v26 = vmul.f32 %v1394_v22, %v1394_v22 }
  0x32   : > { %v1444_v25 = vld [vmem:[%s1438_s29] sm:$0x3]  ;;  %v1412_v27 = vmul.f32 %v1411_v23, %v1411_v23  ;;  %v1428_v28 = vsel %vm1391_vm2, %v1427_v24, 0.0 }
  0x33   : > { %v1445_v29 = vsel %vm1391_vm2, %v1444_v25, 0.0  ;;  %v1429_v30 = vmul.f32 %v1428_v28, %v1428_v28  ;;  %v1397_v33 = vsel %vm1396_vm3, 0.0, %v1395_v26 }
  0x34   : > { %v1414_v31 = vadd.f32 %v1412_v27, %v1395_v26  ;;  %v1446_v32 = vmul.f32 %v1445_v29, %v1445_v29  ;;  %v1413_v34 = vadd.f32 %v1412_v27, %v1397_v33 }
  0x36   : > { %v1431_v35 = vadd.f32 %v1429_v30, %v1414_v31  ;;  %v1430_v36 = vadd.f32 %v1429_v30, %v1413_v34  ;;  %v1448_v37 = vsel %vm1447_vm4, 0.0, %v1446_v32 }
  0x38   : > { %v1450_v38 = vadd.f32 %v1446_v32, %v1431_v35  ;;  %v1449_v39 = vadd.f32 %v1448_v37, %v1430_v36 }
  0x3a   : > { %1451 = vadd.xlane.f32.xlu0 %v1450_v38 }
  0x3e   : > { %1459 = vadd.xlane.f32.xlu0 %v1449_v39 }
  0xc7   : > { %v1452_v40 = vpop.xlane.xlu0 %1451 }
  0xc8   : > { %v1453_v41 = vrot.slane %v1452_v40, 4 }
  0xca   : > { %v1454_v42 = vadd.f32 %v1453_v41, %v1452_v40 }
  0xcb   : > { %v1460_v43 = vpop.xlane.xlu0 %1459 }
  0xcc   : > { %v1455_v44 = vrot.slane %v1454_v42, 2  ;;  %v1461_v45 = vrot.slane %v1460_v43, 4 }
  0xce   : > { %v1462_v46 = vadd.f32 %v1461_v45, %v1460_v43  ;;  %v1456_v47 = vadd.f32 %v1455_v44, %v1454_v42 }
  0xd0   : > { %v1463_v48 = vrot.slane %v1462_v46, 2  ;;  %v1457_v50 = vrot.slane %v1456_v47, 1 }
  0xd2   : > { %v1464_v49 = vadd.f32 %v1463_v48, %v1462_v46  ;;  %v1458_v53 = vadd.f32 %v1457_v50, %v1456_v47 }
  0xd4   : > { %v1465_v51 = vrot.slane %v1464_v49, 1 }
  0xd6   : > { %v1466_v52 = vadd.f32 %v1465_v51, %v1464_v49 }
  0xd8   : > { %1552 = vpush %v1466_v52 }
  0xd9   : > { %1554 = vpush %v1458_v53 }
 0x109   : > { %s1553_s14 = spop %1552 }
 0x10a   : > { %s1555_s15 = spop %1554 }
 0x10b   : > { %s1469_s16 = smul.f32 1e-10, %s1555_s15 }
 0x10d   : > { %p1470_p8 = scmp.le.f32.partialorder %s1553_s14, %s1469_s16 }
 0x10e   : > { %s1797_s17 = smov (!%p1470_p8), 0  }
 0x10f   : > { %1473 = sbr.rel (%p1470_p8) target bundleno = 953 (0x3b9), region = 467 }
 0x116 LB: >> { %s1802_s20 = smov 0   ;;  %s1645_s17 = sphi %s1797_s17, %s2042_s17  }
 0x117 LB: >>> { %s466_s30 = smov [#allocation20]  ;;  %v470_v6 = vmov %v1761_v6  ;;  %v473_v7 = vmov %v1763_v7  ;;  %s486_s21 = smov [#allocation21]  ;;  %vm789_vm14 = vcmp.eq.s32.totalorder %v1763_v7, 0  ;;  %vm801_vm15 = vcmp.eq.s32.totalorder %v1763_v7, 1  ;;  %s1649_s20 = sphi %s1802_s20, %s465_s20  }
 0x118   : >>> { %v490_v6 = vmov %v1761_v6  ;;  %v493_v7 = vmov %v1763_v7  ;;  %v474_v54 = vld [vmem:[%s466_s30] sm:$0x3]  ;;  %vm477_vm5 = vcmp.eq.s32.totalorder %v473_v7, %v470_v6  ;;  %s506_s22 = smov [#allocation23]  ;;  %s467_s29 = smov [#allocation24] }
 0x119   : >>> { %vm497_vm6 = vcmp.eq.s32.totalorder %v493_v7, %v490_v6  ;;  %v510_v6 = vmov %v1761_v6  ;;  %v513_v7 = vmov %v1763_v7  ;;  %v478_v55 = vsel %vm477_vm5, %v474_v54, 0.0  ;;  %v494_v56 = vld [vmem:[%s486_s21] sm:$0x3]  ;;  %s487_s14 = smov [#allocation25]  ;;  %s507_s15 = smov [#allocation26] }
 0x11a   : >>> { %vm517_vm7 = vcmp.eq.s32.totalorder %v513_v7, %v510_v6  ;;  %v479_v57 = vrot.slane %v478_v55, 4  ;;  %v498_v58 = vsel %vm497_vm6, %v494_v56, 0.0  ;;  %v514_v59 = vld [vmem:[%s506_s22] sm:$0x3]  ;;  %s530_s16 = smov [#allocation25]  ;;  %s528_s30 = smov [#allocation24]  ;;  %v579_v6 = vmov %v1761_v6 }
 0x11b   : >>> { %v499_v60 = vrot.slane %v498_v58, 4  ;;  %v518_v61 = vsel %vm517_vm7, %v514_v59, 0.0  ;;  %s532_s21 = smov [#allocation26]  ;;  %s567_s22 = smov [#allocation27]  ;;  %v582_v7 = vmov %v1763_v7  ;;  %v594_v6 = vmov %v1761_v6 }
 0x11c   : >>> { %v480_v62 = vadd.f32 %v479_v57, %v478_v55  ;;  %v519_v63 = vrot.slane %v518_v61, 4  ;;  %v597_v7 = vmov %v1763_v7  ;;  %vm584_vm12 = vcmp.eq.s32.totalorder %v582_v7, %v579_v6  ;;  %s1821_s24 = smov [#allocation22]  ;;  %s1827_s23 = smov [#allocation14] }
 0x11d   : >>> { %v500_v0 = vadd.f32 %v499_v60, %v498_v58  ;;  %vm599_vm13 = vcmp.eq.s32.totalorder %v597_v7, %v594_v6  ;;  %s829_s11 = smov [#allocation31]  ;;  %s1833_s27 = smov [#allocation18]  ;;  %v615_v55 = vld [vmem:[%s1821_s24] sm:$0x3]  ;;  %v692_v6 = vmov %v1761_v6  ;;  %v695_v7 = vmov %v1763_v7 }
 0x11e   : >>> { %v481_v1 = vrot.slane %v480_v62, 2  ;;  %v520_v2 = vadd.f32 %v519_v63, %v518_v61  ;;  %v838_v58 = vld [vmem:[%s1827_s23] sm:$0x3]  ;;  %s607_s26 = smov [#allocation32]  ;;  %s831_s25 = smov [#allocation32]  ;;  %v706_v6 = vmov %v1761_v6  ;;  %v709_v7 = vmov %v1763_v7 }
 0x11f   : >>> { %v501_v3 = vrot.slane %v500_v0, 2  ;;  %v840_v61 = vld [vmem:[%s1833_s27] sm:$0x3]  ;;  %vm699_vm0 = vcmp.eq.s32.totalorder %v695_v7, %v692_v6  ;;  %v665_v6 = vmov %v1761_v6  ;;  %v668_v7 = vmov %v1763_v7  ;;  %s465_s20 = sadd.s32 1, %s1649_s20  }
 0x120   : >>> { %v482_v4 = vadd.f32 %v481_v1, %v480_v62  ;;  %v521_v5 = vrot.slane %v520_v2, 2  ;;  %v679_v6 = vmov %v1761_v6  ;;  %v682_v7 = vmov %v1763_v7  ;;  %p462_p9 = scmp.ge.s32.totalorder %s465_s20, 3  }
 0x121   : >>> { %v502_v8 = vadd.f32 %v501_v3, %v500_v0  ;;  %vm714_vm1 = vcmp.eq.s32.totalorder %v709_v7, %v706_v6  ;;  %vm673_vm3 = vcmp.eq.s32.totalorder %v668_v7, %v665_v6  ;;  %vm686_vm4 = vcmp.eq.s32.totalorder %v682_v7, %v679_v6 }
 0x122   : >>> { %v483_v9 = vrot.slane %v482_v4, 1  ;;  %v522_v10 = vadd.f32 %v521_v5, %v520_v2  ;;  %vm728_vm5 = vcmp.eq.s32.totalorder %v1761_v6, 0  ;;  %vm732_vm6 = vcmp.eq.s32.totalorder %v1761_v6, 1 }
 0x123   : >>> { %v503_v11 = vrot.slane %v502_v8, 1  ;;  %v366_v6 = vmov (%p462_p9), %v1761_v6  ;;  %v369_v7 = vmov (%p462_p9), %v1763_v7 }
 0x124   : >>> { %v484_v12 = vadd.f32 %v483_v9, %v482_v4  ;;  %v523_v13 = vrot.slane %v522_v10, 1  ;;  %v419_v6 = vmov (%p462_p9), %v1761_v6  ;;  %vm381_vm7 = vcmp.eq.s32.totalorder (%p462_p9), %v369_v7, %v366_v6 }
 0x125   : >>> { %v504_v14 = vadd.f32 %v503_v11, %v502_v8  ;;  %v422_v7 = vmov (%p462_p9), %v1763_v7  ;;  %v385_v6 = vmov (%p462_p9), %v1761_v6 }
 0x126   : >>> { %485 = vst [vmem:[%s467_s29] sm:$0x1] %v484_v12  ;;  %v524_v15 = vadd.f32 %v523_v13, %v522_v10  ;;  %s569_s29 = smov [#allocation28]  ;;  %v388_v7 = vmov (%p462_p9), %v1763_v7  ;;  %v402_v6 = vmov (%p462_p9), %v1761_v6 }
 0x127   : >>> { %505 = vst [vmem:[%s487_s14] sm:$0x1] %v504_v14  ;;  %s526_s14 = smov [#allocation29]  ;;  %v405_v7 = vmov (%p462_p9), %v1763_v7 }
 0x128   : >>> { %525 = vst [vmem:[%s507_s15] sm:$0x1] %v524_v15  ;;  %s527_s15 = smov [#allocation30]  ;;  %s571_s14 = smov %s526_s14 }
 0x129   : >>> { %s573_s15 = smov %s527_s15 }
 0x12d   : >>> { %v529_v18 = vld [vmem:[%s528_s30] sm:$0xff]  ;;  %s590_s30 = smov [#allocation30] }
 0x12e   : >>> { %v531_v16 = vld [vmem:[%s530_s16] sm:$0xff]  ;;  %v552_v31 = vand.u32 2147483647, %v529_v18  ;;  %s575_s16 = smov [#allocation29] }
 0x12f   : >>> { %v535_v17 = vmul.f32 2.0, %v531_v16  ;;  %v533_v19 = vld [vmem:[%s532_s21] sm:$0xff]  ;;  %v553_v36 = vand.u32 2147483647, %v531_v16  ;;  %s588_s21 = smov [#allocation31] }
 0x130   : >>> { %v534_v20 = vsub.f32 %v533_v19, %v529_v18  ;;  %v554_v32 = vand.u32 2147483647, %v533_v19 }
 0x131   : >>> { %1603 = vrcp.f32 %v535_v17 }
 0x132   : >>> { %v555_v35 = vmin.f32 %v552_v31, %v554_v32 }
 0x134   : >>> { %v556_v37 = vmul.f32 1.1920929e-08, %v555_v35 }
 0x136   : >>> { %vm557_vm11 = vcmp.le.f32.partialorder %v553_v36, %v556_v37 }
 0x13b   : >>> { %v1604_v21 = vpop.eup %1603 }
 0x13c   : >>> { %v537_v22 = vmul.f32 %v1604_v21, %v534_v20 }
 0x13e   : >>> { %v539_v23 = vmul.f32 %v537_v22, %v537_v22  ;;  %vm538_vm10 = vcmp.ge.f32.partialorder %v537_v22, 0.0 }
 0x140   : >>> { %v540_v24 = vadd.f32 1.0, %v539_v23 }
 0x142   : >>> { %1605 = vrsqrt.f32 %v540_v24  ;;  %vm543_vm8 = vcmp.eq.f32.partialorder %v540_v24, inf  ;;  %v546_v26 = vand.u32 2147483648, %v540_v24  ;;  %vm545_vm9 = vcmp.eq.f32.partialorder %v540_v24, 0.0 }
 0x14c   : >>> { %v1606_v25 = vpop.eup %1605 }
 0x14d   : >>> { %v542_v27 = vmul.f32 %v1606_v25, %v540_v24 }
 0x14f   : >>> { %v544_v28 = vsel %vm543_vm8, %v540_v24, %v542_v27  ;;  %vm434_vm8 = vcmp.eq.s32.totalorder (%p462_p9), %v422_v7, %v419_v6 }
 0x150   : >>> { %v547_v29 = vsel %vm545_vm9, %v546_v26, %v544_v28 }
 0x151   : >>> { %v548_v30 = vxor.u32 2147483648, %v547_v29 }
 0x153   : >>> { %v549_v33 = vsel %vm538_vm10, %v547_v29, %v548_v30 }
 0x154   : >>> { %v550_v34 = vadd.f32 %v549_v33, %v537_v22 }
 0x156   : >>> { %1607 = vrcp.f32 %v550_v34 }
 0x160   : >>> { %v1608_v38 = vpop.eup %1607 }
 0x161   : >>> { %v558_v39 = vsel %vm557_vm11, 0.0, %v1608_v38 }
 0x162   : >>> { %v559_v40 = vmul.f32 %v558_v39, %v558_v39  ;;  %v563_v41 = vmul.f32 %v558_v39, %v531_v16 }
 0x164   : >>> { %v560_v42 = vadd.f32 1.0, %v559_v40  ;;  %v564_v43 = vsub.f32 %v529_v18, %v563_v41  ;;  %v566_v44 = vadd.f32 %v563_v41, %v533_v19 }
 0x166   : >>> { %1609 = vrsqrt.f32 %v560_v42  ;;  %568 = vst [vmem:[%s567_s22] sm:$0xff] %v564_v43  ;;  %570 = vst [vmem:[%s569_s29] sm:$0xff] %v566_v44  ;;  %s605_s22 = smov [#allocation31]  ;;  %s1817_s29 = smov [#allocation20] }
 0x167   : >>> { %v613_v53 = vld [vmem:[%s1817_s29] sm:$0x3] }
 0x170   : >>> { %v1610_v45 = vpop.eup %1609 }
 0x171   : >>> { %572 = vst [vmem:[%s571_s14] sm:$0xff] %v1610_v45  ;;  %v562_v46 = vmul.f32 %v1610_v45, %v558_v39  ;;  %s603_s14 = smov [#allocation32] }
 0x173   : >>> { %574 = vst [vmem:[%s573_s15] sm:$0xff] %v562_v46  ;;  %s1819_s15 = smov [#allocation21] }
 0x174   : >>> { %v614_v54 = vld [vmem:[%s1819_s15] sm:$0x3] }
 0x178   : >>> { %v576_v47 = vld [vmem:[%s575_s16] ss:$0 sm:$0xff]  ;;  %s1823_s16 = smov [#allocation23] }
 0x179   : >>> { %v585_v48 = vsel %vm584_vm12, %v576_v47, 0.0  ;;  %v616_v56 = vld [vmem:[%s1823_s16] sm:$0x3] }
 0x17a   : >>> { %586 = vadd.xlane.f32.xlu0 %v585_v48  ;;  %v591_v49 = vld [vmem:[%s590_s30] ss:$0 sm:$0xff]  ;;  %s1825_s30 = smov [#allocation12] }
 0x17b   : >>> { %v600_v50 = vsel %vm599_vm13, %v591_v49, 0.0  ;;  %v837_v57 = vld [vmem:[%s1825_s30] sm:$0x3] }
 0x17e   : >>> { %601 = vadd.xlane.f32.xlu0 %v600_v50 }
 0x207   : >>> { %v587_v51 = vpop.xlane.xlu0 %586 }
 0x208   : >>> { %589 = vst [vmem:[%s588_s21] sm:$0xff] %v587_v51  ;;  %s1829_s21 = smov [#allocation16] }
 0x209   : >>> { %v839_v59 = vld [vmem:[%s1829_s21] sm:$0x3] }
 0x20b   : >>> { %v602_v52 = vpop.xlane.xlu0 %601 }
 0x20c   : >>> { %604 = vst [vmem:[%s603_s14] sm:$0xff] %v602_v52  ;;  %s1853_s14 = smov [#allocation23] }
 0x20f   : >>> { %v606_v60 = vld [vmem:[%s605_s22] sm:$0xff]  ;;  %s1851_s22 = smov [#allocation22] }
 0x210   : >>> { %v830_v62 = vld [vmem:[%s829_s11] sm:$0xff]  ;;  %v617_v63 = vmul.f32 %v613_v53, %v606_v60  ;;  %v620_v0 = vmul.f32 %v614_v54, %v606_v60  ;;  %v624_v1 = vmul.f32 %v615_v55, %v606_v60  ;;  %v627_v2 = vmul.f32 %v616_v56, %v606_v60  ;;  %s1849_s11 = smov [#allocation12] }
 0x211   : >>> { %v841_v3 = vmul.f32 %v837_v57, %v830_v62  ;;  %v844_v4 = vmul.f32 %v838_v58, %v830_v62  ;;  %v848_v5 = vmul.f32 %v839_v59, %v830_v62  ;;  %v851_v8 = vmul.f32 %v840_v61, %v830_v62 }
 0x213   : >>> { %v608_v9 = vld [vmem:[%s607_s26] sm:$0xff]  ;;  %s635_s26 = smov [#allocation30] }
 0x214   : >>> { %v832_v10 = vld [vmem:[%s831_s25] sm:$0xff]  ;;  %v618_v11 = vmul.f32 %v615_v55, %v608_v9  ;;  %v621_v12 = vmul.f32 %v616_v56, %v608_v9  ;;  %v623_v13 = vmul.f32 %v613_v53, %v608_v9  ;;  %v626_v14 = vmul.f32 %v614_v54, %v608_v9  ;;  %s633_s25 = smov [#allocation29] }
 0x215   : >>> { %v842_v15 = vmul.f32 %v839_v59, %v832_v10  ;;  %v845_v16 = vmul.f32 %v840_v61, %v832_v10  ;;  %v847_v17 = vmul.f32 %v837_v57, %v832_v10  ;;  %v850_v18 = vmul.f32 %v838_v58, %v832_v10  ;;  %v634_v27 = vld [vmem:[%s633_s25] ss:$0 sm:$0xff]  ;;  %s662_s25 = smov [#allocation27] }
 0x216   : >>> { %v619_v19 = vsub.f32 %v617_v63, %v618_v11  ;;  %v622_v20 = vsub.f32 %v620_v0, %v621_v12  ;;  %v625_v21 = vadd.f32 %v624_v1, %v623_v13  ;;  %v628_v22 = vadd.f32 %v627_v2, %v626_v14  ;;  %v636_v28 = vld [vmem:[%s635_s26] ss:$0 sm:$0xff]  ;;  %s661_s26 = smov [#allocation20] }
 0x217   : >>> { %v843_v23 = vsub.f32 %v841_v3, %v842_v15  ;;  %v846_v24 = vsub.f32 %v844_v4, %v845_v16  ;;  %v849_v25 = vadd.f32 %v848_v5, %v847_v17  ;;  %v852_v26 = vadd.f32 %v851_v8, %v850_v18  ;;  %v669_v63 = vld [vmem:[%s662_s25] ss:$0 sm:$0xff]  ;;  %s905_s25 = sadd.s32 (%p462_p9), 1, %s1645_s17  }
 0x218   : >>> { %630 = vst [vmem:[%s1819_s15] sm:$0x3] %v622_v20  ;;  %632 = vst [vmem:[%s1823_s16] sm:$0x3] %v628_v22  ;;  %s1855_s15 = smov [#allocation20]  ;;  %s703_s16 = smov [#allocation28] }
 0x219   : >>> { %629 = vst [vmem:[%s1817_s29] sm:$0x3] %v619_v19  ;;  %631 = vst [vmem:[%s1821_s24] sm:$0x3] %v625_v21  ;;  %s1857_s24 = smov [#allocation16]  ;;  %s1865_s29 = smov [#allocation21]  ;;  %v710_v59 = vld [vmem:[%s703_s16] ss:$0 sm:$0xff] }
 0x21a   : >>> { %853 = vst [vmem:[%s1825_s30] sm:$0x3] %v843_v23  ;;  %854 = vst [vmem:[%s1827_s23] sm:$0x3] %v846_v24  ;;  %s1859_s23 = smov [#allocation14]  ;;  %s689_s30 = smov [#allocation22] }
 0x21b   : >>> { %855 = vst [vmem:[%s1829_s21] sm:$0x3] %v849_v25  ;;  %856 = vst [vmem:[%s1833_s27] sm:$0x3] %v852_v26  ;;  %s1863_s27 = smov [#allocation18]  ;;  %s702_s21 = smov [#allocation23] }
 0x21c   : >>> { %s805_s16 = smov [#allocation21]  ;;  %p458_p10 = scmp.ge.s32.totalorder (%p462_p9), %s905_s25, 15 }
 0x21d   : >> { %s2042_s17 = smov (%p462_p9), %s905_s25 }
 0x21f   : >>> { %v644_v30 = vld [vmem:[%s1853_s14] sm:$0x3] }
 0x220   : >>> { %v643_v29 = vld [vmem:[%s1851_s22] sm:$0x3]  ;;  %v652_v36 = vmul.f32 %v644_v30, %v636_v28  ;;  %v655_v42 = vmul.f32 %v644_v30, %v634_v27 }
 0x221   : >>> { %v641_v31 = vld [vmem:[%s1855_s15] sm:$0x3]  ;;  %v651_v35 = vmul.f32 %v643_v29, %v634_v27  ;;  %v654_v37 = vmul.f32 %v643_v29, %v636_v28 }
 0x222   : >>> { %v859_v32 = vld [vmem:[%s1849_s11] ss:$0 sm:$0xff]  ;;  %v1531_v34 = vld [vmem:[%s1849_s11 + $0x1] ss:$0 sm:$0xff]  ;;  %v645_v48 = vmul.f32 %v641_v31, %v634_v27  ;;  %v648_v49 = vmul.f32 %v641_v31, %v636_v28 }
 0x223   : >>> { %v1530_v33 = vld [vmem:[%s1849_s11 - $0x1] sm:$0x2]  ;;  %v1533_v40 = vld [vmem:[%s1857_s24 + $0x1] sm:$0x1]  ;;  %v653_v47 = vsub.f32 %v651_v35, %v652_v36  ;;  %v656_v53 = vadd.f32 %v655_v42, %v654_v37 }
 0x224   : >>> { %v866_v38 = vsel %vm789_vm14, %v859_v32, %v1530_v33  ;;  %v870_v39 = vld [vmem:[%s1857_s24] ss:$0 sm:$0xff]  ;;  %v878_v43 = vsel %vm801_vm15, %v1531_v34, %v1533_v40  ;;  %v1535_v45 = vld [vmem:[%s1859_s23 + $0x1] ss:$0 sm:$0xff] }
 0x225   : >>> { %v883_v41 = vld [vmem:[%s1859_s23] ss:$0 sm:$0xff]  ;;  %869 = vst [vmem:[%s1849_s11] sm:$0x3] %v866_v38  ;;  %880 = vst [vmem:[%s1857_s24] sm:$0x3] %v878_v43  ;;  %v1537_v51 = vld [vmem:[%s1863_s27 + $0x1] sm:$0x1] }
 0x226   : >>> { %v1534_v44 = vld [vmem:[%s1859_s23 - $0x1] sm:$0x2]  ;;  %1532 = vst [vmem:[%s1849_s11 + $0x1] sm:$0x1] %v870_v39  ;;  %v902_v54 = vsel %vm801_vm15, %v1535_v45, %v1537_v51  ;;  %659 = vst [vmem:[%s1851_s22] sm:$0x3] %v653_v47  ;;  %s676_s11 = smov [#allocation21] }
 0x227   : >>> { %v894_v46 = vld [vmem:[%s1863_s27] ss:$0 sm:$0xff]  ;;  %v890_v50 = vsel %vm789_vm14, %v883_v41, %v1534_v44  ;;  %660 = vst [vmem:[%s1853_s14] sm:$0x3] %v656_v53  ;;  %s1907_s22 = smov [#allocation22]  ;;  %s1652_s14 = smov 1  }
 0x228   : >>> { %v642_v52 = vld [vmem:[%s1865_s29] sm:$0x3]  ;;  %893 = vst [vmem:[%s1859_s23] sm:$0x3] %v890_v50  ;;  %904 = vst [vmem:[%s1863_s27] sm:$0x3] %v902_v54  ;;  %s718_s24 = smov [#allocation21]  ;;  %s1910_s27 = smov [#allocation23] }
 0x229   : >>> { %v646_v55 = vmul.f32 %v642_v52, %v636_v28  ;;  %v649_v56 = vmul.f32 %v642_v52, %v634_v27  ;;  %1536 = vst [vmem:[%s1859_s23 + $0x1] sm:$0x1] %v894_v46  ;;  %s1653_s23 = smov 127  }
 0x22b   : >>> { %v647_v57 = vsub.f32 %v645_v48, %v646_v55  ;;  %v650_v58 = vadd.f32 %v649_v56, %v648_v49 }
 0x22d   : >>> { %657 = vst [vmem:[%s1855_s15] sm:$0x3] %v647_v57  ;;  %658 = vst [vmem:[%s1865_s29] sm:$0x3] %v650_v58  ;;  %v696_v60 = vld [vmem:[%s689_s30] sm:$0x3]  ;;  %s717_s15 = smov [#allocation20]  ;;  %s781_s29 = smov [#allocation20] }
 0x22e   : >>> { %v700_v61 = vsel %vm699_vm0, 0.0, %v696_v60  ;;  %v711_v62 = vld [vmem:[%s702_s21] sm:$0x3] }
 0x22f   : >>> { %701 = vst [vmem:[%s689_s30] sm:$0x3] %v700_v61  ;;  %v715_v0 = vsel %vm714_vm1, %v710_v59, %v711_v62  ;;  %s782_s30 = smov [#allocation22] }
 0x230   : >>> { %716 = vst [vmem:[%s702_s21] sm:$0x3] %v715_v0  ;;  %s806_s21 = smov [#allocation23] }
 0x234   : >>> { %v670_v1 = vld [vmem:[%s661_s26] sm:$0x3] }
 0x235   : >>> { %v683_v2 = vld [vmem:[%s676_s11] sm:$0x3]  ;;  %v674_v3 = vsel %vm673_vm3, %v669_v63, %v670_v1 }
 0x236   : >>> { %v687_v4 = vsel %vm686_vm4, 0.0, %v683_v2  ;;  %675 = vst [vmem:[%s661_s26] sm:$0x3] %v674_v3  ;;  %v755_v5 = vld [vmem:[%s1907_s22] sm:$0x3]  ;;  %s370_s26 = smov (%p462_p9), [#allocation20] }
 0x237   : >>> { %688 = vst [vmem:[%s676_s11] sm:$0x3] %v687_v4  ;;  %756 = vrot.lane.b32.xlu0 %v755_v5, %s1652_s14  ;;  %v751_v11 = vld [vmem:[%s1910_s27] sm:$0x3]  ;;  %s389_s11 = smov (%p462_p9), [#allocation21] }
 0x238   : >>> { %v772_v12 = vld [vmem:[%s1910_s27] sm:$0x3] }
 0x239   : >>> { %v754_v30 = vld [vmem:[%s1907_s22] sm:$0x3] }
 0x23d   : >>> { %v723_v8 = vld [vmem:[%s717_s15] sm:$0x3] }
 0x23e   : >>> { %724 = vrot.lane.b32.xlu1 %v723_v8, %s1652_s14  ;;  %v719_v9 = vld [vmem:[%s718_s24] sm:$0x3] }
 0x23f   : >>> { %v740_v10 = vld [vmem:[%s718_s24] sm:$0x3] }
 0x240   : >>> { %v722_v18 = vld [vmem:[%s717_s15] sm:$0x3] }
 0x242   : >>> { %720 = vrot.lane.b32.xlu1 %v719_v9, %s1652_s14 }
 0x246   : >>> { %741 = vrot.lane.b32.xlu1 %v740_v10, %s1653_s23 }
 0x24a   : >>> { %752 = vrot.lane.b32.xlu1 %v751_v11, %s1652_s14  ;;  %s423_s14 = smov (%p462_p9), [#allocation23] }
 0x24e   : >>> { %773 = vrot.lane.b32.xlu1 %v772_v12, %s1653_s23 }
 0x2a9   : >>> { %v757_v20 = vpop.permute.xlu0 %756 }
 0x2aa   : >>> { %v761_v22 = vsel %vm728_vm5, %v755_v5, %v757_v20 }
 0x2b0   : >>> { %v725_v13 = vpop.permute.xlu1 %724 }
 0x2b1   : >>> { %v729_v14 = vsel %vm728_vm5, %v723_v8, %v725_v13 }
 0x2b4   : >>> { %v721_v15 = vpop.permute.xlu1 %720 }
 0x2b5   : >>> { %v733_v16 = vsel %vm732_vm6, %v721_v15, %v729_v14 }
 0x2b6   : >>> { %v739_v17 = vsel %vm1391_vm2, %v733_v16, 0.0 }
 0x2b7   : >>> { %747 = vst [vmem:[%s717_s15] sm:$0x3] %v739_v17 }
 0x2b8   : >>> { %v742_v19 = vpop.permute.xlu1 %741 }
 0x2b9   : >>> { %v746_v21 = vsel %vm732_vm6, %v722_v18, %v742_v19 }
 0x2ba   : >>> { %748 = vst [vmem:[%s718_s24] sm:$0x3] %v746_v21 }
 0x2bc   : >>> { %v753_v23 = vpop.permute.xlu1 %752 }
 0x2bd   : >>> { %v765_v24 = vsel %vm732_vm6, %v753_v23, %v761_v22 }
 0x2be   : >>> { %v783_v25 = vld [vmem:[%s781_s29] ss:$0 sm:$0xff]  ;;  %v1523_v27 = vld [vmem:[%s781_s29 + $0x1] ss:$0 sm:$0xff]  ;;  %v771_v29 = vsel %vm1391_vm2, %v765_v24, 0.0 }
 0x2bf   : >>> { %v1522_v26 = vld [vmem:[%s781_s29 - $0x1] sm:$0x2]  ;;  %779 = vst [vmem:[%s1907_s22] sm:$0x3] %v771_v29  ;;  %s406_s22 = smov (%p462_p9), [#allocation22] }
 0x2c0   : >>> { %v790_v28 = vsel %vm789_vm14, %v783_v25, %v1522_v26  ;;  %v774_v31 = vpop.permute.xlu1 %773 }
 0x2c1   : >>> { %793 = vst [vmem:[%s781_s29] sm:$0x3] %v790_v28  ;;  %v807_v32 = vld [vmem:[%s805_s16] ss:$0 sm:$0xff]  ;;  %v1527_v34 = vld [vmem:[%s805_s16 + $0x1] ss:$0 sm:$0xff]  ;;  %v778_v35 = vsel %vm732_vm6, %v754_v30, %v774_v31 }
 0x2c2   : >>> { %v1526_v33 = vld [vmem:[%s805_s16 - $0x1] sm:$0x2]  ;;  %780 = vst [vmem:[%s1910_s27] sm:$0x3] %v778_v35 }
 0x2c3   : >>> { %v814_v36 = vsel %vm789_vm14, %v807_v32, %v1526_v33 }
 0x2c4   : >>> { %817 = vst [vmem:[%s805_s16] sm:$0x3] %v814_v36 }
 0x2c6   : >>> { %v794_v37 = vld [vmem:[%s782_s30] ss:$0 sm:$0xff]  ;;  %v1525_v38 = vld [vmem:[%s782_s30 + $0x1] sm:$0x1] }
 0x2c7   : >>> { %1524 = vst [vmem:[%s781_s29 + $0x1] sm:$0x1] %v794_v37  ;;  %v802_v39 = vsel %vm801_vm15, %v1523_v27, %v1525_v38  ;;  %464 = sbr.rel (!%p462_p9) target bundleno = 279 (0x117), region = 462 }
 0x2c8   : >>> { %804 = vst [vmem:[%s782_s30] sm:$0x3] %v802_v39 }
 0x2c9   : >>> { %v818_v40 = vld [vmem:[%s806_s21] ss:$0 sm:$0xff]  ;;  %v1529_v41 = vld [vmem:[%s806_s21 + $0x1] sm:$0x1] }
 0x2ca   : >>> { %1528 = vst [vmem:[%s805_s16 + $0x1] sm:$0x1] %v818_v40  ;;  %v826_v42 = vsel %vm801_vm15, %v1527_v34, %v1529_v41 }
 0x2cb   : >>> { %828 = vst [vmem:[%s806_s21] sm:$0x3] %v826_v42 }
 0x2ce   : >> { %v376_v43 = vld [vmem:[%s370_s26] sm:$0x3] }
 0x2cf   : >> { %v377_v45 = vsel %vm1391_vm2, %v376_v43, 0.0  ;;  %v412_v47 = vld [vmem:[%s406_s22] sm:$0x3] }
 0x2d0   : >> { %v378_v49 = vmul.f32 %v377_v45, %v377_v45  ;;  %v413_v51 = vsel %vm1391_vm2, %v412_v47, 0.0 }
 0x2d1   : >> { %v395_v44 = vld [vmem:[%s389_s11] sm:$0x3]  ;;  %v414_v53 = vmul.f32 %v413_v51, %v413_v51 }
 0x2d2   : >> { %v396_v46 = vsel %vm1391_vm2, %v395_v44, 0.0  ;;  %v429_v48 = vld [vmem:[%s423_s14] sm:$0x3]  ;;  %v382_v56 = vsel %vm381_vm7, 0.0, %v378_v49 }
 0x2d3   : >> { %v397_v50 = vmul.f32 %v396_v46, %v396_v46  ;;  %v430_v52 = vsel %vm1391_vm2, %v429_v48, 0.0 }
 0x2d4   : >> { %v431_v55 = vmul.f32 %v430_v52, %v430_v52 }
 0x2d5   : >> { %v399_v54 = vadd.f32 %v397_v50, %v378_v49  ;;  %v398_v57 = vadd.f32 %v397_v50, %v382_v56 }
 0x2d6   : >> { %v435_v60 = vsel %vm434_vm8, 0.0, %v431_v55 }
 0x2d7   : >> { %v416_v58 = vadd.f32 %v414_v53, %v399_v54  ;;  %v415_v59 = vadd.f32 %v414_v53, %v398_v57 }
 0x2d9   : >> { %v437_v61 = vadd.f32 %v431_v55, %v416_v58  ;;  %v436_v62 = vadd.f32 %v435_v60, %v415_v59 }
 0x2db   : >> { %438 = vadd.xlane.f32.xlu0 %v437_v61 }
 0x2df   : >> { %446 = vadd.xlane.f32.xlu0 %v436_v62 }
 0x368   : >> { %v439_v63 = vpop.xlane.xlu0 %438 }
 0x369   : >> { %v440_v0 = vrot.slane %v439_v63, 4 }
 0x36b   : >> { %v441_v1 = vadd.f32 %v440_v0, %v439_v63 }
 0x36c   : >> { %v447_v2 = vpop.xlane.xlu0 %446 }
 0x36d   : >> { %v442_v3 = vrot.slane %v441_v1, 2  ;;  %v448_v4 = vrot.slane %v447_v2, 4 }
 0x36f   : >> { %v449_v5 = vadd.f32 %v448_v4, %v447_v2  ;;  %v443_v8 = vadd.f32 %v442_v3, %v441_v1 }
 0x371   : >> { %v450_v9 = vrot.slane %v449_v5, 2  ;;  %v444_v11 = vrot.slane %v443_v8, 1 }
 0x373   : >> { %v451_v10 = vadd.f32 %v450_v9, %v449_v5  ;;  %v445_v14 = vadd.f32 %v444_v11, %v443_v8 }
 0x375   : >> { %v452_v12 = vrot.slane %v451_v10, 1 }
 0x377   : >> { %v453_v13 = vadd.f32 %v452_v12, %v451_v10 }
 0x379   : >> { %1556 = vpush %v453_v13 }
 0x37a   : >> { %1558 = vpush %v445_v14 }
 0x3aa   : >> { %s1557_s20 = spop %1556 }
 0x3ab   : >> { %s1559_s15 = spop %1558 }
 0x3ac   : >> { %s456_s24 = smul.f32 1e-10, %s1559_s15 }
 0x3ae   : >> { %p457_p11 = scmp.le.f32.partialorder %s1557_s20, %s456_s24 }
 0x3b0   : >> { %p459_p12 = por %p458_p10, %p457_p11 }
 0x3b2   : > { %907 = sbr.rel (!%p459_p12) target bundleno = 278 (0x116), region = 473 }
 0x3b9 PF: > { %s912_s23 = smov [#allocation20]  ;;  %v916_v6 = vmov %v1761_v6  ;;  %v919_v7 = vmov %v1763_v7  ;;  %v967_v15 = vld [vmem:[#allocation12] sm:$0x3]  ;;  %v973_v16 = vld [vmem:[#allocation14] sm:$0x3]  ;;  %s2043_s17 = scalar_lea.vmem [#allocation13], %s1757_s28 }
 0x3ba   : > { %v936_v6 = vmov %v1761_v6  ;;  %v939_v7 = vmov %v1763_v7  ;;  %v920_v17 = vld [vmem:[%s912_s23] sm:$0x3]  ;;  %vm923_vm9 = vcmp.eq.s32.totalorder %v919_v7, %v916_v6  ;;  %969 = vst [vmem:[%s2043_s17] sm:$0x3] %v967_v15  ;;  %s2044_s27 = scalar_lea.vmem [#allocation15], %s1757_s28  ;;  %v979_v18 = vld [vmem:[#allocation16] sm:$0x3] }
 0x3bb   : > { %vm943_vm10 = vcmp.eq.s32.totalorder %v939_v7, %v936_v6  ;;  %975 = vst [vmem:[%s2044_s27] sm:$0x3] %v973_v16  ;;  %v924_v19 = vsel %vm923_vm9, %v920_v17, 0.0  ;;  %s932_s29 = smov [#allocation23]  ;;  %s2045_s16 = scalar_lea.vmem [#allocation17], %s1757_s28  ;;  %v985_v20 = vld [vmem:[#allocation18] sm:$0x3] }
 0x3bc   : > { %981 = vst [vmem:[%s2045_s16] sm:$0x3] %v979_v18  ;;  %v925_v21 = vrot.slane %v924_v19, 4  ;;  %v940_v22 = vld [vmem:[%s932_s29] sm:$0x3]  ;;  %s2046_s30 = scalar_lea.vmem [#allocation19], %s1757_s28  ;;  %s908_s21 = sand.u32 7, %s1720_s12  }
 0x3bd   : > { %987 = vst [vmem:[%s2046_s30] sm:$0x3] %v985_v20  ;;  %v944_v23 = vsel %vm943_vm10, %v940_v22, 0.0  ;;  %s909_s25 = scalar_lea.vmem [#allocation8], %s908_s21  ;;  %s911_s26 = scalar_lea.vmem [#allocation10], %s908_s21 }
 0x3be   : > { %v926_v24 = vadd.f32 %v925_v21, %v924_v19  ;;  %v945_v25 = vrot.slane %v944_v23, 4  ;;  %s913_s25 = smov %s909_s25  ;;  %s933_s26 = smov %s911_s26 }
 0x3bf   : > { %s2047_s11 = scalar_lea.vmem [#allocation9], %s1759_s18  ;;  %s2048_s22 = scalar_lea.vmem [#allocation11], %s1759_s18 }
 0x3c0   : > { %v927_v26 = vrot.slane %v926_v24, 2  ;;  %v946_v6 = vadd.f32 %v945_v25, %v944_v23  ;;  %s1015_s14 = sshrl.u32 (%p1734_p3), %s1720_s12, 3  ;;  %s2049_s20 = scalar_lea.vmem (%p1734_p3), [#allocation9], %s1759_s18 }
 0x3c1   : > { %s1544_s15 = sshll.u32 (%p1734_p3), %s1015_s14, 1 }
 0x3c2   : > { %v928_v7 = vadd.f32 %v927_v26, %v926_v24  ;;  %v947_v27 = vrot.slane %v946_v6, 2  ;;  %s1017_s17 = scalar_lea.vmem (%p1734_p3), %s2034_s4, %s1544_s15 }
 0x3c4   : > { %v929_v28 = vrot.slane %v928_v7, 1  ;;  %v948_v29 = vadd.f32 %v947_v27, %v946_v6 }
 0x3c6   : > { %v930_v30 = vadd.f32 %v929_v28, %v928_v7  ;;  %v949_v31 = vrot.slane %v948_v29, 1 }
 0x3c8   : > { %931 = vst [vmem:[%s913_s25] sm:$0x1] %v930_v30  ;;  %v950_v32 = vadd.f32 %v949_v31, %v948_v29 }
 0x3ca   : > { %951 = vst [vmem:[%s933_s26] sm:$0x1] %v950_v32 }
 0x3cc   : > { %1014 = sbr.rel (!%p1734_p3) target bundleno = 985 (0x3d9), region = 158 }
 0x3cf   : > { %v955_v33 = vld [vmem:[#allocation8] sm:$0x3] }
 0x3d0   : > { %957 = vst [vmem:[%s2047_s11] sm:$0x3] %v955_v33 }
 0x3d1   : > { %v961_v34 = vld [vmem:[#allocation10] sm:$0x3] }
 0x3d2   : > { %963 = vst [vmem:[%s2048_s22] sm:$0x3] %v961_v34 }
 0x3d7   : > { %v1033_v35 = vld [vmem:[%s2049_s20] sm:$0x3] }
 0x3d8   : > { %1034 = vst [vmem:[%s1017_s17] sm:$0x3] %v1033_v35 }
 0x3d9 PF: > { %1051 = sbr.rel (!%p1734_p3) target bundleno = 993 (0x3e1), region = 192  ;;  %s1052_s27 = sshrl.u32 (%p1734_p3), %s1720_s12, 3 }
 0x3da   : > { %s2050_s29 = scalar_lea.vmem (%p1734_p3), [#allocation11], %s1759_s18  ;;  %s1545_s16 = sshll.u32 (%p1734_p3), %s1052_s27, 1 }
 0x3db   : > { %s1054_s25 = scalar_lea.vmem (%p1734_p3), %s2035_s5, %s1545_s16 }
 0x3df   : > { %v1070_v36 = vld [vmem:[%s2050_s29] sm:$0x3] (%p1734_p3) }
 0x3e0   : > { %1071 = vst [vmem:[%s1054_s25] sm:$0x3] %v1070_v36 }
 0x3e1 PF: > { %s1546_s26 = sshll.u32 %s1720_s12, 1  ;;  %s2051_s19 = scalar_lea.vmem [#allocation13], %s1757_s28 }
 0x3e2   : > { %v1103_v37 = vld [vmem:[%s2051_s19] sm:$0x3]  ;;  %s2052_s11 = scalar_lea.vmem [#allocation15], %s1757_s28  ;;  %s1087_s14 = scalar_lea.vmem %s2036_s6, %s1546_s26 }
 0x3e3   : > { %v1136_v38 = vld [vmem:[%s2052_s11] sm:$0x3]  ;;  %s1120_s24 = scalar_lea.vmem %s2037_s7, %s1546_s26  ;;  %s2053_s23 = scalar_lea.vmem [#allocation17], %s1757_s28  ;;  %1104 = vst [vmem:[%s1087_s14] sm:$0x3] %v1103_v37 }
 0x3e4   : > { %v1169_v39 = vld [vmem:[%s2053_s23] sm:$0x3]  ;;  %s2054_s17 = scalar_lea.vmem [#allocation19], %s1757_s28  ;;  %1137 = vst [vmem:[%s1120_s24] sm:$0x3] %v1136_v38  ;;  %s1153_s29 = scalar_lea.vmem %s2038_s8, %s1546_s26 }
 0x3e5   : > { %v1202_v40 = vld [vmem:[%s2054_s17] sm:$0x3]  ;;  %s1186_s21 = scalar_lea.vmem %s2039_s9, %s1546_s26  ;;  %1170 = vst [vmem:[%s1153_s29] sm:$0x3] %v1169_v39 }
 0x3e6   : > { %1203 = vst [vmem:[%s1186_s21] sm:$0x3] %v1202_v40 }
 0x3e7 PF: > { %s2055_s25 = sld [smem:[#allocation33_spill]]  ;;  %p13_p13 = scmp.ge.s32.totalorder %s1723_s13, 4  }
 0x3e8   : > { %s2056_s30 = smov %s1637_s10  ;;  %s2058_s11 = smov %s1723_s13 }
 0x3e9   :  { %15 = sbr.rel (!%p13_p13) target bundleno = 2 (0x2), region = 484 }
 0x3ed   : > { %s2057_s10 = smov %s2055_s25 }

// kernel: reverse.2
= control target key start
LH: loop header
LB: loop body
LE: loop exit
PB: predicated region body
PF: predicated region fallthrough
CT: control target
= control target key end

     0   :  { %v2_v0 = vlaneseq  ;;  %s105_s0 = inlined_call_operand.vmem [shape: f32[2,3], index: 0, kind: input, shape index: {}]   ;;  %s106_s1 = inlined_call_operand.vmem [shape: f32[2,3], index: 1, kind: output, shape index: {}]  }
   0x2   :  { %v3_v1 = vsub.s32 2, %v2_v0 }
   0x4   :  { %4 = vset.pattern.permute.xlu0 %v3_v1 }
   0x5   :  { %v20_v2 = vld [vmem:[%s105_s0] sm:$0x3] }
   0x6   :  { %21 = vst [vmem:[#allocation1] sm:$0x3] %v20_v2 }
   0xd   :  { %v38_v3 = vld [vmem:[#allocation1] sm:$0x3] }
   0xe   :  { %39 = vst [vmem:[#allocation0] sm:$0x3] %v38_v3 }
  0x15   :  { %v40_v4 = vld [vmem:[#allocation0] sm:$0xff] }
  0x16   :  { %41 = vperm.xlu0 %4, %v40_v4  }
  0x95   :  { %v42_v5 = vpop.permute.xlu0 %41 }
  0x96   :  { %43 = vst [vmem:[#allocation2] sm:$0xff] %v42_v5 }
  0x9d   :  { %v47_v6 = vld [vmem:[#allocation2] sm:$0x3] }
  0x9e   :  { %49 = vst [vmem:[#allocation3] sm:$0x3] %v47_v6 }
  0xa5   :  { %v65_v7 = vld [vmem:[#allocation3] sm:$0x3] }
  0xa6   :  { %66 = vst [vmem:[%s106_s1] sm:$0x3] %v65_v7 }

// kernel: custom-call.16
= control target key start
LH: loop header
LB: loop body
LE: loop exit
PB: predicated region body
PF: predicated region fallthrough
CT: control target
= control target key end

     0   :  { %s653_s9 = smov 0   ;;  %s655_s10 = smov 0   ;;  %s799_s0 = inlined_call_operand.vmem [shape: f32[2,3,3], index: 0, kind: input, shape index: {}]   ;;  %s800_s1 = inlined_call_operand.vmem [shape: f32[2,3,3], index: 1, kind: output, shape index: {0}]   ;;  %s801_s2 = inlined_call_operand.vmem [shape: f32[2,3], index: 2, kind: output, shape index: {1}]  }
   0x1   :  { %s657_s11 = smov 0   ;;  %s659_s12 = smov 0  }
   0x2   :  { %s661_s13 = smov 0  }
   0x3 LB: > { %s28_s14 = sadd.s32 1, %s626_s12  ;;  %s508_s15 = sadd.s32 4294967295, %s630_s13   ;;  %s630_s13 = sphi %s661_s13, %s9_s13   ;;  %s626_s12 = sphi %s659_s12, %s808_s12   ;;  %s622_s11 = sphi %s657_s11, %s807_s11   ;;  %s618_s10 = sphi %s655_s10, %s806_s10   ;;  %s614_s9 = sphi %s653_s9, %s805_s9  }
   0x4   : > { %p30_p0 = scmp.ge.s32.totalorder %s28_s14, 2  ;;  %s33_s16 = ssub.s32 0, %s626_s12 }
   0x5   : > { %s510_s17 = smin.u32 %s626_s12, %s33_s16  ;;  %p57_p1 = scmp.ne.s32.totalorder %s618_s10, %s614_s9 }
   0x6   : > { %s810_s14 = smov (%p30_p0, %s28_s14), 0  ;;  %s35_s18 = sshrl.u32 %s510_s17, 3 }
   0x7   : > { %s39_s19 = ssub.s32 0, %s810_s14  ;;  %p58_p2 = scmp.eq.s32.totalorder %s508_s15, 1 }
   0x8   : > { %s511_s20 = smin.u32 %s39_s19, %s810_s14  ;;  %s47_s24 = sadd.s32 1, %s618_s10 }
   0x9   : > { %s41_s21 = sshrl.u32 %s511_s20, 3  ;;  %p688_p3 = por %p58_p2, %p57_p1 }
   0xa   : > { %s44_s23 = ssub.s32 %s35_s18, %s41_s21  ;;  %p513_p5 = scmp.ge.s32.totalorder %s630_s13, 2 }
   0xb   : > { %p45_p4 = scmp.eq.s32.totalorder %s44_s23, 0  ;;  %s82_s26 = sand.u32 (!%p513_p5), 1, %s630_s13  }
   0xc   : > { %80 = sbr.rel (%p513_p5) target bundleno = 19 (0x13), region = 16  ;;  %s515_s27 = sshll.u32 (!%p513_p5), %s626_s12, 2 }
   0xd   : > { %s694_s25 = scalar_select %p45_p4, %s618_s10, %s47_s24  }
   0xe   : > { %s514_s28 = sshll.u32 (!%p513_p5), %s82_s26, 2  ;;  %s88_s3 = scalar_lea.vmem (!%p513_p5), %s799_s0, %s515_s27 }
   0xf   : > { %v104_v0 = vld [vmem:[%s88_s3] sm:$0xf] (!%p513_p5)  ;;  %s84_s4 = scalar_lea.vmem (!%p513_p5), [#allocation1], %s514_s28 }
  0x10   : > { %105 = vst [vmem:[%s84_s4] sm:$0xf] (!%p513_p5), %v104_v0 }
  0x13 PF: > { %p516_p6 = scmp.ge.s32.totalorder %s630_s13, 1  ;;  %p121_p7 = scmp.lt.s32.totalorder %s630_s13, 3 }
  0x15   : > { %p122_p8 = pnand %p516_p6, %p121_p7 }
  0x17   : > { %125 = sbr.rel (%p122_p8) target bundleno = 346 (0x15a), region = 50 }
  0x1e   : > { %s132_s5 = sand.u32 1, %s508_s15   ;;  %s142_s6 = sand.u32 1, %s614_s9   ;;  %v636_v2 = vmov 0.0  }
  0x1f   : > { %s517_s7 = sshll.u32 %s132_s5, 2  ;;  %s705_s8 = sshll.u32 %s142_s6, 1 }
  0x20   : > { %s134_s16 = scalar_lea.vmem [#allocation1], %s517_s7  ;;  %s155_s17 = sand.u32 7, %s622_s11  }
  0x21   : > { %v147_v1 = vld [vmem:[%s134_s16] sm:$0xf]  ;;  %s708_s18 = scalar_lea.vmem [#allocation4], %s155_s17  ;;  %s711_s19 = scalar_lea.vmem [#allocation3], %s517_s7 }
  0x22   : > { %148 = vst [vmem:[#allocation0] sm:$0xf] %v147_v1  ;;  %159 = vst [vmem:[%s708_s18] sm:$0x1] %v636_v2  ;;  %s144_s15 = scalar_lea.vmem [#allocation5], %s705_s8  ;;  %s714_s20 = smov 0  }
  0x29   : > { %v157_v3 = vld [vmem:[#allocation0] sm:$0xff] }
  0x2a   : > { %158 = vst [vmem:[#allocation2] sm:$0xff] %v157_v3 }
  0x2b LB: >> { %v167_v4 = vlaneseq  ;;  %v723_v6 = vstv %s634_s20  ;;  %s194_s9 = scalar_lea.vmem [#allocation2], %s634_s20  ;;  %s230_s21 = smov [#allocation2]  ;;  %v637_v60 = vmov 1.0   ;;  %v265_v61 = vld [vmem:[%s708_s18] ss:$0 sm:$0xff]  ;;  %s634_s20 = sphi %s714_s20, %s165_s20  }
  0x2c   : >> { %s252_s23 = scalar_lea.vmem [#allocation6], %s634_s20  ;;  %s268_s24 = smov [#allocation2] }
  0x2d   : >> { %v720_v5 = vshrl.u32 %v167_v4, 7  ;;  %v246_v49 = vand.u32 127, %v167_v4  ;;  %s269_s26 = smov [#allocation6] }
  0x2f   : >> { %vm171_vm0 = vcmp.gt.s32.totalorder %v720_v5, %v723_v6  ;;  %vm172_vm1 = vcmp.lt.s32.totalorder %v720_v5, 3  ;;  %v233_v5 = vmov %v720_v5  ;;  %vm738_vm12 = vcmp.eq.s32.totalorder %v246_v49, %v723_v6 }
  0x30   : >> { %vm173_vm2 = vmand %vm171_vm0, %vm172_vm1  ;;  %vm237_vm9 = vcmp.gt.s32.totalorder %v233_v5, %v723_v6  ;;  %vm238_vm10 = vcmp.lt.s32.totalorder %v233_v5, 3  ;;  %v272_v5 = vmov %v720_v5  ;;  %vm298_vm15 = vcmp.gt.s32.totalorder %v246_v49, %v723_v6 }
  0x31   : >> { %v166_v7 = vld [vmem:[#allocation2] sm:$0xff]  ;;  %v195_v16 = vld [vmem:[%s194_s9] ss:$0 sm:$0xff]  ;;  %vm239_vm11 = vmand %vm237_vm9, %vm238_vm10  ;;  %vm277_vm13 = vcmp.lt.s32.totalorder %v272_v5, 3  ;;  %v289_v5 = vmov %v720_v5 }
  0x32   : >> { %v174_v8 = vsel %vm173_vm2, %v166_v7, 0.0  ;;  %v196_v17 = vand.u32 2147483647, %v195_v16  ;;  %vm221_vm8 = vcmp.lt.f32.partialorder %v195_v16, 0.0  ;;  %v234_v46 = vld [vmem:[%s230_s21] sm:$0xff]  ;;  %vm306_vm14 = vcmp.ge.s32.totalorder %v289_v5, %v723_v6 }
  0x33   : >> { %v175_v9 = vmul.f32 %v174_v8, %v174_v8  ;;  %v240_v50 = vsel %vm239_vm11, %v234_v46, 0.0  ;;  %v275_v0 = vld [vmem:[%s268_s24] sm:$0xff]  ;;  %s285_s24 = smov %s268_s24  ;;  %vm307_vm0 = vmand %vm738_vm12, %vm306_vm14 }
  0x34   : >> { %v197_v22 = vmax.f32 %v196_v17, 0.0  ;;  %s310_s27 = scalar_lea.vmem %s285_s24, %s634_s20  ;;  %s165_s20 = sadd.s32 1, %s634_s20  }
  0x35   : >> { %v176_v10 = vrot.slane %v175_v9, 4  ;;  %p162_p9 = scmp.ge.s32.totalorder %s165_s20, 3  }
  0x36   : > { %s523_s28 = sshll.u32 (%p162_p9), %s622_s11, 2 }
  0x37   : >> { %v177_v11 = vadd.f32 %v176_v10, %v175_v9  ;;  %s341_s3 = scalar_lea.vmem (%p162_p9), %s800_s1, %s523_s28 }
  0x39   : >> { %v178_v12 = vrot.slane %v177_v11, 2 }
  0x3b   : >> { %v179_v13 = vadd.f32 %v178_v12, %v177_v11 }
  0x3d   : >> { %v180_v14 = vrot.slane %v179_v13, 1 }
  0x3f   : >> { %v181_v15 = vadd.f32 %v180_v14, %v179_v13  ;;  %v296_v14 = vld [vmem:[%s285_s24] sm:$0xff] }
  0x41   : >> { %578 = vrsqrt.f32 %v181_v15  ;;  %vm184_vm3 = vcmp.eq.f32.partialorder %v181_v15, inf  ;;  %v187_v19 = vand.u32 2147483648, %v181_v15  ;;  %vm186_vm4 = vcmp.eq.f32.partialorder %v181_v15, 0.0 }
  0x4b   : >> { %v579_v18 = vpop.eup %578 }
  0x4c   : >> { %v183_v20 = vmul.f32 %v579_v18, %v181_v15 }
  0x4e   : >> { %v185_v21 = vsel %vm184_vm3, %v181_v15, %v183_v20 }
  0x4f   : >> { %v188_v23 = vsel %vm186_vm4, %v187_v19, %v185_v21 }
  0x50   : >> { %v198_v24 = vand.u32 2147483647, %v188_v23 }
  0x52   : >> { %v199_v25 = vmax.f32 %v197_v22, %v198_v24 }
  0x54   : >> { %580 = vrcp.f32 %v199_v25  ;;  %vm211_vm7 = vcmp.eq.f32.partialorder %v199_v25, 0.0 }
  0x5e   : >> { %v581_v26 = vpop.eup %580 }
  0x5f   : >> { %v201_v27 = vmul.f32 %v581_v26, %v196_v17  ;;  %v204_v28 = vmul.f32 0.0, %v581_v26  ;;  %v208_v29 = vmul.f32 %v581_v26, %v198_v24 }
  0x61   : >> { %v202_v30 = vmul.f32 %v201_v27, %v201_v27  ;;  %v205_v31 = vmul.f32 %v204_v28, %v204_v28  ;;  %v209_v32 = vmul.f32 %v208_v29, %v208_v29 }
  0x63   : >> { %v206_v33 = vadd.f32 %v205_v31, %v202_v30 }
  0x65   : >> { %v210_v34 = vadd.f32 %v209_v32, %v206_v33 }
  0x67   : >> { %582 = vrsqrt.f32 %v210_v34  ;;  %vm214_vm5 = vcmp.eq.f32.partialorder %v210_v34, inf  ;;  %v217_v36 = vand.u32 2147483648, %v210_v34  ;;  %vm216_vm6 = vcmp.eq.f32.partialorder %v210_v34, 0.0 }
  0x71   : >> { %v583_v35 = vpop.eup %582 }
  0x72   : >> { %v213_v37 = vmul.f32 %v583_v35, %v210_v34 }
  0x74   : >> { %v215_v38 = vsel %vm214_vm5, %v210_v34, %v213_v37 }
  0x75   : >> { %v218_v39 = vsel %vm216_vm6, %v217_v36, %v215_v38 }
  0x76   : >> { %v219_v40 = vmul.f32 %v218_v39, %v199_v25 }
  0x78   : >> { %v220_v41 = vsel %vm211_vm7, 0.0, %v219_v40 }
  0x79   : >> { %v222_v42 = vxor.u32 2147483648, %v220_v41 }
  0x7b   : >> { %v223_v43 = vsel %vm221_vm8, %v220_v41, %v222_v42 }
  0x7c   : >> { %v731_v44 = vsel %vm186_vm4, %v195_v16, %v223_v43  ;;  %584 = vrcp.f32 %v223_v43  ;;  %v224_v47 = vsub.f32 %v223_v43, %v195_v16 }
  0x7d   : >> { %v229_v45 = vsub.f32 %v195_v16, %v731_v44 }
  0x7f   : >> { %586 = vrcp.f32 %v229_v45 }
  0x86   : >> { %v585_v48 = vpop.eup %584 }
  0x87   : >> { %v226_v51 = vmul.f32 %v585_v48, %v224_v47 }
  0x89   : >> { %v587_v52 = vpop.eup %586  ;;  %v228_v56 = vsel %vm186_vm4, 0.0, %v226_v51 }
  0x8a   : >> { %v242_v53 = vmul.f32 %v587_v52, %v240_v50  ;;  %v258_v58 = vsel %vm738_vm12, %v228_v56, 0.0 }
  0x8c   : >> { %v243_v55 = vsel %vm186_vm4, 0.0, %v242_v53 }
  0x8d   : >> { %v248_v57 = vsel %vm738_vm12, %v243_v55, 0.0 }
  0x8e   : >> { %249 = vadd.xlane.f32.xlu0 %v248_v57 }
  0x92   : >> { %259 = vadd.xlane.f32.xlu0 %v258_v58 }
 0x11b   : >> { %v250_v59 = vpop.xlane.xlu0 %249 }
 0x11c   : >> { %251 = vst [vmem:[#allocation6] sm:$0xff] %v250_v59 }
 0x11d   : >> { %253 = vst [vmem:[%s252_s23] sm:$0x1] %v637_v60 }
 0x11f   : >> { %v260_v62 = vpop.xlane.xlu0 %259 }
 0x120   : >> { %v266_v63 = vsel %vm738_vm12, %v260_v62, %v265_v61 }
 0x121   : >> { %267 = vst [vmem:[%s708_s18] sm:$0x1] %v266_v63 }
 0x124   : >> { %v274_v1 = vld [vmem:[%s269_s26] sm:$0xff]  ;;  %s286_s26 = smov %s269_s26 }
 0x125   : >> { %v276_v2 = vmul.f32 %v275_v0, %v274_v1  ;;  %v294_v13 = vld [vmem:[%s286_s26] sm:$0xff] }
 0x127   : >> { %v278_v3 = vsel %vm277_vm13, %v276_v2, 0.0 }
 0x128   : >> { %v279_v4 = vrot.slane %v278_v3, 4  ;;  %v327_v6 = vld [vmem:[#allocation4] sm:$0x3] (%p162_p9) }
 0x129   : > { %329 = vst [vmem:[%s144_s15] sm:$0x3] (%p162_p9), %v327_v6 }
 0x12a   : >> { %v280_v7 = vadd.f32 %v279_v4, %v278_v3 }
 0x12c   : >> { %v281_v8 = vrot.slane %v280_v7, 2 }
 0x12e   : >> { %v282_v9 = vadd.f32 %v281_v8, %v280_v7 }
 0x130   : >> { %v283_v10 = vrot.slane %v282_v9, 1 }
 0x132   : >> { %v284_v11 = vadd.f32 %v283_v10, %v282_v9 }
 0x134   : >> { %v290_v12 = vmul.f32 %v284_v11, %v260_v62 }
 0x136   : >> { %v295_v15 = vmul.f32 %v294_v13, %v290_v12 }
 0x138   : >> { %v299_v16 = vsub.f32 %v296_v14, %v295_v15 }
 0x13a   : >> { %v300_v17 = vsel %vm298_vm15, %v299_v16, %v296_v14 }
 0x13b   : >> { %v308_v18 = vsel %vm307_vm0, %v294_v13, %v300_v17 }
 0x13c   : >> { %309 = vst [vmem:[%s285_s24] sm:$0xff] %v308_v18 }
 0x13f   : > { %164 = sbr.rel (!%p162_p9) target bundleno = 43 (0x2b), region = 167 }
 0x143   : >> { %v311_v19 = vld [vmem:[%s310_s27] ss:$0 sm:$0xff] }
 0x144   : >> { %v316_v20 = vsel %vm738_vm12, %v731_v44, %v311_v19 }
 0x145   : >> { %317 = vst [vmem:[%s310_s27] sm:$0x1] %v316_v20 }
 0x146   : > { %p376_p10 = scmp.lt.s32.totalorder (%p688_p3), %s622_s11, 0  ;;  %s377_s4 = ssub.s32 (%p688_p3), 0, %s622_s11  ;;  %v399_v22 = vld [vmem:[%s144_s15] sm:$0x3] (%p688_p3) }
 0x147   : > { %s524_s5 = smin.u32 (%p688_p3), %s622_s11, %s377_s4 }
 0x148   : > { %s379_s6 = sshrl.u32 (%p688_p3), %s524_s5, 3 }
 0x149   : > { %s380_s7 = ssub.s32 (%p688_p3), 0, %s379_s6 }
 0x14c   : > { %v321_v5 = vld [vmem:[#allocation2] sm:$0xf] }
 0x14d   : > { %323 = vst [vmem:[%s711_s19] sm:$0xf] %v321_v5 }
 0x14f   : > { %375 = sbr.rel (!%p688_p3) target bundleno = 346 (0x15a), region = 91 }
 0x154   : > { %v357_v21 = vld [vmem:[%s711_s19] sm:$0xf] }
 0x155   : > { %358 = vst [vmem:[%s341_s3] sm:$0xf] %v357_v21 }
 0x156   : > { %s812_s7 = smov (!%p376_p10, %s380_s7), %s379_s6 }
 0x157   : > { %s525_s16 = sshll.u32 %s812_s7, 1 }
 0x158   : > { %s383_s19 = scalar_lea.vmem %s801_s2, %s525_s16 }
 0x159   : > { %400 = vst [vmem:[%s383_s19] sm:$0x3] %v399_v22 }
 0x15a PF: > { %s9_s13 = sadd.s32 1, %s630_s13   ;;  %s805_s9 = smov %s618_s10 }
 0x15b   : > { %p6_p11 = scmp.ge.s32.totalorder %s9_s13, 4   ;;  %s806_s10 = smov %s694_s25 }
 0x15c   : > { %s807_s11 = smov %s626_s12  ;;  %s808_s12 = smov %s810_s14 }
 0x15d   :  { %8 = sbr.rel (!%p6_p11) target bundleno = 3 (0x3), region = 178 }

</bundles_post_ra>
